<compile_context>
chip_gen: v7x
topology: tpu7x:2x2x1
jax: 0.10.0
libtpu: 0.0.40
codegen_flags: <defaults>
</compile_context>

<pallas_src>
import jax
import jax.numpy as jnp
import numpy as np
from jax import lax
from jax.experimental import pallas as pl
from jax.experimental.pallas import tpu as pltpu

EPS = 1e-5
NEG_SLOPE = 0.2


# ------------------------- trace-time (numpy) planning ------------------------- #

def _conv_out(h, k, s, p):
    return (h + 2 * p - k) // s + 1


def _im2col_index(N, C, H, W, k, s, p):
    """Flat indices into the zero-padded input (N, C, H+2p, W+2p) for each entry
    of the im2col patch matrix: rows = (c, ki, kj), cols = (n, ho, wo)."""
    Hp, Wp = H + 2 * p, W + 2 * p
    Ho, Wo = _conv_out(H, k, s, p), _conv_out(W, k, s, p)
    base = np.arange(N * C * Hp * Wp, dtype=np.int32).reshape(N, C, Hp, Wp)
    cols = np.empty((C, k, k, N, Ho, Wo), dtype=np.int32)
    for ki in range(k):
        for kj in range(k):
            cols[:, ki, kj] = base[:, :, ki:ki + s * Ho:s, kj:kj + s * Wo:s].transpose(1, 0, 2, 3)
    return cols.reshape(C * k * k, N * Ho * Wo), Ho, Wo


def _src_map(N, H, W, k, s, p):
    """src[t, (n,ho,wo)] = flat input position (n*H*W + h*W + w) read by tap
    t=(ki,kj) for that output position, or -1 where the tap hits zero padding."""
    Ho, Wo = _conv_out(H, k, s, p), _conv_out(W, k, s, p)
    src = np.full((k, k, N, Ho, Wo), -1, dtype=np.int32)
    for ki in range(k):
        for kj in range(k):
            for ho in range(Ho):
                h = s * ho + ki - p
                if not 0 <= h < H:
                    continue
                for wo in range(Wo):
                    w = s * wo + kj - p
                    if not 0 <= w < W:
                        continue
                    src[ki, kj, :, ho, wo] = np.arange(N, dtype=np.int32) * H * W + h * W + w
    return src.reshape(k * k, N * Ho * Wo), Ho, Wo


def _prep_constants(N, C, H, W):
    idx1, H1, W1 = _im2col_index(N, C, H, W, 5, 2, 1)      # layer-1 im2col (padded raw input)
    src2, H2, W2 = _src_map(N, H1, W1, 5, 2, 1)            # layer-2 taps over layer-1 positions
    flat2 = src2.reshape(-1)                               # order: (tap, pout)
    idx1e = idx1[:, np.clip(flat2, 0, None)]               # tap-expanded layer-1 patch indices
    mask2 = (flat2 >= 0).astype(np.float32)[None, :]       # zero out layer-2 conv padding cols

    # Exact layer-1 BN statistics from the expanded copy: one representative
    # occurrence of every unique layer-1 output position, pre-scaled by 1/P1.
    P1 = N * H1 * W1
    vals, first = np.unique(flat2, return_index=True)
    keep = vals >= 0
    assert np.array_equal(vals[keep], np.arange(P1)), \
        "layer-2 taps must cover every layer-1 output position"
    rep = np.zeros((1, flat2.size), np.float32)
    rep[0, first[keep]] = 1.0 / P1

    src3, H3, W3 = _src_map(N, H2, W2, 5, 2, 1)
    src4, H4, W4 = _src_map(N, H3, W3, 3, 1, 0)
    src5, H5, W5 = _src_map(N, H4, W4, 3, 1, 0)
    spatial = (H1, W1, H2, W2, H3, W3, H4, W4, H5, W5)
    return (idx1e, rep, mask2,
            src3.reshape(1, -1), src4.reshape(1, -1), src5.reshape(1, -1), spatial)


def _kflat(w):
    """(Cout, Cin, k, k) -> (Cout, k*k*Cin): contraction ordered (tap, cin) to
    match the in-kernel patch-matrix rows."""
    return w.transpose(0, 2, 3, 1).reshape(w.shape[0], -1)


def _vspec(shape):
    zeros = (0,) * len(shape)
    return pl.BlockSpec(shape, lambda i: zeros)


# ------------------------------- Pallas kernel --------------------------------- #

def _bn_lrelu(y, gamma, beta):
    # Training-mode BatchNorm (biased variance, one-pass stats) + LeakyReLU(0.2).
    mean = jnp.mean(y, axis=1, keepdims=True)
    var = jnp.mean(y * y, axis=1, keepdims=True) - mean * mean
    z = (y - mean) * lax.rsqrt(var + EPS) * gamma + beta
    return jnp.where(z >= 0, z, NEG_SLOPE * z)


def _gather_cols(a, src_ref):
    """Gather columns of a (C, Pin) into (C, T*Pout) with ONE lane-dense MXU
    matmul against a 0/1 selection matrix rebuilt in-kernel on the VPU from the
    int32 source map (src == -1, i.e. conv zero-padding, selects nothing)."""
    pin = a.shape[1]
    src = src_ref[...]                                           # (1, T*Pout) int32
    rows = lax.broadcasted_iota(jnp.int32, (pin, src.shape[1]), 0)
    sel = (rows == src).astype(jnp.float32)
    return jnp.dot(a, sel, preferred_element_type=jnp.float32)


def _regroup(g, taps, cols, scratch):
    """Regroup (C, taps*cols) column blocks into (taps*C, cols) row blocks via a
    VMEM scratch (static, sublane-aligned copies feeding the fused-K matmul)."""
    c = g.shape[0]
    for t in range(taps):
        scratch[pl.ds(t * c, c), :] = g[:, t * cols:(t + 1) * cols]
    return scratch[...]


def _disc_kernel(x1e_ref, rep_ref, mask2_ref,
                 w1_ref, gam1_ref, bet1_ref,
                 w2_ref, gam2_ref, bet2_ref,
                 src3_ref, w3_ref, gam3_ref, bet3_ref,
                 src4_ref, w4_ref, gam4_ref, bet4_ref,
                 src5_ref, w5_ref,
                 o_ref,
                 p2_scr, p3_scr, p4_scr, p5_scr):
    # ---- layer 1: one MXU matmul over the tap-expanded patch matrix ----
    y1e = jnp.dot(w1_ref[...], x1e_ref[...], preferred_element_type=jnp.float32)
    rep = rep_ref[...]                                   # 1/P1 at representative cols
    mean1 = jnp.sum(y1e * rep, axis=1, keepdims=True)    # exact batch stats
    var1 = jnp.sum(y1e * y1e * rep, axis=1, keepdims=True) - mean1 * mean1
    z1 = (y1e - mean1) * lax.rsqrt(var1 + EPS) * gam1_ref[...] + bet1_ref[...]
    a1e = jnp.where(z1 >= 0, z1, NEG_SLOPE * z1) * mask2_ref[...]

    # ---- layer 2: regroup tap blocks to rows, single fused-K matmul ----
    c1 = gam1_ref.shape[0]
    taps2 = w2_ref.shape[1] // c1
    n2 = a1e.shape[1] // taps2
    y2 = jnp.dot(w2_ref[...], _regroup(a1e, taps2, n2, p2_scr),
                 preferred_element_type=jnp.float32)
    a2 = _bn_lrelu(y2, gam2_ref[...], bet2_ref[...])

    # ---- layer 3: selection-matmul gather + fused-K conv matmul ----
    c2 = gam2_ref.shape[0]
    taps3 = w3_ref.shape[1] // c2
    n3 = src3_ref.shape[1] // taps3
    y3 = jnp.dot(w3_ref[...], _regroup(_gather_cols(a2, src3_ref), taps3, n3, p3_scr),
                 preferred_element_type=jnp.float32)
    a3 = _bn_lrelu(y3, gam3_ref[...], bet3_ref[...])

    # ---- layer 4 ----
    c3 = gam3_ref.shape[0]
    taps4 = w4_ref.shape[1] // c3
    n4 = src4_ref.shape[1] // taps4
    y4 = jnp.dot(w4_ref[...], _regroup(_gather_cols(a3, src4_ref), taps4, n4, p4_scr),
                 preferred_element_type=jnp.float32)
    a4 = _bn_lrelu(y4, gam4_ref[...], bet4_ref[...])

    # ---- layer 5: conv + Tanhshrink (x - tanh(x)) ----
    c4 = gam4_ref.shape[0]
    taps5 = w5_ref.shape[1] // c4
    n5 = src5_ref.shape[1] // taps5
    y5 = jnp.dot(w5_ref[...], _regroup(_gather_cols(a4, src5_ref), taps5, n5, p5_scr),
                 preferred_element_type=jnp.float32)
    o_ref[...] = y5 - jnp.tanh(y5)


# ---------------------------------- wrapper ------------------------------------ #

@jax.jit
def discriminator_forward(x, p):
    N, C, H, W = x.shape
    idx1e, rep, mask2, src3, src4, src5, spatial = _prep_constants(N, C, H, W)
    H1, W1, H2, W2, H3, W3, H4, W4, H5, W5 = spatial
    P2, P3, P4, P5 = N * H2 * W2, N * H3 * W3, N * H4 * W4, N * H5 * W5

    # Single wrapper-side gather: tap-expanded layer-1 im2col patch matrix.
    xf = jnp.pad(x, ((0, 0), (0, 0), (1, 1), (1, 1))).reshape(-1)
    x1e = xf[idx1e]                                      # (C*25, 25*P2)

    c1, c2, c3, c4 = p["g1"].size, p["g2"].size, p["g3"].size, p["g4"].size
    t2 = p["w2"].shape[2] * p["w2"].shape[3]
    t3 = p["w3"].shape[2] * p["w3"].shape[3]
    t4 = p["w4"].shape[2] * p["w4"].shape[3]
    t5 = p["w5"].shape[2] * p["w5"].shape[3]

    args = (
        x1e, jnp.asarray(rep), jnp.asarray(mask2),
        p["w1"].reshape(c1, -1), p["g1"].reshape(-1, 1), p["b1"].reshape(-1, 1),
        _kflat(p["w2"]), p["g2"].reshape(-1, 1), p["b2"].reshape(-1, 1),
        jnp.asarray(src3), _kflat(p["w3"]), p["g3"].reshape(-1, 1), p["b3"].reshape(-1, 1),
        jnp.asarray(src4), _kflat(p["w4"]), p["g4"].reshape(-1, 1), p["b4"].reshape(-1, 1),
        jnp.asarray(src5), _kflat(p["w5"]),
    )

    out = pl.pallas_call(
        _disc_kernel,
        grid=(1,),
        in_specs=[_vspec(a.shape) for a in args],
        out_specs=_vspec((1, P5)),
        out_shape=jax.ShapeDtypeStruct((1, P5), jnp.float32),
        scratch_shapes=[
            pltpu.VMEM((t2 * c1, P2), jnp.float32),   # layer-2 patches (200, 242)
            pltpu.VMEM((t3 * c2, P3), jnp.float32),   # layer-3 patches (400, 50)
            pltpu.VMEM((t4 * c3, P4), jnp.float32),   # layer-4 patches (288, 18)
            pltpu.VMEM((t5 * c4, P5), jnp.float32),   # layer-5 patches (576, 2)
        ],
        compiler_params=pltpu.CompilerParams(
            dimension_semantics=("arbitrary",),
            vmem_limit_bytes=32 * 1024 * 1024),
    )(*args)
    return out.reshape(N, 1, H5, W5)


def init_params(key, nc, ndf):
    ks = jax.random.split(key, 9)

    def w(k, shape):  # DCGAN-style N(0, 0.02) init, deterministic
        return 0.02 * jax.random.normal(k, shape, jnp.float32)

    return {
        "w1": w(ks[0], (ndf, nc, 5, 5)),
        "w2": w(ks[1], (ndf * 2, ndf, 5, 5)),
        "w3": w(ks[2], (ndf * 4, ndf * 2, 5, 5)),
        "w4": w(ks[3], (ndf * 8, ndf * 4, 3, 3)),
        "w5": w(ks[4], (1, ndf * 8, 3, 3)),
        "g1": 1.0 + 0.02 * jax.random.normal(ks[5], (ndf,), jnp.float32),
        "g2": 1.0 + 0.02 * jax.random.normal(ks[6], (ndf * 2,), jnp.float32),
        "g3": 1.0 + 0.02 * jax.random.normal(ks[7], (ndf * 4,), jnp.float32),
        "g4": 1.0 + 0.02 * jax.random.normal(ks[8], (ndf * 8,), jnp.float32),
        "b1": jnp.zeros((ndf,), jnp.float32),
        "b2": jnp.zeros((ndf * 2,), jnp.float32),
        "b3": jnp.zeros((ndf * 4,), jnp.float32),
        "b4": jnp.zeros((ndf * 8,), jnp.float32),
    }


# ----------------------------- pure-JAX reference ------------------------------ #

def _ref_conv(x, w, stride, pad):
    return lax.conv_general_dilated(
        x, w, (stride, stride), [(pad, pad), (pad, pad)],
        dimension_numbers=("NCHW", "OIHW", "NCHW"),
        precision=lax.Precision.HIGHEST)


def _ref_bn_lrelu(y, gamma, beta):
    mean = jnp.mean(y, axis=(0, 2, 3), keepdims=True)
    var = jnp.mean((y - mean) ** 2, axis=(0, 2, 3), keepdims=True)
    z = (y - mean) * lax.rsqrt(var + EPS) * gamma[None, :, None, None] + beta[None, :, None, None]
    return jnp.where(z >= 0, z, NEG_SLOPE * z)


def reference_forward(x, p):
    h = _ref_bn_lrelu(_ref_conv(x, p["w1"], 2, 1), p["g1"], p["b1"])
    h = _ref_bn_lrelu(_ref_conv(h, p["w2"], 2, 1), p["g2"], p["b2"])
    h = _ref_bn_lrelu(_ref_conv(h, p["w3"], 2, 1), p["g3"], p["b3"])
    h = _ref_bn_lrelu(_ref_conv(h, p["w4"], 1, 0), p["g4"], p["b4"])
    y = _ref_conv(h, p["w5"], 1, 0)
    return y - jnp.tanh(y)


if __name__ == "__main__":
    key = jax.random.PRNGKey(0)
    k_x, k_p = jax.random.split(key)
    nc, ndf, N, H = 3, 8, 2, 48          # 48x48 input -> single 1x1 output
    x = jax.random.normal(k_x, (N, nc, H, H), jnp.float32)
    params = init_params(k_p, nc, ndf)

    out = discriminator_forward(x, params)
    jax.block_until_ready(out)
    assert out.shape == (N, 1, 1, 1), out.shape

    ref = reference_forward(x, params)
    np.testing.assert_allclose(np.asarray(out), np.asarray(ref), rtol=5e-3, atol=5e-3)
    print("KERNEL_OK")
</pallas_src>

<mosaic_0001>
module attributes {stable_mosaic.version = 11 : i64} {
  func.func @_disc_kernel(%arg0: i32, %arg1: memref<75x6050xf32, #tpu.memory_space<vmem>>, %arg2: memref<1x6050xf32, #tpu.memory_space<vmem>>, %arg3: memref<1x6050xf32, #tpu.memory_space<vmem>>, %arg4: memref<8x75xf32, #tpu.memory_space<vmem>>, %arg5: memref<8x1xf32, #tpu.memory_space<vmem>>, %arg6: memref<8x1xf32, #tpu.memory_space<vmem>>, %arg7: memref<16x200xf32, #tpu.memory_space<vmem>>, %arg8: memref<16x1xf32, #tpu.memory_space<vmem>>, %arg9: memref<16x1xf32, #tpu.memory_space<vmem>>, %arg10: memref<1x1250xi32, #tpu.memory_space<vmem>>, %arg11: memref<32x400xf32, #tpu.memory_space<vmem>>, %arg12: memref<32x1xf32, #tpu.memory_space<vmem>>, %arg13: memref<32x1xf32, #tpu.memory_space<vmem>>, %arg14: memref<1x162xi32, #tpu.memory_space<vmem>>, %arg15: memref<64x288xf32, #tpu.memory_space<vmem>>, %arg16: memref<64x1xf32, #tpu.memory_space<vmem>>, %arg17: memref<64x1xf32, #tpu.memory_space<vmem>>, %arg18: memref<1x18xi32, #tpu.memory_space<vmem>>, %arg19: memref<1x576xf32, #tpu.memory_space<vmem>>, %arg20: memref<1x2xf32, #tpu.memory_space<vmem>>, %arg21: memref<200x242xf32, #tpu.memory_space<vmem>>, %arg22: memref<400x50xf32, #tpu.memory_space<vmem>>, %arg23: memref<288x18xf32, #tpu.memory_space<vmem>>, %arg24: memref<576x2xf32, #tpu.memory_space<vmem>>) attributes {dimension_semantics = [#tpu.dimension_semantics<arbitrary>], iteration_bounds = array<i64: 1>, scalar_prefetch = 0 : i64, scratch_operands = 4 : i64, tpu.core_type = #tpu.core_type<tc>, window_params = [{pipeline_mode = #tpu.pipeline_mode<synchronous>, transform_indices = @transform_0, window_bounds = array<i64: 75, 6050>}, {pipeline_mode = #tpu.pipeline_mode<synchronous>, transform_indices = @transform_1, window_bounds = array<i64: 1, 6050>}, {pipeline_mode = #tpu.pipeline_mode<synchronous>, transform_indices = @transform_2, window_bounds = array<i64: 1, 6050>}, {pipeline_mode = #tpu.pipeline_mode<synchronous>, transform_indices = @transform_3, window_bounds = array<i64: 8, 75>}, {pipeline_mode = #tpu.pipeline_mode<synchronous>, transform_indices = @transform_4, window_bounds = array<i64: 8, 1>}, {pipeline_mode = #tpu.pipeline_mode<synchronous>, transform_indices = @transform_5, window_bounds = array<i64: 8, 1>}, {pipeline_mode = #tpu.pipeline_mode<synchronous>, transform_indices = @transform_6, window_bounds = array<i64: 16, 200>}, {pipeline_mode = #tpu.pipeline_mode<synchronous>, transform_indices = @transform_7, window_bounds = array<i64: 16, 1>}, {pipeline_mode = #tpu.pipeline_mode<synchronous>, transform_indices = @transform_8, window_bounds = array<i64: 16, 1>}, {pipeline_mode = #tpu.pipeline_mode<synchronous>, transform_indices = @transform_9, window_bounds = array<i64: 1, 1250>}, {pipeline_mode = #tpu.pipeline_mode<synchronous>, transform_indices = @transform_10, window_bounds = array<i64: 32, 400>}, {pipeline_mode = #tpu.pipeline_mode<synchronous>, transform_indices = @transform_11, window_bounds = array<i64: 32, 1>}, {pipeline_mode = #tpu.pipeline_mode<synchronous>, transform_indices = @transform_12, window_bounds = array<i64: 32, 1>}, {pipeline_mode = #tpu.pipeline_mode<synchronous>, transform_indices = @transform_13, window_bounds = array<i64: 1, 162>}, {pipeline_mode = #tpu.pipeline_mode<synchronous>, transform_indices = @transform_14, window_bounds = array<i64: 64, 288>}, {pipeline_mode = #tpu.pipeline_mode<synchronous>, transform_indices = @transform_15, window_bounds = array<i64: 64, 1>}, {pipeline_mode = #tpu.pipeline_mode<synchronous>, transform_indices = @transform_16, window_bounds = array<i64: 64, 1>}, {pipeline_mode = #tpu.pipeline_mode<synchronous>, transform_indices = @transform_17, window_bounds = array<i64: 1, 18>}, {pipeline_mode = #tpu.pipeline_mode<synchronous>, transform_indices = @transform_18, window_bounds = array<i64: 1, 576>}, {pipeline_mode = #tpu.pipeline_mode<synchronous>, transform_indices = @transform_19, window_bounds = array<i64: 1, 2>}]} {
    %c0 = arith.constant 0 : index
    %c0_0 = arith.constant 0 : index
    %0 = vector.load %arg4[%c0, %c0_0] : memref<8x75xf32, #tpu.memory_space<vmem>>, vector<8x75xf32>
    %c0_1 = arith.constant 0 : index
    %c0_2 = arith.constant 0 : index
    %1 = vector.load %arg1[%c0_1, %c0_2] : memref<75x6050xf32, #tpu.memory_space<vmem>>, vector<75x6050xf32>
    %cst = arith.constant dense<0.000000e+00> : vector<8x6050xf32>
    %2 = tpu.matmul %0, %1, %cst {dimension_numbers = #tpu.dot_dimension_numbers<[1], [0], [0], [1], [0, 0, 1, 1], [], []>} : vector<8x75xf32>, vector<75x6050xf32>, vector<8x6050xf32> -> vector<8x6050xf32>
    %c0_3 = arith.constant 0 : index
    %c0_4 = arith.constant 0 : index
    %3 = vector.load %arg2[%c0_3, %c0_4] : memref<1x6050xf32, #tpu.memory_space<vmem>>, vector<1x6050xf32>
    %4 = vector.broadcast %3 : vector<1x6050xf32> to vector<8x6050xf32>
    %5 = arith.mulf %2, %4 : vector<8x6050xf32>
    %cst_5 = arith.constant dense<0.000000e+00> : vector<8xf32>
    %6 = vector.multi_reduction <add>, %5, %cst_5 [1] : vector<8x6050xf32> to vector<8xf32>
    %7 = vector.shape_cast %6 : vector<8xf32> to vector<8x1xf32>
    %8 = arith.mulf %2, %2 : vector<8x6050xf32>
    %9 = vector.broadcast %3 : vector<1x6050xf32> to vector<8x6050xf32>
    %10 = arith.mulf %8, %9 : vector<8x6050xf32>
    %cst_6 = arith.constant dense<0.000000e+00> : vector<8xf32>
    %11 = vector.multi_reduction <add>, %10, %cst_6 [1] : vector<8x6050xf32> to vector<8xf32>
    %12 = vector.shape_cast %11 : vector<8xf32> to vector<8x1xf32>
    %13 = arith.mulf %7, %7 : vector<8x1xf32>
    %14 = arith.subf %12, %13 : vector<8x1xf32>
    %15 = vector.broadcast %7 : vector<8x1xf32> to vector<8x6050xf32>
    %16 = arith.subf %2, %15 : vector<8x6050xf32>
    %cst_7 = arith.constant 9.99999974E-6 : f32
    %17 = vector.broadcast %cst_7 : f32 to vector<8x1xf32>
    %18 = arith.addf %14, %17 : vector<8x1xf32>
    %19 = math.rsqrt %18 : vector<8x1xf32>
    %20 = vector.broadcast %19 : vector<8x1xf32> to vector<8x6050xf32>
    %21 = arith.mulf %16, %20 : vector<8x6050xf32>
    %c0_8 = arith.constant 0 : index
    %c0_9 = arith.constant 0 : index
    %22 = vector.load %arg5[%c0_8, %c0_9] : memref<8x1xf32, #tpu.memory_space<vmem>>, vector<8x1xf32>
    %23 = vector.broadcast %22 : vector<8x1xf32> to vector<8x6050xf32>
    %24 = arith.mulf %21, %23 : vector<8x6050xf32>
    %c0_10 = arith.constant 0 : index
    %c0_11 = arith.constant 0 : index
    %25 = vector.load %arg6[%c0_10, %c0_11] : memref<8x1xf32, #tpu.memory_space<vmem>>, vector<8x1xf32>
    %26 = vector.broadcast %25 : vector<8x1xf32> to vector<8x6050xf32>
    %27 = arith.addf %24, %26 : vector<8x6050xf32>
    %cst_12 = arith.constant 0.000000e+00 : f32
    %28 = vector.broadcast %cst_12 : f32 to vector<8x6050xf32>
    %29 = arith.cmpf oge, %27, %28 : vector<8x6050xf32>
    %cst_13 = arith.constant 2.000000e-01 : f32
    %30 = vector.broadcast %cst_13 : f32 to vector<8x6050xf32>
    %31 = arith.mulf %30, %27 : vector<8x6050xf32>
    %32 = arith.select %29, %27, %31 : vector<8x6050xi1>, vector<8x6050xf32>
    %c0_14 = arith.constant 0 : index
    %c0_15 = arith.constant 0 : index
    %33 = vector.load %arg3[%c0_14, %c0_15] : memref<1x6050xf32, #tpu.memory_space<vmem>>, vector<1x6050xf32>
    %34 = vector.broadcast %33 : vector<1x6050xf32> to vector<8x6050xf32>
    %35 = arith.mulf %32, %34 : vector<8x6050xf32>
    %c0_16 = arith.constant 0 : index
    %c0_17 = arith.constant 0 : index
    %36 = vector.load %arg7[%c0_16, %c0_17] : memref<16x200xf32, #tpu.memory_space<vmem>>, vector<16x200xf32>
    %37 = vector.extract_strided_slice %35 {offsets = [0, 0], sizes = [8, 242], strides = [1, 1]} : vector<8x6050xf32> to vector<8x242xf32>
    %c0_18 = arith.constant 0 : index
    %c0_19 = arith.constant 0 : index
    %38 = vector.load %arg21[%c0_18, %c0_19] : memref<200x242xf32, #tpu.memory_space<vmem>>, vector<8x242xf32>
    tpu.vector_store %arg21[%c0_18, %c0_19], %37 {strides = array<i32>} : memref<200x242xf32, #tpu.memory_space<vmem>>, vector<8x242xf32>,
    %39 = vector.extract_strided_slice %35 {offsets = [0, 242], sizes = [8, 242], strides = [1, 1]} : vector<8x6050xf32> to vector<8x242xf32>
    %c8 = arith.constant 8 : index
    %c0_20 = arith.constant 0 : index
    %40 = vector.load %arg21[%c8, %c0_20] : memref<200x242xf32, #tpu.memory_space<vmem>>, vector<8x242xf32>
    tpu.vector_store %arg21[%c8, %c0_20], %39 {strides = array<i32>} : memref<200x242xf32, #tpu.memory_space<vmem>>, vector<8x242xf32>,
    %41 = vector.extract_strided_slice %35 {offsets = [0, 484], sizes = [8, 242], strides = [1, 1]} : vector<8x6050xf32> to vector<8x242xf32>
    %c16 = arith.constant 16 : index
    %c0_21 = arith.constant 0 : index
    %42 = vector.load %arg21[%c16, %c0_21] : memref<200x242xf32, #tpu.memory_space<vmem>>, vector<8x242xf32>
    tpu.vector_store %arg21[%c16, %c0_21], %41 {strides = array<i32>} : memref<200x242xf32, #tpu.memory_space<vmem>>, vector<8x242xf32>,
    %43 = vector.extract_strided_slice %35 {offsets = [0, 726], sizes = [8, 242], strides = [1, 1]} : vector<8x6050xf32> to vector<8x242xf32>
    %c24 = arith.constant 24 : index
    %c0_22 = arith.constant 0 : index
    %44 = vector.load %arg21[%c24, %c0_22] : memref<200x242xf32, #tpu.memory_space<vmem>>, vector<8x242xf32>
    tpu.vector_store %arg21[%c24, %c0_22], %43 {strides = array<i32>} : memref<200x242xf32, #tpu.memory_space<vmem>>, vector<8x242xf32>,
    %45 = vector.extract_strided_slice %35 {offsets = [0, 968], sizes = [8, 242], strides = [1, 1]} : vector<8x6050xf32> to vector<8x242xf32>
    %c32 = arith.constant 32 : index
    %c0_23 = arith.constant 0 : index
    %46 = vector.load %arg21[%c32, %c0_23] : memref<200x242xf32, #tpu.memory_space<vmem>>, vector<8x242xf32>
    tpu.vector_store %arg21[%c32, %c0_23], %45 {strides = array<i32>} : memref<200x242xf32, #tpu.memory_space<vmem>>, vector<8x242xf32>,
    %47 = vector.extract_strided_slice %35 {offsets = [0, 1210], sizes = [8, 242], strides = [1, 1]} : vector<8x6050xf32> to vector<8x242xf32>
    %c40 = arith.constant 40 : index
    %c0_24 = arith.constant 0 : index
    %48 = vector.load %arg21[%c40, %c0_24] : memref<200x242xf32, #tpu.memory_space<vmem>>, vector<8x242xf32>
    tpu.vector_store %arg21[%c40, %c0_24], %47 {strides = array<i32>} : memref<200x242xf32, #tpu.memory_space<vmem>>, vector<8x242xf32>,
    %49 = vector.extract_strided_slice %35 {offsets = [0, 1452], sizes = [8, 242], strides = [1, 1]} : vector<8x6050xf32> to vector<8x242xf32>
    %c48 = arith.constant 48 : index
    %c0_25 = arith.constant 0 : index
    %50 = vector.load %arg21[%c48, %c0_25] : memref<200x242xf32, #tpu.memory_space<vmem>>, vector<8x242xf32>
    tpu.vector_store %arg21[%c48, %c0_25], %49 {strides = array<i32>} : memref<200x242xf32, #tpu.memory_space<vmem>>, vector<8x242xf32>,
    %51 = vector.extract_strided_slice %35 {offsets = [0, 1694], sizes = [8, 242], strides = [1, 1]} : vector<8x6050xf32> to vector<8x242xf32>
    %c56 = arith.constant 56 : index
    %c0_26 = arith.constant 0 : index
    %52 = vector.load %arg21[%c56, %c0_26] : memref<200x242xf32, #tpu.memory_space<vmem>>, vector<8x242xf32>
    tpu.vector_store %arg21[%c56, %c0_26], %51 {strides = array<i32>} : memref<200x242xf32, #tpu.memory_space<vmem>>, vector<8x242xf32>,
    %53 = vector.extract_strided_slice %35 {offsets = [0, 1936], sizes = [8, 242], strides = [1, 1]} : vector<8x6050xf32> to vector<8x242xf32>
    %c64 = arith.constant 64 : index
    %c0_27 = arith.constant 0 : index
    %54 = vector.load %arg21[%c64, %c0_27] : memref<200x242xf32, #tpu.memory_space<vmem>>, vector<8x242xf32>
    tpu.vector_store %arg21[%c64, %c0_27], %53 {strides = array<i32>} : memref<200x242xf32, #tpu.memory_space<vmem>>, vector<8x242xf32>,
    %55 = vector.extract_strided_slice %35 {offsets = [0, 2178], sizes = [8, 242], strides = [1, 1]} : vector<8x6050xf32> to vector<8x242xf32>
    %c72 = arith.constant 72 : index
    %c0_28 = arith.constant 0 : index
    %56 = vector.load %arg21[%c72, %c0_28] : memref<200x242xf32, #tpu.memory_space<vmem>>, vector<8x242xf32>
    tpu.vector_store %arg21[%c72, %c0_28], %55 {strides = array<i32>} : memref<200x242xf32, #tpu.memory_space<vmem>>, vector<8x242xf32>,
    %57 = vector.extract_strided_slice %35 {offsets = [0, 2420], sizes = [8, 242], strides = [1, 1]} : vector<8x6050xf32> to vector<8x242xf32>
    %c80 = arith.constant 80 : index
    %c0_29 = arith.constant 0 : index
    %58 = vector.load %arg21[%c80, %c0_29] : memref<200x242xf32, #tpu.memory_space<vmem>>, vector<8x242xf32>
    tpu.vector_store %arg21[%c80, %c0_29], %57 {strides = array<i32>} : memref<200x242xf32, #tpu.memory_space<vmem>>, vector<8x242xf32>,
    %59 = vector.extract_strided_slice %35 {offsets = [0, 2662], sizes = [8, 242], strides = [1, 1]} : vector<8x6050xf32> to vector<8x242xf32>
    %c88 = arith.constant 88 : index
    %c0_30 = arith.constant 0 : index
    %60 = vector.load %arg21[%c88, %c0_30] : memref<200x242xf32, #tpu.memory_space<vmem>>, vector<8x242xf32>
    tpu.vector_store %arg21[%c88, %c0_30], %59 {strides = array<i32>} : memref<200x242xf32, #tpu.memory_space<vmem>>, vector<8x242xf32>,
    %61 = vector.extract_strided_slice %35 {offsets = [0, 2904], sizes = [8, 242], strides = [1, 1]} : vector<8x6050xf32> to vector<8x242xf32>
    %c96 = arith.constant 96 : index
    %c0_31 = arith.constant 0 : index
    %62 = vector.load %arg21[%c96, %c0_31] : memref<200x242xf32, #tpu.memory_space<vmem>>, vector<8x242xf32>
    tpu.vector_store %arg21[%c96, %c0_31], %61 {strides = array<i32>} : memref<200x242xf32, #tpu.memory_space<vmem>>, vector<8x242xf32>,
    %63 = vector.extract_strided_slice %35 {offsets = [0, 3146], sizes = [8, 242], strides = [1, 1]} : vector<8x6050xf32> to vector<8x242xf32>
    %c104 = arith.constant 104 : index
    %c0_32 = arith.constant 0 : index
    %64 = vector.load %arg21[%c104, %c0_32] : memref<200x242xf32, #tpu.memory_space<vmem>>, vector<8x242xf32>
    tpu.vector_store %arg21[%c104, %c0_32], %63 {strides = array<i32>} : memref<200x242xf32, #tpu.memory_space<vmem>>, vector<8x242xf32>,
    %65 = vector.extract_strided_slice %35 {offsets = [0, 3388], sizes = [8, 242], strides = [1, 1]} : vector<8x6050xf32> to vector<8x242xf32>
    %c112 = arith.constant 112 : index
    %c0_33 = arith.constant 0 : index
    %66 = vector.load %arg21[%c112, %c0_33] : memref<200x242xf32, #tpu.memory_space<vmem>>, vector<8x242xf32>
    tpu.vector_store %arg21[%c112, %c0_33], %65 {strides = array<i32>} : memref<200x242xf32, #tpu.memory_space<vmem>>, vector<8x242xf32>,
    %67 = vector.extract_strided_slice %35 {offsets = [0, 3630], sizes = [8, 242], strides = [1, 1]} : vector<8x6050xf32> to vector<8x242xf32>
    %c120 = arith.constant 120 : index
    %c0_34 = arith.constant 0 : index
    %68 = vector.load %arg21[%c120, %c0_34] : memref<200x242xf32, #tpu.memory_space<vmem>>, vector<8x242xf32>
    tpu.vector_store %arg21[%c120, %c0_34], %67 {strides = array<i32>} : memref<200x242xf32, #tpu.memory_space<vmem>>, vector<8x242xf32>,
    %69 = vector.extract_strided_slice %35 {offsets = [0, 3872], sizes = [8, 242], strides = [1, 1]} : vector<8x6050xf32> to vector<8x242xf32>
    %c128 = arith.constant 128 : index
    %c0_35 = arith.constant 0 : index
    %70 = vector.load %arg21[%c128, %c0_35] : memref<200x242xf32, #tpu.memory_space<vmem>>, vector<8x242xf32>
    tpu.vector_store %arg21[%c128, %c0_35], %69 {strides = array<i32>} : memref<200x242xf32, #tpu.memory_space<vmem>>, vector<8x242xf32>,
    %71 = vector.extract_strided_slice %35 {offsets = [0, 4114], sizes = [8, 242], strides = [1, 1]} : vector<8x6050xf32> to vector<8x242xf32>
    %c136 = arith.constant 136 : index
    %c0_36 = arith.constant 0 : index
    %72 = vector.load %arg21[%c136, %c0_36] : memref<200x242xf32, #tpu.memory_space<vmem>>, vector<8x242xf32>
    tpu.vector_store %arg21[%c136, %c0_36], %71 {strides = array<i32>} : memref<200x242xf32, #tpu.memory_space<vmem>>, vector<8x242xf32>,
    %73 = vector.extract_strided_slice %35 {offsets = [0, 4356], sizes = [8, 242], strides = [1, 1]} : vector<8x6050xf32> to vector<8x242xf32>
    %c144 = arith.constant 144 : index
    %c0_37 = arith.constant 0 : index
    %74 = vector.load %arg21[%c144, %c0_37] : memref<200x242xf32, #tpu.memory_space<vmem>>, vector<8x242xf32>
    tpu.vector_store %arg21[%c144, %c0_37], %73 {strides = array<i32>} : memref<200x242xf32, #tpu.memory_space<vmem>>, vector<8x242xf32>,
    %75 = vector.extract_strided_slice %35 {offsets = [0, 4598], sizes = [8, 242], strides = [1, 1]} : vector<8x6050xf32> to vector<8x242xf32>
    %c152 = arith.constant 152 : index
    %c0_38 = arith.constant 0 : index
    %76 = vector.load %arg21[%c152, %c0_38] : memref<200x242xf32, #tpu.memory_space<vmem>>, vector<8x242xf32>
    tpu.vector_store %arg21[%c152, %c0_38], %75 {strides = array<i32>} : memref<200x242xf32, #tpu.memory_space<vmem>>, vector<8x242xf32>,
    %77 = vector.extract_strided_slice %35 {offsets = [0, 4840], sizes = [8, 242], strides = [1, 1]} : vector<8x6050xf32> to vector<8x242xf32>
    %c160 = arith.constant 160 : index
    %c0_39 = arith.constant 0 : index
    %78 = vector.load %arg21[%c160, %c0_39] : memref<200x242xf32, #tpu.memory_space<vmem>>, vector<8x242xf32>
    tpu.vector_store %arg21[%c160, %c0_39], %77 {strides = array<i32>} : memref<200x242xf32, #tpu.memory_space<vmem>>, vector<8x242xf32>,
    %79 = vector.extract_strided_slice %35 {offsets = [0, 5082], sizes = [8, 242], strides = [1, 1]} : vector<8x6050xf32> to vector<8x242xf32>
    %c168 = arith.constant 168 : index
    %c0_40 = arith.constant 0 : index
    %80 = vector.load %arg21[%c168, %c0_40] : memref<200x242xf32, #tpu.memory_space<vmem>>, vector<8x242xf32>
    tpu.vector_store %arg21[%c168, %c0_40], %79 {strides = array<i32>} : memref<200x242xf32, #tpu.memory_space<vmem>>, vector<8x242xf32>,
    %81 = vector.extract_strided_slice %35 {offsets = [0, 5324], sizes = [8, 242], strides = [1, 1]} : vector<8x6050xf32> to vector<8x242xf32>
    %c176 = arith.constant 176 : index
    %c0_41 = arith.constant 0 : index
    %82 = vector.load %arg21[%c176, %c0_41] : memref<200x242xf32, #tpu.memory_space<vmem>>, vector<8x242xf32>
    tpu.vector_store %arg21[%c176, %c0_41], %81 {strides = array<i32>} : memref<200x242xf32, #tpu.memory_space<vmem>>, vector<8x242xf32>,
    %83 = vector.extract_strided_slice %35 {offsets = [0, 5566], sizes = [8, 242], strides = [1, 1]} : vector<8x6050xf32> to vector<8x242xf32>
    %c184 = arith.constant 184 : index
    %c0_42 = arith.constant 0 : index
    %84 = vector.load %arg21[%c184, %c0_42] : memref<200x242xf32, #tpu.memory_space<vmem>>, vector<8x242xf32>
    tpu.vector_store %arg21[%c184, %c0_42], %83 {strides = array<i32>} : memref<200x242xf32, #tpu.memory_space<vmem>>, vector<8x242xf32>,
    %85 = vector.extract_strided_slice %35 {offsets = [0, 5808], sizes = [8, 242], strides = [1, 1]} : vector<8x6050xf32> to vector<8x242xf32>
    %c192 = arith.constant 192 : index
    %c0_43 = arith.constant 0 : index
    %86 = vector.load %arg21[%c192, %c0_43] : memref<200x242xf32, #tpu.memory_space<vmem>>, vector<8x242xf32>
    tpu.vector_store %arg21[%c192, %c0_43], %85 {strides = array<i32>} : memref<200x242xf32, #tpu.memory_space<vmem>>, vector<8x242xf32>,
    %c0_44 = arith.constant 0 : index
    %c0_45 = arith.constant 0 : index
    %87 = vector.load %arg21[%c0_44, %c0_45] : memref<200x242xf32, #tpu.memory_space<vmem>>, vector<200x242xf32>
    %cst_46 = arith.constant dense<0.000000e+00> : vector<16x242xf32>
    %88 = tpu.matmul %36, %87, %cst_46 {dimension_numbers = #tpu.dot_dimension_numbers<[1], [0], [0], [1], [0, 0, 1, 1], [], []>} : vector<16x200xf32>, vector<200x242xf32>, vector<16x242xf32> -> vector<16x242xf32>
    %c0_47 = arith.constant 0 : index
    %c0_48 = arith.constant 0 : index
    %89 = vector.load %arg8[%c0_47, %c0_48] : memref<16x1xf32, #tpu.memory_space<vmem>>, vector<16x1xf32>
    %c0_49 = arith.constant 0 : index
    %c0_50 = arith.constant 0 : index
    %90 = vector.load %arg9[%c0_49, %c0_50] : memref<16x1xf32, #tpu.memory_space<vmem>>, vector<16x1xf32>
    %cst_51 = arith.constant dense<0.000000e+00> : vector<16xf32>
    %91 = vector.multi_reduction <add>, %88, %cst_51 [1] : vector<16x242xf32> to vector<16xf32>
    %92 = vector.shape_cast %91 : vector<16xf32> to vector<16x1xf32>
    %cst_52 = arith.constant 2.420000e+02 : f32
    %93 = vector.broadcast %cst_52 : f32 to vector<16x1xf32>
    %94 = arith.divf %92, %93 : vector<16x1xf32>
    %95 = arith.mulf %88, %88 : vector<16x242xf32>
    %cst_53 = arith.constant dense<0.000000e+00> : vector<16xf32>
    %96 = vector.multi_reduction <add>, %95, %cst_53 [1] : vector<16x242xf32> to vector<16xf32>
    %97 = vector.shape_cast %96 : vector<16xf32> to vector<16x1xf32>
    %cst_54 = arith.constant 2.420000e+02 : f32
    %98 = vector.broadcast %cst_54 : f32 to vector<16x1xf32>
    %99 = arith.divf %97, %98 : vector<16x1xf32>
    %100 = arith.mulf %94, %94 : vector<16x1xf32>
    %101 = arith.subf %99, %100 : vector<16x1xf32>
    %102 = vector.broadcast %94 : vector<16x1xf32> to vector<16x242xf32>
    %103 = arith.subf %88, %102 : vector<16x242xf32>
    %cst_55 = arith.constant 9.99999974E-6 : f32
    %104 = vector.broadcast %cst_55 : f32 to vector<16x1xf32>
    %105 = arith.addf %101, %104 : vector<16x1xf32>
    %106 = math.rsqrt %105 : vector<16x1xf32>
    %107 = vector.broadcast %106 : vector<16x1xf32> to vector<16x242xf32>
    %108 = arith.mulf %103, %107 : vector<16x242xf32>
    %109 = vector.broadcast %89 : vector<16x1xf32> to vector<16x242xf32>
    %110 = arith.mulf %108, %109 : vector<16x242xf32>
    %111 = vector.broadcast %90 : vector<16x1xf32> to vector<16x242xf32>
    %112 = arith.addf %110, %111 : vector<16x242xf32>
    %cst_56 = arith.constant 0.000000e+00 : f32
    %113 = vector.broadcast %cst_56 : f32 to vector<16x242xf32>
    %114 = arith.cmpf oge, %112, %113 : vector<16x242xf32>
    %cst_57 = arith.constant 2.000000e-01 : f32
    %115 = vector.broadcast %cst_57 : f32 to vector<16x242xf32>
    %116 = arith.mulf %115, %112 : vector<16x242xf32>
    %117 = arith.select %114, %112, %116 : vector<16x242xi1>, vector<16x242xf32>
    %c0_58 = arith.constant 0 : index
    %c0_59 = arith.constant 0 : index
    %118 = vector.load %arg11[%c0_58, %c0_59] : memref<32x400xf32, #tpu.memory_space<vmem>>, vector<32x400xf32>
    %c0_60 = arith.constant 0 : index
    %c0_61 = arith.constant 0 : index
    %119 = vector.load %arg10[%c0_60, %c0_61] : memref<1x1250xi32, #tpu.memory_space<vmem>>, vector<1x1250xi32>
    %120 = tpu.iota {dimensions = array<i32: 0>} : vector<242x1250xi32>
    %121 = vector.broadcast %119 : vector<1x1250xi32> to vector<242x1250xi32>
    %122 = arith.cmpi eq, %120, %121 : vector<242x1250xi32>
    %123 = arith.extui %122 : vector<242x1250xi1> to vector<242x1250xi32>
    %124 = arith.sitofp %123 : vector<242x1250xi32> to vector<242x1250xf32>
    %cst_62 = arith.constant dense<0.000000e+00> : vector<16x1250xf32>
    %125 = tpu.matmul %117, %124, %cst_62 {dimension_numbers = #tpu.dot_dimension_numbers<[1], [0], [0], [1], [0, 0, 1, 1], [], []>} : vector<16x242xf32>, vector<242x1250xf32>, vector<16x1250xf32> -> vector<16x1250xf32>
    %126 = vector.extract_strided_slice %125 {offsets = [0, 0], sizes = [16, 50], strides = [1, 1]} : vector<16x1250xf32> to vector<16x50xf32>
    %c0_63 = arith.constant 0 : index
    %c0_64 = arith.constant 0 : index
    %127 = vector.load %arg22[%c0_63, %c0_64] : memref<400x50xf32, #tpu.memory_space<vmem>>, vector<16x50xf32>
    tpu.vector_store %arg22[%c0_63, %c0_64], %126 {strides = array<i32>} : memref<400x50xf32, #tpu.memory_space<vmem>>, vector<16x50xf32>,
    %128 = vector.extract_strided_slice %125 {offsets = [0, 50], sizes = [16, 50], strides = [1, 1]} : vector<16x1250xf32> to vector<16x50xf32>
    %c16_65 = arith.constant 16 : index
    %c0_66 = arith.constant 0 : index
    %129 = vector.load %arg22[%c16_65, %c0_66] : memref<400x50xf32, #tpu.memory_space<vmem>>, vector<16x50xf32>
    tpu.vector_store %arg22[%c16_65, %c0_66], %128 {strides = array<i32>} : memref<400x50xf32, #tpu.memory_space<vmem>>, vector<16x50xf32>,
    %130 = vector.extract_strided_slice %125 {offsets = [0, 100], sizes = [16, 50], strides = [1, 1]} : vector<16x1250xf32> to vector<16x50xf32>
    %c32_67 = arith.constant 32 : index
    %c0_68 = arith.constant 0 : index
    %131 = vector.load %arg22[%c32_67, %c0_68] : memref<400x50xf32, #tpu.memory_space<vmem>>, vector<16x50xf32>
    tpu.vector_store %arg22[%c32_67, %c0_68], %130 {strides = array<i32>} : memref<400x50xf32, #tpu.memory_space<vmem>>, vector<16x50xf32>,
    %132 = vector.extract_strided_slice %125 {offsets = [0, 150], sizes = [16, 50], strides = [1, 1]} : vector<16x1250xf32> to vector<16x50xf32>
    %c48_69 = arith.constant 48 : index
    %c0_70 = arith.constant 0 : index
    %133 = vector.load %arg22[%c48_69, %c0_70] : memref<400x50xf32, #tpu.memory_space<vmem>>, vector<16x50xf32>
    tpu.vector_store %arg22[%c48_69, %c0_70], %132 {strides = array<i32>} : memref<400x50xf32, #tpu.memory_space<vmem>>, vector<16x50xf32>,
    %134 = vector.extract_strided_slice %125 {offsets = [0, 200], sizes = [16, 50], strides = [1, 1]} : vector<16x1250xf32> to vector<16x50xf32>
    %c64_71 = arith.constant 64 : index
    %c0_72 = arith.constant 0 : index
    %135 = vector.load %arg22[%c64_71, %c0_72] : memref<400x50xf32, #tpu.memory_space<vmem>>, vector<16x50xf32>
    tpu.vector_store %arg22[%c64_71, %c0_72], %134 {strides = array<i32>} : memref<400x50xf32, #tpu.memory_space<vmem>>, vector<16x50xf32>,
    %136 = vector.extract_strided_slice %125 {offsets = [0, 250], sizes = [16, 50], strides = [1, 1]} : vector<16x1250xf32> to vector<16x50xf32>
    %c80_73 = arith.constant 80 : index
    %c0_74 = arith.constant 0 : index
    %137 = vector.load %arg22[%c80_73, %c0_74] : memref<400x50xf32, #tpu.memory_space<vmem>>, vector<16x50xf32>
    tpu.vector_store %arg22[%c80_73, %c0_74], %136 {strides = array<i32>} : memref<400x50xf32, #tpu.memory_space<vmem>>, vector<16x50xf32>,
    %138 = vector.extract_strided_slice %125 {offsets = [0, 300], sizes = [16, 50], strides = [1, 1]} : vector<16x1250xf32> to vector<16x50xf32>
    %c96_75 = arith.constant 96 : index
    %c0_76 = arith.constant 0 : index
    %139 = vector.load %arg22[%c96_75, %c0_76] : memref<400x50xf32, #tpu.memory_space<vmem>>, vector<16x50xf32>
    tpu.vector_store %arg22[%c96_75, %c0_76], %138 {strides = array<i32>} : memref<400x50xf32, #tpu.memory_space<vmem>>, vector<16x50xf32>,
    %140 = vector.extract_strided_slice %125 {offsets = [0, 350], sizes = [16, 50], strides = [1, 1]} : vector<16x1250xf32> to vector<16x50xf32>
    %c112_77 = arith.constant 112 : index
    %c0_78 = arith.constant 0 : index
    %141 = vector.load %arg22[%c112_77, %c0_78] : memref<400x50xf32, #tpu.memory_space<vmem>>, vector<16x50xf32>
    tpu.vector_store %arg22[%c112_77, %c0_78], %140 {strides = array<i32>} : memref<400x50xf32, #tpu.memory_space<vmem>>, vector<16x50xf32>,
    %142 = vector.extract_strided_slice %125 {offsets = [0, 400], sizes = [16, 50], strides = [1, 1]} : vector<16x1250xf32> to vector<16x50xf32>
    %c128_79 = arith.constant 128 : index
    %c0_80 = arith.constant 0 : index
    %143 = vector.load %arg22[%c128_79, %c0_80] : memref<400x50xf32, #tpu.memory_space<vmem>>, vector<16x50xf32>
    tpu.vector_store %arg22[%c128_79, %c0_80], %142 {strides = array<i32>} : memref<400x50xf32, #tpu.memory_space<vmem>>, vector<16x50xf32>,
    %144 = vector.extract_strided_slice %125 {offsets = [0, 450], sizes = [16, 50], strides = [1, 1]} : vector<16x1250xf32> to vector<16x50xf32>
    %c144_81 = arith.constant 144 : index
    %c0_82 = arith.constant 0 : index
    %145 = vector.load %arg22[%c144_81, %c0_82] : memref<400x50xf32, #tpu.memory_space<vmem>>, vector<16x50xf32>
    tpu.vector_store %arg22[%c144_81, %c0_82], %144 {strides = array<i32>} : memref<400x50xf32, #tpu.memory_space<vmem>>, vector<16x50xf32>,
    %146 = vector.extract_strided_slice %125 {offsets = [0, 500], sizes = [16, 50], strides = [1, 1]} : vector<16x1250xf32> to vector<16x50xf32>
    %c160_83 = arith.constant 160 : index
    %c0_84 = arith.constant 0 : index
    %147 = vector.load %arg22[%c160_83, %c0_84] : memref<400x50xf32, #tpu.memory_space<vmem>>, vector<16x50xf32>
    tpu.vector_store %arg22[%c160_83, %c0_84], %146 {strides = array<i32>} : memref<400x50xf32, #tpu.memory_space<vmem>>, vector<16x50xf32>,
    %148 = vector.extract_strided_slice %125 {offsets = [0, 550], sizes = [16, 50], strides = [1, 1]} : vector<16x1250xf32> to vector<16x50xf32>
    %c176_85 = arith.constant 176 : index
    %c0_86 = arith.constant 0 : index
    %149 = vector.load %arg22[%c176_85, %c0_86] : memref<400x50xf32, #tpu.memory_space<vmem>>, vector<16x50xf32>
    tpu.vector_store %arg22[%c176_85, %c0_86], %148 {strides = array<i32>} : memref<400x50xf32, #tpu.memory_space<vmem>>, vector<16x50xf32>,
    %150 = vector.extract_strided_slice %125 {offsets = [0, 600], sizes = [16, 50], strides = [1, 1]} : vector<16x1250xf32> to vector<16x50xf32>
    %c192_87 = arith.constant 192 : index
    %c0_88 = arith.constant 0 : index
    %151 = vector.load %arg22[%c192_87, %c0_88] : memref<400x50xf32, #tpu.memory_space<vmem>>, vector<16x50xf32>
    tpu.vector_store %arg22[%c192_87, %c0_88], %150 {strides = array<i32>} : memref<400x50xf32, #tpu.memory_space<vmem>>, vector<16x50xf32>,
    %152 = vector.extract_strided_slice %125 {offsets = [0, 650], sizes = [16, 50], strides = [1, 1]} : vector<16x1250xf32> to vector<16x50xf32>
    %c208 = arith.constant 208 : index
    %c0_89 = arith.constant 0 : index
    %153 = vector.load %arg22[%c208, %c0_89] : memref<400x50xf32, #tpu.memory_space<vmem>>, vector<16x50xf32>
    tpu.vector_store %arg22[%c208, %c0_89], %152 {strides = array<i32>} : memref<400x50xf32, #tpu.memory_space<vmem>>, vector<16x50xf32>,
    %154 = vector.extract_strided_slice %125 {offsets = [0, 700], sizes = [16, 50], strides = [1, 1]} : vector<16x1250xf32> to vector<16x50xf32>
    %c224 = arith.constant 224 : index
    %c0_90 = arith.constant 0 : index
    %155 = vector.load %arg22[%c224, %c0_90] : memref<400x50xf32, #tpu.memory_space<vmem>>, vector<16x50xf32>
    tpu.vector_store %arg22[%c224, %c0_90], %154 {strides = array<i32>} : memref<400x50xf32, #tpu.memory_space<vmem>>, vector<16x50xf32>,
    %156 = vector.extract_strided_slice %125 {offsets = [0, 750], sizes = [16, 50], strides = [1, 1]} : vector<16x1250xf32> to vector<16x50xf32>
    %c240 = arith.constant 240 : index
    %c0_91 = arith.constant 0 : index
    %157 = vector.load %arg22[%c240, %c0_91] : memref<400x50xf32, #tpu.memory_space<vmem>>, vector<16x50xf32>
    tpu.vector_store %arg22[%c240, %c0_91], %156 {strides = array<i32>} : memref<400x50xf32, #tpu.memory_space<vmem>>, vector<16x50xf32>,
    %158 = vector.extract_strided_slice %125 {offsets = [0, 800], sizes = [16, 50], strides = [1, 1]} : vector<16x1250xf32> to vector<16x50xf32>
    %c256 = arith.constant 256 : index
    %c0_92 = arith.constant 0 : index
    %159 = vector.load %arg22[%c256, %c0_92] : memref<400x50xf32, #tpu.memory_space<vmem>>, vector<16x50xf32>
    tpu.vector_store %arg22[%c256, %c0_92], %158 {strides = array<i32>} : memref<400x50xf32, #tpu.memory_space<vmem>>, vector<16x50xf32>,
    %160 = vector.extract_strided_slice %125 {offsets = [0, 850], sizes = [16, 50], strides = [1, 1]} : vector<16x1250xf32> to vector<16x50xf32>
    %c272 = arith.constant 272 : index
    %c0_93 = arith.constant 0 : index
    %161 = vector.load %arg22[%c272, %c0_93] : memref<400x50xf32, #tpu.memory_space<vmem>>, vector<16x50xf32>
    tpu.vector_store %arg22[%c272, %c0_93], %160 {strides = array<i32>} : memref<400x50xf32, #tpu.memory_space<vmem>>, vector<16x50xf32>,
    %162 = vector.extract_strided_slice %125 {offsets = [0, 900], sizes = [16, 50], strides = [1, 1]} : vector<16x1250xf32> to vector<16x50xf32>
    %c288 = arith.constant 288 : index
    %c0_94 = arith.constant 0 : index
    %163 = vector.load %arg22[%c288, %c0_94] : memref<400x50xf32, #tpu.memory_space<vmem>>, vector<16x50xf32>
    tpu.vector_store %arg22[%c288, %c0_94], %162 {strides = array<i32>} : memref<400x50xf32, #tpu.memory_space<vmem>>, vector<16x50xf32>,
    %164 = vector.extract_strided_slice %125 {offsets = [0, 950], sizes = [16, 50], strides = [1, 1]} : vector<16x1250xf32> to vector<16x50xf32>
    %c304 = arith.constant 304 : index
    %c0_95 = arith.constant 0 : index
    %165 = vector.load %arg22[%c304, %c0_95] : memref<400x50xf32, #tpu.memory_space<vmem>>, vector<16x50xf32>
    tpu.vector_store %arg22[%c304, %c0_95], %164 {strides = array<i32>} : memref<400x50xf32, #tpu.memory_space<vmem>>, vector<16x50xf32>,
    %166 = vector.extract_strided_slice %125 {offsets = [0, 1000], sizes = [16, 50], strides = [1, 1]} : vector<16x1250xf32> to vector<16x50xf32>
    %c320 = arith.constant 320 : index
    %c0_96 = arith.constant 0 : index
    %167 = vector.load %arg22[%c320, %c0_96] : memref<400x50xf32, #tpu.memory_space<vmem>>, vector<16x50xf32>
    tpu.vector_store %arg22[%c320, %c0_96], %166 {strides = array<i32>} : memref<400x50xf32, #tpu.memory_space<vmem>>, vector<16x50xf32>,
    %168 = vector.extract_strided_slice %125 {offsets = [0, 1050], sizes = [16, 50], strides = [1, 1]} : vector<16x1250xf32> to vector<16x50xf32>
    %c336 = arith.constant 336 : index
    %c0_97 = arith.constant 0 : index
    %169 = vector.load %arg22[%c336, %c0_97] : memref<400x50xf32, #tpu.memory_space<vmem>>, vector<16x50xf32>
    tpu.vector_store %arg22[%c336, %c0_97], %168 {strides = array<i32>} : memref<400x50xf32, #tpu.memory_space<vmem>>, vector<16x50xf32>,
    %170 = vector.extract_strided_slice %125 {offsets = [0, 1100], sizes = [16, 50], strides = [1, 1]} : vector<16x1250xf32> to vector<16x50xf32>
    %c352 = arith.constant 352 : index
    %c0_98 = arith.constant 0 : index
    %171 = vector.load %arg22[%c352, %c0_98] : memref<400x50xf32, #tpu.memory_space<vmem>>, vector<16x50xf32>
    tpu.vector_store %arg22[%c352, %c0_98], %170 {strides = array<i32>} : memref<400x50xf32, #tpu.memory_space<vmem>>, vector<16x50xf32>,
    %172 = vector.extract_strided_slice %125 {offsets = [0, 1150], sizes = [16, 50], strides = [1, 1]} : vector<16x1250xf32> to vector<16x50xf32>
    %c368 = arith.constant 368 : index
    %c0_99 = arith.constant 0 : index
    %173 = vector.load %arg22[%c368, %c0_99] : memref<400x50xf32, #tpu.memory_space<vmem>>, vector<16x50xf32>
    tpu.vector_store %arg22[%c368, %c0_99], %172 {strides = array<i32>} : memref<400x50xf32, #tpu.memory_space<vmem>>, vector<16x50xf32>,
    %174 = vector.extract_strided_slice %125 {offsets = [0, 1200], sizes = [16, 50], strides = [1, 1]} : vector<16x1250xf32> to vector<16x50xf32>
    %c384 = arith.constant 384 : index
    %c0_100 = arith.constant 0 : index
    %175 = vector.load %arg22[%c384, %c0_100] : memref<400x50xf32, #tpu.memory_space<vmem>>, vector<16x50xf32>
    tpu.vector_store %arg22[%c384, %c0_100], %174 {strides = array<i32>} : memref<400x50xf32, #tpu.memory_space<vmem>>, vector<16x50xf32>,
    %c0_101 = arith.constant 0 : index
    %c0_102 = arith.constant 0 : index
    %176 = vector.load %arg22[%c0_101, %c0_102] : memref<400x50xf32, #tpu.memory_space<vmem>>, vector<400x50xf32>
    %cst_103 = arith.constant dense<0.000000e+00> : vector<32x50xf32>
    %177 = tpu.matmul %118, %176, %cst_103 {dimension_numbers = #tpu.dot_dimension_numbers<[1], [0], [0], [1], [0, 0, 1, 1], [], []>} : vector<32x400xf32>, vector<400x50xf32>, vector<32x50xf32> -> vector<32x50xf32>
    %c0_104 = arith.constant 0 : index
    %c0_105 = arith.constant 0 : index
    %178 = vector.load %arg12[%c0_104, %c0_105] : memref<32x1xf32, #tpu.memory_space<vmem>>, vector<32x1xf32>
    %c0_106 = arith.constant 0 : index
    %c0_107 = arith.constant 0 : index
    %179 = vector.load %arg13[%c0_106, %c0_107] : memref<32x1xf32, #tpu.memory_space<vmem>>, vector<32x1xf32>
    %cst_108 = arith.constant dense<0.000000e+00> : vector<32xf32>
    %180 = vector.multi_reduction <add>, %177, %cst_108 [1] : vector<32x50xf32> to vector<32xf32>
    %181 = vector.shape_cast %180 : vector<32xf32> to vector<32x1xf32>
    %cst_109 = arith.constant 5.000000e+01 : f32
    %182 = vector.broadcast %cst_109 : f32 to vector<32x1xf32>
    %183 = arith.divf %181, %182 : vector<32x1xf32>
    %184 = arith.mulf %177, %177 : vector<32x50xf32>
    %cst_110 = arith.constant dense<0.000000e+00> : vector<32xf32>
    %185 = vector.multi_reduction <add>, %184, %cst_110 [1] : vector<32x50xf32> to vector<32xf32>
    %186 = vector.shape_cast %185 : vector<32xf32> to vector<32x1xf32>
    %cst_111 = arith.constant 5.000000e+01 : f32
    %187 = vector.broadcast %cst_111 : f32 to vector<32x1xf32>
    %188 = arith.divf %186, %187 : vector<32x1xf32>
    %189 = arith.mulf %183, %183 : vector<32x1xf32>
    %190 = arith.subf %188, %189 : vector<32x1xf32>
    %191 = vector.broadcast %183 : vector<32x1xf32> to vector<32x50xf32>
    %192 = arith.subf %177, %191 : vector<32x50xf32>
    %cst_112 = arith.constant 9.99999974E-6 : f32
    %193 = vector.broadcast %cst_112 : f32 to vector<32x1xf32>
    %194 = arith.addf %190, %193 : vector<32x1xf32>
    %195 = math.rsqrt %194 : vector<32x1xf32>
    %196 = vector.broadcast %195 : vector<32x1xf32> to vector<32x50xf32>
    %197 = arith.mulf %192, %196 : vector<32x50xf32>
    %198 = vector.broadcast %178 : vector<32x1xf32> to vector<32x50xf32>
    %199 = arith.mulf %197, %198 : vector<32x50xf32>
    %200 = vector.broadcast %179 : vector<32x1xf32> to vector<32x50xf32>
    %201 = arith.addf %199, %200 : vector<32x50xf32>
    %cst_113 = arith.constant 0.000000e+00 : f32
    %202 = vector.broadcast %cst_113 : f32 to vector<32x50xf32>
    %203 = arith.cmpf oge, %201, %202 : vector<32x50xf32>
    %cst_114 = arith.constant 2.000000e-01 : f32
    %204 = vector.broadcast %cst_114 : f32 to vector<32x50xf32>
    %205 = arith.mulf %204, %201 : vector<32x50xf32>
    %206 = arith.select %203, %201, %205 : vector<32x50xi1>, vector<32x50xf32>
    %c0_115 = arith.constant 0 : index
    %c0_116 = arith.constant 0 : index
    %207 = vector.load %arg15[%c0_115, %c0_116] : memref<64x288xf32, #tpu.memory_space<vmem>>, vector<64x288xf32>
    %c0_117 = arith.constant 0 : index
    %c0_118 = arith.constant 0 : index
    %208 = vector.load %arg14[%c0_117, %c0_118] : memref<1x162xi32, #tpu.memory_space<vmem>>, vector<1x162xi32>
    %209 = tpu.iota {dimensions = array<i32: 0>} : vector<50x162xi32>
    %210 = vector.broadcast %208 : vector<1x162xi32> to vector<50x162xi32>
    %211 = arith.cmpi eq, %209, %210 : vector<50x162xi32>
    %212 = arith.extui %211 : vector<50x162xi1> to vector<50x162xi32>
    %213 = arith.sitofp %212 : vector<50x162xi32> to vector<50x162xf32>
    %cst_119 = arith.constant dense<0.000000e+00> : vector<32x162xf32>
    %214 = tpu.matmul %206, %213, %cst_119 {dimension_numbers = #tpu.dot_dimension_numbers<[1], [0], [0], [1], [0, 0, 1, 1], [], []>} : vector<32x50xf32>, vector<50x162xf32>, vector<32x162xf32> -> vector<32x162xf32>
    %215 = vector.extract_strided_slice %214 {offsets = [0, 0], sizes = [32, 18], strides = [1, 1]} : vector<32x162xf32> to vector<32x18xf32>
    %c0_120 = arith.constant 0 : index
    %c0_121 = arith.constant 0 : index
    %216 = vector.load %arg23[%c0_120, %c0_121] : memref<288x18xf32, #tpu.memory_space<vmem>>, vector<32x18xf32>
    tpu.vector_store %arg23[%c0_120, %c0_121], %215 {strides = array<i32>} : memref<288x18xf32, #tpu.memory_space<vmem>>, vector<32x18xf32>,
    %217 = vector.extract_strided_slice %214 {offsets = [0, 18], sizes = [32, 18], strides = [1, 1]} : vector<32x162xf32> to vector<32x18xf32>
    %c32_122 = arith.constant 32 : index
    %c0_123 = arith.constant 0 : index
    %218 = vector.load %arg23[%c32_122, %c0_123] : memref<288x18xf32, #tpu.memory_space<vmem>>, vector<32x18xf32>
    tpu.vector_store %arg23[%c32_122, %c0_123], %217 {strides = array<i32>} : memref<288x18xf32, #tpu.memory_space<vmem>>, vector<32x18xf32>,
    %219 = vector.extract_strided_slice %214 {offsets = [0, 36], sizes = [32, 18], strides = [1, 1]} : vector<32x162xf32> to vector<32x18xf32>
    %c64_124 = arith.constant 64 : index
    %c0_125 = arith.constant 0 : index
    %220 = vector.load %arg23[%c64_124, %c0_125] : memref<288x18xf32, #tpu.memory_space<vmem>>, vector<32x18xf32>
    tpu.vector_store %arg23[%c64_124, %c0_125], %219 {strides = array<i32>} : memref<288x18xf32, #tpu.memory_space<vmem>>, vector<32x18xf32>,
    %221 = vector.extract_strided_slice %214 {offsets = [0, 54], sizes = [32, 18], strides = [1, 1]} : vector<32x162xf32> to vector<32x18xf32>
    %c96_126 = arith.constant 96 : index
    %c0_127 = arith.constant 0 : index
    %222 = vector.load %arg23[%c96_126, %c0_127] : memref<288x18xf32, #tpu.memory_space<vmem>>, vector<32x18xf32>
    tpu.vector_store %arg23[%c96_126, %c0_127], %221 {strides = array<i32>} : memref<288x18xf32, #tpu.memory_space<vmem>>, vector<32x18xf32>,
    %223 = vector.extract_strided_slice %214 {offsets = [0, 72], sizes = [32, 18], strides = [1, 1]} : vector<32x162xf32> to vector<32x18xf32>
    %c128_128 = arith.constant 128 : index
    %c0_129 = arith.constant 0 : index
    %224 = vector.load %arg23[%c128_128, %c0_129] : memref<288x18xf32, #tpu.memory_space<vmem>>, vector<32x18xf32>
    tpu.vector_store %arg23[%c128_128, %c0_129], %223 {strides = array<i32>} : memref<288x18xf32, #tpu.memory_space<vmem>>, vector<32x18xf32>,
    %225 = vector.extract_strided_slice %214 {offsets = [0, 90], sizes = [32, 18], strides = [1, 1]} : vector<32x162xf32> to vector<32x18xf32>
    %c160_130 = arith.constant 160 : index
    %c0_131 = arith.constant 0 : index
    %226 = vector.load %arg23[%c160_130, %c0_131] : memref<288x18xf32, #tpu.memory_space<vmem>>, vector<32x18xf32>
    tpu.vector_store %arg23[%c160_130, %c0_131], %225 {strides = array<i32>} : memref<288x18xf32, #tpu.memory_space<vmem>>, vector<32x18xf32>,
    %227 = vector.extract_strided_slice %214 {offsets = [0, 108], sizes = [32, 18], strides = [1, 1]} : vector<32x162xf32> to vector<32x18xf32>
    %c192_132 = arith.constant 192 : index
    %c0_133 = arith.constant 0 : index
    %228 = vector.load %arg23[%c192_132, %c0_133] : memref<288x18xf32, #tpu.memory_space<vmem>>, vector<32x18xf32>
    tpu.vector_store %arg23[%c192_132, %c0_133], %227 {strides = array<i32>} : memref<288x18xf32, #tpu.memory_space<vmem>>, vector<32x18xf32>,
    %229 = vector.extract_strided_slice %214 {offsets = [0, 126], sizes = [32, 18], strides = [1, 1]} : vector<32x162xf32> to vector<32x18xf32>
    %c224_134 = arith.constant 224 : index
    %c0_135 = arith.constant 0 : index
    %230 = vector.load %arg23[%c224_134, %c0_135] : memref<288x18xf32, #tpu.memory_space<vmem>>, vector<32x18xf32>
    tpu.vector_store %arg23[%c224_134, %c0_135], %229 {strides = array<i32>} : memref<288x18xf32, #tpu.memory_space<vmem>>, vector<32x18xf32>,
    %231 = vector.extract_strided_slice %214 {offsets = [0, 144], sizes = [32, 18], strides = [1, 1]} : vector<32x162xf32> to vector<32x18xf32>
    %c256_136 = arith.constant 256 : index
    %c0_137 = arith.constant 0 : index
    %232 = vector.load %arg23[%c256_136, %c0_137] : memref<288x18xf32, #tpu.memory_space<vmem>>, vector<32x18xf32>
    tpu.vector_store %arg23[%c256_136, %c0_137], %231 {strides = array<i32>} : memref<288x18xf32, #tpu.memory_space<vmem>>, vector<32x18xf32>,
    %c0_138 = arith.constant 0 : index
    %c0_139 = arith.constant 0 : index
    %233 = vector.load %arg23[%c0_138, %c0_139] : memref<288x18xf32, #tpu.memory_space<vmem>>, vector<288x18xf32>
    %cst_140 = arith.constant dense<0.000000e+00> : vector<64x18xf32>
    %234 = tpu.matmul %207, %233, %cst_140 {dimension_numbers = #tpu.dot_dimension_numbers<[1], [0], [0], [1], [0, 0, 1, 1], [], []>} : vector<64x288xf32>, vector<288x18xf32>, vector<64x18xf32> -> vector<64x18xf32>
    %c0_141 = arith.constant 0 : index
    %c0_142 = arith.constant 0 : index
    %235 = vector.load %arg16[%c0_141, %c0_142] : memref<64x1xf32, #tpu.memory_space<vmem>>, vector<64x1xf32>
    %c0_143 = arith.constant 0 : index
    %c0_144 = arith.constant 0 : index
    %236 = vector.load %arg17[%c0_143, %c0_144] : memref<64x1xf32, #tpu.memory_space<vmem>>, vector<64x1xf32>
    %cst_145 = arith.constant dense<0.000000e+00> : vector<64xf32>
    %237 = vector.multi_reduction <add>, %234, %cst_145 [1] : vector<64x18xf32> to vector<64xf32>
    %238 = vector.shape_cast %237 : vector<64xf32> to vector<64x1xf32>
    %cst_146 = arith.constant 1.800000e+01 : f32
    %239 = vector.broadcast %cst_146 : f32 to vector<64x1xf32>
    %240 = arith.divf %238, %239 : vector<64x1xf32>
    %241 = arith.mulf %234, %234 : vector<64x18xf32>
    %cst_147 = arith.constant dense<0.000000e+00> : vector<64xf32>
    %242 = vector.multi_reduction <add>, %241, %cst_147 [1] : vector<64x18xf32> to vector<64xf32>
    %243 = vector.shape_cast %242 : vector<64xf32> to vector<64x1xf32>
    %cst_148 = arith.constant 1.800000e+01 : f32
    %244 = vector.broadcast %cst_148 : f32 to vector<64x1xf32>
    %245 = arith.divf %243, %244 : vector<64x1xf32>
    %246 = arith.mulf %240, %240 : vector<64x1xf32>
    %247 = arith.subf %245, %246 : vector<64x1xf32>
    %248 = vector.broadcast %240 : vector<64x1xf32> to vector<64x18xf32>
    %249 = arith.subf %234, %248 : vector<64x18xf32>
    %cst_149 = arith.constant 9.99999974E-6 : f32
    %250 = vector.broadcast %cst_149 : f32 to vector<64x1xf32>
    %251 = arith.addf %247, %250 : vector<64x1xf32>
    %252 = math.rsqrt %251 : vector<64x1xf32>
    %253 = vector.broadcast %252 : vector<64x1xf32> to vector<64x18xf32>
    %254 = arith.mulf %249, %253 : vector<64x18xf32>
    %255 = vector.broadcast %235 : vector<64x1xf32> to vector<64x18xf32>
    %256 = arith.mulf %254, %255 : vector<64x18xf32>
    %257 = vector.broadcast %236 : vector<64x1xf32> to vector<64x18xf32>
    %258 = arith.addf %256, %257 : vector<64x18xf32>
    %cst_150 = arith.constant 0.000000e+00 : f32
    %259 = vector.broadcast %cst_150 : f32 to vector<64x18xf32>
    %260 = arith.cmpf oge, %258, %259 : vector<64x18xf32>
    %cst_151 = arith.constant 2.000000e-01 : f32
    %261 = vector.broadcast %cst_151 : f32 to vector<64x18xf32>
    %262 = arith.mulf %261, %258 : vector<64x18xf32>
    %263 = arith.select %260, %258, %262 : vector<64x18xi1>, vector<64x18xf32>
    %c0_152 = arith.constant 0 : index
    %c0_153 = arith.constant 0 : index
    %264 = vector.load %arg19[%c0_152, %c0_153] : memref<1x576xf32, #tpu.memory_space<vmem>>, vector<1x576xf32>
    %c0_154 = arith.constant 0 : index
    %c0_155 = arith.constant 0 : index
    %265 = vector.load %arg18[%c0_154, %c0_155] : memref<1x18xi32, #tpu.memory_space<vmem>>, vector<1x18xi32>
    %266 = tpu.iota {dimensions = array<i32: 0>} : vector<18x18xi32>
    %267 = vector.broadcast %265 : vector<1x18xi32> to vector<18x18xi32>
    %268 = arith.cmpi eq, %266, %267 : vector<18x18xi32>
    %269 = arith.extui %268 : vector<18x18xi1> to vector<18x18xi32>
    %270 = arith.sitofp %269 : vector<18x18xi32> to vector<18x18xf32>
    %cst_156 = arith.constant dense<0.000000e+00> : vector<64x18xf32>
    %271 = tpu.matmul %263, %270, %cst_156 {dimension_numbers = #tpu.dot_dimension_numbers<[1], [0], [0], [1], [0, 0, 1, 1], [], []>} : vector<64x18xf32>, vector<18x18xf32>, vector<64x18xf32> -> vector<64x18xf32>
    %272 = vector.extract_strided_slice %271 {offsets = [0, 0], sizes = [64, 2], strides = [1, 1]} : vector<64x18xf32> to vector<64x2xf32>
    %c0_157 = arith.constant 0 : index
    %c0_158 = arith.constant 0 : index
    %273 = vector.load %arg24[%c0_157, %c0_158] : memref<576x2xf32, #tpu.memory_space<vmem>>, vector<64x2xf32>
    tpu.vector_store %arg24[%c0_157, %c0_158], %272 {strides = array<i32>} : memref<576x2xf32, #tpu.memory_space<vmem>>, vector<64x2xf32>,
    %274 = vector.extract_strided_slice %271 {offsets = [0, 2], sizes = [64, 2], strides = [1, 1]} : vector<64x18xf32> to vector<64x2xf32>
    %c64_159 = arith.constant 64 : index
    %c0_160 = arith.constant 0 : index
    %275 = vector.load %arg24[%c64_159, %c0_160] : memref<576x2xf32, #tpu.memory_space<vmem>>, vector<64x2xf32>
    tpu.vector_store %arg24[%c64_159, %c0_160], %274 {strides = array<i32>} : memref<576x2xf32, #tpu.memory_space<vmem>>, vector<64x2xf32>,
    %276 = vector.extract_strided_slice %271 {offsets = [0, 4], sizes = [64, 2], strides = [1, 1]} : vector<64x18xf32> to vector<64x2xf32>
    %c128_161 = arith.constant 128 : index
    %c0_162 = arith.constant 0 : index
    %277 = vector.load %arg24[%c128_161, %c0_162] : memref<576x2xf32, #tpu.memory_space<vmem>>, vector<64x2xf32>
    tpu.vector_store %arg24[%c128_161, %c0_162], %276 {strides = array<i32>} : memref<576x2xf32, #tpu.memory_space<vmem>>, vector<64x2xf32>,
    %278 = vector.extract_strided_slice %271 {offsets = [0, 6], sizes = [64, 2], strides = [1, 1]} : vector<64x18xf32> to vector<64x2xf32>
    %c192_163 = arith.constant 192 : index
    %c0_164 = arith.constant 0 : index
    %279 = vector.load %arg24[%c192_163, %c0_164] : memref<576x2xf32, #tpu.memory_space<vmem>>, vector<64x2xf32>
    tpu.vector_store %arg24[%c192_163, %c0_164], %278 {strides = array<i32>} : memref<576x2xf32, #tpu.memory_space<vmem>>, vector<64x2xf32>,
    %280 = vector.extract_strided_slice %271 {offsets = [0, 8], sizes = [64, 2], strides = [1, 1]} : vector<64x18xf32> to vector<64x2xf32>
    %c256_165 = arith.constant 256 : index
    %c0_166 = arith.constant 0 : index
    %281 = vector.load %arg24[%c256_165, %c0_166] : memref<576x2xf32, #tpu.memory_space<vmem>>, vector<64x2xf32>
    tpu.vector_store %arg24[%c256_165, %c0_166], %280 {strides = array<i32>} : memref<576x2xf32, #tpu.memory_space<vmem>>, vector<64x2xf32>,
    %282 = vector.extract_strided_slice %271 {offsets = [0, 10], sizes = [64, 2], strides = [1, 1]} : vector<64x18xf32> to vector<64x2xf32>
    %c320_167 = arith.constant 320 : index
    %c0_168 = arith.constant 0 : index
    %283 = vector.load %arg24[%c320_167, %c0_168] : memref<576x2xf32, #tpu.memory_space<vmem>>, vector<64x2xf32>
    tpu.vector_store %arg24[%c320_167, %c0_168], %282 {strides = array<i32>} : memref<576x2xf32, #tpu.memory_space<vmem>>, vector<64x2xf32>,
    %284 = vector.extract_strided_slice %271 {offsets = [0, 12], sizes = [64, 2], strides = [1, 1]} : vector<64x18xf32> to vector<64x2xf32>
    %c384_169 = arith.constant 384 : index
    %c0_170 = arith.constant 0 : index
    %285 = vector.load %arg24[%c384_169, %c0_170] : memref<576x2xf32, #tpu.memory_space<vmem>>, vector<64x2xf32>
    tpu.vector_store %arg24[%c384_169, %c0_170], %284 {strides = array<i32>} : memref<576x2xf32, #tpu.memory_space<vmem>>, vector<64x2xf32>,
    %286 = vector.extract_strided_slice %271 {offsets = [0, 14], sizes = [64, 2], strides = [1, 1]} : vector<64x18xf32> to vector<64x2xf32>
    %c448 = arith.constant 448 : index
    %c0_171 = arith.constant 0 : index
    %287 = vector.load %arg24[%c448, %c0_171] : memref<576x2xf32, #tpu.memory_space<vmem>>, vector<64x2xf32>
    tpu.vector_store %arg24[%c448, %c0_171], %286 {strides = array<i32>} : memref<576x2xf32, #tpu.memory_space<vmem>>, vector<64x2xf32>,
    %288 = vector.extract_strided_slice %271 {offsets = [0, 16], sizes = [64, 2], strides = [1, 1]} : vector<64x18xf32> to vector<64x2xf32>
    %c512 = arith.constant 512 : index
    %c0_172 = arith.constant 0 : index
    %289 = vector.load %arg24[%c512, %c0_172] : memref<576x2xf32, #tpu.memory_space<vmem>>, vector<64x2xf32>
    tpu.vector_store %arg24[%c512, %c0_172], %288 {strides = array<i32>} : memref<576x2xf32, #tpu.memory_space<vmem>>, vector<64x2xf32>,
    %c0_173 = arith.constant 0 : index
    %c0_174 = arith.constant 0 : index
    %290 = vector.load %arg24[%c0_173, %c0_174] : memref<576x2xf32, #tpu.memory_space<vmem>>, vector<576x2xf32>
    %cst_175 = arith.constant dense<0.000000e+00> : vector<1x2xf32>
    %291 = tpu.matmul %264, %290, %cst_175 {dimension_numbers = #tpu.dot_dimension_numbers<[1], [0], [0], [1], [0, 0, 1, 1], [], []>} : vector<1x576xf32>, vector<576x2xf32>, vector<1x2xf32> -> vector<1x2xf32>
    %292 = math.tanh %291 : vector<1x2xf32>
    %293 = arith.subf %291, %292 : vector<1x2xf32>
    %c0_176 = arith.constant 0 : index
    %c0_177 = arith.constant 0 : index
    %294 = vector.load %arg20[%c0_176, %c0_177] : memref<1x2xf32, #tpu.memory_space<vmem>>, vector<1x2xf32>
    tpu.vector_store %arg20[%c0_176, %c0_177], %293 {strides = array<i32>} : memref<1x2xf32, #tpu.memory_space<vmem>>, vector<1x2xf32>,
    return
  }
  func.func @transform_0(%arg0: i32) -> (i32, i32) {
    %c0_i32 = arith.constant 0 : i32
    %c0_i32_0 = arith.constant 0 : i32
    %c0_i32_1 = arith.constant 0 : i32
    return %c0_i32, %c0_i32_0 : i32, i32
  }
  func.func @transform_1(%arg0: i32) -> (i32, i32) {
    %c0_i32 = arith.constant 0 : i32
    %c0_i32_0 = arith.constant 0 : i32
    %c0_i32_1 = arith.constant 0 : i32
    return %c0_i32, %c0_i32_0 : i32, i32
  }
  func.func @transform_2(%arg0: i32) -> (i32, i32) {
    %c0_i32 = arith.constant 0 : i32
    %c0_i32_0 = arith.constant 0 : i32
    %c0_i32_1 = arith.constant 0 : i32
    return %c0_i32, %c0_i32_0 : i32, i32
  }
  func.func @transform_3(%arg0: i32) -> (i32, i32) {
    %c0_i32 = arith.constant 0 : i32
    %c0_i32_0 = arith.constant 0 : i32
    %c0_i32_1 = arith.constant 0 : i32
    return %c0_i32, %c0_i32_0 : i32, i32
  }
  func.func @transform_4(%arg0: i32) -> (i32, i32) {
    %c0_i32 = arith.constant 0 : i32
    %c0_i32_0 = arith.constant 0 : i32
    %c0_i32_1 = arith.constant 0 : i32
    return %c0_i32, %c0_i32_0 : i32, i32
  }
  func.func @transform_5(%arg0: i32) -> (i32, i32) {
    %c0_i32 = arith.constant 0 : i32
    %c0_i32_0 = arith.constant 0 : i32
    %c0_i32_1 = arith.constant 0 : i32
    return %c0_i32, %c0_i32_0 : i32, i32
  }
  func.func @transform_6(%arg0: i32) -> (i32, i32) {
    %c0_i32 = arith.constant 0 : i32
    %c0_i32_0 = arith.constant 0 : i32
    %c0_i32_1 = arith.constant 0 : i32
    return %c0_i32, %c0_i32_0 : i32, i32
  }
  func.func @transform_7(%arg0: i32) -> (i32, i32) {
    %c0_i32 = arith.constant 0 : i32
    %c0_i32_0 = arith.constant 0 : i32
    %c0_i32_1 = arith.constant 0 : i32
    return %c0_i32, %c0_i32_0 : i32, i32
  }
  func.func @transform_8(%arg0: i32) -> (i32, i32) {
    %c0_i32 = arith.constant 0 : i32
    %c0_i32_0 = arith.constant 0 : i32
    %c0_i32_1 = arith.constant 0 : i32
    return %c0_i32, %c0_i32_0 : i32, i32
  }
  func.func @transform_9(%arg0: i32) -> (i32, i32) {
    %c0_i32 = arith.constant 0 : i32
    %c0_i32_0 = arith.constant 0 : i32
    %c0_i32_1 = arith.constant 0 : i32
    return %c0_i32, %c0_i32_0 : i32, i32
  }
  func.func @transform_10(%arg0: i32) -> (i32, i32) {
    %c0_i32 = arith.constant 0 : i32
    %c0_i32_0 = arith.constant 0 : i32
    %c0_i32_1 = arith.constant 0 : i32
    return %c0_i32, %c0_i32_0 : i32, i32
  }
  func.func @transform_11(%arg0: i32) -> (i32, i32) {
    %c0_i32 = arith.constant 0 : i32
    %c0_i32_0 = arith.constant 0 : i32
    %c0_i32_1 = arith.constant 0 : i32
    return %c0_i32, %c0_i32_0 : i32, i32
  }
  func.func @transform_12(%arg0: i32) -> (i32, i32) {
    %c0_i32 = arith.constant 0 : i32
    %c0_i32_0 = arith.constant 0 : i32
    %c0_i32_1 = arith.constant 0 : i32
    return %c0_i32, %c0_i32_0 : i32, i32
  }
  func.func @transform_13(%arg0: i32) -> (i32, i32) {
    %c0_i32 = arith.constant 0 : i32
    %c0_i32_0 = arith.constant 0 : i32
    %c0_i32_1 = arith.constant 0 : i32
    return %c0_i32, %c0_i32_0 : i32, i32
  }
  func.func @transform_14(%arg0: i32) -> (i32, i32) {
    %c0_i32 = arith.constant 0 : i32
    %c0_i32_0 = arith.constant 0 : i32
    %c0_i32_1 = arith.constant 0 : i32
    return %c0_i32, %c0_i32_0 : i32, i32
  }
  func.func @transform_15(%arg0: i32) -> (i32, i32) {
    %c0_i32 = arith.constant 0 : i32
    %c0_i32_0 = arith.constant 0 : i32
    %c0_i32_1 = arith.constant 0 : i32
    return %c0_i32, %c0_i32_0 : i32, i32
  }
  func.func @transform_16(%arg0: i32) -> (i32, i32) {
    %c0_i32 = arith.constant 0 : i32
    %c0_i32_0 = arith.constant 0 : i32
    %c0_i32_1 = arith.constant 0 : i32
    return %c0_i32, %c0_i32_0 : i32, i32
  }
  func.func @transform_17(%arg0: i32) -> (i32, i32) {
    %c0_i32 = arith.constant 0 : i32
    %c0_i32_0 = arith.constant 0 : i32
    %c0_i32_1 = arith.constant 0 : i32
    return %c0_i32, %c0_i32_0 : i32, i32
  }
  func.func @transform_18(%arg0: i32) -> (i32, i32) {
    %c0_i32 = arith.constant 0 : i32
    %c0_i32_0 = arith.constant 0 : i32
    %c0_i32_1 = arith.constant 0 : i32
    return %c0_i32, %c0_i32_0 : i32, i32
  }
  func.func @transform_19(%arg0: i32) -> (i32, i32) {
    %c0_i32 = arith.constant 0 : i32
    %c0_i32_0 = arith.constant 0 : i32
    %c0_i32_1 = arith.constant 0 : i32
    return %c0_i32, %c0_i32_0 : i32, i32
  }
}

</mosaic_0001>

<bundles_post_ra>
// kernel: discriminator_forward.1
= control target key start
LH: loop header
LB: loop body
LE: loop exit
PB: predicated region body
PF: predicated region fallthrough
CT: control target
= control target key end

     0   :  { %s14825_s0 = inlined_call_operand.vmem [shape: f32[75,6050], index: 0, kind: input, shape index: {}]   ;;  %s14826_s1 = inlined_call_operand.vmem [shape: f32[1,6050], index: 1, kind: input, shape index: {}]   ;;  %s14827_s2 = inlined_call_operand.vmem [shape: f32[1,6050], index: 2, kind: input, shape index: {}]   ;;  %s14828_s3 = inlined_call_operand.vmem [shape: f32[8,75], index: 3, kind: input, shape index: {}]   ;;  %s14829_s4 = inlined_call_operand.vmem [shape: f32[8,1], index: 4, kind: input, shape index: {}]   ;;  %s14830_s5 = inlined_call_operand.vmem [shape: f32[8,1], index: 5, kind: input, shape index: {}]   ;;  %s14831_s6 = inlined_call_operand.vmem [shape: f32[16,200], index: 6, kind: input, shape index: {}]   ;;  %s14832_s7 = inlined_call_operand.vmem [shape: f32[16,1], index: 7, kind: input, shape index: {}]   ;;  %s14833_s8 = inlined_call_operand.vmem [shape: f32[16,1], index: 8, kind: input, shape index: {}]   ;;  %s14834_s9 = inlined_call_operand.vmem [shape: s32[1,1250], index: 9, kind: input, shape index: {}]   ;;  %s14835_s10 = inlined_call_operand.vmem [shape: f32[32,400], index: 10, kind: input, shape index: {}]   ;;  %s14836_s11 = inlined_call_operand.vmem [shape: f32[32,1], index: 11, kind: input, shape index: {}]   ;;  %s14837_s12 = inlined_call_operand.vmem [shape: f32[32,1], index: 12, kind: input, shape index: {}]   ;;  %s14838_s13 = inlined_call_operand.vmem [shape: s32[1,162], index: 13, kind: input, shape index: {}]   ;;  %s14839_s14 = inlined_call_operand.vmem [shape: f32[64,288], index: 14, kind: input, shape index: {}]   ;;  %s14840_s15 = inlined_call_operand.vmem [shape: f32[64,1], index: 15, kind: input, shape index: {}]   ;;  %s14841_s16 = inlined_call_operand.vmem [shape: f32[64,1], index: 16, kind: input, shape index: {}]   ;;  %s14842_s17 = inlined_call_operand.vmem [shape: s32[1,18], index: 17, kind: input, shape index: {}]   ;;  %s14843_s18 = inlined_call_operand.vmem [shape: f32[1,576], index: 18, kind: input, shape index: {}]   ;;  %s14844_s19 = inlined_call_operand.hbm [shape: f32[1,2], index: 19, kind: output, shape index: {}]  }
   0x1   :  { %14891 = sst [smem:[#allocation27_spill]] %s14825_s0 }
   0x2   :  { %14892 = sst [smem:[#allocation28_spill]] %s14826_s1 }
   0x3   :  { %14893 = sst [smem:[#allocation29_spill]] %s14827_s2 }
   0x4   :  { %14894 = sst [smem:[#allocation30_spill]] %s14828_s3 }
   0x5   :  { %s14895_s20 = sld [smem:[#allocation27_spill]]  ;;  %v14849_v7 = vmov 0.0   ;;  %vm548_vm0 = vcmask 1042432   ;;  %vm10010_vm1 = vmmov 1   ;;  %s14898_s22 = sld [smem:[#allocation30_spill]]  ;;  %vm544_vm3 = vcmask 613376  }
   0x6   :  { %757 = vmatprep.mubr.f32.mxu0 %v14849_v7  ;;  %828 = vmatprep.mubr.f32.mxu1 %v14849_v7  ;;  %vm10274_vm2 = vmpackc.low %vm548_vm0, %vm10010_vm1 }
   0xb   :  { %v65_v0 = vld [vmem:[%s14895_s20 + $0x8] sm:$0xff]  ;;  %v64_v2 = vld [vmem:[%s14895_s20] sm:$0xff]  ;;  %v67_v5 = vld [vmem:[%s14895_s20 + $0x18] sm:$0xff] }
   0xc   :  { %v113_v1 = vld [vmem:[%s14895_s20 + $0x188] sm:$0xff]  ;;  %v112_v4 = vld [vmem:[%s14895_s20 + $0x180] sm:$0xff]  ;;  %v115_v6 = vld [vmem:[%s14895_s20 + $0x198] sm:$0xff] }
   0xd   :  { %v8834_v3 = vpack.c.bf16 %v113_v1, %v65_v0  ;;  %v8836_v8 = vpack.c.bf16 %v112_v4, %v64_v2  ;;  %v8856_v9 = vpack.c.bf16 %v115_v6, %v67_v5  ;;  %v161_v10 = vld [vmem:[%s14895_s20 + $0x308] sm:$0xff]  ;;  %v66_v12 = vld [vmem:[%s14895_s20 + $0x10] sm:$0xff]  ;;  %v160_v15 = vld [vmem:[%s14895_s20 + $0x300] sm:$0xff] }
   0xe   :  { %v209_v11 = vld [vmem:[%s14895_s20 + $0x488] sm:$0xff]  ;;  %v114_v14 = vld [vmem:[%s14895_s20 + $0x190] sm:$0xff]  ;;  %v208_v16 = vld [vmem:[%s14895_s20 + $0x480] sm:$0xff] }
   0xf   :  { %8835 = vmatprep.subr.bf16.mxu0 %v8834_v3  ;;  %v8838_v13 = vpack.c.bf16 %v209_v11, %v161_v10  ;;  %8857 = vmatprep.subr.bf16.mxu1 %v8856_v9  ;;  %v8858_v17 = vpack.c.bf16 %v114_v14, %v66_v12  ;;  %v8840_v18 = vpack.c.bf16 %v208_v16, %v160_v15  ;;  %v163_v19 = vld [vmem:[%s14895_s20 + $0x318] sm:$0xff]  ;;  %v257_v21 = vld [vmem:[%s14895_s20 + $0x608] sm:$0xff]  ;;  %v162_v24 = vld [vmem:[%s14895_s20 + $0x310] sm:$0xff] }
  0x10   :  { %8837 = vmatpush1.bf16.msra.mxu0 %v8836_v8  ;;  %v211_v20 = vld [vmem:[%s14895_s20 + $0x498] sm:$0xff]  ;;  %v305_v23 = vld [vmem:[%s14895_s20 + $0x788] sm:$0xff]  ;;  %v210_v25 = vld [vmem:[%s14895_s20 + $0x490] sm:$0xff] }
  0x11   :  { %8839 = vmatprep.subr.bf16.mxu0 %v8838_v13  ;;  %v8860_v22 = vpack.c.bf16 %v211_v20, %v163_v19  ;;  %8859 = vmatpush1.bf16.msra.mxu1 %v8858_v17  ;;  %v8842_v26 = vpack.c.bf16 %v305_v23, %v257_v21  ;;  %v8862_v27 = vpack.c.bf16 %v210_v25, %v162_v24  ;;  %v256_v28 = vld [vmem:[%s14895_s20 + $0x600] sm:$0xff]  ;;  %v259_v30 = vld [vmem:[%s14895_s20 + $0x618] sm:$0xff]  ;;  %v353_v32 = vld [vmem:[%s14895_s20 + $0x908] sm:$0xff] }
  0x12   :  { %v304_v29 = vld [vmem:[%s14895_s20 + $0x780] sm:$0xff]  ;;  %v307_v31 = vld [vmem:[%s14895_s20 + $0x798] sm:$0xff]  ;;  %v401_v33 = vld [vmem:[%s14895_s20 + $0xa88] sm:$0xff] }
  0x13   :  { %8861 = vmatprep.subr.bf16.mxu1 %v8860_v22  ;;  %v8844_v34 = vpack.c.bf16 %v304_v29, %v256_v28  ;;  %v8864_v35 = vpack.c.bf16 %v307_v31, %v259_v30  ;;  %v258_v36 = vld [vmem:[%s14895_s20 + $0x610] sm:$0xff]  ;;  %v352_v38 = vld [vmem:[%s14895_s20 + $0x900] sm:$0xff]  ;;  %v8846_v39 = vpack.c.bf16 %v401_v33, %v353_v32  ;;  %v355_v41 = vld [vmem:[%s14895_s20 + $0x918] sm:$0xff] }
  0x14   :  { %8841 = vmatpush1.bf16.msra.mxu0 %v8840_v18  ;;  %v306_v37 = vld [vmem:[%s14895_s20 + $0x790] sm:$0xff]  ;;  %v400_v40 = vld [vmem:[%s14895_s20 + $0xa80] sm:$0xff]  ;;  %v403_v42 = vld [vmem:[%s14895_s20 + $0xa98] sm:$0xff] }
  0x15   :  { %8843 = vmatprep.subr.bf16.mxu0 %v8842_v26  ;;  %8863 = vmatpush1.bf16.msra.mxu1 %v8862_v27  ;;  %v8866_v43 = vpack.c.bf16 %v306_v37, %v258_v36  ;;  %v449_v44 = vld [vmem:[%s14895_s20 + $0xc08] sm:$0xff]  ;;  %v8868_v46 = vpack.c.bf16 %v403_v42, %v355_v41  ;;  %v354_v47 = vld [vmem:[%s14895_s20 + $0x910] sm:$0xff]  ;;  %v8848_v49 = vpack.c.bf16 %v400_v40, %v352_v38  ;;  %v451_v50 = vld [vmem:[%s14895_s20 + $0xc18] sm:$0xff] }
  0x16   :  { %v497_v45 = vld [vmem:[%s14895_s20 + $0xd88] sm:$0x7]  ;;  %8865 = vmatprep.subr.bf16.mxu1 %v8864_v35  ;;  %v402_v48 = vld [vmem:[%s14895_s20 + $0xa90] sm:$0xff]  ;;  %v499_v51 = vld [vmem:[%s14895_s20 + $0xd98] sm:$0x7] }
  0x17   :  { %v8850_v52 = vpack.c.bf16 %v497_v45, %v449_v44  ;;  %v448_v53 = vld [vmem:[%s14895_s20 + $0xc00] sm:$0xff]  ;;  %v8870_v56 = vpack.c.bf16 %v402_v48, %v354_v47  ;;  %v69_v57 = vld [vmem:[%s14895_s20 + $0x28] sm:$0xff]  ;;  %v8872_v59 = vpack.c.bf16 %v499_v51, %v451_v50  ;;  %v450_v60 = vld [vmem:[%s14895_s20 + $0xc10] sm:$0xff] }
  0x18   :  { %8845 = vmatpush1.bf16.msra.mxu0 %v8844_v34  ;;  %v496_v54 = vld [vmem:[%s14895_s20 + $0xd80] sm:$0x7]  ;;  %v117_v58 = vld [vmem:[%s14895_s20 + $0x1a8] sm:$0xff]  ;;  %v498_v61 = vld [vmem:[%s14895_s20 + $0xd90] sm:$0x7] }
  0x19   :  { %8847 = vmatprep.subr.bf16.mxu0 %v8846_v39  ;;  %8867 = vmatpush1.bf16.msra.mxu1 %v8866_v43  ;;  %v8853_v62 = vpack.c.bf16 %v496_v54, %v448_v53  ;;  %v71_v63 = vld [vmem:[%s14895_s20 + $0x38] sm:$0xff]  ;;  %v8878_v1 = vpack.c.bf16 %v117_v58, %v69_v57  ;;  %v68_v2 = vld [vmem:[%s14895_s20 + $0x20] sm:$0xff]  ;;  %v8875_v4 = vpack.c.bf16 %v498_v61, %v450_v60  ;;  %v165_v5 = vld [vmem:[%s14895_s20 + $0x328] sm:$0xff] }
  0x1a   :  { %8869 = vmatprep.subr.bf16.mxu1 %v8868_v46  ;;  %v119_v0 = vld [vmem:[%s14895_s20 + $0x1b8] sm:$0xff]  ;;  %v116_v3 = vld [vmem:[%s14895_s20 + $0x1a0] sm:$0xff]  ;;  %v213_v6 = vld [vmem:[%s14895_s20 + $0x4a8] sm:$0xff] }
  0x1b   :  { %v8900_v8 = vpack.c.bf16 %v119_v0, %v71_v63  ;;  %v70_v9 = vld [vmem:[%s14895_s20 + $0x30] sm:$0xff]  ;;  %v10323_v11 = vld [vmem:[%s14898_s22] sm:$0xff]  ;;  %v8880_v12 = vpack.c.bf16 %v116_v3, %v68_v2  ;;  %v167_v13 = vld [vmem:[%s14895_s20 + $0x338] sm:$0xff]  ;;  %v8882_v15 = vpack.c.bf16 %v213_v6, %v165_v5 }
  0x1c   :  { %8849 = vmatpush1.bf16.msra.mxu0 %v8848_v49  ;;  %v118_v10 = vld [vmem:[%s14895_s20 + $0x1b0] sm:$0xff]  ;;  %v215_v14 = vld [vmem:[%s14895_s20 + $0x4b8] sm:$0xff]  ;;  %v164_v16 = vld [vmem:[%s14895_s20 + $0x320] sm:$0xff] }
  0x1d   :  { %8852 = vmatprep.subr.msk.bf16.mxu0 %vm10274_vm2, %v8850_v52  ;;  %8871 = vmatpush1.bf16.msra.mxu1 %v8870_v56  ;;  %v212_v17 = vld [vmem:[%s14895_s20 + $0x4a0] sm:$0xff]  ;;  %v8902_v18 = vpack.c.bf16 %v118_v10, %v70_v9  ;;  %v261_v19 = vld [vmem:[%s14895_s20 + $0x628] sm:$0xff]  ;;  %v8904_v21 = vpack.c.bf16 %v215_v14, %v167_v13  ;;  %v166_v22 = vld [vmem:[%s14895_s20 + $0x330] sm:$0xff] }
  0x1e   :  { %8874 = vmatprep.subr.msk.bf16.mxu1 %vm10274_vm2, %v8872_v59  ;;  %v309_v20 = vld [vmem:[%s14895_s20 + $0x7a8] sm:$0xff]  ;;  %v214_v23 = vld [vmem:[%s14895_s20 + $0x4b0] sm:$0xff]  ;;  %v8884_v24 = vpack.c.bf16 %v212_v17, %v164_v16  ;;  %v263_v25 = vld [vmem:[%s14895_s20 + $0x638] sm:$0xff] }
  0x1f   :  { %v311_v26 = vld [vmem:[%s14895_s20 + $0x7b8] sm:$0xff]  ;;  %v8886_v27 = vpack.c.bf16 %v309_v20, %v261_v19  ;;  %v260_v28 = vld [vmem:[%s14895_s20 + $0x620] sm:$0xff]  ;;  %v8906_v30 = vpack.c.bf16 %v214_v23, %v166_v22  ;;  %v357_v31 = vld [vmem:[%s14895_s20 + $0x928] sm:$0xff] }
  0x20   :  { %8855 = vmatpush1.bf16.msk.msra.mxu0 %vm10274_vm2, %v8853_v62  ;;  %v308_v29 = vld [vmem:[%s14895_s20 + $0x7a0] sm:$0xff]  ;;  %v405_v32 = vld [vmem:[%s14895_s20 + $0xaa8] sm:$0xff]  ;;  %v8908_v33 = vpack.c.bf16 %v311_v26, %v263_v25  ;;  %v262_v34 = vld [vmem:[%s14895_s20 + $0x630] sm:$0xff] }
  0x21   :  { %8879 = vmatprep.subr.bf16.mxu0 %v8878_v1  ;;  %8877 = vmatpush1.bf16.msk.msra.mxu1 %vm10274_vm2, %v8875_v4  ;;  %v310_v35 = vld [vmem:[%s14895_s20 + $0x7b0] sm:$0xff]  ;;  %v8888_v36 = vpack.c.bf16 %v308_v29, %v260_v28  ;;  %v359_v37 = vld [vmem:[%s14895_s20 + $0x938] sm:$0xff]  ;;  %v8890_v39 = vpack.c.bf16 %v405_v32, %v357_v31  ;;  %v356_v40 = vld [vmem:[%s14895_s20 + $0x920] sm:$0xff] }
  0x22   :  { %8901 = vmatprep.subr.bf16.mxu1 %v8900_v8  ;;  %v407_v38 = vld [vmem:[%s14895_s20 + $0xab8] sm:$0xff]  ;;  %v404_v41 = vld [vmem:[%s14895_s20 + $0xaa0] sm:$0xff]  ;;  %v8910_v42 = vpack.c.bf16 %v310_v35, %v262_v34  ;;  %v453_v43 = vld [vmem:[%s14895_s20 + $0xc28] sm:$0xff] }
  0x23   :  { %7813 = vmatmul.mubr.msk.f32.vlgmr.msra.gmra.mrb[0].mxu0 %vm544_vm3, %v10323_v11  ;;  %v501_v44 = vld [vmem:[%s14895_s20 + $0xda8] sm:$0x7]  ;;  %v8912_v45 = vpack.c.bf16 %v407_v38, %v359_v37  ;;  %v358_v46 = vld [vmem:[%s14895_s20 + $0x930] sm:$0xff]  ;;  %v8892_v48 = vpack.c.bf16 %v404_v41, %v356_v40  ;;  %v455_v49 = vld [vmem:[%s14895_s20 + $0xc38] sm:$0xff] }
  0x24   :  { %8881 = vmatpush1.bf16.msra.mxu0 %v8880_v12  ;;  %899 = vmatprep.mubr.f32.mxu0 %v14849_v7  ;;  %v406_v47 = vld [vmem:[%s14895_s20 + $0xab0] sm:$0xff]  ;;  %v503_v50 = vld [vmem:[%s14895_s20 + $0xdb8] sm:$0x7]  ;;  %v8894_v51 = vpack.c.bf16 %v501_v44, %v453_v43  ;;  %v452_v52 = vld [vmem:[%s14895_s20 + $0xc20] sm:$0xff] }
  0x25   :  { %7816 = vmatmul.mubr.msk.f32.vlgmr.msra.gmra.mrb[0].mxu1 %vm544_vm3, %v10323_v11  ;;  %8883 = vmatprep.subr.bf16.mxu0 %v8882_v15  ;;  %v500_v53 = vld [vmem:[%s14895_s20 + $0xda0] sm:$0x7]  ;;  %v8914_v54 = vpack.c.bf16 %v406_v47, %v358_v46  ;;  %v73_v56 = vld [vmem:[%s14895_s20 + $0x48] sm:$0xff]  ;;  %v8916_v58 = vpack.c.bf16 %v503_v50, %v455_v49  ;;  %v454_v59 = vld [vmem:[%s14895_s20 + $0xc30] sm:$0xff] }
  0x26   :  { %8903 = vmatpush1.bf16.msra.mxu1 %v8902_v18  ;;  %970 = vmatprep.mubr.f32.mxu1 %v14849_v7  ;;  %v121_v57 = vld [vmem:[%s14895_s20 + $0x1c8] sm:$0xff]  ;;  %v502_v60 = vld [vmem:[%s14895_s20 + $0xdb0] sm:$0x7]  ;;  %v8897_v61 = vpack.c.bf16 %v500_v53, %v452_v52  ;;  %v75_v62 = vld [vmem:[%s14895_s20 + $0x58] sm:$0xff] }
  0x27   :  { %8905 = vmatprep.subr.bf16.mxu1 %v8904_v21  ;;  %v123_v63 = vld [vmem:[%s14895_s20 + $0x1d8] sm:$0xff]  ;;  %v8922_v0 = vpack.c.bf16 %v121_v57, %v73_v56  ;;  %v72_v1 = vld [vmem:[%s14895_s20 + $0x40] sm:$0xff]  ;;  %v8919_v3 = vpack.c.bf16 %v502_v60, %v454_v59  ;;  %v169_v4 = vld [vmem:[%s14895_s20 + $0x348] sm:$0xff] }
  0x28   :  { %8885 = vmatpush1.bf16.msra.mxu0 %v8884_v24  ;;  %v120_v2 = vld [vmem:[%s14895_s20 + $0x1c0] sm:$0xff]  ;;  %v217_v5 = vld [vmem:[%s14895_s20 + $0x4c8] sm:$0xff]  ;;  %v8944_v6 = vpack.c.bf16 %v123_v63, %v75_v62  ;;  %v74_v8 = vld [vmem:[%s14895_s20 + $0x50] sm:$0xff] }
  0x29   :  { %8887 = vmatprep.subr.bf16.mxu0 %v8886_v27  ;;  %v122_v9 = vld [vmem:[%s14895_s20 + $0x1d0] sm:$0xff]  ;;  %v8924_v10 = vpack.c.bf16 %v120_v2, %v72_v1  ;;  %v171_v12 = vld [vmem:[%s14895_s20 + $0x358] sm:$0xff]  ;;  %v8926_v14 = vpack.c.bf16 %v217_v5, %v169_v4  ;;  %v168_v15 = vld [vmem:[%s14895_s20 + $0x340] sm:$0xff] }
  0x2a   :  { %8907 = vmatpush1.bf16.msra.mxu1 %v8906_v30  ;;  %v219_v13 = vld [vmem:[%s14895_s20 + $0x4d8] sm:$0xff]  ;;  %v216_v16 = vld [vmem:[%s14895_s20 + $0x4c0] sm:$0xff]  ;;  %v8946_v17 = vpack.c.bf16 %v122_v9, %v74_v8  ;;  %v265_v18 = vld [vmem:[%s14895_s20 + $0x648] sm:$0xff] }
  0x2b   :  { %8909 = vmatprep.subr.bf16.mxu1 %v8908_v33  ;;  %v313_v19 = vld [vmem:[%s14895_s20 + $0x7c8] sm:$0xff]  ;;  %v8948_v20 = vpack.c.bf16 %v219_v13, %v171_v12  ;;  %v170_v21 = vld [vmem:[%s14895_s20 + $0x350] sm:$0xff]  ;;  %v8928_v23 = vpack.c.bf16 %v216_v16, %v168_v15  ;;  %v267_v24 = vld [vmem:[%s14895_s20 + $0x658] sm:$0xff] }
  0x2c   :  { %8889 = vmatpush1.bf16.msra.mxu0 %v8888_v36  ;;  %v218_v22 = vld [vmem:[%s14895_s20 + $0x4d0] sm:$0xff]  ;;  %v315_v25 = vld [vmem:[%s14895_s20 + $0x7d8] sm:$0xff]  ;;  %v8930_v26 = vpack.c.bf16 %v313_v19, %v265_v18  ;;  %v264_v27 = vld [vmem:[%s14895_s20 + $0x640] sm:$0xff] }
  0x2d   :  { %8891 = vmatprep.subr.bf16.mxu0 %v8890_v39  ;;  %v312_v28 = vld [vmem:[%s14895_s20 + $0x7c0] sm:$0xff]  ;;  %v8950_v29 = vpack.c.bf16 %v218_v22, %v170_v21  ;;  %v361_v30 = vld [vmem:[%s14895_s20 + $0x948] sm:$0xff]  ;;  %v8952_v32 = vpack.c.bf16 %v315_v25, %v267_v24  ;;  %v266_v33 = vld [vmem:[%s14895_s20 + $0x650] sm:$0xff] }
  0x2e   :  { %8911 = vmatpush1.bf16.msra.mxu1 %v8910_v42  ;;  %v409_v31 = vld [vmem:[%s14895_s20 + $0xac8] sm:$0xff]  ;;  %v314_v34 = vld [vmem:[%s14895_s20 + $0x7d0] sm:$0xff]  ;;  %v8932_v35 = vpack.c.bf16 %v312_v28, %v264_v27  ;;  %v363_v36 = vld [vmem:[%s14895_s20 + $0x958] sm:$0xff] }
  0x2f   :  { %8913 = vmatprep.subr.bf16.mxu1 %v8912_v45  ;;  %v411_v37 = vld [vmem:[%s14895_s20 + $0xad8] sm:$0xff]  ;;  %v8934_v38 = vpack.c.bf16 %v409_v31, %v361_v30  ;;  %v360_v39 = vld [vmem:[%s14895_s20 + $0x940] sm:$0xff]  ;;  %v8954_v41 = vpack.c.bf16 %v314_v34, %v266_v33  ;;  %v457_v42 = vld [vmem:[%s14895_s20 + $0xc48] sm:$0xff] }
  0x30   :  { %8893 = vmatpush1.bf16.msra.mxu0 %v8892_v48  ;;  %v408_v40 = vld [vmem:[%s14895_s20 + $0xac0] sm:$0xff]  ;;  %v505_v43 = vld [vmem:[%s14895_s20 + $0xdc8] sm:$0x7]  ;;  %v8956_v44 = vpack.c.bf16 %v411_v37, %v363_v36  ;;  %v362_v45 = vld [vmem:[%s14895_s20 + $0x950] sm:$0xff] }
  0x31   :  { %8896 = vmatprep.subr.msk.bf16.mxu0 %vm10274_vm2, %v8894_v51  ;;  %v410_v46 = vld [vmem:[%s14895_s20 + $0xad0] sm:$0xff]  ;;  %v8936_v47 = vpack.c.bf16 %v408_v40, %v360_v39  ;;  %v459_v48 = vld [vmem:[%s14895_s20 + $0xc58] sm:$0xff]  ;;  %v8938_v50 = vpack.c.bf16 %v505_v43, %v457_v42  ;;  %v456_v51 = vld [vmem:[%s14895_s20 + $0xc40] sm:$0xff] }
  0x32   :  { %8915 = vmatpush1.bf16.msra.mxu1 %v8914_v54  ;;  %v507_v49 = vld [vmem:[%s14895_s20 + $0xdd8] sm:$0x7]  ;;  %v504_v52 = vld [vmem:[%s14895_s20 + $0xdc0] sm:$0x7]  ;;  %v8958_v53 = vpack.c.bf16 %v410_v46, %v362_v45  ;;  %v77_v54 = vld [vmem:[%s14895_s20 + $0x68] sm:$0xff] }
  0x33   :  { %8918 = vmatprep.subr.msk.bf16.mxu1 %vm10274_vm2, %v8916_v58  ;;  %v125_v56 = vld [vmem:[%s14895_s20 + $0x1e8] sm:$0xff]  ;;  %v8960_v57 = vpack.c.bf16 %v507_v49, %v459_v48  ;;  %v458_v58 = vld [vmem:[%s14895_s20 + $0xc50] sm:$0xff]  ;;  %v8941_v60 = vpack.c.bf16 %v504_v52, %v456_v51  ;;  %v127_v62 = vld [vmem:[%s14895_s20 + $0x1f8] sm:$0xff] }
  0x34   :  { %8899 = vmatpush1.bf16.msk.msra.mxu0 %vm10274_vm2, %v8897_v61  ;;  %v506_v59 = vld [vmem:[%s14895_s20 + $0xdd0] sm:$0x7]  ;;  %v79_v61 = vld [vmem:[%s14895_s20 + $0x78] sm:$0xff]  ;;  %v8966_v63 = vpack.c.bf16 %v125_v56, %v77_v54  ;;  %v124_v1 = vld [vmem:[%s14895_s20 + $0x1e0] sm:$0xff] }
  0x35   :  { %8923 = vmatprep.subr.bf16.mxu0 %v8922_v0  ;;  %v76_v0 = vld [vmem:[%s14895_s20 + $0x60] sm:$0xff]  ;;  %v8963_v2 = vpack.c.bf16 %v506_v59, %v458_v58  ;;  %v221_v4 = vld [vmem:[%s14895_s20 + $0x4e8] sm:$0xff]  ;;  %v8988_v5 = vpack.c.bf16 %v127_v62, %v79_v61  ;;  %v126_v8 = vld [vmem:[%s14895_s20 + $0x1f0] sm:$0xff] }
  0x36   :  { %8921 = vmatpush1.bf16.msk.msra.mxu1 %vm10274_vm2, %v8919_v3  ;;  %v173_v3 = vld [vmem:[%s14895_s20 + $0x368] sm:$0xff]  ;;  %v8968_v9 = vpack.c.bf16 %v124_v1, %v76_v0  ;;  %v223_v12 = vld [vmem:[%s14895_s20 + $0x4f8] sm:$0xff]  ;;  %v220_v15 = vld [vmem:[%s14895_s20 + $0x4e0] sm:$0xff] }
  0x37   :  { %7819 = vmatmul.mubr.msk.f32.vlgmr.msra.gmra.mrb[2].mxu0 %vm544_vm3, %v10323_v11  ;;  %8945 = vmatprep.subr.bf16.mxu1 %v8944_v6  ;;  %v78_v6 = vld [vmem:[%s14895_s20 + $0x70] sm:$0xff]  ;;  %v8970_v13 = vpack.c.bf16 %v221_v4, %v173_v3  ;;  %v317_v18 = vld [vmem:[%s14895_s20 + $0x7e8] sm:$0xff]  ;;  %v319_v24 = vld [vmem:[%s14895_s20 + $0x7f8] sm:$0xff] }
  0x38   :  { %8925 = vmatpush1.bf16.msra.mxu0 %v8924_v10  ;;  %1041 = vmatprep.mubr.f32.mxu0 %v14849_v7  ;;  %v175_v10 = vld [vmem:[%s14895_s20 + $0x378] sm:$0xff]  ;;  %v8990_v16 = vpack.c.bf16 %v126_v8, %v78_v6  ;;  %v222_v21 = vld [vmem:[%s14895_s20 + $0x4f0] sm:$0xff]  ;;  %v316_v27 = vld [vmem:[%s14895_s20 + $0x7e0] sm:$0xff] }
  0x39   :  { %7822 = vmatmul.mubr.msk.f32.vlgmr.msra.gmra.mrb[2].mxu1 %vm544_vm3, %v10323_v11  ;;  %8927 = vmatprep.subr.bf16.mxu0 %v8926_v14  ;;  %v172_v14 = vld [vmem:[%s14895_s20 + $0x360] sm:$0xff]  ;;  %v8992_v19 = vpack.c.bf16 %v223_v12, %v175_v10  ;;  %v413_v30 = vld [vmem:[%s14895_s20 + $0xae8] sm:$0xff]  ;;  %v318_v33 = vld [vmem:[%s14895_s20 + $0x7f0] sm:$0xff] }
  0x3a   :  { %8947 = vmatpush1.bf16.msra.mxu1 %v8946_v17  ;;  %1112 = vmatprep.mubr.f32.mxu1 %v14849_v7  ;;  %v269_v17 = vld [vmem:[%s14895_s20 + $0x668] sm:$0xff]  ;;  %v8972_v22 = vpack.c.bf16 %v220_v15, %v172_v14  ;;  %v415_v36 = vld [vmem:[%s14895_s20 + $0xaf8] sm:$0xff]  ;;  %v412_v39 = vld [vmem:[%s14895_s20 + $0xae0] sm:$0xff] }
  0x3b   :  { %8949 = vmatprep.subr.bf16.mxu1 %v8948_v20  ;;  %v174_v20 = vld [vmem:[%s14895_s20 + $0x370] sm:$0xff]  ;;  %v8974_v25 = vpack.c.bf16 %v317_v18, %v269_v17  ;;  %v509_v42 = vld [vmem:[%s14895_s20 + $0xde8] sm:$0x7]  ;;  %v511_v48 = vld [vmem:[%s14895_s20 + $0xdf8] sm:$0x7] }
  0x3c   :  { %8929 = vmatpush1.bf16.msra.mxu0 %v8928_v23  ;;  %v271_v23 = vld [vmem:[%s14895_s20 + $0x678] sm:$0xff]  ;;  %v8994_v28 = vpack.c.bf16 %v222_v21, %v174_v20  ;;  %v414_v45 = vld [vmem:[%s14895_s20 + $0xaf0] sm:$0xff]  ;;  %v508_v51 = vld [vmem:[%s14895_s20 + $0xde0] sm:$0x7] }
  0x3d   :  { %8931 = vmatprep.subr.bf16.mxu0 %v8930_v26  ;;  %v268_v26 = vld [vmem:[%s14895_s20 + $0x660] sm:$0xff]  ;;  %v8996_v31 = vpack.c.bf16 %v319_v24, %v271_v23  ;;  %v129_v54 = vld [vmem:[%s14895_s20 + $0x208] sm:$0xff]  ;;  %v510_v58 = vld [vmem:[%s14895_s20 + $0xdf0] sm:$0x7] }
  0x3e   :  { %8951 = vmatpush1.bf16.msra.mxu1 %v8950_v29  ;;  %v365_v29 = vld [vmem:[%s14895_s20 + $0x968] sm:$0xff]  ;;  %v8976_v34 = vpack.c.bf16 %v316_v27, %v268_v26  ;;  %v131_v61 = vld [vmem:[%s14895_s20 + $0x218] sm:$0xff]  ;;  %v128_v0 = vld [vmem:[%s14895_s20 + $0x200] sm:$0xff] }
  0x3f   :  { %8953 = vmatprep.subr.bf16.mxu1 %v8952_v32  ;;  %v270_v32 = vld [vmem:[%s14895_s20 + $0x670] sm:$0xff]  ;;  %v8978_v37 = vpack.c.bf16 %v413_v30, %v365_v29  ;;  %v225_v3 = vld [vmem:[%s14895_s20 + $0x508] sm:$0xff]  ;;  %v227_v10 = vld [vmem:[%s14895_s20 + $0x518] sm:$0xff] }
  0x40   :  { %8933 = vmatpush1.bf16.msra.mxu0 %v8932_v35  ;;  %v367_v35 = vld [vmem:[%s14895_s20 + $0x978] sm:$0xff]  ;;  %v8998_v40 = vpack.c.bf16 %v318_v33, %v270_v32  ;;  %v130_v6 = vld [vmem:[%s14895_s20 + $0x210] sm:$0xff]  ;;  %v224_v14 = vld [vmem:[%s14895_s20 + $0x500] sm:$0xff] }
  0x41   :  { %8935 = vmatprep.subr.bf16.mxu0 %v8934_v38  ;;  %v364_v38 = vld [vmem:[%s14895_s20 + $0x960] sm:$0xff]  ;;  %v9000_v43 = vpack.c.bf16 %v415_v36, %v367_v35  ;;  %v321_v17 = vld [vmem:[%s14895_s20 + $0x808] sm:$0xff]  ;;  %v226_v20 = vld [vmem:[%s14895_s20 + $0x510] sm:$0xff] }
  0x42   :  { %8955 = vmatpush1.bf16.msra.mxu1 %v8954_v41  ;;  %v461_v41 = vld [vmem:[%s14895_s20 + $0xc68] sm:$0xff]  ;;  %v8980_v46 = vpack.c.bf16 %v412_v39, %v364_v38  ;;  %v323_v23 = vld [vmem:[%s14895_s20 + $0x818] sm:$0xff]  ;;  %v320_v26 = vld [vmem:[%s14895_s20 + $0x800] sm:$0xff] }
  0x43   :  { %8957 = vmatprep.subr.bf16.mxu1 %v8956_v44  ;;  %v366_v44 = vld [vmem:[%s14895_s20 + $0x970] sm:$0xff]  ;;  %v8982_v49 = vpack.c.bf16 %v509_v42, %v461_v41  ;;  %v417_v29 = vld [vmem:[%s14895_s20 + $0xb08] sm:$0xff]  ;;  %v419_v35 = vld [vmem:[%s14895_s20 + $0xb18] sm:$0xff] }
  0x44   :  { %8937 = vmatpush1.bf16.msra.mxu0 %v8936_v47  ;;  %v463_v47 = vld [vmem:[%s14895_s20 + $0xc78] sm:$0xff]  ;;  %v9002_v52 = vpack.c.bf16 %v414_v45, %v366_v44  ;;  %v322_v32 = vld [vmem:[%s14895_s20 + $0x810] sm:$0xff]  ;;  %v416_v38 = vld [vmem:[%s14895_s20 + $0xb00] sm:$0xff] }
  0x45   :  { %8940 = vmatprep.subr.msk.bf16.mxu0 %vm10274_vm2, %v8938_v50  ;;  %v460_v50 = vld [vmem:[%s14895_s20 + $0xc60] sm:$0xff]  ;;  %v9004_v56 = vpack.c.bf16 %v511_v48, %v463_v47  ;;  %v513_v41 = vld [vmem:[%s14895_s20 + $0xe08] sm:$0x7]  ;;  %v418_v44 = vld [vmem:[%s14895_s20 + $0xb10] sm:$0xff] }
  0x46   :  { %8959 = vmatpush1.bf16.msra.mxu1 %v8958_v53  ;;  %v81_v53 = vld [vmem:[%s14895_s20 + $0x88] sm:$0xff]  ;;  %v8985_v59 = vpack.c.bf16 %v508_v51, %v460_v50  ;;  %v515_v47 = vld [vmem:[%s14895_s20 + $0xe18] sm:$0x7]  ;;  %v512_v50 = vld [vmem:[%s14895_s20 + $0xe00] sm:$0x7] }
  0x47   :  { %8962 = vmatprep.subr.msk.bf16.mxu1 %vm10274_vm2, %v8960_v57  ;;  %v462_v57 = vld [vmem:[%s14895_s20 + $0xc70] sm:$0xff]  ;;  %v9010_v62 = vpack.c.bf16 %v129_v54, %v81_v53  ;;  %v133_v53 = vld [vmem:[%s14895_s20 + $0x228] sm:$0xff] }
  0x48   :  { %8943 = vmatpush1.bf16.msk.msra.mxu0 %vm10274_vm2, %v8941_v60  ;;  %v83_v60 = vld [vmem:[%s14895_s20 + $0x98] sm:$0xff]  ;;  %v9007_v1 = vpack.c.bf16 %v510_v58, %v462_v57  ;;  %v514_v57 = vld [vmem:[%s14895_s20 + $0xe10] sm:$0x7] }
  0x49   :  { %8967 = vmatprep.subr.bf16.mxu0 %v8966_v63  ;;  %v80_v63 = vld [vmem:[%s14895_s20 + $0x80] sm:$0xff]  ;;  %v9032_v4 = vpack.c.bf16 %v131_v61, %v83_v60  ;;  %v135_v60 = vld [vmem:[%s14895_s20 + $0x238] sm:$0xff] }
  0x4a   :  { %8965 = vmatpush1.bf16.msk.msra.mxu1 %vm10274_vm2, %v8963_v2  ;;  %v177_v2 = vld [vmem:[%s14895_s20 + $0x388] sm:$0xff]  ;;  %v9012_v8 = vpack.c.bf16 %v128_v0, %v80_v63  ;;  %v132_v63 = vld [vmem:[%s14895_s20 + $0x220] sm:$0xff] }
  0x4b   :  { %7825 = vmatmul.mubr.msk.f32.vlgmr.msra.gmra.mrb[4].mxu0 %vm544_vm3, %v10323_v11  ;;  %8989 = vmatprep.subr.bf16.mxu1 %v8988_v5  ;;  %v82_v5 = vld [vmem:[%s14895_s20 + $0x90] sm:$0xff]  ;;  %v9014_v12 = vpack.c.bf16 %v225_v3, %v177_v2  ;;  %v229_v2 = vld [vmem:[%s14895_s20 + $0x528] sm:$0xff] }
  0x4c   :  { %8969 = vmatpush1.bf16.msra.mxu0 %v8968_v9  ;;  %1183 = vmatprep.mubr.f32.mxu0 %v14849_v7  ;;  %v179_v9 = vld [vmem:[%s14895_s20 + $0x398] sm:$0xff]  ;;  %v9034_v15 = vpack.c.bf16 %v130_v6, %v82_v5  ;;  %v134_v5 = vld [vmem:[%s14895_s20 + $0x230] sm:$0xff] }
  0x4d   :  { %7828 = vmatmul.mubr.msk.f32.vlgmr.msra.gmra.mrb[4].mxu1 %vm544_vm3, %v10323_v11  ;;  %8971 = vmatprep.subr.bf16.mxu0 %v8970_v13  ;;  %v176_v13 = vld [vmem:[%s14895_s20 + $0x380] sm:$0xff]  ;;  %v9036_v18 = vpack.c.bf16 %v227_v10, %v179_v9  ;;  %v231_v9 = vld [vmem:[%s14895_s20 + $0x538] sm:$0xff] }
  0x4e   :  { %8991 = vmatpush1.bf16.msra.mxu1 %v8990_v16  ;;  %1254 = vmatprep.mubr.f32.mxu1 %v14849_v7  ;;  %v273_v16 = vld [vmem:[%s14895_s20 + $0x688] sm:$0xff]  ;;  %v9016_v21 = vpack.c.bf16 %v224_v14, %v176_v13  ;;  %v228_v13 = vld [vmem:[%s14895_s20 + $0x520] sm:$0xff] }
  0x4f   :  { %8993 = vmatprep.subr.bf16.mxu1 %v8992_v19  ;;  %v178_v19 = vld [vmem:[%s14895_s20 + $0x390] sm:$0xff]  ;;  %v9018_v24 = vpack.c.bf16 %v321_v17, %v273_v16  ;;  %v325_v16 = vld [vmem:[%s14895_s20 + $0x828] sm:$0xff] }
  0x50   :  { %8973 = vmatpush1.bf16.msra.mxu0 %v8972_v22  ;;  %v275_v22 = vld [vmem:[%s14895_s20 + $0x698] sm:$0xff]  ;;  %v9038_v27 = vpack.c.bf16 %v226_v20, %v178_v19  ;;  %v230_v19 = vld [vmem:[%s14895_s20 + $0x530] sm:$0xff] }
  0x51   :  { %8975 = vmatprep.subr.bf16.mxu0 %v8974_v25  ;;  %v272_v25 = vld [vmem:[%s14895_s20 + $0x680] sm:$0xff]  ;;  %v9040_v30 = vpack.c.bf16 %v323_v23, %v275_v22  ;;  %v327_v22 = vld [vmem:[%s14895_s20 + $0x838] sm:$0xff] }
  0x52   :  { %8995 = vmatpush1.bf16.msra.mxu1 %v8994_v28  ;;  %v369_v28 = vld [vmem:[%s14895_s20 + $0x988] sm:$0xff]  ;;  %v9020_v33 = vpack.c.bf16 %v320_v26, %v272_v25  ;;  %v324_v25 = vld [vmem:[%s14895_s20 + $0x820] sm:$0xff] }
  0x53   :  { %8997 = vmatprep.subr.bf16.mxu1 %v8996_v31  ;;  %v274_v31 = vld [vmem:[%s14895_s20 + $0x690] sm:$0xff]  ;;  %v9022_v36 = vpack.c.bf16 %v417_v29, %v369_v28  ;;  %v421_v28 = vld [vmem:[%s14895_s20 + $0xb28] sm:$0xff] }
  0x54   :  { %8977 = vmatpush1.bf16.msra.mxu0 %v8976_v34  ;;  %v371_v34 = vld [vmem:[%s14895_s20 + $0x998] sm:$0xff]  ;;  %v9042_v39 = vpack.c.bf16 %v322_v32, %v274_v31  ;;  %v326_v31 = vld [vmem:[%s14895_s20 + $0x830] sm:$0xff] }
  0x55   :  { %8979 = vmatprep.subr.bf16.mxu0 %v8978_v37  ;;  %v368_v37 = vld [vmem:[%s14895_s20 + $0x980] sm:$0xff]  ;;  %v9044_v42 = vpack.c.bf16 %v419_v35, %v371_v34  ;;  %v423_v34 = vld [vmem:[%s14895_s20 + $0xb38] sm:$0xff] }
  0x56   :  { %8999 = vmatpush1.bf16.msra.mxu1 %v8998_v40  ;;  %v465_v40 = vld [vmem:[%s14895_s20 + $0xc88] sm:$0xff]  ;;  %v9024_v45 = vpack.c.bf16 %v416_v38, %v368_v37  ;;  %v420_v37 = vld [vmem:[%s14895_s20 + $0xb20] sm:$0xff] }
  0x57   :  { %9001 = vmatprep.subr.bf16.mxu1 %v9000_v43  ;;  %v370_v43 = vld [vmem:[%s14895_s20 + $0x990] sm:$0xff]  ;;  %v9026_v48 = vpack.c.bf16 %v513_v41, %v465_v40  ;;  %v517_v40 = vld [vmem:[%s14895_s20 + $0xe28] sm:$0x7] }
  0x58   :  { %8981 = vmatpush1.bf16.msra.mxu0 %v8980_v46  ;;  %v467_v46 = vld [vmem:[%s14895_s20 + $0xc98] sm:$0xff]  ;;  %v9046_v51 = vpack.c.bf16 %v418_v44, %v370_v43  ;;  %v422_v43 = vld [vmem:[%s14895_s20 + $0xb30] sm:$0xff] }
  0x59   :  { %8984 = vmatprep.subr.msk.bf16.mxu0 %vm10274_vm2, %v8982_v49  ;;  %v464_v49 = vld [vmem:[%s14895_s20 + $0xc80] sm:$0xff]  ;;  %v9048_v54 = vpack.c.bf16 %v515_v47, %v467_v46  ;;  %v519_v46 = vld [vmem:[%s14895_s20 + $0xe38] sm:$0x7] }
  0x5a   :  { %9003 = vmatpush1.bf16.msra.mxu1 %v9002_v52  ;;  %v85_v52 = vld [vmem:[%s14895_s20 + $0xa8] sm:$0xff]  ;;  %v9029_v58 = vpack.c.bf16 %v512_v50, %v464_v49  ;;  %v516_v49 = vld [vmem:[%s14895_s20 + $0xe20] sm:$0x7] }
  0x5b   :  { %9006 = vmatprep.subr.msk.bf16.mxu1 %vm10274_vm2, %v9004_v56  ;;  %v466_v56 = vld [vmem:[%s14895_s20 + $0xc90] sm:$0xff]  ;;  %v9054_v61 = vpack.c.bf16 %v133_v53, %v85_v52  ;;  %v137_v52 = vld [vmem:[%s14895_s20 + $0x248] sm:$0xff] }
  0x5c   :  { %8987 = vmatpush1.bf16.msk.msra.mxu0 %vm10274_vm2, %v8985_v59  ;;  %v87_v59 = vld [vmem:[%s14895_s20 + $0xb8] sm:$0xff]  ;;  %v9051_v0 = vpack.c.bf16 %v514_v57, %v466_v56  ;;  %v518_v56 = vld [vmem:[%s14895_s20 + $0xe30] sm:$0x7] }
  0x5d   :  { %9011 = vmatprep.subr.bf16.mxu0 %v9010_v62  ;;  %v84_v62 = vld [vmem:[%s14895_s20 + $0xa0] sm:$0xff]  ;;  %v9076_v3 = vpack.c.bf16 %v135_v60, %v87_v59  ;;  %v139_v59 = vld [vmem:[%s14895_s20 + $0x258] sm:$0xff] }
  0x5e   :  { %9009 = vmatpush1.bf16.msk.msra.mxu1 %vm10274_vm2, %v9007_v1  ;;  %v181_v1 = vld [vmem:[%s14895_s20 + $0x3a8] sm:$0xff]  ;;  %v9056_v6 = vpack.c.bf16 %v132_v63, %v84_v62  ;;  %v136_v62 = vld [vmem:[%s14895_s20 + $0x240] sm:$0xff] }
  0x5f   :  { %7831 = vmatmul.mubr.msk.f32.vlgmr.msra.gmra.mrb[6].mxu0 %vm544_vm3, %v10323_v11  ;;  %9033 = vmatprep.subr.bf16.mxu1 %v9032_v4  ;;  %v86_v4 = vld [vmem:[%s14895_s20 + $0xb0] sm:$0xff]  ;;  %v9058_v10 = vpack.c.bf16 %v229_v2, %v181_v1  ;;  %v233_v1 = vld [vmem:[%s14895_s20 + $0x548] sm:$0xff] }
  0x60   :  { %9013 = vmatpush1.bf16.msra.mxu0 %v9012_v8  ;;  %1325 = vmatprep.mubr.f32.mxu0 %v14849_v7  ;;  %v183_v8 = vld [vmem:[%s14895_s20 + $0x3b8] sm:$0xff]  ;;  %v9078_v14 = vpack.c.bf16 %v134_v5, %v86_v4  ;;  %v138_v4 = vld [vmem:[%s14895_s20 + $0x250] sm:$0xff] }
  0x61   :  { %7834 = vmatmul.mubr.msk.f32.vlgmr.msra.gmra.mrb[6].mxu1 %vm544_vm3, %v10323_v11  ;;  %9015 = vmatprep.subr.bf16.mxu0 %v9014_v12  ;;  %v180_v12 = vld [vmem:[%s14895_s20 + $0x3a0] sm:$0xff]  ;;  %v9080_v17 = vpack.c.bf16 %v231_v9, %v183_v8  ;;  %v235_v8 = vld [vmem:[%s14895_s20 + $0x558] sm:$0xff] }
  0x62   :  { %9035 = vmatpush1.bf16.msra.mxu1 %v9034_v15  ;;  %1396 = vmatprep.mubr.f32.mxu1 %v14849_v7  ;;  %v277_v15 = vld [vmem:[%s14895_s20 + $0x6a8] sm:$0xff]  ;;  %v9060_v20 = vpack.c.bf16 %v228_v13, %v180_v12  ;;  %v232_v12 = vld [vmem:[%s14895_s20 + $0x540] sm:$0xff] }
  0x63   :  { %9037 = vmatprep.subr.bf16.mxu1 %v9036_v18  ;;  %v182_v18 = vld [vmem:[%s14895_s20 + $0x3b0] sm:$0xff]  ;;  %v9062_v23 = vpack.c.bf16 %v325_v16, %v277_v15  ;;  %v329_v15 = vld [vmem:[%s14895_s20 + $0x848] sm:$0xff] }
  0x64   :  { %9017 = vmatpush1.bf16.msra.mxu0 %v9016_v21  ;;  %v279_v21 = vld [vmem:[%s14895_s20 + $0x6b8] sm:$0xff]  ;;  %v9082_v26 = vpack.c.bf16 %v230_v19, %v182_v18  ;;  %v234_v18 = vld [vmem:[%s14895_s20 + $0x550] sm:$0xff] }
  0x65   :  { %9019 = vmatprep.subr.bf16.mxu0 %v9018_v24  ;;  %v276_v24 = vld [vmem:[%s14895_s20 + $0x6a0] sm:$0xff]  ;;  %v9084_v29 = vpack.c.bf16 %v327_v22, %v279_v21  ;;  %v331_v21 = vld [vmem:[%s14895_s20 + $0x858] sm:$0xff] }
  0x66   :  { %9039 = vmatpush1.bf16.msra.mxu1 %v9038_v27  ;;  %v373_v27 = vld [vmem:[%s14895_s20 + $0x9a8] sm:$0xff]  ;;  %v9064_v32 = vpack.c.bf16 %v324_v25, %v276_v24  ;;  %v328_v24 = vld [vmem:[%s14895_s20 + $0x840] sm:$0xff] }
  0x67   :  { %9041 = vmatprep.subr.bf16.mxu1 %v9040_v30  ;;  %v278_v30 = vld [vmem:[%s14895_s20 + $0x6b0] sm:$0xff]  ;;  %v9066_v35 = vpack.c.bf16 %v421_v28, %v373_v27 }
  0x68   :  { %9021 = vmatpush1.bf16.msra.mxu0 %v9020_v33  ;;  %v375_v33 = vld [vmem:[%s14895_s20 + $0x9b8] sm:$0xff]  ;;  %v9086_v38 = vpack.c.bf16 %v326_v31, %v278_v30  ;;  %v282_v28 = vld [vmem:[%s14895_s20 + $0x6d0] sm:$0xff] }
  0x69   :  { %9023 = vmatprep.subr.bf16.mxu0 %v9022_v36  ;;  %v372_v36 = vld [vmem:[%s14895_s20 + $0x9a0] sm:$0xff]  ;;  %v9088_v41 = vpack.c.bf16 %v423_v34, %v375_v33  ;;  %v379_v31 = vld [vmem:[%s14895_s20 + $0x9d8] sm:$0xff] }
  0x6a   :  { %9043 = vmatpush1.bf16.msra.mxu1 %v9042_v39  ;;  %v469_v39 = vld [vmem:[%s14895_s20 + $0xca8] sm:$0xff]  ;;  %v9068_v44 = vpack.c.bf16 %v420_v37, %v372_v36  ;;  %v376_v34 = vld [vmem:[%s14895_s20 + $0x9c0] sm:$0xff] }
  0x6b   :  { %9045 = vmatprep.subr.bf16.mxu1 %v9044_v42  ;;  %v374_v42 = vld [vmem:[%s14895_s20 + $0x9b0] sm:$0xff]  ;;  %v9070_v47 = vpack.c.bf16 %v517_v40, %v469_v39  ;;  %v473_v37 = vld [vmem:[%s14895_s20 + $0xcc8] sm:$0xff] }
  0x6c   :  { %9025 = vmatpush1.bf16.msra.mxu0 %v9024_v45  ;;  %v471_v45 = vld [vmem:[%s14895_s20 + $0xcb8] sm:$0xff]  ;;  %v9090_v50 = vpack.c.bf16 %v422_v43, %v374_v42  ;;  %v378_v40 = vld [vmem:[%s14895_s20 + $0x9d0] sm:$0xff] }
  0x6d   :  { %9028 = vmatprep.subr.msk.bf16.mxu0 %vm10274_vm2, %v9026_v48  ;;  %v468_v48 = vld [vmem:[%s14895_s20 + $0xca0] sm:$0xff]  ;;  %v9092_v53 = vpack.c.bf16 %v519_v46, %v471_v45  ;;  %v475_v43 = vld [vmem:[%s14895_s20 + $0xcd8] sm:$0xff] }
  0x6e   :  { %9047 = vmatpush1.bf16.msra.mxu1 %v9046_v51  ;;  %v89_v51 = vld [vmem:[%s14895_s20 + $0xc8] sm:$0xff]  ;;  %v9073_v57 = vpack.c.bf16 %v516_v49, %v468_v48  ;;  %v472_v46 = vld [vmem:[%s14895_s20 + $0xcc0] sm:$0xff] }
  0x6f   :  { %9050 = vmatprep.subr.msk.bf16.mxu1 %vm10274_vm2, %v9048_v54  ;;  %v470_v54 = vld [vmem:[%s14895_s20 + $0xcb0] sm:$0xff]  ;;  %v9098_v60 = vpack.c.bf16 %v137_v52, %v89_v51  ;;  %v93_v49 = vld [vmem:[%s14895_s20 + $0xe8] sm:$0xff] }
  0x70   :  { %9031 = vmatpush1.bf16.msk.msra.mxu0 %vm10274_vm2, %v9029_v58  ;;  %v91_v58 = vld [vmem:[%s14895_s20 + $0xd8] sm:$0xff]  ;;  %v9095_v63 = vpack.c.bf16 %v518_v56, %v470_v54  ;;  %v474_v52 = vld [vmem:[%s14895_s20 + $0xcd0] sm:$0xff] }
  0x71   :  { %9055 = vmatprep.subr.bf16.mxu0 %v9054_v61  ;;  %v88_v61 = vld [vmem:[%s14895_s20 + $0xc0] sm:$0xff]  ;;  %v9120_v2 = vpack.c.bf16 %v139_v59, %v91_v58  ;;  %v95_v56 = vld [vmem:[%s14895_s20 + $0xf8] sm:$0xff] }
  0x72   :  { %9053 = vmatpush1.bf16.msk.msra.mxu1 %vm10274_vm2, %v9051_v0  ;;  %v185_v0 = vld [vmem:[%s14895_s20 + $0x3c8] sm:$0xff]  ;;  %v9100_v5 = vpack.c.bf16 %v136_v62, %v88_v61  ;;  %v92_v59 = vld [vmem:[%s14895_s20 + $0xe0] sm:$0xff] }
  0x73   :  { %7837 = vmatmul.mubr.msk.f32.vlgmr.msra.gmra.mrb[8].mxu0 %vm544_vm3, %v10323_v11  ;;  %9077 = vmatprep.subr.bf16.mxu1 %v9076_v3  ;;  %v90_v3 = vld [vmem:[%s14895_s20 + $0xd0] sm:$0xff]  ;;  %v9102_v9 = vpack.c.bf16 %v233_v1, %v185_v0  ;;  %v189_v62 = vld [vmem:[%s14895_s20 + $0x3e8] sm:$0xff] }
  0x74   :  { %9057 = vmatpush1.bf16.msra.mxu0 %v9056_v6  ;;  %1467 = vmatprep.mubr.f32.mxu0 %v14849_v7  ;;  %v187_v6 = vld [vmem:[%s14895_s20 + $0x3d8] sm:$0xff]  ;;  %v9122_v13 = vpack.c.bf16 %v138_v4, %v90_v3  ;;  %v94_v1 = vld [vmem:[%s14895_s20 + $0xf0] sm:$0xff] }
  0x75   :  { %7840 = vmatmul.mubr.msk.f32.vlgmr.msra.gmra.mrb[8].mxu1 %vm544_vm3, %v10323_v11  ;;  %9059 = vmatprep.subr.bf16.mxu0 %v9058_v10  ;;  %v184_v10 = vld [vmem:[%s14895_s20 + $0x3c0] sm:$0xff]  ;;  %v9124_v16 = vpack.c.bf16 %v235_v8, %v187_v6  ;;  %v191_v4 = vld [vmem:[%s14895_s20 + $0x3f8] sm:$0xff] }
  0x76   :  { %9079 = vmatpush1.bf16.msra.mxu1 %v9078_v14  ;;  %1538 = vmatprep.mubr.f32.mxu1 %v14849_v7  ;;  %v281_v14 = vld [vmem:[%s14895_s20 + $0x6c8] sm:$0xff]  ;;  %v9104_v19 = vpack.c.bf16 %v232_v12, %v184_v10  ;;  %v188_v8 = vld [vmem:[%s14895_s20 + $0x3e0] sm:$0xff] }
  0x77   :  { %9081 = vmatprep.subr.bf16.mxu1 %v9080_v17  ;;  %v186_v17 = vld [vmem:[%s14895_s20 + $0x3d0] sm:$0xff]  ;;  %v9106_v22 = vpack.c.bf16 %v329_v15, %v281_v14  ;;  %v285_v12 = vld [vmem:[%s14895_s20 + $0x6e8] sm:$0xff]  ;;  %v11152_v14 = vld [vmem:[%s14898_s22] sm:$0xff] }
  0x78   :  { %9061 = vmatpush1.bf16.msra.mxu0 %v9060_v20  ;;  %v283_v20 = vld [vmem:[%s14895_s20 + $0x6d8] sm:$0xff]  ;;  %v9126_v25 = vpack.c.bf16 %v234_v18, %v186_v17  ;;  %v238_v17 = vld [vmem:[%s14895_s20 + $0x570] sm:$0xff] }
  0x79   :  { %9063 = vmatprep.subr.bf16.mxu0 %v9062_v23  ;;  %v280_v23 = vld [vmem:[%s14895_s20 + $0x6c0] sm:$0xff]  ;;  %v9128_v27 = vpack.c.bf16 %v331_v21, %v283_v20  ;;  %v335_v20 = vld [vmem:[%s14895_s20 + $0x878] sm:$0xff] }
  0x7a   :  { %9083 = vmatpush1.bf16.msra.mxu1 %v9082_v26  ;;  %v377_v26 = vld [vmem:[%s14895_s20 + $0x9c8] sm:$0xff]  ;;  %v9108_v30 = vpack.c.bf16 %v328_v24, %v280_v23  ;;  %v332_v23 = vld [vmem:[%s14895_s20 + $0x860] sm:$0xff] }
  0x7b   :  { %9085 = vmatprep.subr.bf16.mxu1 %v9084_v29  ;;  %v330_v29 = vld [vmem:[%s14895_s20 + $0x850] sm:$0xff] }
  0x7c   :  { %9065 = vmatpush1.bf16.msra.mxu0 %v9064_v32  ;;  %v427_v32 = vld [vmem:[%s14895_s20 + $0xb58] sm:$0xff]  ;;  %v9130_v36 = vpack.c.bf16 %v330_v29, %v282_v28  ;;  %v334_v28 = vld [vmem:[%s14895_s20 + $0x870] sm:$0xff] }
  0x7d   :  { %9067 = vmatprep.subr.bf16.mxu0 %v9066_v35  ;;  %v424_v35 = vld [vmem:[%s14895_s20 + $0xb40] sm:$0xff]  ;;  %v9132_v39 = vpack.c.bf16 %v427_v32, %v379_v31  ;;  %v431_v31 = vld [vmem:[%s14895_s20 + $0xb78] sm:$0xff] }
  0x7e   :  { %9087 = vmatpush1.bf16.msra.mxu1 %v9086_v38  ;;  %v521_v38 = vld [vmem:[%s14895_s20 + $0xe48] sm:$0x7]  ;;  %v9112_v42 = vpack.c.bf16 %v424_v35, %v376_v34  ;;  %v428_v34 = vld [vmem:[%s14895_s20 + $0xb60] sm:$0xff] }
  0x7f   :  { %9089 = vmatprep.subr.bf16.mxu1 %v9088_v41  ;;  %v426_v41 = vld [vmem:[%s14895_s20 + $0xb50] sm:$0xff]  ;;  %v9114_v45 = vpack.c.bf16 %v521_v38, %v473_v37  ;;  %v525_v37 = vld [vmem:[%s14895_s20 + $0xe68] sm:$0x7] }
  0x80   :  { %9069 = vmatpush1.bf16.msra.mxu0 %v9068_v44  ;;  %v523_v44 = vld [vmem:[%s14895_s20 + $0xe58] sm:$0x7]  ;;  %v9134_v48 = vpack.c.bf16 %v426_v41, %v378_v40  ;;  %v430_v40 = vld [vmem:[%s14895_s20 + $0xb70] sm:$0xff] }
  0x81   :  { %9072 = vmatprep.subr.msk.bf16.mxu0 %vm10274_vm2, %v9070_v47  ;;  %v520_v47 = vld [vmem:[%s14895_s20 + $0xe40] sm:$0x7]  ;;  %v9136_v51 = vpack.c.bf16 %v523_v44, %v475_v43  ;;  %v527_v43 = vld [vmem:[%s14895_s20 + $0xe78] sm:$0x7] }
  0x82   :  { %9091 = vmatpush1.bf16.msra.mxu1 %v9090_v50  ;;  %v141_v50 = vld [vmem:[%s14895_s20 + $0x268] sm:$0xff]  ;;  %v9117_v54 = vpack.c.bf16 %v520_v47, %v472_v46  ;;  %v524_v46 = vld [vmem:[%s14895_s20 + $0xe60] sm:$0x7] }
  0x83   :  { %9094 = vmatprep.subr.msk.bf16.mxu1 %vm10274_vm2, %v9092_v53  ;;  %v522_v53 = vld [vmem:[%s14895_s20 + $0xe50] sm:$0x7]  ;;  %v9142_v58 = vpack.c.bf16 %v141_v50, %v93_v49  ;;  %v145_v49 = vld [vmem:[%s14895_s20 + $0x288] sm:$0xff] }
  0x84   :  { %9075 = vmatpush1.bf16.msk.msra.mxu0 %vm10274_vm2, %v9073_v57  ;;  %v143_v57 = vld [vmem:[%s14895_s20 + $0x278] sm:$0xff]  ;;  %v9139_v61 = vpack.c.bf16 %v522_v53, %v474_v52  ;;  %v526_v52 = vld [vmem:[%s14895_s20 + $0xe70] sm:$0x7] }
  0x85   :  { %9099 = vmatprep.subr.bf16.mxu0 %v9098_v60  ;;  %v140_v60 = vld [vmem:[%s14895_s20 + $0x260] sm:$0xff]  ;;  %v9164_v0 = vpack.c.bf16 %v143_v57, %v95_v56  ;;  %v147_v56 = vld [vmem:[%s14895_s20 + $0x298] sm:$0xff] }
  0x86   :  { %9097 = vmatpush1.bf16.msk.msra.mxu1 %vm10274_vm2, %v9095_v63  ;;  %v237_v63 = vld [vmem:[%s14895_s20 + $0x568] sm:$0xff]  ;;  %v9144_v3 = vpack.c.bf16 %v140_v60, %v92_v59  ;;  %v144_v59 = vld [vmem:[%s14895_s20 + $0x280] sm:$0xff] }
  0x87   :  { %7843 = vmatmul.mubr.msk.f32.vlgmr.msra.gmra.mrb[10].mxu0 %vm544_vm3, %v10323_v11  ;;  %9121 = vmatprep.subr.bf16.mxu1 %v9120_v2  ;;  %v142_v2 = vld [vmem:[%s14895_s20 + $0x270] sm:$0xff]  ;;  %v9146_v6 = vpack.c.bf16 %v237_v63, %v189_v62  ;;  %v241_v62 = vld [vmem:[%s14895_s20 + $0x588] sm:$0xff] }
  0x88   :  { %9101 = vmatpush1.bf16.msra.mxu0 %v9100_v5  ;;  %1609 = vmatprep.mubr.f32.mxu0 %v14849_v7  ;;  %v239_v5 = vld [vmem:[%s14895_s20 + $0x578] sm:$0xff]  ;;  %v9166_v10 = vpack.c.bf16 %v142_v2, %v94_v1  ;;  %v146_v1 = vld [vmem:[%s14895_s20 + $0x290] sm:$0xff] }
  0x89   :  { %7846 = vmatmul.mubr.msk.f32.vlgmr.msra.gmra.mrb[10].mxu1 %vm544_vm3, %v10323_v11  ;;  %9103 = vmatprep.subr.bf16.mxu0 %v9102_v9  ;;  %v425_v11 = vld [vmem:[%s14895_s20 + $0xb48] sm:$0xff]  ;;  %v236_v9 = vld [vmem:[%s14895_s20 + $0x560] sm:$0xff]  ;;  %v9168_v15 = vpack.c.bf16 %v239_v5, %v191_v4  ;;  %v243_v4 = vld [vmem:[%s14895_s20 + $0x598] sm:$0xff] }
  0x8a   :  { %9123 = vmatpush1.bf16.msra.mxu1 %v9122_v13  ;;  %1680 = vmatprep.mubr.f32.mxu1 %v14849_v7  ;;  %v9110_v33 = vpack.c.bf16 %v425_v11, %v377_v26  ;;  %v333_v13 = vld [vmem:[%s14895_s20 + $0x868] sm:$0xff]  ;;  %v9148_v18 = vpack.c.bf16 %v236_v9, %v188_v8  ;;  %v240_v8 = vld [vmem:[%s14895_s20 + $0x580] sm:$0xff] }
  0x8b   :  { %9125 = vmatprep.subr.bf16.mxu1 %v9124_v16  ;;  %v190_v16 = vld [vmem:[%s14895_s20 + $0x3f0] sm:$0xff]  ;;  %v9150_v21 = vpack.c.bf16 %v333_v13, %v285_v12  ;;  %v429_v26 = vld [vmem:[%s14895_s20 + $0xb68] sm:$0xff] }
  0x8c   :  { %9105 = vmatpush1.bf16.msra.mxu0 %v9104_v19  ;;  %v287_v19 = vld [vmem:[%s14895_s20 + $0x6f8] sm:$0xff]  ;;  %v9170_v24 = vpack.c.bf16 %v238_v17, %v190_v16  ;;  %v337_v12 = vld [vmem:[%s14895_s20 + $0x888] sm:$0xff] }
  0x8d   :  { %9107 = vmatprep.subr.bf16.mxu0 %v9106_v22  ;;  %v284_v22 = vld [vmem:[%s14895_s20 + $0x6e0] sm:$0xff]  ;;  %v9172_v11 = vpack.c.bf16 %v335_v20, %v287_v19 }
  0x8e   :  { %9127 = vmatpush1.bf16.msra.mxu1 %v9126_v25  ;;  %v381_v25 = vld [vmem:[%s14895_s20 + $0x9e8] sm:$0xff]  ;;  %v9152_v29 = vpack.c.bf16 %v332_v23, %v284_v22 }
  0x8f   :  { %9129 = vmatprep.subr.bf16.mxu1 %v9128_v27  ;;  %v286_v27 = vld [vmem:[%s14895_s20 + $0x6f0] sm:$0xff]  ;;  %v9154_v32 = vpack.c.bf16 %v429_v26, %v381_v25 }
  0x90   :  { %9109 = vmatpush1.bf16.msra.mxu0 %v9108_v30  ;;  %v383_v30 = vld [vmem:[%s14895_s20 + $0x9f8] sm:$0xff]  ;;  %v9174_v35 = vpack.c.bf16 %v334_v28, %v286_v27 }
  0x91   :  { %9111 = vmatprep.subr.bf16.mxu0 %v9110_v33  ;;  %v380_v33 = vld [vmem:[%s14895_s20 + $0x9e0] sm:$0xff]  ;;  %v9176_v38 = vpack.c.bf16 %v431_v31, %v383_v30 }
  0x92   :  { %9131 = vmatpush1.bf16.msra.mxu1 %v9130_v36  ;;  %v477_v36 = vld [vmem:[%s14895_s20 + $0xce8] sm:$0xff]  ;;  %v9156_v41 = vpack.c.bf16 %v428_v34, %v380_v33 }
  0x93   :  { %9133 = vmatprep.subr.bf16.mxu1 %v9132_v39  ;;  %v382_v39 = vld [vmem:[%s14895_s20 + $0x9f0] sm:$0xff]  ;;  %v9158_v44 = vpack.c.bf16 %v525_v37, %v477_v36 }
  0x94   :  { %9113 = vmatpush1.bf16.msra.mxu0 %v9112_v42  ;;  %v479_v42 = vld [vmem:[%s14895_s20 + $0xcf8] sm:$0xff]  ;;  %v9178_v47 = vpack.c.bf16 %v430_v40, %v382_v39 }
  0x95   :  { %9116 = vmatprep.subr.msk.bf16.mxu0 %vm10274_vm2, %v9114_v45  ;;  %v476_v45 = vld [vmem:[%s14895_s20 + $0xce0] sm:$0xff]  ;;  %v9180_v50 = vpack.c.bf16 %v527_v43, %v479_v42 }
  0x96   :  { %9135 = vmatpush1.bf16.msra.mxu1 %v9134_v48  ;;  %v97_v48 = vld [vmem:[%s14895_s20 + $0x108] sm:$0xff]  ;;  %v9161_v53 = vpack.c.bf16 %v524_v46, %v476_v45 }
  0x97   :  { %9138 = vmatprep.subr.msk.bf16.mxu1 %vm10274_vm2, %v9136_v51  ;;  %v478_v51 = vld [vmem:[%s14895_s20 + $0xcf0] sm:$0xff]  ;;  %v9186_v57 = vpack.c.bf16 %v145_v49, %v97_v48 }
  0x98   :  { %9119 = vmatpush1.bf16.msk.msra.mxu0 %vm10274_vm2, %v9117_v54  ;;  %v99_v54 = vld [vmem:[%s14895_s20 + $0x118] sm:$0xff]  ;;  %v9183_v60 = vpack.c.bf16 %v526_v52, %v478_v51 }
  0x99   :  { %9143 = vmatprep.subr.bf16.mxu0 %v9142_v58  ;;  %v96_v58 = vld [vmem:[%s14895_s20 + $0x100] sm:$0xff]  ;;  %v9208_v63 = vpack.c.bf16 %v147_v56, %v99_v54 }
  0x9a   :  { %9141 = vmatpush1.bf16.msk.msra.mxu1 %vm10274_vm2, %v9139_v61  ;;  %v193_v61 = vld [vmem:[%s14895_s20 + $0x408] sm:$0xff]  ;;  %v9188_v2 = vpack.c.bf16 %v144_v59, %v96_v58 }
  0x9b   :  { %7849 = vmatmul.mubr.msk.f32.vlgmr.msra.gmra.mrb[12].mxu0 %vm544_vm3, %v11152_v14  ;;  %9165 = vmatprep.subr.bf16.mxu1 %v9164_v0  ;;  %v98_v0 = vld [vmem:[%s14895_s20 + $0x110] sm:$0xff]  ;;  %v9190_v5 = vpack.c.bf16 %v241_v62, %v193_v61 }
  0x9c   :  { %9145 = vmatpush1.bf16.msra.mxu0 %v9144_v3  ;;  %1751 = vmatprep.mubr.f32.mxu0 %v14849_v7  ;;  %v195_v3 = vld [vmem:[%s14895_s20 + $0x418] sm:$0xff]  ;;  %v9210_v9 = vpack.c.bf16 %v146_v1, %v98_v0 }
  0x9d   :  { %7852 = vmatmul.mubr.msk.f32.vlgmr.msra.gmra.mrb[12].mxu1 %vm544_vm3, %v11152_v14  ;;  %9147 = vmatprep.subr.bf16.mxu0 %v9146_v6  ;;  %v192_v6 = vld [vmem:[%s14895_s20 + $0x400] sm:$0xff] }
  0x9e   :  { %9167 = vmatpush1.bf16.msra.mxu1 %v9166_v10  ;;  %1822 = vmatprep.mubr.f32.mxu1 %v14849_v7  ;;  %v289_v10 = vld [vmem:[%s14895_s20 + $0x708] sm:$0xff] }
  0x9f   :  { %9169 = vmatprep.subr.bf16.mxu1 %v9168_v15 }
  0xa0   :  { %9149 = vmatpush1.bf16.msra.mxu0 %v9148_v18 }
  0xa1   :  { %9151 = vmatprep.subr.bf16.mxu0 %v9150_v21 }
  0xa2   :  { %9171 = vmatpush1.bf16.msra.mxu1 %v9170_v24 }
  0xa3   :  { %9173 = vmatprep.subr.bf16.mxu1 %v9172_v11 }
  0xa4   :  { %9153 = vmatpush1.bf16.msra.mxu0 %v9152_v29 }
  0xa5   :  { %9155 = vmatprep.subr.bf16.mxu0 %v9154_v32 }
  0xa6   :  { %9175 = vmatpush1.bf16.msra.mxu1 %v9174_v35 }
  0xa7   :  { %9177 = vmatprep.subr.bf16.mxu1 %v9176_v38 }
  0xa8   :  { %9157 = vmatpush1.bf16.msra.mxu0 %v9156_v41 }
  0xa9   :  { %9160 = vmatprep.subr.msk.bf16.mxu0 %vm10274_vm2, %v9158_v44 }
  0xaa   :  { %9179 = vmatpush1.bf16.msra.mxu1 %v9178_v47 }
  0xab   :  { %9182 = vmatprep.subr.msk.bf16.mxu1 %vm10274_vm2, %v9180_v50 }
  0xac   :  { %9163 = vmatpush1.bf16.msk.msra.mxu0 %vm10274_vm2, %v9161_v53 }
  0xad   :  { %9187 = vmatprep.subr.bf16.mxu0 %v9186_v57 }
  0xae   :  { %9185 = vmatpush1.bf16.msk.msra.mxu1 %vm10274_vm2, %v9183_v60 }
  0xaf   :  { %24 = vsyncpa [#allocation7], 0  ;;  %7855 = vmatmul.mubr.msk.f32.vlgmr.msra.gmra.mrb[14].mxu0 %vm544_vm3, %v11152_v14  ;;  %9209 = vmatprep.subr.bf16.mxu1 %v9208_v63  ;;  %v9212_v13 = vpack.c.bf16 %v243_v4, %v195_v3  ;;  %v194_v15 = vld [vmem:[%s14895_s20 + $0x410] sm:$0xff]  ;;  %v9192_v17 = vpack.c.bf16 %v240_v8, %v192_v6  ;;  %v291_v18 = vld [vmem:[%s14895_s20 + $0x718] sm:$0xff]  ;;  %v9194_v20 = vpack.c.bf16 %v337_v12, %v289_v10  ;;  %s14900_s22 = sld [smem:[#allocation28_spill]]  ;;  %vm14885_vm4 = vcmask 277504  }
  0xb0   :  { %v242_v16 = vld [vmem:[%s14895_s20 + $0x590] sm:$0xff]  ;;  %9189 = vmatpush1.bf16.msra.mxu0 %v9188_v2  ;;  %v339_v19 = vld [vmem:[%s14895_s20 + $0x898] sm:$0xff]  ;;  %1893 = vmatprep.mubr.f32.mxu0 %v14849_v7  ;;  %v288_v21 = vld [vmem:[%s14895_s20 + $0x700] sm:$0xff]  ;;  %s14918_s28 = sld [smem:[#allocation29_spill]]  ;;  %vm14888_vm5 = vcmask 932864   ;;  %s10012_s0 = smov 14  }
  0xb1   :  { %7858 = vmatmul.mubr.msk.f32.vlgmr.msra.gmra.mrb[14].mxu1 %vm544_vm3, %v11152_v14  ;;  %9191 = vmatprep.subr.bf16.mxu0 %v9190_v5  ;;  %v336_v22 = vld [vmem:[%s14895_s20 + $0x880] sm:$0xff]  ;;  %v9214_v23 = vpack.c.bf16 %v242_v16, %v194_v15  ;;  %v385_v24 = vld [vmem:[%s14895_s20 + $0xa08] sm:$0xff]  ;;  %v9216_v26 = vpack.c.bf16 %v339_v19, %v291_v18  ;;  %v290_v11 = vld [vmem:[%s14895_s20 + $0x710] sm:$0xff]  ;;  %s10013_s30 = smov 28   ;;  %s10014_s21 = smov 56  }
  0xb2   :  { %9211 = vmatpush1.bf16.msra.mxu1 %v9210_v9  ;;  %v433_v25 = vld [vmem:[%s14895_s20 + $0xb88] sm:$0xff]  ;;  %1964 = vmatprep.mubr.f32.mxu1 %v14849_v7  ;;  %v338_v27 = vld [vmem:[%s14895_s20 + $0x890] sm:$0xff]  ;;  %v9196_v28 = vpack.c.bf16 %v336_v22, %v288_v21  ;;  %v387_v29 = vld [vmem:[%s14895_s20 + $0xa18] sm:$0xff]  ;;  %s10015_s1 = smov 70   ;;  %s10016_s2 = smov 42  }
  0xb3   :  { %9213 = vmatprep.subr.bf16.mxu1 %v9212_v13  ;;  %v435_v30 = vld [vmem:[%s14895_s20 + $0xb98] sm:$0xff]  ;;  %v9198_v31 = vpack.c.bf16 %v433_v25, %v385_v24  ;;  %v384_v32 = vld [vmem:[%s14895_s20 + $0xa00] sm:$0xff]  ;;  %v9218_v34 = vpack.c.bf16 %v338_v27, %v290_v11  ;;  %v481_v35 = vld [vmem:[%s14895_s20 + $0xd08] sm:$0xff]  ;;  %s10017_s23 = smov 84   ;;  %s14870_s3 = smov 126  }
  0xb4   :  { %9193 = vmatpush1.bf16.msra.mxu0 %v9192_v17  ;;  %v432_v33 = vld [vmem:[%s14895_s20 + $0xb80] sm:$0xff]  ;;  %v529_v36 = vld [vmem:[%s14895_s20 + $0xe88] sm:$0x7]  ;;  %v9220_v37 = vpack.c.bf16 %v435_v30, %v387_v29  ;;  %v386_v38 = vld [vmem:[%s14895_s20 + $0xa10] sm:$0xff]  ;;  %s10021_s26 = smov 12   ;;  %s10023_s29 = smov 40  }
  0xb5   :  { %9195 = vmatprep.subr.bf16.mxu0 %v9194_v20  ;;  %v434_v39 = vld [vmem:[%s14895_s20 + $0xb90] sm:$0xff]  ;;  %v9200_v40 = vpack.c.bf16 %v432_v33, %v384_v32  ;;  %v483_v41 = vld [vmem:[%s14895_s20 + $0xd18] sm:$0xff]  ;;  %v9202_v43 = vpack.c.bf16 %v529_v36, %v481_v35  ;;  %v480_v44 = vld [vmem:[%s14895_s20 + $0xd00] sm:$0xff]  ;;  %s10026_s25 = smov 82   ;;  %s10029_s27 = smov 10  }
  0xb6   :  { %9215 = vmatpush1.bf16.msra.mxu1 %v9214_v23  ;;  %v531_v42 = vld [vmem:[%s14895_s20 + $0xe98] sm:$0x7]  ;;  %v528_v45 = vld [vmem:[%s14895_s20 + $0xe80] sm:$0x7]  ;;  %v9222_v46 = vpack.c.bf16 %v434_v39, %v386_v38  ;;  %v101_v47 = vld [vmem:[%s14895_s20 + $0x128] sm:$0xff]  ;;  %s14874_s24 = smov 38  }
  0xb7   :  { %9217 = vmatprep.subr.bf16.mxu1 %v9216_v26  ;;  %v149_v48 = vld [vmem:[%s14895_s20 + $0x2a8] sm:$0xff]  ;;  %v9224_v49 = vpack.c.bf16 %v531_v42, %v483_v41  ;;  %v482_v50 = vld [vmem:[%s14895_s20 + $0xd10] sm:$0xff]  ;;  %v9205_v52 = vpack.c.bf16 %v528_v45, %v480_v44  ;;  %v103_v53 = vld [vmem:[%s14895_s20 + $0x138] sm:$0xff] }
  0xb8   :  { %9197 = vmatpush1.bf16.msra.mxu0 %v9196_v28  ;;  %v530_v51 = vld [vmem:[%s14895_s20 + $0xe90] sm:$0x7]  ;;  %v151_v54 = vld [vmem:[%s14895_s20 + $0x2b8] sm:$0xff]  ;;  %v9230_v56 = vpack.c.bf16 %v149_v48, %v101_v47  ;;  %v100_v57 = vld [vmem:[%s14895_s20 + $0x120] sm:$0xff] }
  0xb9   :  { %9199 = vmatprep.subr.bf16.mxu0 %v9198_v31  ;;  %v148_v58 = vld [vmem:[%s14895_s20 + $0x2a0] sm:$0xff]  ;;  %v9227_v59 = vpack.c.bf16 %v530_v51, %v482_v50  ;;  %v197_v60 = vld [vmem:[%s14895_s20 + $0x428] sm:$0xff]  ;;  %v9252_v62 = vpack.c.bf16 %v151_v54, %v103_v53  ;;  %v102_v63 = vld [vmem:[%s14895_s20 + $0x130] sm:$0xff] }
  0xba   :  { %9219 = vmatpush1.bf16.msra.mxu1 %v9218_v34  ;;  %v245_v61 = vld [vmem:[%s14895_s20 + $0x5a8] sm:$0xff]  ;;  %v150_v0 = vld [vmem:[%s14895_s20 + $0x2b0] sm:$0xff]  ;;  %v9232_v1 = vpack.c.bf16 %v148_v58, %v100_v57  ;;  %v199_v2 = vld [vmem:[%s14895_s20 + $0x438] sm:$0xff] }
  0xbb   :  { %9221 = vmatprep.subr.bf16.mxu1 %v9220_v37  ;;  %v247_v3 = vld [vmem:[%s14895_s20 + $0x5b8] sm:$0xff]  ;;  %v9234_v4 = vpack.c.bf16 %v245_v61, %v197_v60  ;;  %v196_v5 = vld [vmem:[%s14895_s20 + $0x420] sm:$0xff]  ;;  %v9254_v8 = vpack.c.bf16 %v150_v0, %v102_v63  ;;  %v293_v9 = vld [vmem:[%s14895_s20 + $0x728] sm:$0xff] }
  0xbc   :  { %9201 = vmatpush1.bf16.msra.mxu0 %v9200_v40  ;;  %v244_v6 = vld [vmem:[%s14895_s20 + $0x5a0] sm:$0xff]  ;;  %v341_v10 = vld [vmem:[%s14895_s20 + $0x8a8] sm:$0xff]  ;;  %v9256_v12 = vpack.c.bf16 %v247_v3, %v199_v2  ;;  %v198_v13 = vld [vmem:[%s14895_s20 + $0x430] sm:$0xff] }
  0xbd   :  { %9204 = vmatprep.subr.msk.bf16.mxu0 %vm10274_vm2, %v9202_v43  ;;  %v246_v15 = vld [vmem:[%s14895_s20 + $0x5b0] sm:$0xff]  ;;  %v9236_v16 = vpack.c.bf16 %v244_v6, %v196_v5  ;;  %v295_v17 = vld [vmem:[%s14895_s20 + $0x738] sm:$0xff]  ;;  %v9238_v19 = vpack.c.bf16 %v341_v10, %v293_v9  ;;  %v292_v20 = vld [vmem:[%s14895_s20 + $0x720] sm:$0xff] }
  0xbe   :  { %9223 = vmatpush1.bf16.msra.mxu1 %v9222_v46  ;;  %v343_v18 = vld [vmem:[%s14895_s20 + $0x8b8] sm:$0xff]  ;;  %v340_v21 = vld [vmem:[%s14895_s20 + $0x8a0] sm:$0xff]  ;;  %v9258_v22 = vpack.c.bf16 %v246_v15, %v198_v13  ;;  %v389_v23 = vld [vmem:[%s14895_s20 + $0xa28] sm:$0xff] }
  0xbf   :  { %9226 = vmatprep.subr.msk.bf16.mxu1 %vm10274_vm2, %v9224_v49  ;;  %v437_v24 = vld [vmem:[%s14895_s20 + $0xba8] sm:$0xff]  ;;  %v9260_v25 = vpack.c.bf16 %v343_v18, %v295_v17  ;;  %v294_v26 = vld [vmem:[%s14895_s20 + $0x730] sm:$0xff]  ;;  %v9240_v27 = vpack.c.bf16 %v340_v21, %v292_v20  ;;  %v391_v28 = vld [vmem:[%s14895_s20 + $0xa38] sm:$0xff] }
  0xc0   :  { %9207 = vmatpush1.bf16.msk.msra.mxu0 %vm10274_vm2, %v9205_v52  ;;  %v342_v11 = vld [vmem:[%s14895_s20 + $0x8b0] sm:$0xff]  ;;  %v439_v29 = vld [vmem:[%s14895_s20 + $0xbb8] sm:$0xff]  ;;  %v9242_v30 = vpack.c.bf16 %v437_v24, %v389_v23  ;;  %v388_v31 = vld [vmem:[%s14895_s20 + $0xa20] sm:$0xff] }
  0xc1   :  { %9231 = vmatprep.subr.bf16.mxu0 %v9230_v56  ;;  %v436_v32 = vld [vmem:[%s14895_s20 + $0xba0] sm:$0xff]  ;;  %v9262_v33 = vpack.c.bf16 %v342_v11, %v294_v26  ;;  %v485_v34 = vld [vmem:[%s14895_s20 + $0xd28] sm:$0xff]  ;;  %v9264_v36 = vpack.c.bf16 %v439_v29, %v391_v28  ;;  %v390_v37 = vld [vmem:[%s14895_s20 + $0xa30] sm:$0xff] }
  0xc2   :  { %9229 = vmatpush1.bf16.msk.msra.mxu1 %vm10274_vm2, %v9227_v59  ;;  %v533_v35 = vld [vmem:[%s14895_s20 + $0xea8] sm:$0x7]  ;;  %v438_v38 = vld [vmem:[%s14895_s20 + $0xbb0] sm:$0xff]  ;;  %v9244_v39 = vpack.c.bf16 %v436_v32, %v388_v31  ;;  %v487_v40 = vld [vmem:[%s14895_s20 + $0xd38] sm:$0xff] }
  0xc3   :  { %7861 = vmatmul.mubr.msk.f32.vlgmr.msra.gmra.mrb[16].mxu0 %vm544_vm3, %v11152_v14  ;;  %9253 = vmatprep.subr.bf16.mxu1 %v9252_v62  ;;  %v535_v41 = vld [vmem:[%s14895_s20 + $0xeb8] sm:$0x7]  ;;  %v9246_v42 = vpack.c.bf16 %v533_v35, %v485_v34  ;;  %v484_v43 = vld [vmem:[%s14895_s20 + $0xd20] sm:$0xff]  ;;  %v9266_v45 = vpack.c.bf16 %v438_v38, %v390_v37  ;;  %v105_v46 = vld [vmem:[%s14895_s20 + $0x148] sm:$0xff] }
  0xc4   :  { %9233 = vmatpush1.bf16.msra.mxu0 %v9232_v1  ;;  %2035 = vmatprep.mubr.f32.mxu0 %v14849_v7  ;;  %v532_v44 = vld [vmem:[%s14895_s20 + $0xea0] sm:$0x7]  ;;  %v153_v47 = vld [vmem:[%s14895_s20 + $0x2c8] sm:$0xff]  ;;  %v9268_v48 = vpack.c.bf16 %v535_v41, %v487_v40  ;;  %v486_v49 = vld [vmem:[%s14895_s20 + $0xd30] sm:$0xff] }
  0xc5   :  { %7864 = vmatmul.mubr.msk.f32.vlgmr.msra.gmra.mrb[16].mxu1 %vm544_vm3, %v11152_v14  ;;  %9235 = vmatprep.subr.bf16.mxu0 %v9234_v4  ;;  %v534_v50 = vld [vmem:[%s14895_s20 + $0xeb0] sm:$0x7]  ;;  %v9249_v51 = vpack.c.bf16 %v532_v44, %v484_v43  ;;  %v107_v52 = vld [vmem:[%s14895_s20 + $0x158] sm:$0xff]  ;;  %v9274_v54 = vpack.c.bf16 %v153_v47, %v105_v46  ;;  %v104_v56 = vld [vmem:[%s14895_s20 + $0x140] sm:$0xff] }
  0xc6   :  { %9255 = vmatpush1.bf16.msra.mxu1 %v9254_v8  ;;  %2106 = vmatprep.mubr.f32.mxu1 %v14849_v7  ;;  %v155_v53 = vld [vmem:[%s14895_s20 + $0x2d8] sm:$0xff]  ;;  %v152_v57 = vld [vmem:[%s14895_s20 + $0x2c0] sm:$0xff]  ;;  %v9271_v58 = vpack.c.bf16 %v534_v50, %v486_v49  ;;  %v201_v59 = vld [vmem:[%s14895_s20 + $0x448] sm:$0xff] }
  0xc7   :  { %9257 = vmatprep.subr.bf16.mxu1 %v9256_v12  ;;  %v249_v60 = vld [vmem:[%s14895_s20 + $0x5c8] sm:$0xff]  ;;  %v9296_v61 = vpack.c.bf16 %v155_v53, %v107_v52  ;;  %v106_v62 = vld [vmem:[%s14895_s20 + $0x150] sm:$0xff]  ;;  %v9276_v0 = vpack.c.bf16 %v152_v57, %v104_v56  ;;  %v203_v1 = vld [vmem:[%s14895_s20 + $0x458] sm:$0xff] }
  0xc8   :  { %9237 = vmatpush1.bf16.msra.mxu0 %v9236_v16  ;;  %v154_v63 = vld [vmem:[%s14895_s20 + $0x2d0] sm:$0xff]  ;;  %v251_v2 = vld [vmem:[%s14895_s20 + $0x5d8] sm:$0xff]  ;;  %v9278_v3 = vpack.c.bf16 %v249_v60, %v201_v59  ;;  %v200_v4 = vld [vmem:[%s14895_s20 + $0x440] sm:$0xff] }
  0xc9   :  { %9239 = vmatprep.subr.bf16.mxu0 %v9238_v19  ;;  %v248_v5 = vld [vmem:[%s14895_s20 + $0x5c0] sm:$0xff]  ;;  %v9298_v6 = vpack.c.bf16 %v154_v63, %v106_v62  ;;  %v297_v8 = vld [vmem:[%s14895_s20 + $0x748] sm:$0xff]  ;;  %v9300_v10 = vpack.c.bf16 %v251_v2, %v203_v1  ;;  %v202_v12 = vld [vmem:[%s14895_s20 + $0x450] sm:$0xff]  ;;  %v2409_v63 = vlaneseq }
  0xca   :  { %9259 = vmatpush1.bf16.msra.mxu1 %v9258_v22  ;;  %v345_v9 = vld [vmem:[%s14895_s20 + $0x8c8] sm:$0xff]  ;;  %v250_v13 = vld [vmem:[%s14895_s20 + $0x5d0] sm:$0xff]  ;;  %v9280_v15 = vpack.c.bf16 %v248_v5, %v200_v4  ;;  %v299_v16 = vld [vmem:[%s14895_s20 + $0x758] sm:$0xff] }
  0xcb   :  { %9261 = vmatprep.subr.bf16.mxu1 %v9260_v25  ;;  %v347_v17 = vld [vmem:[%s14895_s20 + $0x8d8] sm:$0xff]  ;;  %v9282_v18 = vpack.c.bf16 %v345_v9, %v297_v8  ;;  %v296_v19 = vld [vmem:[%s14895_s20 + $0x740] sm:$0xff]  ;;  %v9302_v21 = vpack.c.bf16 %v250_v13, %v202_v12  ;;  %v393_v22 = vld [vmem:[%s14895_s20 + $0xa48] sm:$0xff] }
  0xcc   :  { %9241 = vmatpush1.bf16.msra.mxu0 %v9240_v27  ;;  %v344_v20 = vld [vmem:[%s14895_s20 + $0x8c0] sm:$0xff]  ;;  %v441_v23 = vld [vmem:[%s14895_s20 + $0xbc8] sm:$0xff]  ;;  %v9304_v24 = vpack.c.bf16 %v347_v17, %v299_v16  ;;  %v298_v25 = vld [vmem:[%s14895_s20 + $0x750] sm:$0xff] }
  0xcd   :  { %9243 = vmatprep.subr.bf16.mxu0 %v9242_v30  ;;  %v346_v26 = vld [vmem:[%s14895_s20 + $0x8d0] sm:$0xff]  ;;  %v9284_v11 = vpack.c.bf16 %v344_v20, %v296_v19  ;;  %v395_v27 = vld [vmem:[%s14895_s20 + $0xa58] sm:$0xff]  ;;  %v9286_v29 = vpack.c.bf16 %v441_v23, %v393_v22  ;;  %v392_v30 = vld [vmem:[%s14895_s20 + $0xa40] sm:$0xff] }
  0xce   :  { %9263 = vmatpush1.bf16.msra.mxu1 %v9262_v33  ;;  %v443_v28 = vld [vmem:[%s14895_s20 + $0xbd8] sm:$0xff]  ;;  %v440_v31 = vld [vmem:[%s14895_s20 + $0xbc0] sm:$0xff]  ;;  %v9306_v32 = vpack.c.bf16 %v346_v26, %v298_v25  ;;  %v489_v33 = vld [vmem:[%s14895_s20 + $0xd48] sm:$0xff] }
  0xcf   :  { %9265 = vmatprep.subr.bf16.mxu1 %v9264_v36  ;;  %v537_v34 = vld [vmem:[%s14895_s20 + $0xec8] sm:$0x7]  ;;  %v9308_v35 = vpack.c.bf16 %v443_v28, %v395_v27  ;;  %v394_v36 = vld [vmem:[%s14895_s20 + $0xa50] sm:$0xff]  ;;  %v9288_v38 = vpack.c.bf16 %v440_v31, %v392_v30  ;;  %v539_v40 = vld [vmem:[%s14895_s20 + $0xed8] sm:$0x7] }
  0xd0   :  { %9245 = vmatpush1.bf16.msra.mxu0 %v9244_v39  ;;  %v442_v37 = vld [vmem:[%s14895_s20 + $0xbd0] sm:$0xff]  ;;  %v491_v39 = vld [vmem:[%s14895_s20 + $0xd58] sm:$0xff]  ;;  %v9290_v41 = vpack.c.bf16 %v537_v34, %v489_v33  ;;  %v536_v43 = vld [vmem:[%s14895_s20 + $0xec0] sm:$0x7] }
  0xd1   :  { %9248 = vmatprep.subr.msk.bf16.mxu0 %vm10274_vm2, %v9246_v42  ;;  %v488_v42 = vld [vmem:[%s14895_s20 + $0xd40] sm:$0xff]  ;;  %v9310_v44 = vpack.c.bf16 %v442_v37, %v394_v36  ;;  %v157_v46 = vld [vmem:[%s14895_s20 + $0x2e8] sm:$0xff]  ;;  %v9312_v47 = vpack.c.bf16 %v539_v40, %v491_v39  ;;  %v538_v49 = vld [vmem:[%s14895_s20 + $0xed0] sm:$0x7] }
  0xd2   :  { %9267 = vmatpush1.bf16.msra.mxu1 %v9266_v45  ;;  %v109_v45 = vld [vmem:[%s14895_s20 + $0x168] sm:$0xff]  ;;  %v9293_v50 = vpack.c.bf16 %v536_v43, %v488_v42  ;;  %v159_v52 = vld [vmem:[%s14895_s20 + $0x2f8] sm:$0xff]  ;;  %v156_v56 = vld [vmem:[%s14895_s20 + $0x2e0] sm:$0xff] }
  0xd3   :  { %9270 = vmatprep.subr.msk.bf16.mxu1 %vm10274_vm2, %v9268_v48  ;;  %v490_v48 = vld [vmem:[%s14895_s20 + $0xd50] sm:$0xff]  ;;  %v9318_v53 = vpack.c.bf16 %v157_v46, %v109_v45  ;;  %v253_v59 = vld [vmem:[%s14895_s20 + $0x5e8] sm:$0xff]  ;;  %v207_v1 = vld [vmem:[%s14895_s20 + $0x478] sm:$0xff] }
  0xd4   :  { %9251 = vmatpush1.bf16.msk.msra.mxu0 %vm10274_vm2, %v9249_v51  ;;  %v111_v51 = vld [vmem:[%s14895_s20 + $0x178] sm:$0xff]  ;;  %v9315_v57 = vpack.c.bf16 %v538_v49, %v490_v48  ;;  %v158_v62 = vld [vmem:[%s14895_s20 + $0x2f0] sm:$0xff]  ;;  %v204_v4 = vld [vmem:[%s14895_s20 + $0x460] sm:$0xff] }
  0xd5   :  { %9275 = vmatprep.subr.bf16.mxu0 %v9274_v54  ;;  %v108_v54 = vld [vmem:[%s14895_s20 + $0x160] sm:$0xff]  ;;  %v9340_v60 = vpack.c.bf16 %v159_v52, %v111_v51  ;;  %v255_v2 = vld [vmem:[%s14895_s20 + $0x5f8] sm:$0xff]  ;;  %v301_v8 = vld [vmem:[%s14895_s20 + $0x768] sm:$0xff] }
  0xd6   :  { %9273 = vmatpush1.bf16.msk.msra.mxu1 %vm10274_vm2, %v9271_v58  ;;  %v205_v58 = vld [vmem:[%s14895_s20 + $0x468] sm:$0xff]  ;;  %v252_v5 = vld [vmem:[%s14895_s20 + $0x5e0] sm:$0xff]  ;;  %v206_v12 = vld [vmem:[%s14895_s20 + $0x470] sm:$0xff] }
  0xd7   :  { %7867 = vmatmul.mubr.msk.f32.vlgmr.msra.gmra.mrb[18].mxu0 %vm544_vm3, %v11152_v14  ;;  %9297 = vmatprep.subr.bf16.mxu1 %v9296_v61  ;;  %v110_v61 = vld [vmem:[%s14895_s20 + $0x170] sm:$0xff]  ;;  %v349_v9 = vld [vmem:[%s14895_s20 + $0x8e8] sm:$0xff]  ;;  %v9324_v16 = vpack.c.bf16 %v252_v5, %v204_v4  ;;  %v303_v17 = vld [vmem:[%s14895_s20 + $0x778] sm:$0xff] }
  0xd8   :  { %9277 = vmatpush1.bf16.msra.mxu0 %v9276_v0  ;;  %2177 = vmatprep.mubr.f32.mxu0 %v14849_v7  ;;  %v9320_v0 = vpack.c.bf16 %v156_v56, %v108_v54  ;;  %v254_v13 = vld [vmem:[%s14895_s20 + $0x5f0] sm:$0xff]  ;;  %v9326_v19 = vpack.c.bf16 %v349_v9, %v301_v8  ;;  %v300_v20 = vld [vmem:[%s14895_s20 + $0x760] sm:$0xff]  ;;  %v397_v23 = vld [vmem:[%s14895_s20 + $0xa68] sm:$0xff] }
  0xd9   :  { %7870 = vmatmul.mubr.msk.f32.vlgmr.msra.gmra.mrb[18].mxu1 %vm544_vm3, %v11152_v14  ;;  %9279 = vmatprep.subr.bf16.mxu0 %v9278_v3  ;;  %v9322_v3 = vpack.c.bf16 %v253_v59, %v205_v58  ;;  %v9346_v22 = vpack.c.bf16 %v254_v13, %v206_v12  ;;  %v350_v27 = vld [vmem:[%s14895_s20 + $0x8f0] sm:$0xff]  ;;  %v399_v31 = vld [vmem:[%s14895_s20 + $0xa78] sm:$0xff]  ;;  %v396_v34 = vld [vmem:[%s14895_s20 + $0xa60] sm:$0xff] }
  0xda   :  { %9299 = vmatpush1.bf16.msra.mxu1 %v9298_v6  ;;  %2248 = vmatprep.mubr.f32.mxu1 %v14849_v7  ;;  %v9342_v6 = vpack.c.bf16 %v158_v62, %v110_v61  ;;  %v493_v39 = vld [vmem:[%s14895_s20 + $0xd68] sm:$0xff]  ;;  %v398_v43 = vld [vmem:[%s14895_s20 + $0xa70] sm:$0xff]  ;;  %v543_v48 = vld [vmem:[%s14895_s20 + $0xef8] sm:$0x7] }
  0xdb   :  { %9301 = vmatprep.subr.bf16.mxu1 %v9300_v10  ;;  %v9344_v10 = vpack.c.bf16 %v255_v2, %v207_v1  ;;  %v541_v40 = vld [vmem:[%s14895_s20 + $0xee8] sm:$0x7]  ;;  %v492_v51 = vld [vmem:[%s14895_s20 + $0xd60] sm:$0xff]  ;;  %v542_v58 = vld [vmem:[%s14895_s20 + $0xef0] sm:$0x7] }
  0xdc   :  { %9281 = vmatpush1.bf16.msra.mxu0 %v9280_v15  ;;  %v11698_v15 = vshrl.u32 %v2409_v63, 7  ;;  %v540_v52 = vld [vmem:[%s14895_s20 + $0xee0] sm:$0x7] }
  0xdd   :  { %9283 = vmatprep.subr.bf16.mxu0 %v9282_v18  ;;  %v351_v18 = vld [vmem:[%s14895_s20 + $0x8f8] sm:$0xff]  ;;  %v9337_v2 = vpack.c.bf16 %v540_v52, %v492_v51 }
  0xde   :  { %9303 = vmatpush1.bf16.msra.mxu1 %v9302_v21  ;;  %14899 = vst [vmem:[#allocation9_spill] sm:$0xff] %v11698_v15  ;;  %v348_v21 = vld [vmem:[%s14895_s20 + $0x8e0] sm:$0xff]  ;;  %v11723_v25 = vsub.s32 0, %v11698_v15  ;;  %v9348_v26 = vpack.c.bf16 %v351_v18, %v303_v17  ;;  %v11737_v30 = vsub.s32 1, %v11698_v15  ;;  %v11752_v36 = vsub.s32 2, %v11698_v15 }
  0xdf   :  { %9305 = vmatprep.subr.bf16.mxu1 %v9304_v24  ;;  %v445_v24 = vld [vmem:[%s14895_s20 + $0xbe8] sm:$0xff]  ;;  %v9328_v28 = vpack.c.bf16 %v348_v21, %v300_v20 }
  0xe0   :  { %9285 = vmatpush1.bf16.msra.mxu0 %v9284_v11  ;;  %v302_v11 = vld [vmem:[%s14895_s20 + $0x770] sm:$0xff]  ;;  %v9330_v33 = vpack.c.bf16 %v445_v24, %v397_v23  ;;  %v11828_v23 = vsub.s32 4, %v11698_v15  ;;  %v11831_v24 = vsub.s32 5, %v11698_v15 }
  0xe1   :  { %9287 = vmatprep.subr.bf16.mxu0 %v9286_v29  ;;  %v11734_v29 = vld [vmem:[%s14900_s22] sm:$0xff]  ;;  %v9350_v37 = vpack.c.bf16 %v350_v27, %v302_v11  ;;  %v11839_v11 = vsub.s32 7, %v11698_v15 }
  0xe2   :  { %9307 = vmatpush1.bf16.msra.mxu1 %v9306_v32  ;;  %v447_v32 = vld [vmem:[%s14895_s20 + $0xbf8] sm:$0xff]  ;;  %v2416_v45 = vrot.slane %v11734_v29, %v11737_v30  ;;  %v2420_v49 = vrot.slane %v11734_v29, %v11752_v36  ;;  %v2428_v55 = vrot.slane %v11734_v29, %v11828_v23  ;;  %v2432_v27 = vrot.slane %v11734_v29, %v11831_v24 }
  0xe3   :  { %9309 = vmatprep.subr.bf16.mxu1 %v9308_v35  ;;  %v444_v35 = vld [vmem:[%s14895_s20 + $0xbe0] sm:$0xff]  ;;  %v9352_v42 = vpack.c.bf16 %v447_v32, %v399_v31 }
  0xe4   :  { %9289 = vmatpush1.bf16.msra.mxu0 %v9288_v38  ;;  %v11755_v38 = vsub.s32 3, %v11698_v15  ;;  %v9332_v46 = vpack.c.bf16 %v444_v35, %v396_v34  ;;  %v2440_v34 = vrot.slane %v11734_v29, %v11839_v11 }
  0xe5   :  { %9292 = vmatprep.subr.msk.bf16.mxu0 %vm10274_vm2, %v9290_v41  ;;  %v2412_v41 = vrot.slane %v11734_v29, %v11723_v25 }
  0xe6   :  { %9311 = vmatpush1.bf16.msra.mxu1 %v9310_v44  ;;  %v446_v44 = vld [vmem:[%s14895_s20 + $0xbf0] sm:$0xff]  ;;  %v2424_v54 = vrot.slane %v11734_v29, %v11755_v38 }
  0xe7   :  { %9314 = vmatprep.subr.msk.bf16.mxu1 %vm10274_vm2, %v9312_v47  ;;  %v495_v47 = vld [vmem:[%s14895_s20 + $0xd78] sm:$0xff]  ;;  %v9354_v56 = vpack.c.bf16 %v446_v44, %v398_v43 }
  0xe8   :  { %9295 = vmatpush1.bf16.msk.msra.mxu0 %vm10274_vm2, %v9293_v50  ;;  %v9334_v50 = vpack.c.bf16 %v541_v40, %v493_v39  ;;  %v9356_v62 = vpack.c.bf16 %v543_v48, %v495_v47 }
  0xe9   :  { %9319 = vmatprep.subr.bf16.mxu0 %v9318_v53 }
  0xea   :  { %9317 = vmatpush1.bf16.msk.msra.mxu1 %vm10274_vm2, %v9315_v57  ;;  %v494_v57 = vld [vmem:[%s14895_s20 + $0xd70] sm:$0xff]  ;;  %s10022_s20 = smov 26  }
  0xeb   :  { %7873 = vmatmul.mubr.msk.f32.vlgmr.msra.gmra.mrb[20].mxu0 %vm544_vm3, %v11152_v14  ;;  %9341 = vmatprep.subr.bf16.mxu1 %v9340_v60  ;;  %v9359_v8 = vpack.c.bf16 %v542_v58, %v494_v57  ;;  %v2398_v58 = vld [vmem:[%s14900_s22 + $0x8] sm:$0xff] }
  0xec   :  { %9321 = vmatpush1.bf16.msra.mxu0 %v9320_v0  ;;  %2319 = vmatprep.mubr.f32.mxu0 %v14849_v7 }
  0xed   :  { %7876 = vmatmul.mubr.msk.f32.vlgmr.msra.gmra.mrb[20].mxu1 %vm544_vm3, %v11152_v14  ;;  %9323 = vmatprep.subr.bf16.mxu0 %v9322_v3 }
  0xee   :  { %9343 = vmatpush1.bf16.msra.mxu1 %v9342_v6  ;;  %2390 = vmatprep.mubr.f32.mxu1 %v14849_v7  ;;  %v2401_v7 = vld [vmem:[%s14900_s22 + $0x20] sm:$0xff] }
  0xef   :  { %9345 = vmatprep.subr.bf16.mxu1 %v9344_v10 }
  0xf0   :  { %9325 = vmatpush1.bf16.msra.mxu0 %v9324_v16 }
  0xf1   :  { %9327 = vmatprep.subr.bf16.mxu0 %v9326_v19 }
  0xf2   :  { %9347 = vmatpush1.bf16.msra.mxu1 %v9346_v22 }
  0xf3   :  { %9349 = vmatprep.subr.bf16.mxu1 %v9348_v26  ;;  %v11834_v26 = vsub.s32 6, %v11698_v15 }
  0xf4   :  { %9329 = vmatpush1.bf16.msra.mxu0 %v9328_v28 }
  0xf5   :  { %9331 = vmatprep.subr.bf16.mxu0 %v9330_v33 }
  0xf6   :  { %v11787_v53 = vpop.f32.mrb[0].mxu0  ;;  %9351 = vmatpush1.bf16.msra.mxu1 %v9350_v37 }
  0xf7   :  { %v2649_v59 = vmul.f32 %v2412_v41, %v11787_v53  ;;  %v2748_v60 = vmul.f32 %v11787_v53, %v11787_v53  ;;  %v11800_v61 = vpop.f32.mrb[1].mxu0  ;;  %9353 = vmatprep.subr.bf16.mxu1 %v9352_v42 }
  0xf8   :  { %v2650_v63 = vmul.f32 %v2416_v45, %v11800_v61  ;;  %v2749_v0 = vmul.f32 %v11800_v61, %v11800_v61  ;;  %9333 = vmatpush1.bf16.msra.mxu0 %v9332_v46  ;;  %v11805_v1 = vpop.f32.mrb[0].mxu1 }
  0xf9   :  { %v2796_v3 = vmul.f32 %v2748_v60, %v2412_v41  ;;  %v2651_v4 = vmul.f32 %v2420_v49, %v11805_v1  ;;  %v2750_v5 = vmul.f32 %v11805_v1, %v11805_v1  ;;  %v11810_v6 = vpop.f32.mrb[1].mxu1  ;;  %9336 = vmatprep.subr.msk.bf16.mxu0 %vm10274_vm2, %v9334_v50  ;;  %v2448_v60 = vrot.slane %v2398_v58, %v11737_v30 }
  0xfa   :  { %v2697_v9 = vadd.f32 %v2650_v63, %v2649_v59  ;;  %v2797_v10 = vmul.f32 %v2749_v0, %v2416_v45  ;;  %v2652_v12 = vmul.f32 %v2424_v54, %v11810_v6  ;;  %v2751_v13 = vmul.f32 %v11810_v6, %v11810_v6  ;;  %9355 = vmatpush1.bf16.msra.mxu1 %v9354_v56 }
  0xfb   :  { %v2798_v16 = vmul.f32 %v2750_v5, %v2420_v49  ;;  %9358 = vmatprep.subr.msk.bf16.mxu1 %vm10274_vm2, %v9356_v62  ;;  %v2444_v59 = vrot.slane %v2398_v58, %v11723_v25  ;;  %v2452_v62 = vrot.slane %v2398_v58, %v11752_v36 }
  0xfc   :  { %v2844_v17 = vadd.f32 %v2797_v10, %v2796_v3  ;;  %v2698_v18 = vadd.f32 %v2697_v9, %v2651_v4  ;;  %v2799_v19 = vmul.f32 %v2751_v13, %v2424_v54  ;;  %9339 = vmatpush1.bf16.msk.msra.mxu0 %vm10274_vm2, %v9337_v2  ;;  %v2456_v4 = vrot.slane %v2398_v58, %v11755_v38 }
  0xfe   :  { %v2845_v20 = vadd.f32 %v2844_v17, %v2798_v16  ;;  %v2699_v21 = vadd.f32 %v2698_v18, %v2652_v12  ;;  %9361 = vmatpush1.bf16.msk.msra.mxu1 %vm10274_vm2, %v9359_v8 }
  0xff   :  { %7879 = vmatmul.mubr.msk.f32.vlgmr.msra.gmra.mrb[22].mxu0 %vm544_vm3, %v11152_v14 }
 0x100   :  { %v2846_v22 = vadd.f32 %v2845_v20, %v2799_v19 }
 0x101   :  { %7882 = vmatmul.mubr.msk.f32.vlgmr.msra.gmra.mrb[22].mxu1 %vm544_vm3, %v11152_v14  ;;  %v2436_v14 = vrot.slane %v11734_v29, %v11834_v26 }
 0x10a   :  { %v11845_v28 = vpop.f32.mrb[2].mxu0 }
 0x10b   :  { %v2653_v31 = vmul.f32 %v2428_v55, %v11845_v28  ;;  %v2752_v32 = vmul.f32 %v11845_v28, %v11845_v28  ;;  %v11850_v33 = vpop.f32.mrb[3].mxu0 }
 0x10c   :  { %v2654_v35 = vmul.f32 %v2432_v27, %v11850_v33  ;;  %v2753_v37 = vmul.f32 %v11850_v33, %v11850_v33  ;;  %v11857_v39 = vpop.f32.mrb[2].mxu1 }
 0x10d   :  { %v2700_v40 = vadd.f32 %v2699_v21, %v2653_v31  ;;  %v2800_v41 = vmul.f32 %v2752_v32, %v2428_v55  ;;  %v2655_v42 = vmul.f32 %v2436_v14, %v11857_v39  ;;  %v2754_v43 = vmul.f32 %v11857_v39, %v11857_v39  ;;  %v11862_v44 = vpop.f32.mrb[3].mxu1 }
 0x10e   :  { %v2801_v45 = vmul.f32 %v2753_v37, %v2432_v27  ;;  %v2755_v29 = vmul.f32 %v11862_v44, %v11862_v44  ;;  %v2656_v49 = vmul.f32 %v2440_v34, %v11862_v44  ;;  %v2460_v37 = vrot.slane %v2398_v58, %v11828_v23 }
 0x10f   :  { %v2847_v46 = vadd.f32 %v2846_v22, %v2800_v41  ;;  %v2701_v47 = vadd.f32 %v2700_v40, %v2654_v35  ;;  %v2802_v48 = vmul.f32 %v2754_v43, %v2436_v14  ;;  %v2464_v40 = vrot.slane %v2398_v58, %v11831_v24 }
 0x110   :  { %v2803_v52 = vmul.f32 %v2755_v29, %v2440_v34  ;;  %v2468_v41 = vrot.slane %v2398_v58, %v11834_v26 }
 0x111   :  { %v2848_v50 = vadd.f32 %v2847_v46, %v2801_v45  ;;  %v2702_v51 = vadd.f32 %v2701_v47, %v2655_v42  ;;  %v2472_v46 = vrot.slane %v2398_v58, %v11839_v11 }
 0x113   :  { %v2849_v54 = vadd.f32 %v2848_v50, %v2802_v48  ;;  %v2703_v56 = vadd.f32 %v2702_v51, %v2656_v49 }
 0x115   :  { %v2850_v57 = vadd.f32 %v2849_v54, %v2803_v52 }
 0x11e   :  { %v11873_v63 = vpop.f32.mrb[4].mxu0 }
 0x11f   :  { %v2657_v0 = vmul.f32 %v2444_v59, %v11873_v63  ;;  %v2756_v2 = vmul.f32 %v11873_v63, %v11873_v63  ;;  %v11878_v3 = vpop.f32.mrb[5].mxu0 }
 0x120   :  { %v2658_v5 = vmul.f32 %v2448_v60, %v11878_v3  ;;  %v2757_v8 = vmul.f32 %v11878_v3, %v11878_v3  ;;  %v11884_v9 = vpop.f32.mrb[4].mxu1 }
 0x121   :  { %v2704_v10 = vadd.f32 %v2703_v56, %v2657_v0  ;;  %v2804_v12 = vmul.f32 %v2756_v2, %v2444_v59  ;;  %v2659_v13 = vmul.f32 %v2452_v62, %v11884_v9  ;;  %v2758_v16 = vmul.f32 %v11884_v9, %v11884_v9  ;;  %v11889_v17 = vpop.f32.mrb[5].mxu1 }
 0x122   :  { %v2805_v18 = vmul.f32 %v2757_v8, %v2448_v60  ;;  %v2759_v19 = vmul.f32 %v11889_v17, %v11889_v17  ;;  %v2660_v55 = vmul.f32 %v2456_v4, %v11889_v17 }
 0x123   :  { %v2851_v20 = vadd.f32 %v2850_v57, %v2804_v12  ;;  %v2705_v21 = vadd.f32 %v2704_v10, %v2658_v5  ;;  %v2806_v22 = vmul.f32 %v2758_v16, %v2452_v62 }
 0x124   :  { %v2807_v31 = vmul.f32 %v2759_v19, %v2456_v4 }
 0x125   :  { %v2852_v27 = vadd.f32 %v2851_v20, %v2805_v18  ;;  %v2706_v14 = vadd.f32 %v2705_v21, %v2659_v13  ;;  %v2399_v13 = vld [vmem:[%s14900_s22 + $0x10] sm:$0xff] }
 0x126   :  { %v2476_v16 = vrot.slane %v2399_v13, %v11723_v25  ;;  %v2480_v18 = vrot.slane %v2399_v13, %v11737_v30  ;;  %v2484_v19 = vrot.slane %v2399_v13, %v11752_v36 }
 0x127   :  { %v2853_v32 = vadd.f32 %v2852_v27, %v2806_v22  ;;  %v2707_v34 = vadd.f32 %v2706_v14, %v2660_v55  ;;  %v2488_v27 = vrot.slane %v2399_v13, %v11755_v38 }
 0x129   :  { %v2854_v35 = vadd.f32 %v2853_v32, %v2807_v31 }
 0x132   :  { %v11897_v42 = vpop.f32.mrb[6].mxu0 }
 0x133   :  { %v2661_v43 = vmul.f32 %v2460_v37, %v11897_v42  ;;  %v2760_v45 = vmul.f32 %v11897_v42, %v11897_v42  ;;  %v11902_v29 = vpop.f32.mrb[7].mxu0 }
 0x134   :  { %v2662_v47 = vmul.f32 %v2464_v40, %v11902_v29  ;;  %v2761_v48 = vmul.f32 %v11902_v29, %v11902_v29  ;;  %v11908_v49 = vpop.f32.mrb[6].mxu1 }
 0x135   :  { %v2708_v50 = vadd.f32 %v2707_v34, %v2661_v43  ;;  %v2808_v51 = vmul.f32 %v2760_v45, %v2460_v37  ;;  %v2663_v52 = vmul.f32 %v2468_v41, %v11908_v49  ;;  %v2762_v54 = vmul.f32 %v11908_v49, %v11908_v49  ;;  %v11913_v56 = vpop.f32.mrb[7].mxu1 }
 0x136   :  { %v2809_v57 = vmul.f32 %v2761_v48, %v2464_v40  ;;  %v2763_v58 = vmul.f32 %v11913_v56, %v11913_v56  ;;  %v2664_v0 = vmul.f32 %v2472_v46, %v11913_v56 }
 0x137   :  { %v2855_v59 = vadd.f32 %v2854_v35, %v2808_v51  ;;  %v2709_v60 = vadd.f32 %v2708_v50, %v2662_v47  ;;  %v2810_v62 = vmul.f32 %v2762_v54, %v2468_v41 }
 0x138   :  { %v2811_v5 = vmul.f32 %v2763_v58, %v2472_v46 }
 0x139   :  { %v2856_v2 = vadd.f32 %v2855_v59, %v2809_v57  ;;  %v2710_v4 = vadd.f32 %v2709_v60, %v2663_v52  ;;  %v2492_v60 = vrot.slane %v2399_v13, %v11828_v23 }
 0x13b   :  { %v2857_v8 = vadd.f32 %v2856_v2, %v2810_v62  ;;  %v2711_v10 = vadd.f32 %v2710_v4, %v2664_v0  ;;  %v2496_v62 = vrot.slane %v2399_v13, %v11831_v24  ;;  %v2500_v0 = vrot.slane %v2399_v13, %v11834_v26 }
 0x13d   :  { %v2858_v12 = vadd.f32 %v2857_v8, %v2811_v5 }
 0x146   :  { %v11924_v20 = vpop.f32.mrb[8].mxu0 }
 0x147   :  { %v2665_v21 = vmul.f32 %v2476_v16, %v11924_v20  ;;  %v2764_v22 = vmul.f32 %v11924_v20, %v11924_v20  ;;  %v11929_v55 = vpop.f32.mrb[9].mxu0 }
 0x148   :  { %v2666_v14 = vmul.f32 %v2480_v18, %v11929_v55  ;;  %v2765_v31 = vmul.f32 %v11929_v55, %v11929_v55  ;;  %v11935_v32 = vpop.f32.mrb[8].mxu1 }
 0x149   :  { %v2712_v34 = vadd.f32 %v2711_v10, %v2665_v21  ;;  %v2812_v35 = vmul.f32 %v2764_v22, %v2476_v16  ;;  %v2667_v37 = vmul.f32 %v2484_v19, %v11935_v32  ;;  %v2766_v40 = vmul.f32 %v11935_v32, %v11935_v32  ;;  %v11940_v41 = vpop.f32.mrb[9].mxu1 }
 0x14a   :  { %v2813_v43 = vmul.f32 %v2765_v31, %v2480_v18  ;;  %v2767_v45 = vmul.f32 %v11940_v41, %v11940_v41  ;;  %v2668_v50 = vmul.f32 %v2488_v27, %v11940_v41  ;;  %v2504_v10 = vrot.slane %v2399_v13, %v11839_v11 }
 0x14b   :  { %v2859_v46 = vadd.f32 %v2858_v12, %v2812_v35  ;;  %v2713_v47 = vadd.f32 %v2712_v34, %v2666_v14  ;;  %v2814_v48 = vmul.f32 %v2766_v40, %v2484_v19 }
 0x14c   :  { %v2815_v54 = vmul.f32 %v2767_v45, %v2488_v27 }
 0x14d   :  { %v2860_v51 = vadd.f32 %v2859_v46, %v2813_v43  ;;  %v2714_v52 = vadd.f32 %v2713_v47, %v2667_v37  ;;  %v2994_v47 = vld [vmem:[%s14829_s4] sm:$0xff]  ;;  %s10018_s4 = smov 98  }
 0x14f   :  { %v2861_v57 = vadd.f32 %v2860_v51, %v2814_v48  ;;  %v2715_v58 = vadd.f32 %v2714_v52, %v2668_v50  ;;  %v10011_v48 = vmov 0   ;;  %v3048_v52 = vld [vmem:[%s14830_s5] sm:$0xff]  ;;  %s10019_s5 = smov 112  }
 0x150   :  { %9950 = vset.pattern.permute.xlu1 %v10011_v48  ;;  %9951 = vset.pattern.permute.xlu0 %v10011_v48 }
 0x151   :  { %v2862_v59 = vadd.f32 %v2861_v57, %v2815_v54  ;;  %2997 = vperm.xlu1 %9950, %v2994_v47   ;;  %v2400_v57 = vld [vmem:[%s14900_s22 + $0x18] sm:$0xff] }
 0x155   :  { %3051 = vperm.xlu1 %9950, %v3048_v52  }
 0x15a   :  { %v11948_v2 = vpop.f32.mrb[10].mxu0 }
 0x15b   :  { %v2669_v4 = vmul.f32 %v2492_v60, %v11948_v2  ;;  %v2768_v5 = vmul.f32 %v11948_v2, %v11948_v2  ;;  %v11953_v8 = vpop.f32.mrb[11].mxu0 }
 0x15c   :  { %v2670_v12 = vmul.f32 %v2496_v62, %v11953_v8  ;;  %v2769_v16 = vmul.f32 %v11953_v8, %v11953_v8  ;;  %v11959_v18 = vpop.f32.mrb[10].mxu1 }
 0x15d   :  { %v2716_v19 = vadd.f32 %v2715_v58, %v2669_v4  ;;  %v2816_v21 = vmul.f32 %v2768_v5, %v2492_v60  ;;  %v2671_v22 = vmul.f32 %v2500_v0, %v11959_v18  ;;  %v2770_v27 = vmul.f32 %v11959_v18, %v11959_v18  ;;  %v11964_v14 = vpop.f32.mrb[11].mxu1 }
 0x15e   :  { %v2817_v31 = vmul.f32 %v2769_v16, %v2496_v62  ;;  %v2771_v13 = vmul.f32 %v11964_v14, %v11964_v14  ;;  %v2672_v40 = vmul.f32 %v2504_v10, %v11964_v14  ;;  %v2508_v58 = vrot.slane %v2400_v57, %v11723_v25 }
 0x15f   :  { %v2863_v34 = vadd.f32 %v2862_v59, %v2816_v21  ;;  %v2717_v35 = vadd.f32 %v2716_v19, %v2670_v12  ;;  %v2818_v37 = vmul.f32 %v2770_v27, %v2500_v0  ;;  %v2512_v59 = vrot.slane %v2400_v57, %v11737_v30 }
 0x160   :  { %v2819_v46 = vmul.f32 %v2771_v13, %v2504_v10  ;;  %v2516_v60 = vrot.slane %v2400_v57, %v11752_v36  ;;  %v2520_v10 = vrot.slane %v2400_v57, %v11755_v38 }
 0x161   :  { %v2864_v43 = vadd.f32 %v2863_v34, %v2817_v31  ;;  %v2718_v45 = vadd.f32 %v2717_v35, %v2671_v22 }
 0x163   :  { %v2865_v50 = vadd.f32 %v2864_v43, %v2818_v37  ;;  %v2719_v51 = vadd.f32 %v2718_v45, %v2672_v40 }
 0x165   :  { %v2866_v54 = vadd.f32 %v2865_v50, %v2819_v46 }
 0x16e   :  { %v11981_v62 = vpop.f32.mrb[12].mxu0 }
 0x16f   :  { %v2673_v0 = vmul.f32 %v2508_v58, %v11981_v62  ;;  %v2772_v4 = vmul.f32 %v11981_v62, %v11981_v62  ;;  %v11986_v5 = vpop.f32.mrb[13].mxu0 }
 0x170   :  { %v2674_v12 = vmul.f32 %v2512_v59, %v11986_v5  ;;  %v2773_v16 = vmul.f32 %v11986_v5, %v11986_v5  ;;  %v11992_v19 = vpop.f32.mrb[12].mxu1 }
 0x171   :  { %v2720_v21 = vadd.f32 %v2719_v51, %v2673_v0  ;;  %v2820_v22 = vmul.f32 %v2772_v4, %v2508_v58  ;;  %v2675_v27 = vmul.f32 %v2516_v60, %v11992_v19  ;;  %v2774_v31 = vmul.f32 %v11992_v19, %v11992_v19  ;;  %v11997_v13 = vpop.f32.mrb[13].mxu1 }
 0x172   :  { %14901 = vst [vmem:[#allocation10_spill] sm:$0xff] %v11997_v13  ;;  %v2821_v34 = vmul.f32 %v2773_v16, %v2512_v59  ;;  %v2775_v35 = vmul.f32 %v11997_v13, %v11997_v13  ;;  %v2676_v45 = vmul.f32 %v2520_v10, %v11997_v13  ;;  %v2524_v58 = vrot.slane %v2400_v57, %v11828_v23 }
 0x173   :  { %v2867_v37 = vadd.f32 %v2866_v54, %v2820_v22  ;;  %v2721_v40 = vadd.f32 %v2720_v21, %v2674_v12  ;;  %v2822_v43 = vmul.f32 %v2774_v31, %v2516_v60  ;;  %v2528_v0 = vrot.slane %v2400_v57, %v11831_v24 }
 0x174   :  { %v2823_v48 = vmul.f32 %v2775_v35, %v2520_v10  ;;  %v2532_v59 = vrot.slane %v2400_v57, %v11834_v26  ;;  %v2536_v10 = vrot.slane %v2400_v57, %v11839_v11  ;;  %v2556_v13 = vrot.slane %v2401_v7, %v11828_v23 }
 0x175   :  { %v2868_v46 = vadd.f32 %v2867_v37, %v2821_v34  ;;  %v2722_v47 = vadd.f32 %v2721_v40, %v2675_v27 }
 0x177   :  { %v2869_v50 = vadd.f32 %v2868_v46, %v2822_v43  ;;  %v2723_v51 = vadd.f32 %v2722_v47, %v2676_v45 }
 0x179   :  { %v2870_v52 = vadd.f32 %v2869_v50, %v2823_v48 }
 0x182   :  { %v12005_v4 = vpop.f32.mrb[14].mxu0 }
 0x183   :  { %v2677_v54 = vmul.f32 %v2524_v58, %v12005_v4  ;;  %v2776_v60 = vmul.f32 %v12005_v4, %v12005_v4  ;;  %v12010_v12 = vpop.f32.mrb[15].mxu0 }
 0x184   :  { %14902 = vst [vmem:[#allocation11_spill] sm:$0xff] %v12010_v12  ;;  %v2678_v16 = vmul.f32 %v2528_v0, %v12010_v12  ;;  %v2777_v21 = vmul.f32 %v12010_v12, %v12010_v12  ;;  %v12016_v22 = vpop.f32.mrb[14].mxu1 }
 0x185   :  { %v2724_v27 = vadd.f32 %v2723_v51, %v2677_v54  ;;  %v2824_v31 = vmul.f32 %v2776_v60, %v2524_v58  ;;  %v2679_v34 = vmul.f32 %v2532_v59, %v12016_v22  ;;  %v2778_v35 = vmul.f32 %v12016_v22, %v12016_v22  ;;  %v12021_v37 = vpop.f32.mrb[15].mxu1 }
 0x186   :  { %14903 = vst [vmem:[#allocation12_spill] sm:$0xff] %v12021_v37  ;;  %v2825_v40 = vmul.f32 %v2777_v21, %v2528_v0  ;;  %v2779_v57 = vmul.f32 %v12021_v37, %v12021_v37  ;;  %v2680_v47 = vmul.f32 %v2536_v10, %v12021_v37  ;;  %v2540_v0 = vrot.slane %v2401_v7, %v11723_v25 }
 0x187   :  { %v2871_v43 = vadd.f32 %v2870_v52, %v2824_v31  ;;  %v2725_v45 = vadd.f32 %v2724_v27, %v2678_v16  ;;  %v2826_v46 = vmul.f32 %v2778_v35, %v2532_v59  ;;  %v2544_v21 = vrot.slane %v2401_v7, %v11737_v30 }
 0x188   :  { %v2827_v51 = vmul.f32 %v2779_v57, %v2536_v10  ;;  %v2548_v52 = vrot.slane %v2401_v7, %v11752_v36  ;;  %v2552_v31 = vrot.slane %v2401_v7, %v11755_v38 }
 0x189   :  { %v2872_v48 = vadd.f32 %v2871_v43, %v2825_v40  ;;  %v2726_v50 = vadd.f32 %v2725_v45, %v2679_v34 }
 0x18b   :  { %v2873_v58 = vadd.f32 %v2872_v48, %v2826_v46  ;;  %v2727_v54 = vadd.f32 %v2726_v50, %v2680_v47 }
 0x18d   :  { %v2874_v60 = vadd.f32 %v2873_v58, %v2827_v51 }
 0x196   :  { %v12032_v16 = vpop.f32.mrb[16].mxu0 }
 0x197   :  { %v2681_v59 = vmul.f32 %v2540_v0, %v12032_v16  ;;  %v2780_v10 = vmul.f32 %v12032_v16, %v12032_v16  ;;  %v12037_v27 = vpop.f32.mrb[17].mxu0 }
 0x198   :  { %14904 = vst [vmem:[#allocation13_spill] sm:$0xff] %v12037_v27  ;;  %v2682_v34 = vmul.f32 %v2544_v21, %v12037_v27  ;;  %v2781_v35 = vmul.f32 %v12037_v27, %v12037_v27  ;;  %v12043_v40 = vpop.f32.mrb[16].mxu1 }
 0x199   :  { %14905 = vst [vmem:[#allocation14_spill] sm:$0xff] %v12043_v40  ;;  %v2728_v57 = vadd.f32 %v2727_v54, %v2681_v59  ;;  %v2828_v43 = vmul.f32 %v2780_v10, %v2540_v0  ;;  %v2683_v45 = vmul.f32 %v2548_v52, %v12043_v40  ;;  %v2782_v46 = vmul.f32 %v12043_v40, %v12043_v40  ;;  %v12048_v47 = vpop.f32.mrb[17].mxu1 }
 0x19a   :  { %14906 = vst [vmem:[#allocation15_spill] sm:$0xff] %v12048_v47  ;;  %v2829_v48 = vmul.f32 %v2781_v35, %v2544_v21  ;;  %v2783_v50 = vmul.f32 %v12048_v47, %v12048_v47  ;;  %v2684_v27 = vmul.f32 %v2552_v31, %v12048_v47  ;;  %v2560_v40 = vrot.slane %v2401_v7, %v11831_v24 }
 0x19b   :  { %v2875_v51 = vadd.f32 %v2874_v60, %v2828_v43  ;;  %v2729_v58 = vadd.f32 %v2728_v57, %v2682_v34  ;;  %v2830_v15 = vmul.f32 %v2782_v46, %v2548_v52  ;;  %v2564_v21 = vrot.slane %v2401_v7, %v11834_v26 }
 0x19c   :  { %v2831_v54 = vmul.f32 %v2783_v50, %v2552_v31  ;;  %v2568_v31 = vrot.slane %v2401_v7, %v11839_v11 }
 0x19d   :  { %v2876_v37 = vadd.f32 %v2875_v51, %v2829_v48  ;;  %v2730_v12 = vadd.f32 %v2729_v58, %v2683_v45 }
 0x19f   :  { %v2877_v0 = vadd.f32 %v2876_v37, %v2830_v15  ;;  %v2731_v59 = vadd.f32 %v2730_v12, %v2684_v27 }
 0x1a1   :  { %v2878_v10 = vadd.f32 %v2877_v0, %v2831_v54 }
 0x1aa   :  { %v12056_v35 = vpop.f32.mrb[18].mxu0 }
 0x1ab   :  { %14907 = vst [vmem:[#allocation16_spill] sm:$0xff] %v12056_v35  ;;  %v2685_v60 = vmul.f32 %v2556_v13, %v12056_v35  ;;  %v2784_v52 = vmul.f32 %v12056_v35, %v12056_v35  ;;  %v12061_v34 = vpop.f32.mrb[19].mxu0 }
 0x1ac   :  { %14908 = vst [vmem:[#allocation17_spill] sm:$0xff] %v12061_v34  ;;  %v2686_v15 = vmul.f32 %v2560_v40, %v12061_v34  ;;  %v2785_v12 = vmul.f32 %v12061_v34, %v12061_v34  ;;  %v12067_v37 = vpop.f32.mrb[18].mxu1 }
 0x1ad   :  { %14909 = vst [vmem:[#allocation18_spill] sm:$0xff] %v12067_v37  ;;  %v2732_v27 = vadd.f32 %v2731_v59, %v2685_v60  ;;  %v2832_v57 = vmul.f32 %v2784_v52, %v2556_v13  ;;  %v2687_v43 = vmul.f32 %v2564_v21, %v12067_v37  ;;  %v2786_v45 = vmul.f32 %v12067_v37, %v12067_v37  ;;  %v12072_v46 = vpop.f32.mrb[19].mxu1  ;;  %v2402_v37 = vld [vmem:[%s14900_s22 + $0x28] sm:$0xff]  ;;  %s14872_s22 = smov 110  }
 0x1ae   :  { %14910 = vst [vmem:[#allocation19_spill] sm:$0xff] %v12072_v46  ;;  %v2833_v48 = vmul.f32 %v2785_v12, %v2560_v40  ;;  %v2787_v7 = vmul.f32 %v12072_v46, %v12072_v46  ;;  %v2688_v54 = vmul.f32 %v2568_v31, %v12072_v46  ;;  %v2572_v40 = vrot.slane %v2402_v37, %v11723_v25 }
 0x1af   :  { %v2879_v50 = vadd.f32 %v2878_v10, %v2832_v57  ;;  %v2733_v51 = vadd.f32 %v2732_v27, %v2686_v15  ;;  %v2834_v58 = vmul.f32 %v2786_v45, %v2564_v21  ;;  %v2576_v12 = vrot.slane %v2402_v37, %v11737_v30 }
 0x1b0   :  { %v2835_v59 = vmul.f32 %v2787_v7, %v2568_v31  ;;  %v2580_v10 = vrot.slane %v2402_v37, %v11752_v36  ;;  %v2588_v34 = vrot.slane %v2402_v37, %v11828_v23 }
 0x1b1   :  { %v2880_v0 = vadd.f32 %v2879_v50, %v2833_v48  ;;  %v2734_v35 = vadd.f32 %v2733_v51, %v2687_v43 }
 0x1b3   :  { %v2881_v13 = vadd.f32 %v2880_v0, %v2834_v58  ;;  %v2735_v60 = vadd.f32 %v2734_v35, %v2688_v54  ;;  %v2584_v35 = vrot.slane %v2402_v37, %v11755_v38 }
 0x1b5   :  { %v2882_v52 = vadd.f32 %v2881_v13, %v2835_v59 }
 0x1be   :  { %v12083_v15 = vpop.f32.mrb[20].mxu0 }
 0x1bf   :  { %14911 = vst [vmem:[#allocation20_spill] sm:$0xff] %v12083_v15  ;;  %v2689_v21 = vmul.f32 %v2572_v40, %v12083_v15  ;;  %v2788_v31 = vmul.f32 %v12083_v15, %v12083_v15  ;;  %v12088_v27 = vpop.f32.mrb[21].mxu0 }
 0x1c0   :  { %14912 = vst [vmem:[#allocation21_spill] sm:$0xff] %v12088_v27  ;;  %v2690_v57 = vmul.f32 %v2576_v12, %v12088_v27  ;;  %v2789_v43 = vmul.f32 %v12088_v27, %v12088_v27  ;;  %v12094_v45 = vpop.f32.mrb[20].mxu1 }
 0x1c1   :  { %14913 = vst [vmem:[#allocation22_spill] sm:$0xff] %v12094_v45  ;;  %v2736_v48 = vadd.f32 %v2735_v60, %v2689_v21  ;;  %v2836_v7 = vmul.f32 %v2788_v31, %v2572_v40  ;;  %v2691_v50 = vmul.f32 %v2580_v10, %v12094_v45  ;;  %v2790_v51 = vmul.f32 %v12094_v45, %v12094_v45  ;;  %v12099_v58 = vpop.f32.mrb[21].mxu1 }
 0x1c2   :  { %14914 = vst [vmem:[#allocation23_spill] sm:$0xff] %v12099_v58  ;;  %v2837_v54 = vmul.f32 %v2789_v43, %v2576_v12  ;;  %v2791_v0 = vmul.f32 %v12099_v58, %v12099_v58  ;;  %v2692_v27 = vmul.f32 %v2584_v35, %v12099_v58  ;;  %v2592_v45 = vrot.slane %v2402_v37, %v11831_v24 }
 0x1c3   :  { %v2883_v59 = vadd.f32 %v2882_v52, %v2836_v7  ;;  %v2737_v13 = vadd.f32 %v2736_v48, %v2690_v57  ;;  %v2838_v46 = vmul.f32 %v2790_v51, %v2580_v10  ;;  %v2596_v12 = vrot.slane %v2402_v37, %v11834_v26 }
 0x1c4   :  { %v2839_v60 = vmul.f32 %v2791_v0, %v2584_v35  ;;  %v2600_v52 = vrot.slane %v2402_v37, %v11839_v11 }
 0x1c5   :  { %v2884_v15 = vadd.f32 %v2883_v59, %v2837_v54  ;;  %v2738_v47 = vadd.f32 %v2737_v13, %v2691_v50 }
 0x1c7   :  { %v2885_v40 = vadd.f32 %v2884_v15, %v2838_v46  ;;  %v2739_v21 = vadd.f32 %v2738_v47, %v2692_v27 }
 0x1c9   :  { %v2886_v31 = vadd.f32 %v2885_v40, %v2839_v60 }
 0x1d2   :  { %v12107_v43 = vpop.f32.mrb[22].mxu0 }
 0x1d3   :  { %v2693_v10 = vmul.f32 %v2588_v34, %v12107_v43  ;;  %v2792_v57 = vmul.f32 %v12107_v43, %v12107_v43  ;;  %v12113_v48 = vpop.f32.mrb[23].mxu0 }
 0x1d4   :  { %14915 = vst [vmem:[#allocation24_spill] sm:$0xff] %v12113_v48  ;;  %v2694_v47 = vmul.f32 %v2592_v45, %v12113_v48  ;;  %v2793_v46 = vmul.f32 %v12113_v48, %v12113_v48  ;;  %v12118_v15 = vpop.f32.mrb[22].mxu1 }
 0x1d5   :  { %14916 = vst [vmem:[#allocation25_spill] sm:$0xff] %v12118_v15  ;;  %v2740_v27 = vadd.f32 %v2739_v21, %v2693_v10  ;;  %v2840_v35 = vmul.f32 %v2792_v57, %v2588_v34  ;;  %v2695_v7 = vmul.f32 %v2596_v12, %v12118_v15  ;;  %v2794_v37 = vmul.f32 %v12118_v15, %v12118_v15  ;;  %v12123_v50 = vpop.f32.mrb[23].mxu1 }
 0x1d6   :  { %14917 = vst [vmem:[#allocation26_spill] sm:$0xff] %v12123_v50  ;;  %v2841_v51 = vmul.f32 %v2793_v46, %v2592_v45  ;;  %v2795_v54 = vmul.f32 %v12123_v50, %v12123_v50  ;;  %v2696_v0 = vmul.f32 %v2600_v52, %v12123_v50 }
 0x1d7   :  { %v2741_v59 = vadd.f32 %v2740_v27, %v2694_v47  ;;  %v2842_v13 = vmul.f32 %v2794_v37, %v2596_v12  ;;  %v2887_v60 = vadd.f32 %v2886_v31, %v2840_v35  ;;  %v12139_v27 = vpop.permute.xlu1 %2997 }
 0x1d8   :  { %v2744_v40 = vsel %vm14885_vm4, %v2696_v0, 0.0  ;;  %v2843_v21 = vmul.f32 %v2795_v54, %v2600_v52  ;;  %v12137_v52 = vld [vmem:[%s14918_s28] sm:$0xff] }
 0x1d9   :  { %v2742_v34 = vadd.f32 %v2741_v59, %v2695_v7  ;;  %v2888_v10 = vadd.f32 %v2887_v60, %v2841_v51  ;;  %v3265_v35 = vrot.slane %v12137_v52, %v11737_v30 }
 0x1da   :  { %v2890_v57 = vsel %vm14885_vm4, %v2843_v21, 0.0 }
 0x1db   :  { %v2745_v58 = vadd.f32 %v2744_v40, %v2742_v34  ;;  %v2889_v48 = vadd.f32 %v2888_v10, %v2842_v13 }
 0x1dd   :  { %2746 = vadd.xlane.f32.xlu0 %v2745_v58  ;;  %v2891_v15 = vadd.f32 %v2890_v57, %v2889_v48  ;;  %v3261_v58 = vrot.slane %v12137_v52, %v11723_v25  ;;  %v3273_v48 = vrot.slane %v12137_v52, %v11755_v38 }
 0x1e1   :  { %2892 = vadd.xlane.f32.xlu0 %v2891_v15  ;;  %v3269_v15 = vrot.slane %v12137_v52, %v11752_v36 }
 0x26a   :  { %v12130_v45 = vpop.xlane.xlu0 %2746 }
 0x26b   :  { %v2894_v46 = vmul.f32 %v12130_v45, %v12130_v45  ;;  %v2896_v7 = vsub.f32 %v11787_v53, %v12130_v45  ;;  %v2899_v37 = vsub.f32 %v11810_v6, %v12130_v45  ;;  %v2898_v51 = vsub.f32 %v11805_v1, %v12130_v45 }
 0x26c   :  { %v2897_v54 = vsub.f32 %v11800_v61, %v12130_v45  ;;  %v2904_v59 = vsub.f32 %v11873_v63, %v12130_v45  ;;  %v2900_v13 = vsub.f32 %v11845_v28, %v12130_v45  ;;  %v2906_v53 = vsub.f32 %v11884_v9, %v12130_v45 }
 0x26d   :  { %v2901_v6 = vsub.f32 %v11850_v33, %v12130_v45 }
 0x26e   :  { %v2893_v47 = vpop.xlane.xlu0 %2892 }
 0x26f   :  { %v2895_v12 = vsub.f32 %v2893_v47, %v2894_v46  ;;  %v12179_v46 = vpop.permute.xlu1 %3051 }
 0x271   :  { %v2944_v31 = vadd.f32 1e-05, %v2895_v12 }
 0x273   :  { %9952 = vrsqrt.f32 %v2944_v31 }
 0x27d   :  { %v12157_v0 = vpop.eup %9952 }
 0x27e   :  { %v2949_v60 = vmul.f32 %v12157_v0, %v2899_v37  ;;  %v2946_v1 = vmul.f32 %v12157_v0, %v2896_v7  ;;  %v2948_v61 = vmul.f32 %v12157_v0, %v2898_v51  ;;  %v2947_v40 = vmul.f32 %v12157_v0, %v2897_v54 }
 0x27f   :  { %v2954_v63 = vmul.f32 %v12157_v0, %v2904_v59  ;;  %v2950_v21 = vmul.f32 %v12157_v0, %v2900_v13  ;;  %v2956_v28 = vmul.f32 %v12157_v0, %v2906_v53  ;;  %v2951_v9 = vmul.f32 %v12157_v0, %v2901_v6 }
 0x280   :  { %v3003_v34 = vmul.f32 %v12139_v27, %v2949_v60  ;;  %v3000_v33 = vmul.f32 %v12139_v27, %v2946_v1  ;;  %v3002_v10 = vmul.f32 %v12139_v27, %v2948_v61  ;;  %v3001_v57 = vmul.f32 %v12139_v27, %v2947_v40 }
 0x281   :  { %v3008_v47 = vmul.f32 %v12139_v27, %v2954_v63  ;;  %v3004_v12 = vmul.f32 %v12139_v27, %v2950_v21  ;;  %v3010_v31 = vmul.f32 %v12139_v27, %v2956_v28  ;;  %v2903_v7 = vsub.f32 %v11862_v44, %v12130_v45 }
 0x282   :  { %v3057_v37 = vadd.f32 %v12179_v46, %v3003_v34  ;;  %v3054_v51 = vadd.f32 %v12179_v46, %v3000_v33  ;;  %v3056_v54 = vadd.f32 %v12179_v46, %v3002_v10  ;;  %v3055_v59 = vadd.f32 %v12179_v46, %v3001_v57  ;;  %v12198_v34 = vld [vmem:[%s14918_s28 + $0x8] sm:$0xff] }
 0x283   :  { %v3062_v13 = vadd.f32 %v12179_v46, %v3008_v47  ;;  %v3058_v53 = vadd.f32 %v12179_v46, %v3004_v12  ;;  %v3005_v6 = vmul.f32 %v12139_v27, %v2951_v9  ;;  %v2902_v60 = vsub.f32 %v11857_v39, %v12130_v45 }
 0x284   :  { %vm3105_vm6 = vcmp.ge.f32.partialorder %v3057_v37, 0.0  ;;  %v3153_v1 = vmul.f32 0.2, %v3057_v37  ;;  %vm3102_vm7 = vcmp.ge.f32.partialorder %v3054_v51, 0.0  ;;  %v3150_v44 = vmul.f32 0.2, %v3054_v51 }
 0x285   :  { %vm3104_vm8 = vcmp.ge.f32.partialorder %v3056_v54, 0.0  ;;  %v3152_v61 = vmul.f32 0.2, %v3056_v54  ;;  %vm3103_vm9 = vcmp.ge.f32.partialorder %v3055_v59, 0.0  ;;  %v3151_v40 = vmul.f32 0.2, %v3055_v59 }
 0x286   :  { %v3201_v63 = vsel %vm3105_vm6, %v3057_v37, %v3153_v1  ;;  %v3198_v21 = vsel %vm3102_vm7, %v3054_v51, %v3150_v44  ;;  %v3158_v28 = vmul.f32 0.2, %v3062_v13  ;;  %v3064_v9 = vadd.f32 %v12179_v46, %v3010_v31 }
 0x287   :  { %v3501_v33 = vmul.f32 %v3273_v48, %v3201_v63  ;;  %v3498_v39 = vmul.f32 %v3261_v58, %v3198_v21  ;;  %v3200_v10 = vsel %vm3104_vm8, %v3056_v54, %v3152_v61  ;;  %v3199_v57 = vsel %vm3103_vm9, %v3055_v59, %v3151_v40 }
 0x288   :  { %v3500_v47 = vmul.f32 %v3269_v15, %v3200_v10  ;;  %v3499_v12 = vmul.f32 %v3265_v35, %v3199_v57  ;;  %vm3110_vm10 = vcmp.ge.f32.partialorder %v3062_v13, 0.0  ;;  %v3059_v50 = vadd.f32 %v12179_v46, %v3005_v6 }
 0x289   :  { %3560 = vrot.lane.b32.xlu1 %v3501_v33, %s10012_s0  ;;  %3550 = vst [vmem:[#allocation2] sm:$0xff] %v3498_v39  ;;  %v3293_v37 = vrot.slane %v12198_v34, %v11723_v25  ;;  %vm3106_vm11 = vcmp.ge.f32.partialorder %v3058_v53, 0.0  ;;  %v3154_v51 = vmul.f32 0.2, %v3058_v53  ;;  %v2908_v31 = vsub.f32 %v11897_v42, %v12130_v45 }
 0x28a   :  { %3558 = vrot.lane.b32.xlu0 %v3500_v47, %s10012_s0  ;;  %3552 = vst.msk [vmem:[#allocation2 + $0x8] sm:$0xff] %vm14888_vm5, %v3499_v12  ;;  %v3277_v58 = vrot.slane %v12137_v52, %v11828_v23  ;;  %v2953_v48 = vmul.f32 %v12157_v0, %v2903_v7  ;;  %v2952_v15 = vmul.f32 %v12157_v0, %v2902_v60  ;;  %vm3112_vm12 = vcmp.ge.f32.partialorder %v3064_v9, 0.0 }
 0x28b   :  { %v2910_v35 = vsub.f32 %v11908_v49, %v12130_v45  ;;  %v3206_v54 = vsel %vm3110_vm10, %v3062_v13, %v3158_v28  ;;  %v3160_v59 = vmul.f32 0.2, %v3064_v9  ;;  %v2958_v6 = vmul.f32 %v12157_v0, %v2908_v31 }
 0x28c   :  { %v3202_v1 = vsel %vm3106_vm11, %v3058_v53, %v3154_v51  ;;  %v3155_v42 = vmul.f32 0.2, %v3059_v50  ;;  %v3007_v44 = vmul.f32 %v12139_v27, %v2953_v48  ;;  %v3301_v7 = vrot.slane %v12198_v34, %v11752_v36 }
 0x28d   :  { %v2960_v61 = vmul.f32 %v12157_v0, %v2910_v35  ;;  %3556 = vrot.lane.b32.xlu1 %v3499_v12, %s10012_s0  ;;  %vm3107_vm13 = vcmp.ge.f32.partialorder %v3059_v50, 0.0  ;;  %v3006_v60 = vmul.f32 %v12139_v27, %v2952_v15  ;;  %v3012_v49 = vmul.f32 %v12139_v27, %v2958_v6  ;;  %s10024_s0 = smov 54  }
 0x28e   :  { %3571 = vrot.lane.b32.xlu0 %v3501_v33, %s10013_s30  ;;  %v3281_v13 = vrot.slane %v12137_v52, %v11831_v24  ;;  %v3061_v53 = vadd.f32 %v12179_v46, %v3007_v44  ;;  %v2907_v40 = vsub.f32 %v11889_v17, %v12130_v45  ;;  %v2905_v63 = vsub.f32 %v11878_v3, %v12130_v45 }
 0x28f   :  { %v3506_v21 = vmul.f32 %v3293_v37, %v3206_v54  ;;  %v3502_v28 = vmul.f32 %v3277_v58, %v3202_v1  ;;  %v3208_v39 = vsel %vm3112_vm12, %v3064_v9, %v3160_v59  ;;  %v3060_v10 = vadd.f32 %v12179_v46, %v3006_v60 }
 0x290   :  { %v3203_v57 = vsel %vm3107_vm13, %v3059_v50, %v3155_v42  ;;  %v3014_v33 = vmul.f32 %v12139_v27, %v2960_v61  ;;  %v2957_v47 = vmul.f32 %v12157_v0, %v2907_v40  ;;  %v2955_v12 = vmul.f32 %v12157_v0, %v2905_v63 }
 0x291   :  { %3573 = vrot.lane.b32.xlu1 %v3502_v28, %s10013_s30  ;;  %v3157_v51 = vmul.f32 0.2, %v3061_v53  ;;  %vm3108_vm14 = vcmp.ge.f32.partialorder %v3060_v10, 0.0  ;;  %v3156_v17 = vmul.f32 0.2, %v3060_v10  ;;  %v3066_v3 = vadd.f32 %v12179_v46, %v3012_v49 }
 0x292   :  { %3603 = vrot.lane.b32.xlu0 %v3506_v21, %s10014_s21  ;;  %vm3109_vm15 = vcmp.ge.f32.partialorder %v3061_v53, 0.0  ;;  %v2912_v50 = vsub.f32 %v11924_v20, %v12130_v45  ;;  %v3503_v9 = vmul.f32 %v3281_v13, %v3203_v57  ;;  %v3289_v37 = vrot.slane %v12137_v52, %v11839_v11 }
 0x293   :  { %v3285_v31 = vrot.slane %v12137_v52, %v11834_v26  ;;  %v2911_v58 = vsub.f32 %v11913_v56, %v12130_v45  ;;  %v3508_v48 = vmul.f32 %v3301_v7, %v3208_v39  ;;  %v3204_v15 = vsel %vm3108_vm14, %v3060_v10, %v3156_v17 }
 0x294   :  { %v3009_v35 = vmul.f32 %v12139_v27, %v2955_v12  ;;  %v2962_v54 = vmul.f32 %v12157_v0, %v2912_v50  ;;  %v3205_v59 = vsel %vm3109_vm15, %v3061_v53, %v3157_v51  ;;  %v3162_v20 = vmul.f32 0.2, %v3066_v3  ;;  %v12279_v51 = vld [vmem:[%s14918_s28 + $0x10] sm:$0xff] }
 0x295   :  { %3575 = vrot.lane.b32.xlu1 %v3503_v9, %s10013_s30  ;;  %v3068_v6 = vadd.f32 %v12179_v46, %v3014_v33  ;;  %v3011_v1 = vmul.f32 %v12139_v27, %v2957_v47  ;;  %vm3114_vm0 = vcmp.ge.f32.partialorder %v3066_v3, 0.0  ;;  %v3504_v52 = vmul.f32 %v3285_v31, %v3204_v15 }
 0x296   :  { %3618 = vrot.lane.b32.xlu0 %v3508_v48, %s10015_s1  ;;  %v2961_v56 = vmul.f32 %v12157_v0, %v2911_v58  ;;  %v3505_v42 = vmul.f32 %v3289_v37, %v3205_v59  ;;  %v3309_v44 = vrot.slane %v12198_v34, %v11828_v23  ;;  %v3063_v61 = vadd.f32 %v12179_v46, %v3009_v35 }
 0x297   :  { %v3210_v7 = vsel %vm3114_vm0, %v3066_v3, %v3162_v20  ;;  %v3164_v60 = vmul.f32 0.2, %v3068_v6  ;;  %v3065_v49 = vadd.f32 %v12179_v46, %v3011_v1  ;;  %v3016_v13 = vmul.f32 %v12139_v27, %v2962_v54 }
 0x298   :  { %vm3116_vm1 = vcmp.ge.f32.partialorder %v3068_v6, 0.0  ;;  %v2914_v53 = vsub.f32 %v11935_v32, %v12130_v45  ;;  %v2909_v40 = vsub.f32 %v11902_v29, %v12130_v45  ;;  %v3317_v63 = vrot.slane %v12198_v34, %v11834_v26 }
 0x299   :  { %3588 = vrot.lane.b32.xlu1 %v3504_v52, %s10016_s2  ;;  %v3015_v21 = vmul.f32 %v12139_v27, %v2961_v56  ;;  %v2916_v28 = vsub.f32 %v11948_v2, %v12130_v45  ;;  %v3510_v39 = vmul.f32 %v3309_v44, %v3210_v7  ;;  %v3159_v10 = vmul.f32 0.2, %v3063_v61 }
 0x29a   :  { %3601 = vrot.lane.b32.xlu0 %v3505_v42, %s10014_s21  ;;  %v2964_v57 = vmul.f32 %v12157_v0, %v2914_v53  ;;  %v2959_v33 = vmul.f32 %v12157_v0, %v2909_v40  ;;  %v3212_v32 = vsel %vm3116_vm1, %v3068_v6, %v3164_v60  ;;  %v3161_v47 = vmul.f32 0.2, %v3065_v49 }
 0x29b   :  { %vm3111_vm2 = vcmp.ge.f32.partialorder %v3063_v61, 0.0  ;;  %v3070_v29 = vadd.f32 %v12179_v46, %v3016_v13  ;;  %vm3113_vm3 = vcmp.ge.f32.partialorder %v3065_v49, 0.0  ;;  %v3305_v2 = vrot.slane %v12198_v34, %v11755_v38 }
 0x29c   :  { %v3297_v12 = vrot.slane %v12198_v34, %v11737_v30  ;;  %v3069_v17 = vadd.f32 %v12179_v46, %v3015_v21  ;;  %v2966_v3 = vmul.f32 %v12157_v0, %v2916_v28  ;;  %v3512_v50 = vmul.f32 %v3317_v63, %v3212_v32 }
 0x29d   :  { %3590 = vrot.lane.b32.xlu1 %v3505_v42, %s10016_s2  ;;  %v3207_v37 = vsel %vm3111_vm2, %v3063_v61, %v3159_v10  ;;  %v3018_v31 = vmul.f32 %v12139_v27, %v2964_v57  ;;  %v3013_v58 = vmul.f32 %v12139_v27, %v2959_v33  ;;  %v3209_v48 = vsel %vm3113_vm3, %v3065_v49, %v3161_v47 }
 0x29e   :  { %3633 = vrot.lane.b32.xlu0 %v3510_v39, %s10017_s23  ;;  %v3166_v15 = vmul.f32 0.2, %v3070_v29  ;;  %v2918_v35 = vsub.f32 %v11959_v18, %v12130_v45  ;;  %vm3118_vm6 = vcmp.ge.f32.partialorder %v3070_v29, 0.0  ;;  %v3325_v54 = vrot.slane %v12279_v51, %v11723_v25 }
 0x29f   :  { %v3507_v59 = vmul.f32 %v3297_v12, %v3207_v37  ;;  %v3165_v20 = vmul.f32 0.2, %v3069_v17  ;;  %v3020_v6 = vmul.f32 %v12139_v27, %v2966_v3  ;;  %v3509_v52 = vmul.f32 %v3305_v2, %v3209_v48 }
 0x2a0   :  { %v2968_v1 = vmul.f32 %v12157_v0, %v2918_v35  ;;  %vm3117_vm7 = vcmp.ge.f32.partialorder %v3069_v17, 0.0  ;;  %v3067_v56 = vadd.f32 %v12179_v46, %v3013_v58  ;;  %v3214_v18 = vsel %vm3118_vm6, %v3070_v29, %v3166_v15 }
 0x2a1   :  { %3586 = vrot.lane.b32.xlu1 %v3503_v9, %s10016_s2  ;;  %v3072_v9 = vadd.f32 %v12179_v46, %v3018_v31  ;;  %v2913_v42 = vsub.f32 %v11929_v55, %v12130_v45  ;;  %v3213_v44 = vsel %vm3117_vm7, %v3069_v17, %v3165_v20  ;;  %v3321_v61 = vrot.slane %v12198_v34, %v11839_v11  ;;  %s10030_s2 = smov 124  }
 0x2a2   :  { %3648 = vrot.lane.b32.xlu0 %v3512_v50, %s10018_s4  ;;  %v3074_v7 = vadd.f32 %v12179_v46, %v3020_v6  ;;  %v3022_v60 = vmul.f32 %v12139_v27, %v2968_v1  ;;  %v3514_v49 = vmul.f32 %v3325_v54, %v3214_v18  ;;  %v3163_v53 = vmul.f32 0.2, %v3067_v56  ;;  %v12351_v18 = vld [vmem:[%s14918_s28 + $0x18] sm:$0xff] }
 0x2a3   :  { %v3168_v13 = vmul.f32 0.2, %v3072_v9  ;;  %v2963_v40 = vmul.f32 %v12157_v0, %v2913_v42  ;;  %vm3120_vm8 = vcmp.ge.f32.partialorder %v3072_v9, 0.0  ;;  %vm3115_vm9 = vcmp.ge.f32.partialorder %v3067_v56, 0.0 }
 0x2a4   :  { %v2920_v55 = vsub.f32 %v11981_v62, %v12130_v45  ;;  %v3333_v63 = vrot.slane %v12279_v51, %v11752_v36  ;;  %v3513_v21 = vmul.f32 %v3321_v61, %v3213_v44  ;;  %v3313_v28 = vrot.slane %v12198_v34, %v11831_v24 }
 0x2a5   :  { %3605 = vrot.lane.b32.xlu1 %v3507_v59, %s10014_s21  ;;  %v3076_v39 = vadd.f32 %v12179_v46, %v3022_v60  ;;  %v3216_v57 = vsel %vm3120_vm8, %v3072_v9, %v3168_v13  ;;  %v3211_v33 = vsel %vm3115_vm9, %v3067_v56, %v3163_v53  ;;  %v3170_v32 = vmul.f32 0.2, %v3074_v7 }
 0x2a6   :  { %3631 = vrot.lane.b32.xlu0 %v3509_v52, %s10017_s23  ;;  %v2970_v10 = vmul.f32 %v12157_v0, %v2920_v55  ;;  %v3017_v47 = vmul.f32 %v12139_v27, %v2963_v40  ;;  %vm3122_vm10 = vcmp.ge.f32.partialorder %v3074_v7, 0.0  ;;  %v3341_v62 = vrot.slane %v12279_v51, %v11828_v23 }
 0x2a7   :  { %v2922_v34 = vsub.f32 %v11992_v19, %v12130_v45  ;;  %v2915_v29 = vsub.f32 %v11940_v41, %v12130_v45  ;;  %v12323_v2 = vmul.f32 %v3333_v63, %v3216_v57  ;;  %v3511_v12 = vmul.f32 %v3313_v28, %v3211_v33 }
 0x2a8   :  { %vm3124_vm11 = vcmp.ge.f32.partialorder %v3076_v39, 0.0  ;;  %v3172_v17 = vmul.f32 0.2, %v3076_v39  ;;  %v3218_v3 = vsel %vm3122_vm10, %v3074_v7, %v3170_v32  ;;  %v3071_v50 = vadd.f32 %v12179_v46, %v3017_v47 }
 0x2a9   :  { %3620 = vrot.lane.b32.xlu1 %v3509_v52, %s10015_s1  ;;  %v3024_v37 = vmul.f32 %v12139_v27, %v2970_v10  ;;  %v2965_v31 = vmul.f32 %v12157_v0, %v2915_v29  ;;  %v2972_v58 = vmul.f32 %v12157_v0, %v2922_v34  ;;  %v2917_v41 = vsub.f32 %v11953_v8, %v12130_v45 }
 0x2aa   :  { %3663 = vrot.lane.b32.xlu0 %v3514_v49, %s10019_s5  ;;  %v3518_v19 = vmul.f32 %v3341_v62, %v3218_v3  ;;  %v3220_v48 = vsel %vm3124_vm11, %v3076_v39, %v3172_v17  ;;  %v3349_v15 = vrot.slane %v12279_v51, %v11834_v26  ;;  %v3167_v35 = vmul.f32 0.2, %v3071_v50 }
 0x2ab   :  { %v3078_v54 = vadd.f32 %v12179_v46, %v3024_v37  ;;  %v2967_v20 = vmul.f32 %v12157_v0, %v2917_v41  ;;  %vm3119_vm12 = vcmp.ge.f32.partialorder %v3071_v50, 0.0  ;;  %v3026_v6 = vmul.f32 %v12139_v27, %v2972_v58 }
 0x2ac   :  { %v12342_v8 = vmul.f32 %v3349_v15, %v3220_v48  ;;  %v3329_v1 = vrot.slane %v12279_v51, %v11737_v30  ;;  %v2924_v52 = vsub.f32 %v12005_v4, %v12130_v45  ;;  %v3215_v9 = vsel %vm3119_vm12, %v3071_v50, %v3167_v35  ;;  %v14919_v15 = vld [vmem:[#allocation14_spill] sm:$0xff] }
 0x2ad   :  { %3616 = vrot.lane.b32.xlu1 %v3507_v59, %s10015_s1  ;;  %v3019_v59 = vmul.f32 %v12139_v27, %v2965_v31  ;;  %v3174_v56 = vmul.f32 0.2, %v3078_v54  ;;  %v3021_v44 = vmul.f32 %v12139_v27, %v2967_v20  ;;  %vm3126_vm13 = vcmp.ge.f32.partialorder %v3078_v54, 0.0  ;;  %s14880_s1 = smov 68  }
 0x2ae   :  { %3661 = vrot.lane.b32.xlu0 %v3513_v21, %s10019_s5  ;;  %v3080_v61 = vadd.f32 %v12179_v46, %v3026_v6  ;;  %v2974_v7 = vmul.f32 %v12157_v0, %v2924_v52  ;;  %v2919_v4 = vsub.f32 %v11964_v14, %v12130_v45  ;;  %v3515_v60 = vmul.f32 %v3329_v1, %v3215_v9 }
 0x2af   :  { %v3073_v42 = vadd.f32 %v12179_v46, %v3019_v59  ;;  %v3357_v49 = vrot.slane %v12351_v18, %v11723_v25  ;;  %v2926_v13 = vsub.f32 %v12016_v22, %v12130_v45  ;;  %v3222_v53 = vsel %vm3126_vm13, %v3078_v54, %v3174_v56  ;;  %v14921_v56 = vld [vmem:[#allocation11_spill] sm:$0xff] }
 0x2b0   :  { %v3075_v55 = vadd.f32 %v12179_v46, %v3021_v44  ;;  %v2969_v63 = vmul.f32 %v12157_v0, %v2919_v4  ;;  %v3028_v28 = vmul.f32 %v12139_v27, %v2974_v7  ;;  %vm3128_vm15 = vcmp.ge.f32.partialorder %v3080_v61, 0.0 }
 0x2b1   :  { %3635 = vrot.lane.b32.xlu1 %v3511_v12, %s10017_s23  ;;  %v3169_v40 = vmul.f32 0.2, %v3073_v42  ;;  %vm3121_vm14 = vcmp.ge.f32.partialorder %v3073_v42, 0.0  ;;  %v2976_v14 = vmul.f32 %v12157_v0, %v2926_v13  ;;  %v2921_v22 = vsub.f32 %v11986_v5, %v12130_v45 }
 0x2b2   :  { %3677 = vrot.lane.b32.xlu0 %v12323_v2, %s14870_s3  ;;  %v3522_v39 = vmul.f32 %v3357_v49, %v3222_v53  ;;  %v3365_v10 = vrot.slane %v12351_v18, %v11752_v36  ;;  %v3337_v57 = vrot.slane %v12279_v51, %v11755_v38  ;;  %v3171_v32 = vmul.f32 0.2, %v3075_v55 }
 0x2b3   :  { %v3217_v33 = vsel %vm3121_vm14, %v3073_v42, %v3169_v40  ;;  %v3023_v47 = vmul.f32 %v12139_v27, %v2969_v63  ;;  %v2971_v62 = vmul.f32 %v12157_v0, %v2921_v22  ;;  %vm3123_vm0 = vcmp.ge.f32.partialorder %v3075_v55, 0.0 }
 0x2b4   :  { %v3082_v29 = vadd.f32 %v12179_v46, %v3028_v28  ;;  %v3030_v5 = vmul.f32 %v12139_v27, %v2976_v14  ;;  %v3345_v17 = vrot.slane %v12279_v51, %v11831_v24  ;;  %v2928_v3 = vsub.f32 %v12032_v16, %v12130_v45  ;;  %v14920_v16 = vld [vmem:[#allocation10_spill] sm:$0xff]  ;;  %v14922_v14 = vld [vmem:[#allocation17_spill] sm:$0xff] }
 0x2b5   :  { %3650 = vrot.lane.b32.xlu1 %v3513_v21, %s10018_s4  ;;  %v3176_v21 = vmul.f32 0.2, %v3080_v61  ;;  %v3219_v37 = vsel %vm3123_vm0, %v3075_v55, %v3171_v32  ;;  %v3077_v31 = vadd.f32 %v12179_v46, %v3023_v47  ;;  %v3025_v58 = vmul.f32 %v12139_v27, %v2971_v62 }
 0x2b6   :  { %3691 = vrot.lane.b32.xlu0 %v3518_v19, %s10021_s26  ;;  %v3178_v41 = vmul.f32 0.2, %v3082_v29  ;;  %v2978_v48 = vmul.f32 %v12157_v0, %v2928_v3  ;;  %v2930_v35 = vsub.f32 %v14919_v15, %v12130_v45  ;;  %vm3130_vm1 = vcmp.ge.f32.partialorder %v3082_v29, 0.0 }
 0x2b7   :  { %v3224_v34 = vsel %vm3128_vm15, %v3080_v61, %v3176_v21  ;;  %v2923_v54 = vsub.f32 %v14920_v16, %v12130_v45  ;;  %v3519_v59 = vmul.f32 %v3345_v17, %v3219_v37  ;;  %v3373_v20 = vrot.slane %v12351_v18, %v11828_v23 }
 0x2b8   :  { %v12388_v50 = vmul.f32 %v3365_v10, %v3224_v34  ;;  %v2980_v6 = vmul.f32 %v12157_v0, %v2930_v35  ;;  %v3173_v1 = vmul.f32 0.2, %v3077_v31  ;;  %v3079_v52 = vadd.f32 %v12179_v46, %v3025_v58  ;;  %v12436_v34 = vld [vmem:[%s14918_s28 + $0x20] sm:$0xff] }
 0x2b9   :  { %3646 = vrot.lane.b32.xlu1 %v3511_v12, %s10018_s4  ;;  %v3517_v12 = vmul.f32 %v3337_v57, %v3217_v33  ;;  %v2973_v9 = vmul.f32 %v12157_v0, %v2923_v54  ;;  %v2925_v42 = vsub.f32 %v14921_v56, %v12130_v45  ;;  %v3226_v44 = vsel %vm3130_vm1, %v3082_v29, %v3178_v41  ;;  %v14923_v29 = vld [vmem:[#allocation15_spill] sm:$0xff]  ;;  %s10027_s4 = smov 96  }
 0x2ba   :  { %3706 = vrot.lane.b32.xlu0 %v12342_v8, %s10022_s20  ;;  %vm3125_vm2 = vcmp.ge.f32.partialorder %v3077_v31, 0.0  ;;  %v3032_v7 = vmul.f32 %v12139_v27, %v2978_v48  ;;  %v3381_v4 = vrot.slane %v12351_v18, %v11834_v26  ;;  %v3034_v49 = vmul.f32 %v12139_v27, %v2980_v6 }
 0x2bb   :  { %v2975_v13 = vmul.f32 %v12157_v0, %v2925_v42  ;;  %v3526_v53 = vmul.f32 %v3373_v20, %v3226_v44  ;;  %v3221_v40 = vsel %vm3125_vm2, %v3077_v31, %v3173_v1  ;;  %v3175_v55 = vmul.f32 0.2, %v3079_v52 }
 0x2bc   :  { %v3027_v63 = vmul.f32 %v12139_v27, %v2973_v9  ;;  %vm3127_vm6 = vcmp.ge.f32.partialorder %v3079_v52, 0.0  ;;  %v3086_v28 = vadd.f32 %v12179_v46, %v3032_v7  ;;  %v2933_v22 = vsub.f32 %v14922_v14, %v12130_v45  ;;  %v14926_v9 = vld [vmem:[#allocation18_spill] sm:$0xff] }
 0x2bd   :  { %3665 = vrot.lane.b32.xlu1 %v3515_v60, %s10019_s5  ;;  %v3088_v10 = vadd.f32 %v12179_v46, %v3034_v49  ;;  %v3029_v57 = vmul.f32 %v12139_v27, %v2975_v13  ;;  %v3223_v32 = vsel %vm3127_vm6, %v3079_v52, %v3175_v55  ;;  %v3389_v41 = vrot.slane %v12436_v34, %v11723_v25 }
 0x2be   :  { %3702 = vrot.lane.b32.xlu0 %v3518_v19, %s10022_s20  ;;  %v3084_v19 = vadd.f32 %v12179_v46, %v3030_v5  ;;  %v3081_v47 = vadd.f32 %v12179_v46, %v3027_v63  ;;  %v3182_v62 = vmul.f32 0.2, %v3086_v28  ;;  %vm3134_vm7 = vcmp.ge.f32.partialorder %v3086_v28, 0.0 }
 0x2bf   :  { %v2931_v5 = vsub.f32 %v14923_v29, %v12130_v45  ;;  %v3184_v37 = vmul.f32 0.2, %v3088_v10  ;;  %v3083_v31 = vadd.f32 %v12179_v46, %v3029_v57  ;;  %vm3136_vm8 = vcmp.ge.f32.partialorder %v3088_v10, 0.0 }
 0x2c0   :  { %v3180_v61 = vmul.f32 0.2, %v3084_v19  ;;  %vm3132_vm3 = vcmp.ge.f32.partialorder %v3084_v19, 0.0  ;;  %v3230_v15 = vsel %vm3134_vm7, %v3086_v28, %v3182_v62  ;;  %vm3129_vm9 = vcmp.ge.f32.partialorder %v3081_v47, 0.0 }
 0x2c1   :  { %3675 = vrot.lane.b32.xlu1 %v3515_v60, %s14870_s3  ;;  %v3353_v60 = vrot.slane %v12279_v51, %v11839_v11  ;;  %v3361_v51 = vrot.slane %v12351_v18, %v11737_v30  ;;  %v2981_v35 = vmul.f32 %v12157_v0, %v2931_v5  ;;  %v3397_v16 = vrot.slane %v12436_v34, %v11752_v36  ;;  %s10046_s3 = smov 18  }
 0x2c2   :  { %3721 = vrot.lane.b32.xlu0 %v3522_v39, %s10023_s29  ;;  %v3228_v21 = vsel %vm3132_vm3, %v3084_v19, %v3180_v61  ;;  %v3177_v19 = vmul.f32 0.2, %v3081_v47  ;;  %v3369_v54 = vrot.slane %v12351_v18, %v11755_v38  ;;  %v3232_v6 = vsel %vm3136_vm8, %v3088_v10, %v3184_v37 }
 0x2c3   :  { %v12429_v33 = vmul.f32 %v3381_v4, %v3228_v21  ;;  %v3523_v3 = vmul.f32 %v3361_v51, %v3223_v32  ;;  %v3179_v1 = vmul.f32 0.2, %v3083_v31  ;;  %v2934_v56 = vsub.f32 %v14926_v9, %v12130_v45  ;;  %v12518_v9 = vld [vmem:[%s14918_s28 + $0x28] sm:$0xff]  ;;  %s10031_s28 = smov 24  }
 0x2c4   :  { %v3530_v42 = vmul.f32 %v3389_v41, %v3230_v15  ;;  %v3225_v44 = vsel %vm3129_vm9, %v3081_v47, %v3177_v19  ;;  %vm3131_vm10 = vcmp.ge.f32.partialorder %v3083_v31, 0.0  ;;  %v3035_v4 = vmul.f32 %v12139_v27, %v2981_v35 }
 0x2c5   :  { %3689 = vrot.lane.b32.xlu1 %v3517_v12, %s10021_s26  ;;  %v14924_v12 = vld [vmem:[#allocation12_spill] sm:$0xff]  ;;  %v12468_v49 = vmul.f32 %v3397_v16, %v3232_v6  ;;  %v3525_v13 = vmul.f32 %v3369_v54, %v3225_v44  ;;  %v3227_v63 = vsel %vm3131_vm10, %v3083_v31, %v3179_v1  ;;  %v3385_v41 = vrot.slane %v12351_v18, %v11839_v11 }
 0x2c6   :  { %3736 = vrot.lane.b32.xlu0 %v12388_v50, %s10024_s0  ;;  %v2927_v17 = vsub.f32 %v14924_v12, %v12130_v45  ;;  %v3089_v14 = vadd.f32 %v12179_v46, %v3035_v4  ;;  %v2940_v6 = vsub.f32 %v12107_v43, %v12130_v45  ;;  %vm3562_vm7 = vcmask 113664  }
 0x2c7   :  { %vm14886_vm10 = vcmask 228352  }
 0x2c8   :  { %v2977_v48 = vmul.f32 %v12157_v0, %v2927_v17  ;;  %v3185_v5 = vmul.f32 0.2, %v3089_v14  ;;  %vm3137_vm13 = vcmp.ge.f32.partialorder %v3089_v14, 0.0  ;;  %v2990_v43 = vmul.f32 %v12157_v0, %v2940_v6 }
 0x2c9   :  { %3704 = vrot.lane.b32.xlu1 %v3519_v59, %s10022_s20  ;;  %v14925_v59 = vld [vmem:[#allocation13_spill] sm:$0xff]  ;;  %s10034_s20 = smov 66  }
 0x2ca   :  { %3732 = vrot.lane.b32.xlu0 %v3522_v39, %s10024_s0  ;;  %v3521_v39 = vmul.f32 %v3353_v60, %v3221_v40  ;;  %v2929_v20 = vsub.f32 %v14925_v59, %v12130_v45  ;;  %v3031_v61 = vmul.f32 %v12139_v27, %v2977_v48  ;;  %v2984_v60 = vmul.f32 %v12157_v0, %v2934_v56  ;;  %v14927_v40 = vld [vmem:[#allocation20_spill] sm:$0xff] }
 0x2cb   :  { %v2936_v55 = vsub.f32 %v14927_v40, %v12130_v45  ;;  %v3233_v16 = vsel %vm3137_vm13, %v3089_v14, %v3185_v5  ;;  %v3044_v14 = vmul.f32 %v12139_v27, %v2990_v43  ;;  %v3425_v43 = vrot.slane %v12518_v9, %v11737_v30 }
 0x2cc   :  { %v2979_v7 = vmul.f32 %v12157_v0, %v2929_v20  ;;  %v3393_v20 = vrot.slane %v12436_v34, %v11737_v30  ;;  %vm3607_vm13 = vcmask 457728  }
 0x2cd   :  { %3687 = vrot.lane.b32.xlu1 %v12323_v2, %s10021_s26  ;;  %v2983_v2 = vmul.f32 %v12157_v0, %v2933_v22  ;;  %v3038_v22 = vmul.f32 %v12139_v27, %v2984_v60  ;;  %v2986_v51 = vmul.f32 %v12157_v0, %v2936_v55 }
 0x2ce   :  { %3751 = vrot.lane.b32.xlu0 %v3526_v53, %s14880_s1  ;;  %v3033_v28 = vmul.f32 %v12139_v27, %v2979_v7  ;;  %v14930_v7 = vld [vmem:[#allocation19_spill] sm:$0xff] }
 0x2cf   :  { %v3037_v58 = vmul.f32 %v12139_v27, %v2983_v2  ;;  %v3409_v2 = vrot.slane %v12436_v34, %v11831_v24  ;;  %v3092_v12 = vadd.f32 %v12179_v46, %v3038_v22  ;;  %v3040_v17 = vmul.f32 %v12139_v27, %v2986_v51  ;;  %v14932_v51 = vld [vmem:[#allocation25_spill] sm:$0xff] }
 0x2d0   :  { %v3087_v62 = vadd.f32 %v12179_v46, %v3033_v28  ;;  %v2935_v4 = vsub.f32 %v14930_v7, %v12130_v45 }
 0x2d1   :  { %3719 = vrot.lane.b32.xlu1 %v3521_v39, %s10023_s29  ;;  %v3091_v52 = vadd.f32 %v12179_v46, %v3037_v58  ;;  %v14928_v39 = vld [vmem:[#allocation16_spill] sm:$0xff]  ;;  %v3401_v58 = vrot.slane %v12436_v34, %v11755_v38  ;;  %v3188_v54 = vmul.f32 0.2, %v3092_v12  ;;  %v3094_v59 = vadd.f32 %v12179_v46, %v3040_v17 }
 0x2d2   :  { %3766 = vrot.lane.b32.xlu0 %v12429_v33, %s10026_s25  ;;  %v2932_v10 = vsub.f32 %v14928_v39, %v12130_v45  ;;  %v3183_v48 = vmul.f32 0.2, %v3087_v62  ;;  %vm3135_vm14 = vcmp.ge.f32.partialorder %v3087_v62, 0.0  ;;  %vm3140_vm15 = vcmp.ge.f32.partialorder %v3092_v12, 0.0  ;;  %v14933_v17 = vld [vmem:[#allocation24_spill] sm:$0xff] }
 0x2d3   :  { %v3187_v21 = vmul.f32 0.2, %v3091_v52  ;;  %vm3139_vm11 = vcmp.ge.f32.partialorder %v3091_v52, 0.0  ;;  %v12511_v1 = vmul.f32 %v3401_v58, %v3233_v16  ;;  %v3190_v44 = vmul.f32 0.2, %v3094_v59 }
 0x2d4   :  { %v2982_v29 = vmul.f32 %v12157_v0, %v2932_v10  ;;  %vm3142_vm0 = vcmp.ge.f32.partialorder %v3094_v59, 0.0  ;;  %v2942_v39 = vsub.f32 %v14932_v51, %v12130_v45  ;;  %v3405_v10 = vrot.slane %v12436_v34, %v11828_v23 }
 0x2d5   :  { %3734 = vrot.lane.b32.xlu1 %v3523_v3, %s10024_s0  ;;  %v3235_v32 = vsel %vm3139_vm11, %v3091_v52, %v3187_v21  ;;  %v14929_v3 = vld [vmem:[#allocation22_spill] sm:$0xff]  ;;  %v3231_v52 = vsel %vm3135_vm14, %v3087_v62, %v3183_v48  ;;  %v2985_v21 = vmul.f32 %v12157_v0, %v2935_v4  ;;  %vm3592_vm14 = vcmask 343040   ;;  %s10038_s0 = smov 6  }
 0x2d6   :  { %3762 = vrot.lane.b32.xlu0 %v3526_v53, %s10026_s25  ;;  %v3377_v53 = vrot.slane %v12351_v18, %v11831_v24  ;;  %v2938_v37 = vsub.f32 %v14929_v3, %v12130_v45  ;;  %v12494_v31 = vmul.f32 %v3409_v2, %v3235_v32  ;;  %v3036_v15 = vmul.f32 %v12139_v27, %v2982_v29 }
 0x2d7   :  { %v3531_v60 = vmul.f32 %v3393_v20, %v3231_v52  ;;  %v3039_v32 = vmul.f32 %v12139_v27, %v2985_v21  ;;  %v3098_v29 = vadd.f32 %v12179_v46, %v3044_v14  ;;  %v2941_v3 = vsub.f32 %v14933_v17, %v12130_v45  ;;  %v3906_v17 = vld [vmem:[#allocation2] sm:$0xff] }
 0x2d8   :  { %v3527_v57 = vmul.f32 %v3377_v53, %v3227_v63  ;;  %v2988_v35 = vmul.f32 %v12157_v0, %v2938_v37  ;;  %v3090_v56 = vadd.f32 %v12179_v46, %v3036_v15  ;;  %v14931_v53 = vld [vmem:[#allocation21_spill] sm:$0xff]  ;;  %v3429_v37 = vrot.slane %v12518_v9, %v11752_v36 }
 0x2d9   :  { %3717 = vrot.lane.b32.xlu1 %v12342_v8, %s10023_s29  ;;  %v3085_v8 = vadd.f32 %v12179_v46, %v3031_v61  ;;  %v2937_v40 = vsub.f32 %v14931_v53, %v12130_v45  ;;  %v3093_v58 = vadd.f32 %v12179_v46, %v3039_v32  ;;  %v2991_v15 = vmul.f32 %v12157_v0, %v2941_v3 }
 0x2da   :  { %3781 = vrot.lane.b32.xlu0 %v3530_v42, %s10027_s4  ;;  %v3042_v61 = vmul.f32 %v12139_v27, %v2988_v35  ;;  %vm3138_vm1 = vcmp.ge.f32.partialorder %v3090_v56, 0.0  ;;  %v3186_v63 = vmul.f32 0.2, %v3090_v56  ;;  %vm3146_vm3 = vcmp.ge.f32.partialorder %v3098_v29, 0.0  ;;  %v14934_v35 = vld [vmem:[#allocation23_spill] sm:$0xff] }
 0x2db   :  { %v3181_v47 = vmul.f32 0.2, %v3085_v8  ;;  %vm3133_vm12 = vcmp.ge.f32.partialorder %v3085_v8, 0.0  ;;  %v2987_v22 = vmul.f32 %v12157_v0, %v2937_v40  ;;  %v2939_v16 = vsub.f32 %v14934_v35, %v12130_v45 }
 0x2dc   :  { %v3096_v28 = vadd.f32 %v12179_v46, %v3042_v61  ;;  %v3234_v2 = vsel %vm3138_vm1, %v3090_v56, %v3186_v63  ;;  %vm3141_vm6 = vcmp.ge.f32.partialorder %v3093_v58, 0.0  ;;  %vm3956_vm1 = vcmask 588800  }
 0x2dd   :  { %3749 = vrot.lane.b32.xlu1 %v3525_v13, %s14880_s1  ;;  %v3229_v19 = vsel %vm3133_vm12, %v3085_v8, %v3181_v47  ;;  %v3421_v13 = vrot.slane %v12518_v9, %v11723_v25  ;;  %v3238_v8 = vsel %vm3142_vm0, %v3094_v59, %v3190_v44  ;;  %v2992_v47 = vmul.f32 %v12157_v0, %v2942_v39 }
 0x2de   :  { %3796 = vrot.lane.b32.xlu0 %v12468_v49, %s14872_s22  ;;  %v3529_v18 = vmul.f32 %v3385_v41, %v3229_v19  ;;  %v3192_v62 = vmul.f32 0.2, %v3096_v28  ;;  %v3041_v5 = vmul.f32 %v12139_v27, %v2987_v22  ;;  %vm3144_vm2 = vcmp.ge.f32.partialorder %v3096_v28, 0.0  ;;  %v14935_v22 = vld [vmem:[#allocation26_spill] sm:$0xff] }
 0x2df   :  { %v3194_v19 = vmul.f32 0.2, %v3098_v29  ;;  %v2989_v6 = vmul.f32 %v12157_v0, %v2939_v16  ;;  %v2943_v51 = vsub.f32 %v14935_v22, %v12130_v45  ;;  %vm3637_vm0 = vcmask 687104  }
 0x2e0   :  { %v3240_v41 = vsel %vm3144_vm2, %v3096_v28, %v3192_v62  ;;  %v3095_v48 = vadd.f32 %v12179_v46, %v3041_v5  ;;  %vm3622_vm2 = vcmask 572416  }
 0x2e1   :  { %3764 = vrot.lane.b32.xlu1 %v3527_v57, %s10026_s25  ;;  %v3538_v57 = vmul.f32 %v3421_v13, %v3238_v8  ;;  %v3540_v59 = vmul.f32 %v3429_v37, %v3240_v41  ;;  %s14878_s25 = smov 52   ;;  %v3043_v7 = vmul.f32 %v12139_v27, %v2989_v6  ;;  %v3445_v8 = vrot.slane %v12518_v9, %v11834_v26 }
 0x2e2   :  { %3792 = vrot.lane.b32.xlu0 %v3530_v42, %s14872_s22  ;;  %v3236_v42 = vsel %vm3140_vm15, %v3092_v12, %v3188_v54  ;;  %v3534_v12 = vmul.f32 %v3405_v10, %v3234_v2  ;;  %v3437_v54 = vrot.slane %v12518_v9, %v11828_v23  ;;  %v3191_v52 = vmul.f32 0.2, %v3095_v48 }
 0x2e3   :  { %vm3143_vm8 = vcmp.ge.f32.partialorder %v3095_v48, 0.0  ;;  %v3441_v10 = vrot.slane %v12518_v9, %v11831_v24  ;;  %v2993_v62 = vmul.f32 %v12157_v0, %v2943_v51 }
 0x2e5   :  { %3747 = vrot.lane.b32.xlu1 %v12388_v50, %s14880_s1  ;;  %v3413_v50 = vrot.slane %v12436_v34, %v11834_v26  ;;  %s10040_s1 = smov 62  }
 0x2e6   :  { %3822 = vrot.lane.b32.xlu0 %v12494_v31, %s10029_s27 }
 0x2e7   :  { %v3536_v55 = vmul.f32 %v3413_v50, %v3236_v42  ;;  %v3242_v50 = vsel %vm3146_vm3, %v3098_v29, %v3194_v19  ;;  %v3417_v42 = vrot.slane %v12436_v34, %v11839_v11  ;;  %v3907_v29 = vld [vmem:[#allocation2 + $0x8] sm:$0xff]  ;;  %vm3667_vm3 = vcmask 916480  }
 0x2e8   :  { %v3542_v61 = vmul.f32 %v3437_v54, %v3242_v50 }
 0x2e9   :  { %3779 = vrot.lane.b32.xlu1 %v3529_v18, %s10027_s4  ;;  %v3189_v18 = vmul.f32 0.2, %v3093_v58 }
 0x2ea   :  { %3808 = vrot.lane.b32.xlu0 %v12511_v1, %s10030_s2 }
 0x2ed   :  { %3794 = vrot.lane.b32.xlu1 %v3531_v60, %s14872_s22  ;;  %v3239_v60 = vsel %vm3143_vm8, %v3095_v48, %v3191_v52  ;;  %v3047_v48 = vmul.f32 %v12139_v27, %v2993_v62  ;;  %v3449_v52 = vrot.slane %v12518_v9, %v11839_v11  ;;  %vm14884_vm8 = vcmask 97280   ;;  %s10041_s22 = smov 106  }
 0x2ee   :  { %3835 = vrot.lane.b32.xlu0 %v3536_v55, %s10031_s28  ;;  %v3539_v21 = vmul.f32 %v3425_v43, %v3239_v60 }
 0x2ef   :  { %v3101_v54 = vadd.f32 %v12179_v46, %v3047_v48 }
 0x2f1   :  { %3777 = vrot.lane.b32.xlu1 %v12429_v33, %s10027_s4  ;;  %v3046_v33 = vmul.f32 %v12139_v27, %v2992_v47  ;;  %v3197_v6 = vmul.f32 0.2, %v3101_v54  ;;  %vm3149_vm15 = vcmp.ge.f32.partialorder %v3101_v54, 0.0 }
 0x2f2   :  { %3850 = vrot.lane.b32.xlu0 %v3538_v57, %s14874_s24 }
 0x2f3   :  { %v3100_v20 = vadd.f32 %v12179_v46, %v3046_v33 }
 0x2f5   :  { %3820 = vrot.lane.b32.xlu1 %v3534_v12, %s10029_s27  ;;  %v3196_v13 = vmul.f32 0.2, %v3100_v20  ;;  %vm3148_vm9 = vcmp.ge.f32.partialorder %v3100_v20, 0.0 }
 0x2f6   :  { %3833 = vrot.lane.b32.xlu0 %v12494_v31, %s10031_s28  ;;  %v3045_v31 = vmul.f32 %v12139_v27, %v2991_v15 }
 0x2f7   :  { %v3244_v28 = vsel %vm3148_vm9, %v3100_v20, %v3196_v13  ;;  %vm3708_vm9 = vcmask 211968  }
 0x2f8   :  { %v3099_v53 = vadd.f32 %v12179_v46, %v3045_v31  ;;  %v3544_v32 = vmul.f32 %v3445_v8, %v3244_v28 }
 0x2f9   :  { %3806 = vrot.lane.b32.xlu1 %v12468_v49, %s10030_s2  ;;  %v3237_v49 = vsel %vm3141_vm6, %v3093_v58, %v3189_v18  ;;  %v3433_v58 = vrot.slane %v12518_v9, %v11755_v38  ;;  %vm3652_vm6 = vcmask 801792  }
 0x2fa   :  { %3865 = vrot.lane.b32.xlu0 %v3540_v59, %s14878_s25  ;;  %v3537_v40 = vmul.f32 %v3417_v42, %v3237_v49  ;;  %v3195_v14 = vmul.f32 0.2, %v3099_v53  ;;  %vm3147_vm11 = vcmp.ge.f32.partialorder %v3099_v53, 0.0  ;;  %v3547_v42 = vld [vmem:[%s14831_s6 + $0x8] sm:$0xff] }
 0x2fb   :  { %v3561_v56 = vpop.permute.xlu1 %3560  ;;  %7883 = vmatprep.mubr.msk.f32.mxu0 %vm3956_vm1, %v3547_v42 }
 0x2fc   :  { %v3559_v44 = vpop.permute.xlu0 %3558  ;;  %v3243_v12 = vsel %vm3147_vm11, %v3099_v53, %v3195_v14  ;;  %vm14883_vm11 = vcmask 326656  }
 0x2fd   :  { %v3564_v4 = vsel %vm3562_vm7, %v3559_v44, %v3561_v56  ;;  %3818 = vrot.lane.b32.xlu1 %v12511_v1, %s10029_s27  ;;  %v3097_v1 = vadd.f32 %v12179_v46, %v3043_v7  ;;  %s14876_s27 = smov 80   ;;  %v3543_v0 = vmul.f32 %v3441_v10, %v3243_v12  ;;  %v3245_v56 = vsel %vm3149_vm15, %v3101_v54, %v3197_v6 }
 0x2fe   :  { %3568 = vst.msk [vmem:[#allocation2 + $0x18] sm:$0xff] %vm14888_vm5, %v3564_v4  ;;  %3880 = vrot.lane.b32.xlu0 %v3542_v61, %s10034_s20  ;;  %v3545_v61 = vmul.f32 %v3449_v52, %v3245_v56  ;;  %vm3783_vm15 = vcmask 785408  }
 0x2ff   :  { %v3557_v34 = vpop.permute.xlu1 %3556  ;;  %v3193_v47 = vmul.f32 0.2, %v3097_v1  ;;  %vm3145_vm12 = vcmp.ge.f32.partialorder %v3097_v1, 0.0 }
 0x300   :  { %v3572_v55 = vpop.permute.xlu0 %3571  ;;  %v3563_v63 = vsel %vm3562_vm7, %v3557_v34, %v3559_v44  ;;  %vm3679_vm7 = vcmask 1031168  }
 0x301   :  { %3837 = vrot.lane.b32.xlu1 %v3537_v40, %s10031_s28  ;;  %v9364_v37 = vpack.c.bf16 %v3563_v63, %v3906_v17  ;;  %v3241_v19 = vsel %vm3145_vm12, %v3097_v1, %v3193_v47  ;;  %vm3738_vm12 = vcmask 441344  }
 0x302   :  { %3863 = vrot.lane.b32.xlu0 %v3539_v21, %s14878_s25  ;;  %v3541_v35 = vmul.f32 %v3433_v58, %v3241_v19 }
 0x303   :  { %v3574_v39 = vpop.permute.xlu1 %3573 }
 0x304   :  { %v3604_v57 = vpop.permute.xlu0 %3603  ;;  %v12592_v2 = vsel %vm14886_vm10, %v3572_v55, %v3574_v39 }
 0x305   :  { %3852 = vrot.lane.b32.xlu1 %v3539_v21, %s14874_s24  ;;  %v3909_v5 = vld [vmem:[#allocation2 + $0x18] sm:$0xff] }
 0x306   :  { %3895 = vrot.lane.b32.xlu0 %v3544_v32, %s14876_s27  ;;  %v9362_v45 = vpack.c.bf16 %v3909_v5, %v3907_v29 }
 0x307   :  { %v3576_v3 = vpop.permute.xlu1 %3575 }
 0x308   :  { %v3619_v33 = vpop.permute.xlu0 %3618  ;;  %v3579_v41 = vsel %vm14886_vm10, %v3574_v39, %v3576_v3  ;;  %9363 = vmatprep.subr.bf16.mxu0 %v9362_v45 }
 0x309   :  { %3583 = vst.msk [vmem:[#allocation2 + $0x28] sm:$0xff] %vm14888_vm5, %v3579_v41  ;;  %3848 = vrot.lane.b32.xlu1 %v3537_v40, %s14874_s24  ;;  %9365 = vmatpush1.bf16.msra.mxu0 %v9364_v37  ;;  %s10042_s24 = smov 90  }
 0x30a   :  { %3893 = vrot.lane.b32.xlu0 %v3543_v0, %s14876_s27 }
 0x30b   :  { %v3589_v15 = vpop.permute.xlu1 %3588 }
 0x30c   :  { %v3602_v16 = vpop.permute.xlu0 %3601 }
 0x30d   :  { %v3608_v59 = vsel %vm3607_vm13, %v3602_v16, %v3604_v57  ;;  %3867 = vrot.lane.b32.xlu1 %v3541_v35, %s14878_s25  ;;  %s10044_s25 = smov 118  }
 0x30f   :  { %v3591_v18 = vpop.permute.xlu1 %3590 }
 0x310   :  { %v3634_v27 = vpop.permute.xlu0 %3633  ;;  %v3594_v20 = vsel %vm3592_vm14, %v3589_v15, %v3591_v18  ;;  %v3911_v7 = vld [vmem:[#allocation2 + $0x28] sm:$0xff] }
 0x311   :  { %3598 = vst.msk [vmem:[#allocation2 + $0x38] sm:$0xff] %vm14888_vm5, %v3594_v20  ;;  %3882 = vrot.lane.b32.xlu1 %v3543_v0, %s10034_s20 }
 0x313   :  { %v3587_v50 = vpop.permute.xlu1 %3586 }
 0x314   :  { %v3649_v31 = vpop.permute.xlu0 %3648  ;;  %v3593_v46 = vsel %vm3592_vm14, %v3587_v50, %v3589_v15  ;;  %vm3768_vm14 = vcmask 670720  }
 0x315   :  { %3878 = vrot.lane.b32.xlu1 %v3541_v35, %s10034_s20  ;;  %v9368_v13 = vpack.c.bf16 %v3593_v46, %v12592_v2  ;;  %s10049_s20 = smov 2  }
 0x317   :  { %v3606_v44 = vpop.permute.xlu1 %3605 }
 0x318   :  { %v3632_v43 = vpop.permute.xlu0 %3631  ;;  %v3609_v49 = vsel %vm3607_vm13, %v3604_v57, %v3606_v44  ;;  %v3913_v9 = vld [vmem:[#allocation2 + $0x38] sm:$0xff]  ;;  %vm3753_vm13 = vcmask 556032  }
 0x319   :  { %v3638_v4 = vsel %vm3637_vm0, %v3632_v43, %v3634_v27  ;;  %3613 = vst.msk [vmem:[#allocation2 + $0x48] sm:$0xff] %vm14888_vm5, %v3609_v49  ;;  %3897 = vrot.lane.b32.xlu1 %v3545_v61, %s14876_s27  ;;  %v9366_v60 = vpack.c.bf16 %v3913_v9, %v3911_v7  ;;  %s10045_s27 = smov 46  }
 0x31b   :  { %v3621_v53 = vpop.permute.xlu1 %3620  ;;  %9367 = vmatprep.subr.bf16.mxu0 %v9366_v60 }
 0x31c   :  { %v3664_v34 = vpop.permute.xlu0 %3663  ;;  %v3624_v40 = vsel %vm3622_vm2, %v3619_v33, %v3621_v53  ;;  %9369 = vmatpush1.bf16.msra.mxu0 %v9368_v13 }
 0x31d   :  { %3628 = vst.msk [vmem:[#allocation2 + $0x58] sm:$0xff] %vm14888_vm5, %v3624_v40 }
 0x31f   :  { %v3617_v55 = vpop.permute.xlu1 %3616 }
 0x320   :  { %v3662_v63 = vpop.permute.xlu0 %3661  ;;  %v3623_v21 = vsel %vm3622_vm2, %v3617_v55, %v3619_v33  ;;  %v3915_v22 = vld [vmem:[#allocation2 + $0x48] sm:$0xff]  ;;  %vm3824_vm2 = vcmask 80896  }
 0x321   :  { %v3668_v8 = vsel %vm3667_vm3, %v3662_v63, %v3664_v34  ;;  %v9372_v10 = vpack.c.bf16 %v3623_v21, %v3608_v59 }
 0x323   :  { %v3636_v1 = vpop.permute.xlu1 %3635 }
 0x324   :  { %v3678_v28 = vpop.permute.xlu0 %3677  ;;  %v3639_v14 = vsel %vm3637_vm0, %v3634_v27, %v3636_v1  ;;  %v3917_v51 = vld [vmem:[#allocation2 + $0x58] sm:$0xff]  ;;  %vm3798_vm0 = vcmask 900096  }
 0x325   :  { %3684 = vst.msk [vmem:[#allocation2 + $0x98] sm:$0xff] %vm14888_vm5, %v3678_v28  ;;  %3643 = vst.msk [vmem:[#allocation2 + $0x68] sm:$0xff] %vm14888_vm5, %v3639_v14  ;;  %v9370_v39 = vpack.c.bf16 %v3917_v51, %v3915_v22 }
 0x327   :  { %v3651_v57 = vpop.permute.xlu1 %3650  ;;  %9371 = vmatprep.subr.bf16.mxu0 %v9370_v39 }
 0x328   :  { %v3692_v2 = vpop.permute.xlu0 %3691  ;;  %v3654_v32 = vsel %vm3652_vm6, %v3649_v31, %v3651_v57  ;;  %9373 = vmatpush1.bf16.msra.mxu0 %v9372_v10 }
 0x329   :  { %3658 = vst.msk [vmem:[#allocation2 + $0x78] sm:$0xff] %vm14888_vm5, %v3654_v32 }
 0x32b   :  { %v3647_v47 = vpop.permute.xlu1 %3646 }
 0x32c   :  { %v3707_v62 = vpop.permute.xlu0 %3706  ;;  %v3653_v29 = vsel %vm3652_vm6, %v3647_v47, %v3649_v31  ;;  %v3919_v17 = vld [vmem:[#allocation2 + $0x68] sm:$0xff]  ;;  %v3925_v16 = vld [vmem:[#allocation2 + $0x98] sm:$0xff]  ;;  %vm3810_vm6 = vcmask 1014784  }
 0x32d   :  { %v9376_v58 = vpack.c.bf16 %v3653_v29, %v3638_v4 }
 0x32f   :  { %v3666_v5 = vpop.permute.xlu1 %3665 }
 0x330   :  { %v3703_v12 = vpop.permute.xlu0 %3702  ;;  %v3669_v45 = vsel %vm3667_vm3, %v3664_v34, %v3666_v5  ;;  %v3921_v3 = vld [vmem:[#allocation2 + $0x78] sm:$0xff]  ;;  %vm14882_vm3 = vcmask 195584  }
 0x331   :  { %3673 = vst.msk [vmem:[#allocation2 + $0x88] sm:$0xff] %vm14888_vm5, %v3669_v45  ;;  %v9374_v37 = vpack.c.bf16 %v3921_v3, %v3919_v17 }
 0x333   :  { %v3676_v33 = vpop.permute.xlu1 %3675  ;;  %9375 = vmatprep.subr.bf16.mxu0 %v9374_v37 }
 0x334   :  { %v3722_v41 = vpop.permute.xlu0 %3721  ;;  %v3680_v0 = vsel %vm3679_vm7, %v3676_v33, %v3678_v28  ;;  %9377 = vmatpush1.bf16.msra.mxu0 %v9376_v58  ;;  %vm3869_vm7 = vcmask 424960  }
 0x335   :  { %v9380_v59 = vpack.c.bf16 %v3680_v0, %v3668_v8 }
 0x337   :  { %v3690_v19 = vpop.permute.xlu1 %3689 }
 0x338   :  { %v3737_v48 = vpop.permute.xlu0 %3736  ;;  %v3695_v15 = vsel %vm14884_vm8, %v3690_v19, %v3692_v2  ;;  %v3923_v35 = vld [vmem:[#allocation2 + $0x88] sm:$0xff] }
 0x339   :  { %3699 = vst.msk [vmem:[#allocation2 + $0xa8] sm:$0xff] %vm14888_vm5, %v3695_v15  ;;  %v9378_v54 = vpack.c.bf16 %v3925_v16, %v3923_v35 }
 0x33b   :  { %v3705_v18 = vpop.permute.xlu1 %3704  ;;  %9379 = vmatprep.subr.bf16.mxu0 %v9378_v54 }
 0x33c   :  { %v3733_v27 = vpop.permute.xlu0 %3732  ;;  %v3709_v20 = vsel %vm3708_vm9, %v3703_v12, %v3705_v18  ;;  %v3710_v6 = vsel %vm3708_vm9, %v3705_v18, %v3707_v62  ;;  %9381 = vmatpush1.bf16.msra.mxu0 %v9380_v59  ;;  %vm3854_vm9 = vcmask 310272  }
 0x33d   :  { %3714 = vst.msk [vmem:[#allocation2 + $0xb8] sm:$0xff] %vm14888_vm5, %v3710_v6 }
 0x33f   :  { %v3688_v50 = vpop.permute.xlu1 %3687 }
 0x340   :  { %v3752_v52 = vpop.permute.xlu0 %3751  ;;  %v3694_v31 = vsel %vm14884_vm8, %v3688_v50, %v3690_v19  ;;  %v3927_v44 = vld [vmem:[#allocation2 + $0xa8] sm:$0xff] }
 0x341   :  { %v9384_v49 = vpack.c.bf16 %v3709_v20, %v3694_v31 }
 0x343   :  { %v3720_v46 = vpop.permute.xlu1 %3719 }
 0x344   :  { %v3767_v56 = vpop.permute.xlu0 %3766  ;;  %v3725_v42 = vsel %vm14883_vm11, %v3720_v46, %v3722_v41  ;;  %v3929_v61 = vld [vmem:[#allocation2 + $0xb8] sm:$0xff] }
 0x345   :  { %3729 = vst.msk [vmem:[#allocation2 + $0xc8] sm:$0xff] %vm14888_vm5, %v3725_v42  ;;  %v9382_v43 = vpack.c.bf16 %v3929_v61, %v3927_v44 }
 0x347   :  { %v3735_v7 = vpop.permute.xlu1 %3734  ;;  %9383 = vmatprep.subr.bf16.mxu0 %v9382_v43 }
 0x348   :  { %v3763_v9 = vpop.permute.xlu0 %3762  ;;  %v3739_v4 = vsel %vm3738_vm12, %v3733_v27, %v3735_v7  ;;  %v3740_v60 = vsel %vm3738_vm12, %v3735_v7, %v3737_v48  ;;  %9385 = vmatpush1.bf16.msra.mxu0 %v9384_v49  ;;  %vm3899_vm12 = vcmask 654336  }
 0x349   :  { %3744 = vst.msk [vmem:[#allocation2 + $0xd8] sm:$0xff] %vm14888_vm5, %v3740_v60 }
 0x34b   :  { %v3718_v13 = vpop.permute.xlu1 %3717 }
 0x34c   :  { %v3782_v53 = vpop.permute.xlu0 %3781  ;;  %v3724_v34 = vsel %vm14883_vm11, %v3718_v13, %v3720_v46  ;;  %v3931_v21 = vld [vmem:[#allocation2 + $0xc8] sm:$0xff] }
 0x34d   :  { %v9388_v28 = vpack.c.bf16 %v3739_v4, %v3724_v34 }
 0x34f   :  { %v3750_v40 = vpop.permute.xlu1 %3749 }
 0x350   :  { %v3797_v55 = vpop.permute.xlu0 %3796  ;;  %v3755_v63 = vsel %vm3753_vm13, %v3750_v40, %v3752_v52  ;;  %v3933_v8 = vld [vmem:[#allocation2 + $0xd8] sm:$0xff] }
 0x351   :  { %3759 = vst.msk [vmem:[#allocation2 + $0xe8] sm:$0xff] %vm14888_vm5, %v3755_v63  ;;  %v9386_v1 = vpack.c.bf16 %v3933_v8, %v3931_v21 }
 0x353   :  { %v3765_v14 = vpop.permute.xlu1 %3764  ;;  %9387 = vmatprep.subr.bf16.mxu0 %v9386_v1 }
 0x354   :  { %v3793_v22 = vpop.permute.xlu0 %3792  ;;  %v3769_v51 = vsel %vm3768_vm14, %v3763_v9, %v3765_v14  ;;  %v3770_v39 = vsel %vm3768_vm14, %v3765_v14, %v3767_v56  ;;  %9389 = vmatpush1.bf16.msra.mxu0 %v9388_v28 }
 0x355   :  { %3774 = vst.msk [vmem:[#allocation2 + $0xf8] sm:$0xff] %vm14888_vm5, %v3770_v39 }
 0x357   :  { %v3748_v10 = vpop.permute.xlu1 %3747 }
 0x358   :  { %v3823_v57 = vpop.permute.xlu0 %3822  ;;  %v3754_v2 = vsel %vm3753_vm13, %v3748_v10, %v3750_v40  ;;  %v3935_v29 = vld [vmem:[#allocation2 + $0xe8] sm:$0xff]  ;;  %vm3884_vm13 = vcmask 539648  }
 0x359   :  { %v9392_v45 = vpack.c.bf16 %v3769_v51, %v3754_v2 }
 0x35b   :  { %v3780_v32 = vpop.permute.xlu1 %3779 }
 0x35c   :  { %v3809_v47 = vpop.permute.xlu0 %3808  ;;  %v3785_v62 = vsel %vm3783_vm15, %v3780_v32, %v3782_v53  ;;  %v3937_v5 = vld [vmem:[#allocation2 + $0xf8] sm:$0xff] }
 0x35d   :  { %3815 = vst.msk [vmem:[#allocation2 + $0x128] sm:$0xff] %vm14888_vm5, %v3809_v47  ;;  %3789 = vst.msk [vmem:[#allocation2 + $0x108] sm:$0xff] %vm14888_vm5, %v3785_v62  ;;  %v9390_v12 = vpack.c.bf16 %v3937_v5, %v3935_v29  ;;  %v3546_v5 = vld [vmem:[%s14831_s6] sm:$0xff] }
 0x35f   :  { %v3795_v17 = vpop.permute.xlu1 %3794  ;;  %9391 = vmatprep.subr.bf16.mxu0 %v9390_v12  ;;  %v3549_v12 = vld [vmem:[%s14831_s6 + $0x18] sm:$0xff] }
 0x360   :  { %v3836_v3 = vpop.permute.xlu0 %3835  ;;  %v3799_v37 = vsel %vm3798_vm0, %v3793_v22, %v3795_v17  ;;  %v3800_v58 = vsel %vm3798_vm0, %v3795_v17, %v3797_v55  ;;  %9393 = vmatpush1.bf16.msra.mxu0 %v9392_v45  ;;  %v3548_v45 = vld [vmem:[%s14831_s6 + $0x10] sm:$0xff]  ;;  %v12673_v17 = vld [vmem:[%s14834_s9] sm:$0xff]  ;;  %s10039_s6 = smov 34  }
 0x361   :  { %3804 = vst.msk [vmem:[#allocation2 + $0x118] sm:$0xff] %vm14888_vm5, %v3800_v58  ;;  %v12685_v58 = vrot.slane %v12673_v17, %v11723_v25 }
 0x363   :  { %v3778_v33 = vpop.permute.xlu1 %3777 }
 0x364   :  { %v3851_v41 = vpop.permute.xlu0 %3850  ;;  %v3784_v0 = vsel %vm3783_vm15, %v3778_v33, %v3780_v32  ;;  %v3939_v35 = vld [vmem:[#allocation2 + $0x108] sm:$0xff]  ;;  %v12689_v33 = vrot.slane %v12673_v17, %v11752_v36 }
 0x365   :  { %v9396_v18 = vpack.c.bf16 %v3799_v37, %v3784_v0  ;;  %v3943_v46 = vld [vmem:[#allocation2 + $0x128] sm:$0xff]  ;;  %v12681_v37 = vrot.slane %v12673_v17, %v11755_v38 }
 0x367   :  { %v3821_v19 = vpop.permute.xlu1 %3820 }
 0x368   :  { %v3834_v48 = vpop.permute.xlu0 %3833  ;;  %v3826_v15 = vsel %vm3824_vm2, %v3821_v19, %v3823_v57  ;;  %v3941_v16 = vld [vmem:[#allocation2 + $0x118] sm:$0xff] }
 0x369   :  { %v3840_v54 = vsel %vm14882_vm3, %v3834_v48, %v3836_v3  ;;  %3830 = vst.msk [vmem:[#allocation2 + $0x138] sm:$0xff] %vm14888_vm5, %v3826_v15  ;;  %v9394_v59 = vpack.c.bf16 %v3941_v16, %v3939_v35  ;;  %v10036_v15 = vmov 1.0|1.0  }
 0x36b   :  { %v3807_v27 = vpop.permute.xlu1 %3806  ;;  %9395 = vmatprep.subr.bf16.mxu0 %v9394_v59 }
 0x36c   :  { %v3866_v20 = vpop.permute.xlu0 %3865  ;;  %v3811_v6 = vsel %vm3810_vm6, %v3807_v27, %v3809_v47  ;;  %9397 = vmatpush1.bf16.msra.mxu0 %v9396_v18 }
 0x36f   :  { %v3819_v50 = vpop.permute.xlu1 %3818 }
 0x370   :  { %v3881_v52 = vpop.permute.xlu0 %3880  ;;  %v3825_v31 = vsel %vm3824_vm2, %v3819_v50, %v3821_v19  ;;  %v3945_v56 = vld [vmem:[#allocation2 + $0x138] sm:$0xff] }
 0x371   :  { %v9398_v42 = vpack.c.bf16 %v3945_v56, %v3943_v46  ;;  %v9400_v44 = vpack.c.bf16 %v3825_v31, %v3811_v6 }
 0x373   :  { %v3838_v61 = vpop.permute.xlu1 %3837  ;;  %9399 = vmatprep.subr.bf16.mxu0 %v9398_v42 }
 0x374   :  { %v3864_v43 = vpop.permute.xlu0 %3863  ;;  %v3841_v49 = vsel %vm14882_vm3, %v3836_v3, %v3838_v61  ;;  %9401 = vmatpush1.bf16.msra.mxu0 %v9400_v44  ;;  %v12677_v3 = vrot.slane %v12673_v17, %v11737_v30 }
 0x375   :  { %v3870_v7 = vsel %vm3869_vm7, %v3864_v43, %v3866_v20  ;;  %3845 = vst.msk [vmem:[#allocation2 + $0x148] sm:$0xff] %vm14888_vm5, %v3841_v49 }
 0x377   :  { %v3853_v9 = vpop.permute.xlu1 %3852 }
 0x378   :  { %v3896_v4 = vpop.permute.xlu0 %3895  ;;  %v3856_v60 = vsel %vm3854_vm9, %v3851_v41, %v3853_v9 }
 0x379   :  { %3860 = vst.msk [vmem:[#allocation2 + $0x158] sm:$0xff] %vm14888_vm5, %v3856_v60 }
 0x37b   :  { %v3849_v13 = vpop.permute.xlu1 %3848 }
 0x37c   :  { %v3894_v53 = vpop.permute.xlu0 %3893  ;;  %v3855_v34 = vsel %vm3854_vm9, %v3849_v13, %v3851_v41  ;;  %v3947_v21 = vld [vmem:[#allocation2 + $0x148] sm:$0xff] }
 0x37d   :  { %v3900_v40 = vsel %vm3899_vm12, %v3894_v53, %v3896_v4  ;;  %v9404_v28 = vpack.c.bf16 %v3855_v34, %v3840_v54  ;;  %v14936_v41 = vld [vmem:[#allocation9_spill] sm:$0xff] }
 0x37e   :  { %v12692_v0 = vadd.s32 8, %v14936_v41  ;;  %vm4218_vm14 = vcmp.eq.s32.totalorder %v14936_v41, %v12681_v37  ;;  %v12699_v19 = vadd.s32 16, %v14936_v41  ;;  %v12702_v48 = vadd.s32 24, %v14936_v41 }
 0x37f   :  { %v3868_v55 = vpop.permute.xlu1 %3867  ;;  %vm4215_vm2 = vcmp.eq.s32.totalorder %v14936_v41, %v12685_v58  ;;  %vm4217_vm9 = vcmp.eq.s32.totalorder %v14936_v41, %v12689_v33  ;;  %v12727_v35 = vadd.s32 32, %v14936_v41  ;;  %v12730_v16 = vadd.s32 40, %v14936_v41 }
 0x380   :  { %v3871_v63 = vsel %vm3869_vm7, %v3866_v20, %v3868_v55  ;;  %v3949_v8 = vld [vmem:[#allocation2 + $0x158] sm:$0xff]  ;;  %vm4226_vm15 = vcmp.eq.s32.totalorder %v12692_v0, %v12677_v3  ;;  %vm4228_vm0 = vcmp.eq.s32.totalorder %v12692_v0, %v12681_v37  ;;  %vm4225_vm6 = vcmp.eq.s32.totalorder %v12692_v0, %v12685_v58 }
 0x381   :  { %3875 = vst.msk [vmem:[#allocation2 + $0x168] sm:$0xff] %vm14888_vm5, %v3871_v63  ;;  %v9402_v1 = vpack.c.bf16 %v3949_v8, %v3947_v21  ;;  %vm4236_vm3 = vcmp.eq.s32.totalorder %v12699_v19, %v12677_v3  ;;  %vm4246_vm11 = vcmp.eq.s32.totalorder %v12702_v48, %v12677_v3  ;;  %vm9412_vm8 = vmpackc.low %vm4225_vm6, %vm4215_vm2  ;;  %vm4245_vm2 = vcmp.eq.s32.totalorder %v12702_v48, %v12685_v58 }
 0x382   :  { %vm9414_vm6 = vmpackc.low %vm4246_vm11, %vm4236_vm3  ;;  %v12748_v54 = vadd.s32 48, %v14936_v41  ;;  %v12751_v59 = vadd.s32 56, %v14936_v41  ;;  %vm4258_vm3 = vcmp.eq.s32.totalorder %v12727_v35, %v12681_v37  ;;  %v12774_v18 = vadd.s32 64, %v14936_v41 }
 0x383   :  { %v3883_v14 = vpop.permute.xlu1 %3882  ;;  %9403 = vmatprep.subr.bf16.mxu0 %v9402_v1  ;;  %v12777_v27 = vadd.s32 72, %v14936_v41  ;;  %v12800_v20 = vadd.s32 80, %v14936_v41  ;;  %v12803_v6 = vadd.s32 88, %v14936_v41  ;;  %v12826_v50 = vadd.s32 96, %v14936_v41  ;;  %v4042_v1 = vld [vmem:[%s14833_s8] sm:$0xff] }
 0x384   :  { %v3886_v22 = vsel %vm3884_vm13, %v3881_v52, %v3883_v14  ;;  %9405 = vmatpush1.bf16.msra.mxu0 %v9404_v28  ;;  %v12852_v31 = vadd.s32 112, %v14936_v41  ;;  %v12855_v46 = vadd.s32 120, %v14936_v41  ;;  %v12878_v56 = vadd.s32 128, %v14936_v41  ;;  %v4040_v28 = vld [vmem:[%s14832_s7] sm:$0xff] }
 0x385   :  { %3890 = vst.msk [vmem:[#allocation2 + $0x178] sm:$0xff] %vm14888_vm5, %v3886_v22  ;;  %v12881_v42 = vadd.s32 136, %v14936_v41  ;;  %v12957_v14 = vadd.s32 144, %v14936_v41  ;;  %v12960_v22 = vadd.s32 152, %v14936_v41 }
 0x387   :  { %v3879_v51 = vpop.permute.xlu1 %3878 }
 0x388   :  { %v3885_v39 = vsel %vm3884_vm13, %v3879_v51, %v3881_v52  ;;  %v3951_v2 = vld [vmem:[#allocation2 + $0x168] sm:$0xff]  ;;  %vm9470_vm13 = vmpackc.low %vm4228_vm0, %vm4218_vm14  ;;  %vm4235_vm0 = vcmp.eq.s32.totalorder %v12699_v19, %v12685_v58  ;;  %v12829_v52 = vadd.s32 104, %v14936_v41  ;;  %v12963_v51 = vadd.s32 160, %v14936_v41 }
 0x389   :  { %v9408_v62 = vpack.c.bf16 %v3885_v39, %v3870_v7  ;;  %vm9416_vm11 = vmpackc.low %vm4245_vm2, %vm4235_vm0  ;;  %vm4267_vm0 = vcmp.eq.s32.totalorder %v12730_v16, %v12689_v33  ;;  %v12966_v39 = vadd.s32 168, %v14936_v41 }
 0x38b   :  { %v3898_v10 = vpop.permute.xlu1 %3897 }
 0x38c   :  { %v3901_v57 = vsel %vm3899_vm12, %v3896_v4, %v3898_v10  ;;  %v3953_v32 = vld [vmem:[#allocation2 + $0x178] sm:$0xff]  ;;  %vm4227_vm12 = vcmp.eq.s32.totalorder %v12692_v0, %v12689_v33  ;;  %v13009_v10 = vadd.s32 176, %v14936_v41 }
 0x38d   :  { %3905 = vst.msk [vmem:[#allocation2 + $0x188] sm:$0xff] %vm14888_vm5, %v3901_v57  ;;  %v9406_v47 = vpack.c.bf16 %v3953_v32, %v3951_v2  ;;  %vm9472_vm14 = vmpackc.low %vm4227_vm12, %vm4217_vm9  ;;  %vm4266_vm9 = vcmp.eq.s32.totalorder %v12730_v16, %v12677_v3  ;;  %vm4268_vm12 = vcmp.eq.s32.totalorder %v12730_v16, %v12681_v37  ;;  %v13012_v57 = vadd.s32 184, %v14936_v41 }
 0x38e   :  { %vm9478_vm2 = vmpackc.low %vm4268_vm12, %vm4258_vm3  ;;  %vm4275_vm12 = vcmp.eq.s32.totalorder %v12748_v54, %v12685_v58  ;;  %v13015_v2 = vadd.s32 192, %v14936_v41  ;;  %v13018_v32 = vadd.s32 200, %v14936_v41 }
 0x38f   :  { %9407 = vmatprep.subr.bf16.mxu0 %v9406_v47  ;;  %v13042_v47 = vadd.s32 208, %v14936_v41 }
 0x390   :  { %9409 = vmatpush1.bf16.msra.mxu0 %v9408_v62  ;;  %v13045_v62 = vadd.s32 216, %v14936_v41 }
 0x394   :  { %v3955_v29 = vld [vmem:[#allocation2 + $0x188] sm:$0xff] }
 0x395   :  { %4011 = vmatprep.subr.mxu0 %v3955_v29  ;;  %v13068_v29 = vadd.s32 224, %v14936_v41 }
 0x396   :  { %4012 = vmatpush1.msra.mxu0 %v3900_v40 }
 0x397   :  { %4028 = vmatmul.mubr.f32.vlgmr.msra.gmra.mrb[24].mxu0 %v3546_v5  ;;  %9471 = vmatprep.subr.msk.bf16.mxu0 %vm9470_vm13, %v10036_v15  ;;  %vm4247_vm13 = vcmp.eq.s32.totalorder %v12702_v48, %v12689_v33  ;;  %v13071_v5 = vadd.s32 232, %v14936_v41 }
 0x398   :  { %7884 = vmatprep.mubr.msk.f32.mxu0 %vm3956_vm1, %v3549_v12  ;;  %vm4216_vm1 = vcmp.eq.s32.totalorder %v14936_v41, %v12677_v3  ;;  %9473 = vmatpush1.bf16.msk.msra.mxu0 %vm9472_vm14, %v10036_v15  ;;  %vm4265_vm14 = vcmp.eq.s32.totalorder %v12730_v16, %v12685_v58  ;;  %v13084_v12 = vadd.s32 240, %v14936_v41 }
 0x399   :  { %vm9410_vm7 = vmpackc.low %vm4226_vm15, %vm4216_vm1  ;;  %vm4238_vm1 = vcmp.eq.s32.totalorder %v12699_v19, %v12681_v37  ;;  %vm4248_vm15 = vcmp.eq.s32.totalorder %v12702_v48, %v12681_v37 }
 0x39a   :  { %9411 = vmatprep.subr.msk.bf16.mxu1 %vm9410_vm7, %v10036_v15  ;;  %vm4237_vm7 = vcmp.eq.s32.totalorder %v12699_v19, %v12689_v33  ;;  %vm9474_vm4 = vmpackc.low %vm4248_vm15, %vm4238_vm1  ;;  %vm4255_vm15 = vcmp.eq.s32.totalorder %v12727_v35, %v12685_v58 }
 0x39b   :  { %4034 = vmatmul.mubr.f32.gmra.mrb[26].mxu0 %v3548_v45  ;;  %9413 = vmatpush1.bf16.msk.msra.mxu1 %vm9412_vm8, %v10036_v15  ;;  %vm4256_vm8 = vcmp.eq.s32.totalorder %v12727_v35, %v12677_v3  ;;  %vm9476_vm1 = vmpackc.low %vm4247_vm13, %vm4237_vm7  ;;  %vm4276_vm7 = vcmp.eq.s32.totalorder %v12748_v54, %v12677_v3  ;;  %vm4286_vm13 = vcmp.eq.s32.totalorder %v12751_v59, %v12677_v3 }
 0x39c   :  { %9415 = vmatprep.subr.msk.bf16.mxu1 %vm9414_vm6, %v10036_v15  ;;  %9475 = vmatprep.subr.msk.bf16.mxu0 %vm9474_vm4, %v10036_v15  ;;  %vm9418_vm6 = vmpackc.low %vm4266_vm9, %vm4256_vm8  ;;  %vm4257_vm4 = vcmp.eq.s32.totalorder %v12727_v35, %v12689_v33  ;;  %vm4278_vm9 = vcmp.eq.s32.totalorder %v12748_v54, %v12681_v37  ;;  %v13093_v45 = vrot.slane %v12673_v17, %v11831_v24  ;;  %v14937_v24 = vmov 0.0  }
 0x39d   :  { %9477 = vmatpush1.bf16.msk.msra.mxu0 %vm9476_vm1, %v10036_v15  ;;  %vm9420_vm8 = vmpackc.low %vm4265_vm14, %vm4255_vm15  ;;  %vm4285_vm1 = vcmp.eq.s32.totalorder %v12751_v59, %v12685_v58  ;;  %vm4277_vm15 = vcmp.eq.s32.totalorder %v12748_v54, %v12689_v33  ;;  %vm4287_vm14 = vcmp.eq.s32.totalorder %v12751_v59, %v12689_v33 }
 0x39e   :  { %9479 = vmatprep.subr.msk.bf16.mxu0 %vm9478_vm2, %v10036_v15  ;;  %vm9480_vm3 = vmpackc.low %vm4267_vm0, %vm4257_vm4  ;;  %vm4296_vm4 = vcmp.eq.s32.totalorder %v12774_v18, %v12677_v3  ;;  %vm4306_vm0 = vcmp.eq.s32.totalorder %v12777_v27, %v12677_v3 }
 0x39f   :  { %9417 = vmatpush1.bf16.msk.msra.mxu1 %vm9416_vm11, %v10036_v15  ;;  %vm4288_vm11 = vcmp.eq.s32.totalorder %v12751_v59, %v12681_v37 }
 0x3a0   :  { %9419 = vmatprep.subr.msk.bf16.mxu1 %vm9418_vm6, %v10036_v15  ;;  %vm9422_vm6 = vmpackc.low %vm4286_vm13, %vm4276_vm7  ;;  %vm4298_vm13 = vcmp.eq.s32.totalorder %v12774_v18, %v12681_v37 }
 0x3a1   :  { %9481 = vmatpush1.bf16.msk.msra.mxu0 %vm9480_vm3, %v10036_v15  ;;  %vm9482_vm2 = vmpackc.low %vm4288_vm11, %vm4278_vm9  ;;  %vm4295_vm11 = vcmp.eq.s32.totalorder %v12774_v18, %v12685_v58  ;;  %vm4305_vm3 = vcmp.eq.s32.totalorder %v12777_v27, %v12685_v58 }
 0x3a2   :  { %9483 = vmatprep.subr.msk.bf16.mxu0 %vm9482_vm2, %v10036_v15  ;;  %vm9424_vm7 = vmpackc.low %vm4285_vm1, %vm4275_vm12  ;;  %vm4297_vm12 = vcmp.eq.s32.totalorder %v12774_v18, %v12689_v33  ;;  %vm4307_vm1 = vcmp.eq.s32.totalorder %v12777_v27, %v12689_v33 }
 0x3a3   :  { %9421 = vmatpush1.bf16.msk.msra.mxu1 %vm9420_vm8, %v10036_v15  ;;  %vm4308_vm8 = vcmp.eq.s32.totalorder %v12777_v27, %v12681_v37  ;;  %vm9484_vm9 = vmpackc.low %vm4287_vm14, %vm4277_vm15  ;;  %vm4316_vm15 = vcmp.eq.s32.totalorder %v12800_v20, %v12677_v3  ;;  %vm4326_vm14 = vcmp.eq.s32.totalorder %v12803_v6, %v12677_v3 }
 0x3a4   :  { %9423 = vmatprep.subr.msk.bf16.mxu1 %vm9422_vm6, %v10036_v15  ;;  %vm9426_vm6 = vmpackc.low %vm4306_vm0, %vm4296_vm4  ;;  %vm4318_vm0 = vcmp.eq.s32.totalorder %v12800_v20, %v12681_v37 }
 0x3a5   :  { %9485 = vmatpush1.bf16.msk.msra.mxu0 %vm9484_vm9, %v10036_v15  ;;  %vm9486_vm2 = vmpackc.low %vm4308_vm8, %vm4298_vm13  ;;  %vm4315_vm8 = vcmp.eq.s32.totalorder %v12800_v20, %v12685_v58  ;;  %vm4325_vm9 = vcmp.eq.s32.totalorder %v12803_v6, %v12685_v58 }
 0x3a6   :  { %9487 = vmatprep.subr.msk.bf16.mxu0 %vm9486_vm2, %v10036_v15  ;;  %vm9428_vm4 = vmpackc.low %vm4305_vm3, %vm4295_vm11  ;;  %vm4317_vm11 = vcmp.eq.s32.totalorder %v12800_v20, %v12689_v33  ;;  %vm4327_vm3 = vcmp.eq.s32.totalorder %v12803_v6, %v12689_v33 }
 0x3a7   :  { %9425 = vmatpush1.bf16.msk.msra.mxu1 %vm9424_vm7, %v10036_v15  ;;  %vm4328_vm7 = vcmp.eq.s32.totalorder %v12803_v6, %v12681_v37  ;;  %vm9488_vm13 = vmpackc.low %vm4307_vm1, %vm4297_vm12  ;;  %vm4336_vm12 = vcmp.eq.s32.totalorder %v12826_v50, %v12677_v3  ;;  %vm4346_vm1 = vcmp.eq.s32.totalorder %v12829_v52, %v12677_v3 }
 0x3a8   :  { %9427 = vmatprep.subr.msk.bf16.mxu1 %vm9426_vm6, %v10036_v15  ;;  %vm9430_vm6 = vmpackc.low %vm4326_vm14, %vm4316_vm15  ;;  %vm4338_vm14 = vcmp.eq.s32.totalorder %v12826_v50, %v12681_v37 }
 0x3a9   :  { %9489 = vmatpush1.bf16.msk.msra.mxu0 %vm9488_vm13, %v10036_v15  ;;  %vm9490_vm2 = vmpackc.low %vm4328_vm7, %vm4318_vm0  ;;  %vm4335_vm7 = vcmp.eq.s32.totalorder %v12826_v50, %v12685_v58  ;;  %vm4345_vm13 = vcmp.eq.s32.totalorder %v12829_v52, %v12685_v58 }
 0x3aa   :  { %9491 = vmatprep.subr.msk.bf16.mxu0 %vm9490_vm2, %v10036_v15  ;;  %vm9432_vm15 = vmpackc.low %vm4325_vm9, %vm4315_vm8  ;;  %vm4337_vm8 = vcmp.eq.s32.totalorder %v12826_v50, %v12689_v33  ;;  %vm4347_vm9 = vcmp.eq.s32.totalorder %v12829_v52, %v12689_v33 }
 0x3ab   :  { %9429 = vmatpush1.bf16.msk.msra.mxu1 %vm9428_vm4, %v10036_v15  ;;  %vm4348_vm4 = vcmp.eq.s32.totalorder %v12829_v52, %v12681_v37  ;;  %vm9492_vm0 = vmpackc.low %vm4327_vm3, %vm4317_vm11  ;;  %vm4356_vm11 = vcmp.eq.s32.totalorder %v12852_v31, %v12677_v3  ;;  %vm4366_vm3 = vcmp.eq.s32.totalorder %v12855_v46, %v12677_v3 }
 0x3ac   :  { %9431 = vmatprep.subr.msk.bf16.mxu1 %vm9430_vm6, %v10036_v15  ;;  %vm9434_vm6 = vmpackc.low %vm4346_vm1, %vm4336_vm12  ;;  %vm4358_vm1 = vcmp.eq.s32.totalorder %v12852_v31, %v12681_v37 }
 0x3ad   :  { %9493 = vmatpush1.bf16.msk.msra.mxu0 %vm9492_vm0, %v10036_v15  ;;  %vm9494_vm2 = vmpackc.low %vm4348_vm4, %vm4338_vm14  ;;  %vm4355_vm4 = vcmp.eq.s32.totalorder %v12852_v31, %v12685_v58  ;;  %vm4365_vm0 = vcmp.eq.s32.totalorder %v12855_v46, %v12685_v58 }
 0x3ae   :  { %9495 = vmatprep.subr.msk.bf16.mxu0 %vm9494_vm2, %v10036_v15  ;;  %vm9436_vm12 = vmpackc.low %vm4345_vm13, %vm4335_vm7  ;;  %vm4357_vm7 = vcmp.eq.s32.totalorder %v12852_v31, %v12689_v33  ;;  %vm4367_vm13 = vcmp.eq.s32.totalorder %v12855_v46, %v12689_v33 }
 0x3af   :  { %9433 = vmatpush1.bf16.msk.msra.mxu1 %vm9432_vm15, %v10036_v15  ;;  %vm4368_vm15 = vcmp.eq.s32.totalorder %v12855_v46, %v12681_v37  ;;  %vm9496_vm14 = vmpackc.low %vm4347_vm9, %vm4337_vm8  ;;  %vm4376_vm8 = vcmp.eq.s32.totalorder %v12878_v56, %v12677_v3  ;;  %vm4386_vm9 = vcmp.eq.s32.totalorder %v12881_v42, %v12677_v3 }
 0x3b0   :  { %9435 = vmatprep.subr.msk.bf16.mxu1 %vm9434_vm6, %v10036_v15  ;;  %vm9438_vm6 = vmpackc.low %vm4366_vm3, %vm4356_vm11  ;;  %vm4378_vm11 = vcmp.eq.s32.totalorder %v12878_v56, %v12681_v37  ;;  %vm4388_vm3 = vcmp.eq.s32.totalorder %v12881_v42, %v12681_v37 }
 0x3b1   :  { %9497 = vmatpush1.bf16.msk.msra.mxu0 %vm9496_vm14, %v10036_v15  ;;  %vm9498_vm2 = vmpackc.low %vm4368_vm15, %vm4358_vm1  ;;  %vm4375_vm1 = vcmp.eq.s32.totalorder %v12878_v56, %v12685_v58  ;;  %vm4385_vm15 = vcmp.eq.s32.totalorder %v12881_v42, %v12685_v58 }
 0x3b2   :  { %9499 = vmatprep.subr.msk.bf16.mxu0 %vm9498_vm2, %v10036_v15  ;;  %vm9500_vm14 = vmpackc.low %vm4367_vm13, %vm4357_vm7 }
 0x3b3   :  { %9437 = vmatpush1.bf16.msk.msra.mxu1 %vm9436_vm12, %v10036_v15  ;;  %vm9440_vm12 = vmpackc.low %vm4365_vm0, %vm4355_vm4  ;;  %vm4377_vm4 = vcmp.eq.s32.totalorder %v12878_v56, %v12689_v33  ;;  %vm4387_vm0 = vcmp.eq.s32.totalorder %v12881_v42, %v12689_v33 }
 0x3b4   :  { %9439 = vmatprep.subr.msk.bf16.mxu1 %vm9438_vm6, %v10036_v15  ;;  %vm9442_vm6 = vmpackc.low %vm4386_vm9, %vm4376_vm8  ;;  %vm4396_vm8 = vcmp.eq.s32.totalorder %v12957_v14, %v12677_v3  ;;  %vm4406_vm9 = vcmp.eq.s32.totalorder %v12960_v22, %v12677_v3 }
 0x3b5   :  { %9501 = vmatpush1.bf16.msk.msra.mxu0 %vm9500_vm14, %v10036_v15  ;;  %vm9502_vm2 = vmpackc.low %vm4388_vm3, %vm4378_vm11  ;;  %vm4408_vm11 = vcmp.eq.s32.totalorder %v12960_v22, %v12681_v37  ;;  %vm4395_vm14 = vcmp.eq.s32.totalorder %v12957_v14, %v12685_v58 }
 0x3b6   :  { %9503 = vmatprep.subr.msk.bf16.mxu0 %vm9502_vm2, %v10036_v15  ;;  %vm9444_vm7 = vmpackc.low %vm4385_vm15, %vm4375_vm1  ;;  %vm4405_vm1 = vcmp.eq.s32.totalorder %v12960_v22, %v12685_v58  ;;  %vm4397_vm15 = vcmp.eq.s32.totalorder %v12957_v14, %v12689_v33  ;;  %vm4426_vm2 = vcmp.eq.s32.totalorder %v12966_v39, %v12677_v3 }
 0x3b7   :  { %9441 = vmatpush1.bf16.msk.msra.mxu1 %vm9440_vm12, %v10036_v15  ;;  %vm9504_vm13 = vmpackc.low %vm4387_vm0, %vm4377_vm4  ;;  %vm4398_vm12 = vcmp.eq.s32.totalorder %v12957_v14, %v12681_v37  ;;  %vm4416_vm0 = vcmp.eq.s32.totalorder %v12963_v51, %v12677_v3 }
 0x3b8   :  { %9443 = vmatprep.subr.msk.bf16.mxu1 %vm9442_vm6, %v10036_v15  ;;  %vm9446_vm3 = vmpackc.low %vm4406_vm9, %vm4396_vm8  ;;  %vm4407_vm6 = vcmp.eq.s32.totalorder %v12960_v22, %v12689_v33  ;;  %vm4428_vm8 = vcmp.eq.s32.totalorder %v12966_v39, %v12681_v37 }
 0x3b9   :  { %9505 = vmatpush1.bf16.msk.msra.mxu0 %vm9504_vm13, %v10036_v15  ;;  %vm9506_vm4 = vmpackc.low %vm4408_vm11, %vm4398_vm12  ;;  %vm4418_vm13 = vcmp.eq.s32.totalorder %v12963_v51, %v12681_v37  ;;  %vm4415_vm12 = vcmp.eq.s32.totalorder %v12963_v51, %v12685_v58  ;;  %vm4425_vm11 = vcmp.eq.s32.totalorder %v12966_v39, %v12685_v58 }
 0x3ba   :  { %9507 = vmatprep.subr.msk.bf16.mxu0 %vm9506_vm4, %v10036_v15  ;;  %vm9508_vm9 = vmpackc.low %vm4407_vm6, %vm4397_vm15 }
 0x3bb   :  { %9445 = vmatpush1.bf16.msk.msra.mxu1 %vm9444_vm7, %v10036_v15  ;;  %vm9448_vm7 = vmpackc.low %vm4405_vm1, %vm4395_vm14  ;;  %vm4417_vm14 = vcmp.eq.s32.totalorder %v12963_v51, %v12689_v33  ;;  %vm4427_vm1 = vcmp.eq.s32.totalorder %v12966_v39, %v12689_v33 }
 0x3bc   :  { %9447 = vmatprep.subr.msk.bf16.mxu1 %vm9446_vm3, %v10036_v15  ;;  %vm9450_vm3 = vmpackc.low %vm4426_vm2, %vm4416_vm0  ;;  %vm4436_vm0 = vcmp.eq.s32.totalorder %v13009_v10, %v12677_v3  ;;  %vm4446_vm2 = vcmp.eq.s32.totalorder %v13012_v57, %v12677_v3 }
 0x3bd   :  { %9509 = vmatpush1.bf16.msk.msra.mxu0 %vm9508_vm9, %v10036_v15  ;;  %vm9510_vm4 = vmpackc.low %vm4428_vm8, %vm4418_vm13  ;;  %vm4448_vm13 = vcmp.eq.s32.totalorder %v13012_v57, %v12681_v37  ;;  %vm4435_vm9 = vcmp.eq.s32.totalorder %v13009_v10, %v12685_v58 }
 0x3be   :  { %9511 = vmatprep.subr.msk.bf16.mxu0 %vm9510_vm4, %v10036_v15  ;;  %vm9452_vm15 = vmpackc.low %vm4425_vm11, %vm4415_vm12  ;;  %vm4445_vm12 = vcmp.eq.s32.totalorder %v13012_v57, %v12685_v58  ;;  %vm4437_vm11 = vcmp.eq.s32.totalorder %v13009_v10, %v12689_v33  ;;  %vm4466_vm4 = vcmp.eq.s32.totalorder %v13018_v32, %v12677_v3 }
 0x3bf   :  { %9449 = vmatpush1.bf16.msk.msra.mxu1 %vm9448_vm7, %v10036_v15  ;;  %vm9512_vm6 = vmpackc.low %vm4427_vm1, %vm4417_vm14  ;;  %vm4438_vm7 = vcmp.eq.s32.totalorder %v13009_v10, %v12681_v37  ;;  %vm4456_vm1 = vcmp.eq.s32.totalorder %v13015_v2, %v12677_v3 }
 0x3c0   :  { %9451 = vmatprep.subr.msk.bf16.mxu1 %vm9450_vm3, %v10036_v15  ;;  %vm9454_vm8 = vmpackc.low %vm4446_vm2, %vm4436_vm0  ;;  %vm4447_vm3 = vcmp.eq.s32.totalorder %v13012_v57, %v12689_v33  ;;  %vm4468_vm0 = vcmp.eq.s32.totalorder %v13018_v32, %v12681_v37 }
 0x3c1   :  { %9513 = vmatpush1.bf16.msk.msra.mxu0 %vm9512_vm6, %v10036_v15  ;;  %vm9514_vm14 = vmpackc.low %vm4448_vm13, %vm4438_vm7  ;;  %vm4458_vm6 = vcmp.eq.s32.totalorder %v13015_v2, %v12681_v37  ;;  %vm4455_vm7 = vcmp.eq.s32.totalorder %v13015_v2, %v12685_v58  ;;  %vm4465_vm13 = vcmp.eq.s32.totalorder %v13018_v32, %v12685_v58 }
 0x3c2   :  { %9515 = vmatprep.subr.msk.bf16.mxu0 %vm9514_vm14, %v10036_v15  ;;  %vm9516_vm2 = vmpackc.low %vm4447_vm3, %vm4437_vm11  ;;  %vm4476_vm11 = vcmp.eq.s32.totalorder %v13042_v47, %v12677_v3  ;;  %vm4486_vm3 = vcmp.eq.s32.totalorder %v13045_v62, %v12677_v3 }
 0x3c3   :  { %9453 = vmatpush1.bf16.msk.msra.mxu1 %vm9452_vm15, %v10036_v15  ;;  %vm9456_vm15 = vmpackc.low %vm4445_vm12, %vm4435_vm9  ;;  %vm4457_vm9 = vcmp.eq.s32.totalorder %v13015_v2, %v12689_v33  ;;  %vm4467_vm12 = vcmp.eq.s32.totalorder %v13018_v32, %v12689_v33 }
 0x3c4   :  { %9455 = vmatprep.subr.msk.bf16.mxu1 %vm9454_vm8, %v10036_v15  ;;  %vm9458_vm8 = vmpackc.low %vm4466_vm4, %vm4456_vm1  ;;  %vm4478_vm4 = vcmp.eq.s32.totalorder %v13042_v47, %v12681_v37 }
 0x3c5   :  { %9517 = vmatpush1.bf16.msk.msra.mxu0 %vm9516_vm2, %v10036_v15  ;;  %vm9518_vm14 = vmpackc.low %vm4468_vm0, %vm4458_vm6  ;;  %vm4475_vm0 = vcmp.eq.s32.totalorder %v13042_v47, %v12685_v58  ;;  %vm4485_vm2 = vcmp.eq.s32.totalorder %v13045_v62, %v12685_v58 }
 0x3c6   :  { %9519 = vmatprep.subr.msk.bf16.mxu0 %vm9518_vm14, %v10036_v15  ;;  %vm9460_vm1 = vmpackc.low %vm4465_vm13, %vm4455_vm7  ;;  %vm4477_vm13 = vcmp.eq.s32.totalorder %v13042_v47, %v12689_v33  ;;  %vm4506_vm14 = vcmp.eq.s32.totalorder %v13071_v5, %v12677_v3 }
 0x3c7   :  { %9457 = vmatpush1.bf16.msk.msra.mxu1 %vm9456_vm15, %v10036_v15  ;;  %vm4488_vm15 = vcmp.eq.s32.totalorder %v13045_v62, %v12681_v37  ;;  %vm9520_vm6 = vmpackc.low %vm4467_vm12, %vm4457_vm9  ;;  %vm4496_vm12 = vcmp.eq.s32.totalorder %v13068_v29, %v12677_v3 }
 0x3c8   :  { %9459 = vmatprep.subr.msk.bf16.mxu1 %vm9458_vm8, %v10036_v15  ;;  %vm9462_vm7 = vmpackc.low %vm4486_vm3, %vm4476_vm11  ;;  %vm4487_vm8 = vcmp.eq.s32.totalorder %v13045_v62, %v12689_v33  ;;  %vm4498_vm3 = vcmp.eq.s32.totalorder %v13068_v29, %v12681_v37 }
 0x3c9   :  { %9521 = vmatpush1.bf16.msk.msra.mxu0 %vm9520_vm6, %v10036_v15  ;;  %vm9522_vm9 = vmpackc.low %vm4488_vm15, %vm4478_vm4  ;;  %vm4516_vm4 = vcmp.eq.s32.totalorder %v13084_v12, %v12677_v3  ;;  %vm4495_vm6 = vcmp.eq.s32.totalorder %v13068_v29, %v12685_v58 }
 0x3ca   :  { %9523 = vmatprep.subr.msk.bf16.mxu0 %vm9522_vm9, %v10036_v15  ;;  %vm9464_vm11 = vmpackc.low %vm4485_vm2, %vm4475_vm0  ;;  %vm4505_vm0 = vcmp.eq.s32.totalorder %v13071_v5, %v12685_v58  ;;  %vm4518_vm2 = vcmp.eq.s32.totalorder %v13084_v12, %v12681_v37  ;;  %vm4497_vm9 = vcmp.eq.s32.totalorder %v13068_v29, %v12689_v33 }
 0x3cb   :  { %9461 = vmatpush1.bf16.msk.msra.mxu1 %vm9460_vm1, %v10036_v15  ;;  %vm4508_vm1 = vcmp.eq.s32.totalorder %v13071_v5, %v12681_v37  ;;  %vm9524_vm15 = vmpackc.low %vm4487_vm8, %vm4477_vm13  ;;  %vm4507_vm13 = vcmp.eq.s32.totalorder %v13071_v5, %v12689_v33  ;;  %v8188_v3 = vsel %vm4518_vm2, 1.0, %v14937_v24 }
 0x3cc   :  { %9463 = vmatprep.subr.msk.bf16.mxu1 %vm9462_vm7, %v10036_v15  ;;  %vm9466_vm7 = vmpackc.low %vm4506_vm14, %vm4496_vm12  ;;  %vm4515_vm12 = vcmp.eq.s32.totalorder %v13084_v12, %v12685_v58 }
 0x3cd   :  { %9525 = vmatpush1.bf16.msk.msra.mxu0 %vm9524_vm15, %v10036_v15  ;;  %vm9526_vm8 = vmpackc.low %vm4508_vm1, %vm4498_vm3  ;;  %vm4517_vm15 = vcmp.eq.s32.totalorder %v13084_v12, %v12689_v33  ;;  %vm4230_vm3 = vcmp.eq.s32.totalorder %v12692_v0, %v13093_v45  ;;  %v8185_v37 = vsel %vm4515_vm12, 1.0, %v14937_v24  ;;  %v4041_v33 = vld [vmem:[%s14832_s7 + $0x8] sm:$0xff]  ;;  %s15027_s7 = smov 80  }
 0x3ce   :  { %9527 = vmatprep.subr.msk.bf16.mxu0 %vm9526_vm8, %v10036_v15  ;;  %vm9468_vm14 = vmpackc.low %vm4505_vm0, %vm4495_vm6  ;;  %v8187_v58 = vsel %vm4517_vm15, 1.0, %v14937_v24  ;;  %vm4250_vm15 = vcmp.eq.s32.totalorder %v12702_v48, %v13093_v45 }
 0x3cf   :  { %9465 = vmatpush1.bf16.msk.msra.mxu1 %vm9464_vm11, %v10036_v15  ;;  %vm14887_vm11 = vcmask 1041408   ;;  %vm9528_vm1 = vmpackc.low %vm4507_vm13, %vm4497_vm9 }
 0x3d0   :  { %9467 = vmatprep.subr.msk.bf16.mxu1 %vm9466_vm7, %v10036_v15  ;;  %vm4220_vm7 = vcmp.eq.s32.totalorder %v14936_v41, %v13093_v45 }
 0x3d1   :  { %9529 = vmatpush1.bf16.msk.msra.mxu0 %vm9528_vm1, %v10036_v15  ;;  %vm9530_vm0 = vmpackc.low %vm4230_vm3, %vm4220_vm7 }
 0x3d2   :  { %8319 = vmatprep.subr.msk.mxu0 %vm14887_vm11, %v8188_v3 }
 0x3d3   :  { %9469 = vmatpush1.bf16.msk.msra.mxu1 %vm9468_vm14, %v10036_v15  ;;  %vm4240_vm14 = vcmp.eq.s32.totalorder %v12699_v19, %v13093_v45 }
 0x3d5   :  { %8320 = vmatpush1.msk.msra.mxu0 %vm14887_vm11, %v8187_v58 }
 0x46a   :  { %v12922_v44 = vpop.f32.mrb[24].mxu0 }
 0x46b   :  { %v12924_v61 = vpop.f32.mrb[25].mxu0  ;;  %v4055_v9 = vmul.f32 %v12922_v44, %v12922_v44 }
 0x46c   :  { %v4056_v43 = vmul.f32 %v12924_v61, %v12924_v61  ;;  %v4044_v49 = vsel %vm14888_vm5, %v12924_v61, 0.0 }
 0x46d   :  { %v4045_v7 = vadd.f32 %v4044_v49, %v12922_v44  ;;  %v4043_v49 = vld [vmem:[%s14833_s8 + $0x8] sm:$0xff]  ;;  %s10055_s8 = smov 114  }
 0x46e   :  { %v4059_v4 = vsel %vm14888_vm5, %v4056_v43, 0.0  ;;  %v12934_v60 = vpop.f32.mrb[26].mxu0  ;;  %v13102_v43 = vrot.slane %v12673_v17, %v11839_v11  ;;  %v8186_v11 = vsel %vm4516_vm4, 1.0, %v14937_v24 }
 0x46f   :  { %4046 = vadd.xlane.f32.xlu1 %v4045_v7  ;;  %v4060_v13 = vadd.f32 %v4059_v4, %v4055_v9  ;;  %v12936_v53 = vpop.f32.mrb[27].mxu0  ;;  %v4057_v34 = vmul.f32 %v12934_v60, %v12934_v60  ;;  %8255 = vmatprep.subr.msk.mxu1 %vm14887_vm11, %v8186_v11 }
 0x470   :  { %v4058_v40 = vmul.f32 %v12936_v53, %v12936_v53  ;;  %v4048_v55 = vsel %vm14888_vm5, %v12936_v53, 0.0  ;;  %vm4222_vm4 = vcmp.eq.s32.totalorder %v14936_v41, %v13102_v43  ;;  %vm4232_vm6 = vcmp.eq.s32.totalorder %v12692_v0, %v13102_v43  ;;  %8256 = vmatpush1.msk.msra.mxu1 %vm14887_vm11, %v8185_v37  ;;  %vm13211_vm11 = vmpackc.low %vm4250_vm15, %vm4240_vm14 }
 0x471   :  { %4061 = vadd.xlane.f32.xlu0 %v4060_v13  ;;  %v12945_v63 = vadd.f32 %v4048_v55, %v12934_v60  ;;  %vm9590_vm2 = vmpackc.low %vm4232_vm6, %vm4222_vm4  ;;  %9531 = vmatprep.subr.msk.bf16.mxu1 %vm9530_vm0, %v10036_v15  ;;  %vm4242_vm7 = vcmp.eq.s32.totalorder %v12699_v19, %v13102_v43  ;;  %vm4252_vm3 = vcmp.eq.s32.totalorder %v12702_v48, %v13102_v43 }
 0x472   :  { %v4063_v21 = vsel %vm14888_vm5, %v4058_v40, 0.0  ;;  %9591 = vmatprep.subr.msk.bf16.mxu0 %vm9590_vm2, %v10036_v15  ;;  %vm4270_vm14 = vcmp.eq.s32.totalorder %v12730_v16, %v13093_v45 }
 0x473   :  { %v12948_v8 = vadd.f32 %v4063_v21, %v4057_v34 }
 0x480   :  { %4101 = vperm.xlu1 %9950, %v4042_v1   ;;  %v13173_v1 = vrot.slane %v12673_v17, %v11828_v23 }
 0x482   :  { %vm4219_vm9 = vcmp.eq.s32.totalorder %v14936_v41, %v13173_v1  ;;  %vm4229_vm13 = vcmp.eq.s32.totalorder %v12692_v0, %v13173_v1  ;;  %vm4239_vm2 = vcmp.eq.s32.totalorder %v12699_v19, %v13173_v1  ;;  %vm4249_vm10 = vcmp.eq.s32.totalorder %v12702_v48, %v13173_v1 }
 0x483   :  { %vm13195_vm6 = vmpackc.low %vm4229_vm13, %vm4219_vm9 }
 0x484   :  { %vm13235_vm15 = vmpackc.low %vm4249_vm10, %vm4239_vm2  ;;  %vm4259_vm10 = vcmp.eq.s32.totalorder %v12727_v35, %v13173_v1 }
 0x487   :  { %4087 = vperm.xlu0 %9951, %v4040_v28   ;;  %v13177_v28 = vrot.slane %v12673_v17, %v11834_v26 }
 0x489   :  { %vm4221_vm8 = vcmp.eq.s32.totalorder %v14936_v41, %v13177_v28  ;;  %vm4231_vm12 = vcmp.eq.s32.totalorder %v12692_v0, %v13177_v28  ;;  %vm4241_vm9 = vcmp.eq.s32.totalorder %v12699_v19, %v13177_v28  ;;  %vm4251_vm13 = vcmp.eq.s32.totalorder %v12702_v48, %v13177_v28 }
 0x48a   :  { %vm13199_vm0 = vmpackc.low %vm4231_vm12, %vm4221_vm8  ;;  %vm4260_vm12 = vcmp.eq.s32.totalorder %v12727_v35, %v13093_v45 }
 0x48b   :  { %vm9594_vm8 = vmpackc.low %vm4252_vm3, %vm4242_vm7  ;;  %vm4272_vm7 = vcmp.eq.s32.totalorder %v12730_v16, %v13102_v43 }
 0x48c   :  { %vm9596_vm3 = vmpackc.low %vm4251_vm13, %vm4241_vm9  ;;  %vm4280_vm13 = vcmp.eq.s32.totalorder %v12748_v54, %v13093_v45 }
 0x48d   :  { %vm9538_vm2 = vmpackc.low %vm4270_vm14, %vm4260_vm12 }
 0x4a4   :  { %4050 = vadd.xlane.f32.xlu1 %v12945_v63 }
 0x4a6   :  { %4065 = vadd.xlane.f32.xlu0 %v12948_v8 }
 0x4b5   :  { %4092 = vperm.xlu1 %9950, %v4041_v33  }
 0x4b9   :  { %4106 = vperm.xlu1 %9950, %v4043_v49  }
 0x4fc   :  { %v4047_v7 = vpop.xlane.xlu1 %4046 }
 0x4fd   :  { %v4053_v9 = vmul.f32 0.004132231, %v4047_v7 }
 0x4fe   :  { %v4062_v4 = vpop.xlane.xlu0 %4061 }
 0x4ff   :  { %v4067_v13 = vmul.f32 0.004132231, %v4062_v4  ;;  %v4069_v34 = vmul.f32 %v4053_v9, %v4053_v9  ;;  %v4073_v63 = vsub.f32 %v12922_v44, %v4053_v9  ;;  %v4074_v21 = vsub.f32 %v12924_v61, %v4053_v9 }
 0x500   :  { %v4102_v49 = vpop.permute.xlu1 %4101 }
 0x501   :  { %v4071_v40 = vsub.f32 %v4067_v13, %v4069_v34 }
 0x503   :  { %v4077_v55 = vadd.f32 1e-05, %v4071_v40  ;;  %v14944_v40 = vmov 0 }
 0x504   :  { %v14945_v40 = vsel %vm13235_vm15, 4294967295, %v14944_v40 }
 0x505   :  { %9954 = vrsqrt.f32 %v4077_v55  ;;  %v14946_v55 = vmov 0  ;;  %vm14948_vm12 = vnez %v14945_v40 }
 0x506   :  { %v4088_v37 = vpop.permute.xlu0 %4087 }
 0x50f   :  { %v9955_v8 = vpop.eup %9954 }
 0x510   :  { %v4081_v11 = vmul.f32 %v9955_v8, %v4073_v63  ;;  %v4082_v3 = vmul.f32 %v9955_v8, %v4074_v21  ;;  %v14949_v63 = vmov 0  ;;  %v14952_v21 = vmov 0 }
 0x511   :  { %v14955_v8 = vmov 0 }
 0x512   :  { %v4095_v58 = vmul.f32 %v4088_v37, %v4081_v11  ;;  %v4096_v33 = vmul.f32 %v4088_v37, %v4082_v3 }
 0x514   :  { %v4109_v44 = vadd.f32 %v4102_v49, %v4095_v58  ;;  %v4110_v61 = vadd.f32 %v4102_v49, %v4096_v33  ;;  %v4142_v33 = vld [vmem:[%s14834_s9 + $0x8] sm:$0x3]  ;;  %s10037_s9 = smov 78  }
 0x516   :  { %v4117_v26 = vmul.f32 0.2, %v4109_v44  ;;  %v4118_v17 = vmul.f32 0.2, %v4110_v61  ;;  %vm4114_vm1 = vcmp.ge.f32.partialorder %v4110_v61, 0.0  ;;  %vm4113_vm4 = vcmp.ge.f32.partialorder %v4109_v44, 0.0 }
 0x518   :  { %v13207_v4 = vsel %vm4114_vm1, %v4110_v61, %v4118_v17  ;;  %v13209_v13 = vsel %vm4113_vm4, %v4109_v44, %v4117_v26  ;;  %vm4262_vm1 = vcmp.eq.s32.totalorder %v12727_v35, %v13102_v43  ;;  %vm4269_vm4 = vcmp.eq.s32.totalorder %v12730_v16, %v13173_v1 }
 0x519   :  { %8257 = vmatprep.mubr.msk.f32.mxu1 %vm14888_vm5, %v13207_v4  ;;  %8321 = vmatprep.mubr.msk.f32.mxu0 %vm14888_vm5, %v13207_v4  ;;  %vm9598_vm9 = vmpackc.low %vm4272_vm7, %vm4262_vm1  ;;  %vm4290_vm5 = vcmp.eq.s32.totalorder %v12751_v59, %v13093_v45  ;;  %vm4279_vm1 = vcmp.eq.s32.totalorder %v12748_v54, %v13173_v1  ;;  %vm4289_vm7 = vcmp.eq.s32.totalorder %v12751_v59, %v13173_v1 }
 0x51a   :  { %5247 = vmatmul.mubr.f32.vlgmr.msra.gmra.mrb[24].mxu1 %v13209_v13  ;;  %5324 = vmatmul.mubr.f32.vlgmr.msra.gmra.mrb[28].mxu0 %v13209_v13  ;;  %vm13265_vm15 = vmpackc.low %vm4269_vm4, %vm4259_vm10  ;;  %vm4281_vm4 = vcmp.eq.s32.totalorder %v12748_v54, %v13177_v28 }
 0x51b   :  { %9533 = vmatpush1.bf16.msk.msra.mxu1 %vm13195_vm6, %v10036_v15  ;;  %9593 = vmatpush1.bf16.msk.msra.mxu0 %vm13199_vm0, %v10036_v15  ;;  %vm4261_vm6 = vcmp.eq.s32.totalorder %v12727_v35, %v13177_v28  ;;  %vm4271_vm0 = vcmp.eq.s32.totalorder %v12730_v16, %v13177_v28  ;;  %v14947_v55 = vsel %vm13265_vm15, 4294967295, %v14946_v55  ;;  %vm9542_vm10 = vmpackc.low %vm4290_vm5, %vm4280_vm13  ;;  %vm4302_vm5 = vcmp.eq.s32.totalorder %v12774_v18, %v13102_v43 }
 0x51c   :  { %9535 = vmatprep.subr.msk.bf16.mxu1 %vm13211_vm11, %v10036_v15  ;;  %9595 = vmatprep.subr.msk.bf16.mxu0 %vm9594_vm8, %v10036_v15  ;;  %vm4282_vm11 = vcmp.eq.s32.totalorder %v12748_v54, %v13102_v43  ;;  %vm4292_vm8 = vcmp.eq.s32.totalorder %v12751_v59, %v13102_v43  ;;  %vm9600_vm14 = vmpackc.low %vm4271_vm0, %vm4261_vm6  ;;  %vm4310_vm6 = vcmp.eq.s32.totalorder %v12777_v27, %v13093_v45 }
 0x51d   :  { %vm9602_vm15 = vmpackc.low %vm4292_vm8, %vm4282_vm11  ;;  %vm4299_vm11 = vcmp.eq.s32.totalorder %v12774_v18, %v13173_v1  ;;  %vm4309_vm8 = vcmp.eq.s32.totalorder %v12777_v27, %v13173_v1 }
 0x51e   :  { %vm13291_vm0 = vmpackc.low %vm4289_vm7, %vm4279_vm1  ;;  %vm4301_vm7 = vcmp.eq.s32.totalorder %v12774_v18, %v13177_v28 }
 0x51f   :  { %9537 = vmatpush1.bf16.msk.msra.mxu1 %vm14948_vm12, %v10036_v15  ;;  %9597 = vmatpush1.bf16.msk.msra.mxu0 %vm9596_vm3, %v10036_v15  ;;  %vm4291_vm12 = vcmp.eq.s32.totalorder %v12751_v59, %v13177_v28  ;;  %vm4300_vm3 = vcmp.eq.s32.totalorder %v12774_v18, %v13093_v45  ;;  %v14950_v63 = vsel %vm13291_vm0, 4294967295, %v14949_v63 }
 0x520   :  { %9539 = vmatprep.subr.msk.bf16.mxu1 %vm9538_vm2, %v10036_v15  ;;  %9599 = vmatprep.subr.msk.bf16.mxu0 %vm9598_vm9, %v10036_v15  ;;  %vm4312_vm2 = vcmp.eq.s32.totalorder %v12777_v27, %v13102_v43  ;;  %vm14951_vm9 = vnez %v14947_v55  ;;  %vm9604_vm13 = vmpackc.low %vm4291_vm12, %vm4281_vm4  ;;  %vm4330_vm4 = vcmp.eq.s32.totalorder %v12803_v6, %v13093_v45  ;;  %v14975_v55 = vmov 0 }
 0x521   :  { %vm9546_vm1 = vmpackc.low %vm4310_vm6, %vm4300_vm3  ;;  %vm14954_vm3 = vnez %v14950_v63 }
 0x522   :  { %vm9606_vm0 = vmpackc.low %vm4312_vm2, %vm4302_vm5  ;;  %vm4319_vm5 = vcmp.eq.s32.totalorder %v12800_v20, %v13173_v1  ;;  %vm4329_vm2 = vcmp.eq.s32.totalorder %v12803_v6, %v13173_v1 }
 0x523   :  { %9541 = vmatpush1.bf16.msk.msra.mxu1 %vm14951_vm9, %v10036_v15  ;;  %9601 = vmatpush1.bf16.msk.msra.mxu0 %vm9600_vm14, %v10036_v15  ;;  %vm4311_vm9 = vcmp.eq.s32.totalorder %v12777_v27, %v13177_v28  ;;  %vm4320_vm14 = vcmp.eq.s32.totalorder %v12800_v20, %v13093_v45  ;;  %vm13317_vm12 = vmpackc.low %vm4309_vm8, %vm4299_vm11  ;;  %vm4321_vm8 = vcmp.eq.s32.totalorder %v12800_v20, %v13177_v28 }
 0x524   :  { %9543 = vmatprep.subr.msk.bf16.mxu1 %vm9542_vm10, %v10036_v15  ;;  %9603 = vmatprep.subr.msk.bf16.mxu0 %vm9602_vm15, %v10036_v15  ;;  %v14953_v21 = vsel %vm13317_vm12, 4294967295, %v14952_v21  ;;  %vm4322_vm15 = vcmp.eq.s32.totalorder %v12800_v20, %v13102_v43  ;;  %vm4332_vm10 = vcmp.eq.s32.totalorder %v12803_v6, %v13102_v43  ;;  %vm9608_vm6 = vmpackc.low %vm4311_vm9, %vm4301_vm7  ;;  %vm4350_vm7 = vcmp.eq.s32.totalorder %v12829_v52, %v13093_v45 }
 0x525   :  { %vm9550_vm11 = vmpackc.low %vm4330_vm4, %vm4320_vm14  ;;  %vm14957_vm14 = vnez %v14953_v21  ;;  %v14977_v21 = vmov 0 }
 0x526   :  { %vm9610_vm12 = vmpackc.low %vm4332_vm10, %vm4322_vm15  ;;  %vm4339_vm15 = vcmp.eq.s32.totalorder %v12826_v50, %v13173_v1  ;;  %vm4349_vm10 = vcmp.eq.s32.totalorder %v12829_v52, %v13173_v1 }
 0x527   :  { %9545 = vmatpush1.bf16.msk.msra.mxu1 %vm14954_vm3, %v10036_v15  ;;  %9605 = vmatpush1.bf16.msk.msra.mxu0 %vm9604_vm13, %v10036_v15  ;;  %vm4331_vm3 = vcmp.eq.s32.totalorder %v12803_v6, %v13177_v28  ;;  %vm4340_vm13 = vcmp.eq.s32.totalorder %v12826_v50, %v13093_v45  ;;  %vm13343_vm9 = vmpackc.low %vm4329_vm2, %vm4319_vm5  ;;  %vm4341_vm2 = vcmp.eq.s32.totalorder %v12826_v50, %v13177_v28 }
 0x528   :  { %9547 = vmatprep.subr.msk.bf16.mxu1 %vm9546_vm1, %v10036_v15  ;;  %9607 = vmatprep.subr.msk.bf16.mxu0 %vm9606_vm0, %v10036_v15  ;;  %v14956_v8 = vsel %vm13343_vm9, 4294967295, %v14955_v8  ;;  %vm4342_vm0 = vcmp.eq.s32.totalorder %v12826_v50, %v13102_v43  ;;  %vm4352_vm1 = vcmp.eq.s32.totalorder %v12829_v52, %v13102_v43  ;;  %vm9612_vm4 = vmpackc.low %vm4331_vm3, %vm4321_vm8  ;;  %vm4370_vm8 = vcmp.eq.s32.totalorder %v12855_v46, %v13093_v45 }
 0x529   :  { %vm9554_vm5 = vmpackc.low %vm4350_vm7, %vm4340_vm13  ;;  %vm14960_vm13 = vnez %v14956_v8 }
 0x52a   :  { %vm9614_vm9 = vmpackc.low %vm4352_vm1, %vm4342_vm0  ;;  %vm4359_vm0 = vcmp.eq.s32.totalorder %v12852_v31, %v13173_v1  ;;  %vm4369_vm1 = vcmp.eq.s32.totalorder %v12855_v46, %v13173_v1 }
 0x52b   :  { %9549 = vmatpush1.bf16.msk.msra.mxu1 %vm14957_vm14, %v10036_v15  ;;  %9609 = vmatpush1.bf16.msk.msra.mxu0 %vm9608_vm6, %v10036_v15  ;;  %vm4351_vm14 = vcmp.eq.s32.totalorder %v12829_v52, %v13177_v28  ;;  %vm4360_vm6 = vcmp.eq.s32.totalorder %v12852_v31, %v13093_v45  ;;  %vm13369_vm3 = vmpackc.low %vm4349_vm10, %vm4339_vm15  ;;  %vm4371_vm10 = vcmp.eq.s32.totalorder %v12855_v46, %v13177_v28 }
 0x52c   :  { %9551 = vmatprep.subr.msk.bf16.mxu1 %vm9550_vm11, %v10036_v15  ;;  %9611 = vmatprep.subr.msk.bf16.mxu0 %vm9610_vm12, %v10036_v15  ;;  %vm4362_vm12 = vcmp.eq.s32.totalorder %v12852_v31, %v13102_v43  ;;  %vm4372_vm11 = vcmp.eq.s32.totalorder %v12855_v46, %v13102_v43  ;;  %vm13381_vm7 = vmpackc.low %vm4351_vm14, %vm4341_vm2 }
 0x52d   :  { %vm13391_vm15 = vmpackc.low %vm4370_vm8, %vm4360_vm6  ;;  %vm4382_vm6 = vcmp.eq.s32.totalorder %v12878_v56, %v13102_v43  ;;  %vm4392_vm8 = vcmp.eq.s32.totalorder %v12881_v42, %v13102_v43 }
 0x52e   :  { %vm13399_vm2 = vmpackc.low %vm4372_vm11, %vm4362_vm12  ;;  %vm4379_vm11 = vcmp.eq.s32.totalorder %v12878_v56, %v13173_v1 }
 0x52f   :  { %9553 = vmatpush1.bf16.msk.msra.mxu1 %vm14960_vm13, %v10036_v15  ;;  %9613 = vmatpush1.bf16.msk.msra.mxu0 %vm9612_vm4, %v10036_v15  ;;  %vm4361_vm4 = vcmp.eq.s32.totalorder %v12852_v31, %v13177_v28  ;;  %vm13409_vm14 = vmpackc.low %vm4369_vm1, %vm4359_vm0  ;;  %vm4389_vm13 = vcmp.eq.s32.totalorder %v12881_v42, %v13173_v1  ;;  %vm4391_vm0 = vcmp.eq.s32.totalorder %v12881_v42, %v13177_v28 }
 0x530   :  { %9555 = vmatprep.subr.msk.bf16.mxu1 %vm9554_vm5, %v10036_v15  ;;  %9615 = vmatprep.subr.msk.bf16.mxu0 %vm9614_vm9, %v10036_v15  ;;  %vm4380_vm5 = vcmp.eq.s32.totalorder %v12878_v56, %v13093_v45  ;;  %vm4390_vm9 = vcmp.eq.s32.totalorder %v12881_v42, %v13093_v45  ;;  %vm13423_vm12 = vmpackc.low %vm4371_vm10, %vm4361_vm4  ;;  %vm4410_vm4 = vcmp.eq.s32.totalorder %v12960_v22, %v13093_v45 }
 0x531   :  { %v4051_v58 = vpop.xlane.xlu1 %4050  ;;  %vm9622_vm1 = vmpackc.low %vm4392_vm8, %vm4382_vm6  ;;  %vm4399_vm6 = vcmp.eq.s32.totalorder %v12957_v14, %v13173_v1  ;;  %vm4409_vm8 = vcmp.eq.s32.totalorder %v12960_v22, %v13173_v1 }
 0x532   :  { %v13407_v49 = vmul.f32 0.004132231, %v4051_v58  ;;  %vm13460_vm10 = vmpackc.low %vm4389_vm13, %vm4379_vm11  ;;  %vm4411_vm11 = vcmp.eq.s32.totalorder %v12960_v22, %v13177_v28 }
 0x533   :  { %9557 = vmatpush1.bf16.msk.msra.mxu1 %vm13369_vm3, %v10036_v15  ;;  %9617 = vmatpush1.bf16.msk.msra.mxu0 %vm13381_vm7, %v10036_v15  ;;  %v4066_v61 = vpop.xlane.xlu0 %4065  ;;  %vm13445_vm3 = vmpackc.low %vm4390_vm9, %vm4380_vm5  ;;  %vm4381_vm7 = vcmp.eq.s32.totalorder %v12878_v56, %v13177_v28  ;;  %vm4412_vm5 = vcmp.eq.s32.totalorder %v12960_v22, %v13102_v43 }
 0x534   :  { %v4068_v17 = vmul.f32 0.004132231, %v4066_v61  ;;  %v4070_v7 = vmul.f32 %v13407_v49, %v13407_v49  ;;  %9559 = vmatprep.subr.msk.bf16.mxu1 %vm13391_vm15, %v10036_v15  ;;  %9619 = vmatprep.subr.msk.bf16.mxu0 %vm13399_vm2, %v10036_v15  ;;  %vm4400_vm15 = vcmp.eq.s32.totalorder %v12957_v14, %v13093_v45  ;;  %vm4402_vm2 = vcmp.eq.s32.totalorder %v12957_v14, %v13102_v43  ;;  %vm13474_vm9 = vmpackc.low %vm4391_vm0, %vm4381_vm7 }
 0x535   :  { %v14976_v55 = vsel %vm13474_vm9, 4294967295, %v14975_v55  ;;  %vm9626_vm13 = vmpackc.low %vm4412_vm5, %vm4402_vm2  ;;  %vm4420_vm7 = vcmp.eq.s32.totalorder %v12963_v51, %v13093_v45  ;;  %vm4430_vm0 = vcmp.eq.s32.totalorder %v12966_v39, %v13093_v45  ;;  %vm4419_vm2 = vcmp.eq.s32.totalorder %v12963_v51, %v13173_v1  ;;  %v4093_v58 = vpop.permute.xlu1 %4092 }
 0x536   :  { %v4072_v34 = vsub.f32 %v4068_v17, %v4070_v7  ;;  %vm13494_vm9 = vmpackc.low %vm4409_vm8, %vm4399_vm6  ;;  %vm4429_vm5 = vcmp.eq.s32.totalorder %v12966_v39, %v13173_v1  ;;  %vm4421_vm8 = vcmp.eq.s32.totalorder %v12963_v51, %v13177_v28  ;;  %v4075_v44 = vsub.f32 %v12934_v60, %v13407_v49 }
 0x537   :  { %9561 = vmatpush1.bf16.msk.msra.mxu1 %vm13409_vm14, %v10036_v15  ;;  %9621 = vmatpush1.bf16.msk.msra.mxu0 %vm13423_vm12, %v10036_v15  ;;  %vm9566_vm14 = vmpackc.low %vm4410_vm4, %vm4400_vm15  ;;  %vm4401_vm12 = vcmp.eq.s32.totalorder %v12957_v14, %v13177_v28  ;;  %v14978_v21 = vsel %vm13494_vm9, 4294967295, %v14977_v21  ;;  %vm14979_vm15 = vnez %v14976_v55  ;;  %v4076_v61 = vsub.f32 %v12936_v53, %v13407_v49 }
 0x538   :  { %v4078_v63 = vadd.f32 1e-05, %v4072_v34  ;;  %9563 = vmatprep.subr.msk.bf16.mxu1 %vm13445_vm3, %v10036_v15  ;;  %9623 = vmatprep.subr.msk.bf16.mxu0 %vm9622_vm1, %v10036_v15  ;;  %vm4422_vm3 = vcmp.eq.s32.totalorder %v12963_v51, %v13102_v43  ;;  %vm4432_vm1 = vcmp.eq.s32.totalorder %v12966_v39, %v13102_v43  ;;  %vm9628_vm4 = vmpackc.low %vm4411_vm11, %vm4401_vm12  ;;  %vm4440_vm12 = vcmp.eq.s32.totalorder %v13009_v10, %v13093_v45 }
 0x539   :  { %vm9570_vm6 = vmpackc.low %vm4430_vm0, %vm4420_vm7  ;;  %vm4450_vm11 = vcmp.eq.s32.totalorder %v13012_v57, %v13093_v45  ;;  %vm14982_vm7 = vnez %v14978_v21  ;;  %v4107_v55 = vpop.permute.xlu1 %4106  ;;  %v13740_v60 = vrot.slane %v4142_v33, %v11737_v30 }
 0x53a   :  { %9956 = vrsqrt.f32 %v4078_v63  ;;  %vm9630_vm9 = vmpackc.low %vm4432_vm1, %vm4422_vm3  ;;  %vm4439_vm3 = vcmp.eq.s32.totalorder %v13009_v10, %v13173_v1  ;;  %vm4449_vm1 = vcmp.eq.s32.totalorder %v13012_v57, %v13173_v1 }
 0x53b   :  { %9565 = vmatpush1.bf16.msk.msra.mxu1 %vm13460_vm10, %v10036_v15  ;;  %9625 = vmatpush1.bf16.msk.msra.mxu0 %vm14979_vm15, %v10036_v15  ;;  %vm4431_vm10 = vcmp.eq.s32.totalorder %v12966_v39, %v13177_v28  ;;  %vm13522_vm15 = vmpackc.low %vm4429_vm5, %vm4419_vm2  ;;  %vm4451_vm5 = vcmp.eq.s32.totalorder %v13012_v57, %v13177_v28 }
 0x53c   :  { %9567 = vmatprep.subr.msk.bf16.mxu1 %vm9566_vm14, %v10036_v15  ;;  %9627 = vmatprep.subr.msk.bf16.mxu0 %vm9626_vm13, %v10036_v15  ;;  %vm4442_vm14 = vcmp.eq.s32.totalorder %v13009_v10, %v13102_v43  ;;  %vm4452_vm13 = vcmp.eq.s32.totalorder %v13012_v57, %v13102_v43  ;;  %vm13534_vm0 = vmpackc.low %vm4431_vm10, %vm4421_vm8  ;;  %vm4460_vm10 = vcmp.eq.s32.totalorder %v13015_v2, %v13093_v45 }
 0x53d   :  { %vm13544_vm2 = vmpackc.low %vm4450_vm11, %vm4440_vm12  ;;  %vm4462_vm12 = vcmp.eq.s32.totalorder %v13015_v2, %v13102_v43  ;;  %vm4472_vm11 = vcmp.eq.s32.totalorder %v13018_v32, %v13102_v43 }
 0x53e   :  { %vm13552_vm8 = vmpackc.low %vm4452_vm13, %vm4442_vm14  ;;  %vm4459_vm14 = vcmp.eq.s32.totalorder %v13015_v2, %v13173_v1 }
 0x53f   :  { %9569 = vmatpush1.bf16.msk.msra.mxu1 %vm14982_vm7, %v10036_v15  ;;  %9629 = vmatpush1.bf16.msk.msra.mxu0 %vm9628_vm4, %v10036_v15  ;;  %vm4441_vm4 = vcmp.eq.s32.totalorder %v13009_v10, %v13177_v28  ;;  %vm4469_vm7 = vcmp.eq.s32.totalorder %v13018_v32, %v13173_v1 }
 0x540   :  { %9571 = vmatprep.subr.msk.bf16.mxu1 %vm9570_vm6, %v10036_v15  ;;  %9631 = vmatprep.subr.msk.bf16.mxu0 %vm9630_vm9, %v10036_v15  ;;  %vm4470_vm9 = vcmp.eq.s32.totalorder %v13018_v32, %v13093_v45  ;;  %vm13560_vm6 = vmpackc.low %vm4449_vm1, %vm4439_vm3  ;;  %vm4471_vm3 = vcmp.eq.s32.totalorder %v13018_v32, %v13177_v28 }
 0x541   :  { %vm13580_vm13 = vmpackc.low %vm4451_vm5, %vm4441_vm4  ;;  %vm4490_vm4 = vcmp.eq.s32.totalorder %v13045_v62, %v13093_v45 }
 0x542   :  { %vm9638_vm1 = vmpackc.low %vm4472_vm11, %vm4462_vm12  ;;  %vm4489_vm11 = vcmp.eq.s32.totalorder %v13045_v62, %v13173_v1 }
 0x543   :  { %9573 = vmatpush1.bf16.msk.msra.mxu1 %vm13522_vm15, %v10036_v15  ;;  %9633 = vmatpush1.bf16.msk.msra.mxu0 %vm13534_vm0, %v10036_v15  ;;  %vm13598_vm15 = vmpackc.low %vm4470_vm9, %vm4460_vm10  ;;  %vm4461_vm0 = vcmp.eq.s32.totalorder %v13015_v2, %v13177_v28  ;;  %vm4492_vm10 = vcmp.eq.s32.totalorder %v13045_v62, %v13102_v43 }
 0x544   :  { %v9957_v17 = vpop.eup %9956  ;;  %9575 = vmatprep.subr.msk.bf16.mxu1 %vm13544_vm2, %v10036_v15  ;;  %9635 = vmatprep.subr.msk.bf16.mxu0 %vm13552_vm8, %v10036_v15  ;;  %vm4480_vm2 = vcmp.eq.s32.totalorder %v13042_v47, %v13093_v45  ;;  %vm13619_vm5 = vmpackc.low %vm4469_vm7, %vm4459_vm14  ;;  %vm4482_vm8 = vcmp.eq.s32.totalorder %v13042_v47, %v13102_v43  ;;  %vm4491_vm7 = vcmp.eq.s32.totalorder %v13045_v62, %v13177_v28 }
 0x545   :  { %v4083_v53 = vmul.f32 %v9957_v17, %v4075_v44  ;;  %v4084_v49 = vmul.f32 %v9957_v17, %v4076_v61  ;;  %vm13633_vm9 = vmpackc.low %vm4471_vm3, %vm4461_vm0  ;;  %vm4510_vm0 = vcmp.eq.s32.totalorder %v13071_v5, %v13093_v45  ;;  %vm4502_vm3 = vcmp.eq.s32.totalorder %v13068_v29, %v13102_v43 }
 0x546   :  { %vm13641_vm12 = vmpackc.low %vm4490_vm4, %vm4480_vm2 }
 0x547   :  { %v4097_v9 = vmul.f32 %v4093_v58, %v4083_v53  ;;  %v4098_v34 = vmul.f32 %v4093_v58, %v4084_v49  ;;  %9577 = vmatpush1.bf16.msk.msra.mxu1 %vm13560_vm6, %v10036_v15  ;;  %9637 = vmatpush1.bf16.msk.msra.mxu0 %vm13580_vm13, %v10036_v15  ;;  %vm4479_vm6 = vcmp.eq.s32.totalorder %v13042_v47, %v13173_v1  ;;  %vm13652_vm14 = vmpackc.low %vm4492_vm10, %vm4482_vm8 }
 0x548   :  { %9579 = vmatprep.subr.msk.bf16.mxu1 %vm13598_vm15, %v10036_v15  ;;  %9639 = vmatprep.subr.msk.bf16.mxu0 %vm9638_vm1, %v10036_v15  ;;  %vm4481_vm13 = vcmp.eq.s32.totalorder %v13042_v47, %v13177_v28  ;;  %vm4500_vm15 = vcmp.eq.s32.totalorder %v13068_v29, %v13093_v45  ;;  %vm4512_vm1 = vcmp.eq.s32.totalorder %v13071_v5, %v13102_v43  ;;  %vm13680_vm4 = vmpackc.low %vm4489_vm11, %vm4479_vm6 }
 0x549   :  { %v4111_v21 = vadd.f32 %v4107_v55, %v4097_v9  ;;  %v4112_v8 = vadd.f32 %v4107_v55, %v4098_v34  ;;  %vm4499_vm10 = vcmp.eq.s32.totalorder %v13068_v29, %v13173_v1  ;;  %vm4501_vm6 = vcmp.eq.s32.totalorder %v13068_v29, %v13177_v28 }
 0x54a   :  { %vm4511_vm11 = vcmp.eq.s32.totalorder %v13071_v5, %v13177_v28  ;;  %v13750_v53 = vrot.slane %v4142_v33, %v11723_v25  ;;  %v6075_v33 = vld [vmem:[%s14836_s11 + $0x10] sm:$0xff] }
 0x54b   :  { %v4119_v3 = vmul.f32 0.2, %v4111_v21  ;;  %v4120_v37 = vmul.f32 0.2, %v4112_v8  ;;  %9581 = vmatpush1.bf16.msk.msra.mxu1 %vm13619_vm5, %v10036_v15  ;;  %9641 = vmatpush1.bf16.msk.msra.mxu0 %vm13633_vm9, %v10036_v15  ;;  %vm4116_vm2 = vcmp.ge.f32.partialorder %v4112_v8, 0.0  ;;  %vm4115_vm8 = vcmp.ge.f32.partialorder %v4111_v21, 0.0  ;;  %vm9644_vm5 = vmpackc.low %vm4491_vm7, %vm4481_vm13 }
 0x54c   :  { %9583 = vmatprep.subr.msk.bf16.mxu1 %vm13641_vm12, %v10036_v15  ;;  %9643 = vmatprep.subr.msk.bf16.mxu0 %vm13652_vm14, %v10036_v15  ;;  %vm4509_vm9 = vcmp.eq.s32.totalorder %v13071_v5, %v13173_v1  ;;  %vm13713_vm12 = vmpackc.low %vm4510_vm0, %vm4500_vm15  ;;  %vm15007_vm14 = vcmask 932864   ;;  %vm4520_vm15 = vcmp.eq.s32.totalorder %v13084_v12, %v13093_v45  ;;  %vm4522_vm0 = vcmp.eq.s32.totalorder %v13084_v12, %v13102_v43 }
 0x54d   :  { %v13703_v44 = vsel %vm4116_vm2, %v4112_v8, %v4120_v37  ;;  %v13705_v61 = vsel %vm4115_vm8, %v4111_v21, %v4119_v3  ;;  %vm15008_vm13 = vmmov %vm15007_vm14  ;;  %v8190_v45 = vsel %vm4520_vm15, 1.0, %v14937_v24  ;;  %v8192_v43 = vsel %vm4522_vm0, 1.0, %v14937_v24  ;;  %v6077_v37 = vld [vmem:[%s14837_s12] sm:$0xff] }
 0x54e   :  { %8258 = vmatprep.mubr.msk.f32.mxu1 %vm15007_vm14, %v13703_v44  ;;  %8322 = vmatprep.mubr.msk.f32.mxu0 %vm15008_vm13, %v13703_v44  ;;  %vm13731_vm7 = vmpackc.low %vm4512_vm1, %vm4502_vm3  ;;  %vm4233_vm14 = vcmp.eq.s32.totalorder %v12692_v0, %v13750_v53 }
 0x54f   :  { %9585 = vmatpush1.bf16.msk.msra.mxu1 %vm13680_vm4, %v10036_v15  ;;  %9645 = vmatpush1.bf16.msk.msra.mxu0 %vm9644_vm5, %v10036_v15  ;;  %vm9588_vm3 = vmpackc.low %vm4509_vm9, %vm4499_vm10  ;;  %vm4519_vm4 = vcmp.eq.s32.totalorder %v13084_v12, %v13173_v1  ;;  %vm4521_vm5 = vcmp.eq.s32.totalorder %v13084_v12, %v13177_v28  ;;  %vm4224_vm10 = vcmp.eq.s32.totalorder %v14936_v41, %v13740_v60 }
 0x550   :  { %5253 = vmatmul.mubr.f32.gmra.mrb[26].mxu1 %v13705_v61  ;;  %5330 = vmatmul.mubr.f32.gmra.mrb[30].mxu0 %v13705_v61  ;;  %vm9648_vm1 = vmpackc.low %vm4511_vm11, %vm4501_vm6  ;;  %vm4234_vm9 = vcmp.eq.s32.totalorder %v12692_v0, %v13740_v60  ;;  %vm15013_vm6 = vcmask 1041408   ;;  %v8189_v1 = vsel %vm4519_vm4, 1.0, %v14937_v24  ;;  %v8191_v28 = vsel %vm4521_vm5, 1.0, %v14937_v24 }
 0x551   :  { %vm15011_vm2 = vmmov %vm15008_vm13  ;;  %9587 = vmatprep.subr.msk.bf16.mxu1 %vm13713_vm12, %v10036_v15  ;;  %9647 = vmatprep.subr.msk.bf16.mxu0 %vm13731_vm7, %v10036_v15  ;;  %vm4223_vm12 = vcmp.eq.s32.totalorder %v14936_v41, %v13750_v53  ;;  %vm4244_vm13 = vcmp.eq.s32.totalorder %v12699_v19, %v13740_v60  ;;  %vm4254_vm7 = vcmp.eq.s32.totalorder %v12702_v48, %v13740_v60  ;;  %vm15017_vm5 = vcmask 932864  }
 0x552   :  { %8385 = vmatprep.mubr.msk.f32.mxu1 %vm15011_vm2, %v13207_v4  ;;  %vm15012_vm8 = vmmov %vm15011_vm2  ;;  %vm4253_vm4 = vcmp.eq.s32.totalorder %v12702_v48, %v13750_v53 }
 0x553   :  { %8449 = vmatprep.mubr.msk.f32.mxu0 %vm15012_vm8, %v13207_v4  ;;  %9589 = vmatpush1.bf16.msk.msra.mxu1 %vm9588_vm3, %v10036_v15  ;;  %vm15014_vm11 = vmmov %vm15013_vm6  ;;  %vm4243_vm8 = vcmp.eq.s32.totalorder %v12699_v19, %v13750_v53 }
 0x554   :  { %9649 = vmatpush1.bf16.msk.msra.mxu0 %vm9648_vm1, %v10036_v15  ;;  %8383 = vmatprep.subr.msk.mxu1 %vm15013_vm6, %v8190_v45  ;;  %vm9650_vm15 = vmpackc.low %vm4234_vm9, %vm4224_vm10  ;;  %vm4264_vm10 = vcmp.eq.s32.totalorder %v12727_v35, %v13740_v60  ;;  %vm4274_vm9 = vcmp.eq.s32.totalorder %v12730_v16, %v13740_v60  ;;  %v4128_v45 = vld [vmem:[%s14835_s10 + $0x18] sm:$0xff] }
 0x555   :  { %8447 = vmatprep.subr.msk.mxu0 %vm15014_vm11, %v8192_v43  ;;  %vm15015_vm0 = vmmov %vm15013_vm6 }
 0x556   :  { %vm15016_vm3 = vmmov %vm15015_vm0 }
 0x557   :  { %8384 = vmatpush1.msk.msra.mxu1 %vm15015_vm0, %v8189_v1  ;;  %vm9652_vm1 = vmpackc.low %vm4233_vm14, %vm4223_vm12  ;;  %vm4263_vm14 = vcmp.eq.s32.totalorder %v12727_v35, %v13750_v53  ;;  %vm4294_vm0 = vcmp.eq.s32.totalorder %v12751_v59, %v13740_v60 }
 0x558   :  { %8448 = vmatpush1.msk.msra.mxu0 %vm15016_vm3, %v8191_v28  ;;  %5401 = vmatmul.mubr.f32.vlgmr.msra.gmra.mrb[28].mxu1 %v13209_v13  ;;  %vm9654_vm2 = vmpackc.low %vm4254_vm7, %vm4244_vm13  ;;  %vm4273_vm13 = vcmp.eq.s32.totalorder %v12730_v16, %v13750_v53 }
 0x559   :  { %5478 = vmatmul.mubr.f32.vlgmr.msra.gmra.mrb[32].mxu0 %v13209_v13  ;;  %9651 = vmatprep.subr.msk.bf16.mxu1 %vm9650_vm15, %v10036_v15  ;;  %vm15018_vm6 = vmmov %vm15017_vm5  ;;  %vm4284_vm15 = vcmp.eq.s32.totalorder %v12748_v54, %v13740_v60 }
 0x55a   :  { %8386 = vmatprep.mubr.msk.f32.mxu1 %vm15017_vm5, %v13703_v44  ;;  %8450 = vmatprep.mubr.msk.f32.mxu0 %vm15018_vm6, %v13703_v44  ;;  %vm9656_vm11 = vmpackc.low %vm4253_vm4, %vm4243_vm8  ;;  %vm4293_vm8 = vcmp.eq.s32.totalorder %v12751_v59, %v13750_v53  ;;  %vm4304_vm4 = vcmp.eq.s32.totalorder %v12774_v18, %v13740_v60  ;;  %vm4303_vm6 = vcmp.eq.s32.totalorder %v12774_v18, %v13750_v53 }
 0x55b   :  { %9653 = vmatpush1.bf16.msk.msra.mxu1 %vm9652_vm1, %v10036_v15  ;;  %vm9658_vm12 = vmpackc.low %vm4274_vm9, %vm4264_vm10 }
 0x55c   :  { %9655 = vmatprep.subr.msk.bf16.mxu1 %vm9654_vm2, %v10036_v15  ;;  %5407 = vmatmul.mubr.f32.gmra.mrb[30].mxu1 %v13705_v61  ;;  %vm15019_vm7 = vmmov %vm15017_vm5  ;;  %vm4283_vm2 = vcmp.eq.s32.totalorder %v12748_v54, %v13750_v53  ;;  %vm4314_vm5 = vcmp.eq.s32.totalorder %v12777_v27, %v13740_v60 }
 0x55d   :  { %5484 = vmatmul.mubr.f32.gmra.mrb[34].mxu0 %v13705_v61  ;;  %8513 = vmatprep.mubr.msk.f32.mxu1 %vm15019_vm7, %v13207_v4  ;;  %vm9660_vm3 = vmpackc.low %vm4273_vm13, %vm4263_vm14  ;;  %vm4334_vm14 = vcmp.eq.s32.totalorder %v12803_v6, %v13740_v60 }
 0x55e   :  { %vm9662_vm1 = vmpackc.low %vm4294_vm0, %vm4284_vm15  ;;  %vm4323_vm15 = vcmp.eq.s32.totalorder %v12800_v20, %v13750_v53  ;;  %vm4333_vm0 = vcmp.eq.s32.totalorder %v12803_v6, %v13750_v53 }
 0x55f   :  { %9657 = vmatpush1.bf16.msk.msra.mxu1 %vm9656_vm11, %v10036_v15  ;;  %vm9664_vm10 = vmpackc.low %vm4293_vm8, %vm4283_vm2  ;;  %vm4313_vm11 = vcmp.eq.s32.totalorder %v12777_v27, %v13750_v53 }
 0x560   :  { %9659 = vmatprep.subr.msk.bf16.mxu1 %vm9658_vm12, %v10036_v15  ;;  %vm9666_vm9 = vmpackc.low %vm4314_vm5, %vm4304_vm4  ;;  %vm4324_vm12 = vcmp.eq.s32.totalorder %v12800_v20, %v13740_v60  ;;  %vm4343_vm4 = vcmp.eq.s32.totalorder %v12826_v50, %v13750_v53  ;;  %vm4353_vm5 = vcmp.eq.s32.totalorder %v12829_v52, %v13750_v53 }
 0x561   :  { %vm9668_vm13 = vmpackc.low %vm4313_vm11, %vm4303_vm6 }
 0x562   :  { %vm9670_vm7 = vmpackc.low %vm4334_vm14, %vm4324_vm12  ;;  %vm4363_vm12 = vcmp.eq.s32.totalorder %v12852_v31, %v13750_v53  ;;  %vm4373_vm14 = vcmp.eq.s32.totalorder %v12855_v46, %v13750_v53 }
 0x563   :  { %9661 = vmatpush1.bf16.msk.msra.mxu1 %vm9660_vm3, %v10036_v15  ;;  %vm4344_vm3 = vcmp.eq.s32.totalorder %v12826_v50, %v13740_v60  ;;  %vm9672_vm2 = vmpackc.low %vm4333_vm0, %vm4323_vm15 }
 0x564   :  { %9663 = vmatprep.subr.msk.bf16.mxu1 %vm9662_vm1, %v10036_v15  ;;  %vm4354_vm1 = vcmp.eq.s32.totalorder %v12829_v52, %v13740_v60  ;;  %vm9676_vm6 = vmpackc.low %vm4353_vm5, %vm4343_vm4 }
 0x565   :  { %vm9674_vm8 = vmpackc.low %vm4354_vm1, %vm4344_vm3  ;;  %vm4383_vm3 = vcmp.eq.s32.totalorder %v12878_v56, %v13750_v53  ;;  %vm4393_vm1 = vcmp.eq.s32.totalorder %v12881_v42, %v13750_v53 }
 0x566   :  { %vm9680_vm15 = vmpackc.low %vm4373_vm14, %vm4363_vm12 }
 0x567   :  { %9665 = vmatpush1.bf16.msk.msra.mxu1 %vm9664_vm10, %v10036_v15  ;;  %vm4364_vm10 = vcmp.eq.s32.totalorder %v12852_v31, %v13740_v60  ;;  %vm9684_vm4 = vmpackc.low %vm4393_vm1, %vm4383_vm3 }
 0x568   :  { %9667 = vmatprep.subr.msk.bf16.mxu1 %vm9666_vm9, %v10036_v15  ;;  %vm4374_vm9 = vcmp.eq.s32.totalorder %v12855_v46, %v13740_v60 }
 0x569   :  { %vm9678_vm11 = vmpackc.low %vm4374_vm9, %vm4364_vm10  ;;  %vm4403_vm10 = vcmp.eq.s32.totalorder %v12957_v14, %v13750_v53  ;;  %vm4413_vm9 = vcmp.eq.s32.totalorder %v12960_v22, %v13750_v53 }
 0x56a   :  { %vm9688_vm12 = vmpackc.low %vm4413_vm9, %vm4403_vm10 }
 0x56b   :  { %9669 = vmatpush1.bf16.msk.msra.mxu1 %vm9668_vm13, %v10036_v15  ;;  %vm4384_vm13 = vcmp.eq.s32.totalorder %v12878_v56, %v13740_v60 }
 0x56c   :  { %9671 = vmatprep.subr.msk.bf16.mxu1 %vm9670_vm7, %v10036_v15  ;;  %vm4394_vm7 = vcmp.eq.s32.totalorder %v12881_v42, %v13740_v60 }
 0x56d   :  { %vm9682_vm0 = vmpackc.low %vm4394_vm7, %vm4384_vm13  ;;  %vm4423_vm13 = vcmp.eq.s32.totalorder %v12963_v51, %v13750_v53  ;;  %vm4433_vm7 = vcmp.eq.s32.totalorder %v12966_v39, %v13750_v53 }
 0x56e   :  { %vm9692_vm3 = vmpackc.low %vm4433_vm7, %vm4423_vm13 }
 0x56f   :  { %9673 = vmatpush1.bf16.msk.msra.mxu1 %vm9672_vm2, %v10036_v15  ;;  %vm4404_vm2 = vcmp.eq.s32.totalorder %v12957_v14, %v13740_v60 }
 0x570   :  { %9675 = vmatprep.subr.msk.bf16.mxu1 %vm9674_vm8, %v10036_v15  ;;  %vm4414_vm8 = vcmp.eq.s32.totalorder %v12960_v22, %v13740_v60 }
 0x571   :  { %vm9686_vm5 = vmpackc.low %vm4414_vm8, %vm4404_vm2  ;;  %vm4443_vm2 = vcmp.eq.s32.totalorder %v13009_v10, %v13750_v53  ;;  %vm4453_vm8 = vcmp.eq.s32.totalorder %v13012_v57, %v13750_v53 }
 0x572   :  { %vm9696_vm10 = vmpackc.low %vm4453_vm8, %vm4443_vm2 }
 0x573   :  { %9677 = vmatpush1.bf16.msk.msra.mxu1 %vm9676_vm6, %v10036_v15  ;;  %vm4424_vm6 = vcmp.eq.s32.totalorder %v12963_v51, %v13740_v60 }
 0x574   :  { %9679 = vmatprep.subr.msk.bf16.mxu1 %vm9678_vm11, %v10036_v15  ;;  %vm4434_vm11 = vcmp.eq.s32.totalorder %v12966_v39, %v13740_v60 }
 0x575   :  { %vm9690_vm14 = vmpackc.low %vm4434_vm11, %vm4424_vm6  ;;  %vm4463_vm6 = vcmp.eq.s32.totalorder %v13015_v2, %v13750_v53  ;;  %vm4473_vm11 = vcmp.eq.s32.totalorder %v13018_v32, %v13750_v53 }
 0x576   :  { %vm9700_vm13 = vmpackc.low %vm4473_vm11, %vm4463_vm6  ;;  %vm4523_vm6 = vcmp.eq.s32.totalorder %v13084_v12, %v13750_v53  ;;  %vm15020_vm11 = vcmask 1041408  }
 0x577   :  { %9681 = vmatpush1.bf16.msk.msra.mxu1 %vm9680_vm15, %v10036_v15  ;;  %vm4444_vm15 = vcmp.eq.s32.totalorder %v13009_v10, %v13740_v60  ;;  %v8193_v18 = vsel %vm4523_vm6, 1.0, %v14937_v24  ;;  %vm15033_vm6 = vcmask 195584  }
 0x578   :  { %9683 = vmatprep.subr.msk.bf16.mxu1 %vm9682_vm0, %v10036_v15  ;;  %vm4454_vm0 = vcmp.eq.s32.totalorder %v13012_v57, %v13740_v60 }
 0x579   :  { %vm9694_vm1 = vmpackc.low %vm4454_vm0, %vm4444_vm15  ;;  %vm4483_vm15 = vcmp.eq.s32.totalorder %v13042_v47, %v13750_v53  ;;  %vm4493_vm0 = vcmp.eq.s32.totalorder %v13045_v62, %v13750_v53 }
 0x57a   :  { %vm9704_vm2 = vmpackc.low %vm4493_vm0, %vm4483_vm15  ;;  %vm15025_vm15 = vcmask 277504   ;;  %vm5622_vm0 = vcmask 48128  }
 0x57b   :  { %9685 = vmatpush1.bf16.msk.msra.mxu1 %vm9684_vm4, %v10036_v15  ;;  %vm4464_vm4 = vcmp.eq.s32.totalorder %v13015_v2, %v13740_v60 }
 0x57c   :  { %9687 = vmatprep.subr.msk.bf16.mxu1 %vm9686_vm5, %v10036_v15  ;;  %vm4474_vm5 = vcmp.eq.s32.totalorder %v13018_v32, %v13740_v60  ;;  %v10047_v32 = vmov 0.0|0.0  }
 0x57d   :  { %vm9698_vm9 = vmpackc.low %vm4474_vm5, %vm4464_vm4  ;;  %vm4503_vm4 = vcmp.eq.s32.totalorder %v13068_v29, %v13750_v53  ;;  %vm4513_vm5 = vcmp.eq.s32.totalorder %v13071_v5, %v13750_v53  ;;  %v4126_v53 = vld [vmem:[%s14835_s10 + $0x8] sm:$0xff] }
 0x57e   :  { %5967 = vmatprep.mubr.f32.mxu0 %v4126_v53 }
 0x57f   :  { %9689 = vmatpush1.bf16.msk.msra.mxu1 %vm9688_vm12, %v10036_v15  ;;  %vm4484_vm12 = vcmp.eq.s32.totalorder %v13042_v47, %v13740_v60 }
 0x580   :  { %9691 = vmatprep.subr.msk.bf16.mxu1 %vm9690_vm14, %v10036_v15  ;;  %vm4494_vm14 = vcmp.eq.s32.totalorder %v13045_v62, %v13740_v60 }
 0x581   :  { %vm9702_vm7 = vmpackc.low %vm4494_vm14, %vm4484_vm12  ;;  %vm15022_vm14 = vcmask 932864  }
 0x582   :  { %vm15021_vm12 = vmmov %vm15020_vm11 }
 0x583   :  { %9693 = vmatpush1.bf16.msk.msra.mxu1 %vm9692_vm3, %v10036_v15  ;;  %vm4504_vm3 = vcmp.eq.s32.totalorder %v13068_v29, %v13740_v60 }
 0x584   :  { %9695 = vmatprep.subr.msk.bf16.mxu1 %vm9694_vm1, %v10036_v15  ;;  %vm4514_vm1 = vcmp.eq.s32.totalorder %v13071_v5, %v13740_v60 }
 0x585   :  { %vm9706_vm8 = vmpackc.low %vm4514_vm1, %vm4504_vm3  ;;  %vm5890_vm3 = vcmask 130048  }
 0x587   :  { %9697 = vmatpush1.bf16.msk.msra.mxu1 %vm9696_vm10, %v10036_v15  ;;  %vm4524_vm10 = vcmp.eq.s32.totalorder %v13084_v12, %v13740_v60 }
 0x588   :  { %9699 = vmatprep.subr.msk.bf16.mxu1 %vm9698_vm9, %v10036_v15  ;;  %vm9708_vm9 = vmpackc.low %vm4513_vm5, %vm4503_vm4  ;;  %v8194_v59 = vsel %vm4524_vm10, 1.0, %v14937_v24  ;;  %vm5760_vm4 = vcmask 375808   ;;  %vm15030_vm5 = vcmask 326656  }
 0x58b   :  { %9701 = vmatpush1.bf16.msk.msra.mxu1 %vm9700_vm13, %v10036_v15  ;;  %vm5567_vm13 = vcmask 408576  }
 0x58c   :  { %9703 = vmatprep.subr.msk.bf16.mxu1 %vm9702_vm7, %v10036_v15  ;;  %vm15024_vm7 = vcmask 228352  }
 0x58d   :  { %vm15028_vm1 = vmmov %vm15024_vm7 }
 0x58f   :  { %9705 = vmatpush1.bf16.msk.msra.mxu1 %vm9704_vm2, %v10036_v15  ;;  %vm15029_vm2 = vcmask 97280  }
 0x590   :  { %9707 = vmatprep.subr.msk.bf16.mxu1 %vm9706_vm8, %v10036_v15  ;;  %vm14890_vm8 = vcmask 146432   ;;  %vm15031_vm10 = vmmov %vm15029_vm2 }
 0x593   :  { %9709 = vmatpush1.bf16.msk.msra.mxu1 %vm9708_vm9, %v10036_v15  ;;  %vm15032_vm9 = vmmov %vm15030_vm5 }
 0x594   :  { %8511 = vmatprep.subr.msk.mxu1 %vm15020_vm11, %v8194_v59  ;;  %v6073_v59 = vld [vmem:[%s14836_s11] sm:$0xff]  ;;  %vm14889_vm11 = vcmask 15360  }
 0x597   :  { %8512 = vmatpush1.msk.msra.mxu1 %vm15021_vm12, %v8193_v18  ;;  %vm15034_vm12 = vmmov %vm15033_vm6 }
 0x598   :  { %5555 = vmatmul.mubr.f32.vlgmr.msra.gmra.mrb[32].mxu1 %v13209_v13  ;;  %9742 = vmatprep.subr.bf16.mxu1 %v10047_v32 }
 0x599   :  { %8514 = vmatprep.mubr.msk.f32.mxu1 %vm15022_vm14, %v13703_v44  ;;  %vm15035_vm14 = vmmov %vm15025_vm15 }
 0x59c   :  { %5561 = vmatmul.mubr.f32.gmra.mrb[34].mxu1 %v13705_v61 }
 0x59d   :  { %8515 = vmatprep.mubr.msk.f32.mxu1 %vm5890_vm3, %v4128_v45 }
 0x5ed   :  { %v5248_v27 = vpop.f32.mrb[24].mxu1  ;;  %v5325_v20 = vpop.f32.mrb[28].mxu0 }
 0x5ee   :  { %5568 = vst.msk [vmem:[#allocation3] sm:$0xff] %vm5567_vm13, %v5248_v27  ;;  %v5250_v6 = vpop.f32.mrb[25].mxu1  ;;  %v5327_v50 = vpop.f32.mrb[29].mxu0  ;;  %5572 = vrot.lane.b32.xlu0 %v5248_v27, %s10037_s9  ;;  %5616 = vrot.lane.b32.xlu1 %v5325_v20, %s10038_s0 }
 0x5f2   :  { %5582 = vrot.lane.b32.xlu0 %v5248_v27, %s10013_s30  ;;  %5584 = vrot.lane.b32.xlu1 %v5250_v6, %s10013_s30 }
 0x5f6   :  { %5629 = vrot.lane.b32.xlu0 %v5325_v20, %s10017_s23  ;;  %5641 = vrot.lane.b32.xlu1 %v5327_v50, %s10039_s6 }
 0x5fa   :  { %5639 = vrot.lane.b32.xlu0 %v5325_v20, %s10039_s6  ;;  %v6074_v20 = vld [vmem:[%s14836_s11 + $0x8] sm:$0xff] }
 0x5fe   :  { %5653 = vrot.lane.b32.xlu0 %v5327_v50, %s10019_s5 }
 0x602   :  { %5661 = vrot.lane.b32.xlu0 %v5327_v50, %s10040_s1 }
 0x606   :  { %5671 = vrot.lane.b32.xlu0 %v5327_v50, %s10021_s26 }
 0x60a   :  { %5596 = vrot.lane.b32.xlu0 %v5250_v6, %s10041_s22 }
 0x60e   :  { %5604 = vrot.lane.b32.xlu0 %v5250_v6, %s10014_s21 }
 0x612   :  { %5614 = vrot.lane.b32.xlu0 %v5250_v6, %s10038_s0 }
 0x623   :  { %v5254_v52 = vpop.f32.mrb[26].mxu1  ;;  %v13960_v31 = vpop.f32.mrb[30].mxu0 }
 0x624   :  { %5569 = vst.msk [vmem:[#allocation3 + $0x8] sm:$0xff] %vm5567_vm13, %v5254_v52  ;;  %v13963_v46 = vpop.f32.mrb[31].mxu0  ;;  %5586 = vrot.lane.b32.xlu0 %v5254_v52, %s10013_s30  ;;  %5574 = vrot.lane.b32.xlu1 %v5254_v52, %s10037_s9  ;;  %v5256_v56 = vpop.f32.mrb[27].mxu1  ;;  %v6078_v52 = vld [vmem:[%s14837_s12 + $0x8] sm:$0xff] }
 0x628   :  { %5675 = vrot.lane.b32.xlu0 %v13963_v46, %s10021_s26  ;;  %5620 = vrot.lane.b32.xlu1 %v13960_v31, %s10038_s0 }
 0x62b   :  { %v5402_v42 = vpop.f32.mrb[28].mxu1 }
 0x62c   :  { %v5479_v14 = vpop.f32.mrb[32].mxu0  ;;  %5631 = vrot.lane.b32.xlu1 %v13960_v31, %s10017_s23  ;;  %5618 = vrot.lane.b32.xlu0 %v5256_v56, %s10038_s0  ;;  %v5404_v51 = vpop.f32.mrb[29].mxu1  ;;  %s10043_s23 = smov 74  }
 0x62d   :  { %v5481_v22 = vpop.f32.mrb[33].mxu0 }
 0x62f   :  { %v5408_v39 = vpop.f32.mrb[30].mxu1 }
 0x630   :  { %v5485_v10 = vpop.f32.mrb[34].mxu0  ;;  %5655 = vrot.lane.b32.xlu1 %v13963_v46, %s10019_s5  ;;  %5685 = vrot.lane.b32.xlu0 %v5402_v42, %s10042_s24  ;;  %v13974_v2 = vpop.f32.mrb[31].mxu1 }
 0x631   :  { %v5487_v57 = vpop.f32.mrb[35].mxu0 }
 0x634   :  { %5663 = vrot.lane.b32.xlu1 %v13963_v46, %s10040_s1  ;;  %5695 = vrot.lane.b32.xlu0 %v5402_v42, %s10023_s29  ;;  %s10051_s1 = smov 92  }
 0x638   :  { %5588 = vrot.lane.b32.xlu1 %v5256_v56, %s10013_s30  ;;  %5767 = vrot.lane.b32.xlu0 %v5481_v22, %s10030_s2  ;;  %s15023_s30 = smov 68  }
 0x63c   :  { %5598 = vrot.lane.b32.xlu1 %v5256_v56, %s10041_s22  ;;  %5775 = vrot.lane.b32.xlu0 %v5481_v22, %s10043_s23 }
 0x640   :  { %5606 = vrot.lane.b32.xlu1 %v5256_v56, %s10014_s21  ;;  %5785 = vrot.lane.b32.xlu0 %v5481_v22, %s10031_s28 }
 0x644   :  { %5742 = vrot.lane.b32.xlu1 %v5479_v14, %s10027_s4  ;;  %5709 = vrot.lane.b32.xlu0 %v5404_v51, %s10044_s25 }
 0x648   :  { %5752 = vrot.lane.b32.xlu1 %v5479_v14, %s10045_s27  ;;  %5717 = vrot.lane.b32.xlu0 %v5404_v51, %s15023_s30 }
 0x64c   :  { %5673 = vrot.lane.b32.xlu1 %v5402_v42, %s10021_s26  ;;  %5727 = vrot.lane.b32.xlu0 %v5404_v51, %s10046_s3 }
 0x650   :  { %5729 = vrot.lane.b32.xlu1 %v5479_v14, %s10046_s3  ;;  %5756 = vrot.lane.b32.xlu0 %v5485_v10, %s10045_s27 }
 0x654   :  { %5754 = vrot.lane.b32.xlu1 %v5481_v22, %s10045_s27  ;;  %5699 = vrot.lane.b32.xlu0 %v5408_v39, %s10023_s29 }
 0x658   :  { %5697 = vrot.lane.b32.xlu1 %v5404_v51, %s10023_s29  ;;  %5789 = vrot.lane.b32.xlu0 %v5487_v57, %s10031_s28 }
 0x65c   :  { %5744 = vrot.lane.b32.xlu1 %v5485_v10, %s10027_s4  ;;  %5731 = vrot.lane.b32.xlu0 %v13974_v2, %s10046_s3  ;;  %s10048_s4 = smov 102  }
 0x660   :  { %5677 = vrot.lane.b32.xlu1 %v5408_v39, %s10021_s26  ;;  %v5573_v47 = vpop.permute.xlu0 %5572  ;;  %v5617_v62 = vpop.permute.xlu1 %5616  ;;  %s15026_s26 = smov 52  }
 0x661   :  { %5578 = vst.msk [vmem:[#allocation3 + $0x10] sm:$0xff] %vm5567_vm13, %v5573_v47 }
 0x664   :  { %5687 = vrot.lane.b32.xlu1 %v5408_v39, %s10042_s24  ;;  %v5583_v29 = vpop.permute.xlu0 %5582  ;;  %v5585_v5 = vpop.permute.xlu1 %5584  ;;  %v5840_v39 = vld [vmem:[#allocation3] sm:$0xff] }
 0x665   :  { %v5590_v12 = vsel %vm15024_vm7, %v5583_v29, %v5585_v5 }
 0x666   :  { %5594 = vst.msk [vmem:[#allocation3 + $0x20] sm:$0xff] %vm5567_vm13, %v5590_v12 }
 0x668   :  { %5733 = vrot.lane.b32.xlu1 %v5485_v10, %s10046_s3  ;;  %v5630_v4 = vpop.permute.xlu0 %5629  ;;  %v5642_v7 = vpop.permute.xlu1 %5641 }
 0x669   :  { %5635 = vst.msk [vmem:[#allocation3 + $0x60] sm:$0xff] %vm5567_vm13, %v5630_v4  ;;  %v5842_v4 = vld [vmem:[#allocation3 + $0x10] sm:$0xff] }
 0x66b   :  { %v5556_v13 = vpop.f32.mrb[32].mxu1 }
 0x66c   :  { %5799 = vrot.lane.b32.xlu0 %v5556_v13, %s10048_s4  ;;  %v5558_v49 = vpop.f32.mrb[33].mxu1  ;;  %5758 = vrot.lane.b32.xlu1 %v5487_v57, %s10045_s27  ;;  %v5640_v9 = vpop.permute.xlu0 %5639 }
 0x66d   :  { %v5647_v34 = vsel %vm15025_vm15, %v5640_v9, %v5642_v7 }
 0x66e   :  { %5651 = vst.msk [vmem:[#allocation3 + $0x70] sm:$0xff] %vm5567_vm13, %v5647_v34 }
 0x66f   :  { %v5562_v40 = vpop.f32.mrb[34].mxu1 }
 0x670   :  { %5807 = vrot.lane.b32.xlu0 %v5556_v13, %s15026_s26  ;;  %v5564_v55 = vpop.f32.mrb[35].mxu1  ;;  %5769 = vrot.lane.b32.xlu1 %v5487_v57, %s10030_s2  ;;  %v5654_v63 = vpop.permute.xlu0 %5653 }
 0x671   :  { %5659 = vst.msk [vmem:[#allocation3 + $0x80] sm:$0xff] %vm5567_vm13, %v5654_v63 }
 0x674   :  { %5817 = vrot.lane.b32.xlu0 %v5556_v13, %s10049_s20  ;;  %5777 = vrot.lane.b32.xlu1 %v5487_v57, %s10043_s23  ;;  %v5662_v21 = vpop.permute.xlu0 %5661  ;;  %v6079_v57 = vld [vmem:[%s14837_s12 + $0x10] sm:$0xff] }
 0x675   :  { %5667 = vst.msk [vmem:[#allocation3 + $0x90] sm:$0xff] %vm5567_vm13, %v5662_v21 }
 0x678   :  { %5821 = vrot.lane.b32.xlu0 %v5562_v40, %s10049_s20  ;;  %5701 = vrot.lane.b32.xlu1 %v13974_v2, %s10023_s29  ;;  %v14016_v8 = vpop.permute.xlu0 %5671  ;;  %v5856_v42 = vld [vmem:[#allocation3 + $0x80] sm:$0xff] }
 0x67c   :  { %5643 = vrot.lane.b32.xlu0 %v13960_v31, %s10039_s6  ;;  %5711 = vrot.lane.b32.xlu1 %v13974_v2, %s10044_s25  ;;  %v5597_v11 = vpop.permute.xlu0 %5596  ;;  %v5841_v31 = vld [vmem:[#allocation3 + $0x8] sm:$0xff]  ;;  %v5858_v29 = vld [vmem:[#allocation3 + $0x90] sm:$0xff] }
 0x67d   :  { %5602 = vst.msk [vmem:[#allocation3 + $0x30] sm:$0xff] %vm5567_vm13, %v5597_v11  ;;  %v9712_v10 = vpack.c.bf16 %v5841_v31, %v5840_v39 }
 0x680   :  { %5832 = vrot.lane.b32.xlu0 %v5558_v49, %s15027_s7  ;;  %5719 = vrot.lane.b32.xlu1 %v13974_v2, %s15023_s30  ;;  %v5605_v3 = vpop.permute.xlu0 %5604 }
 0x681   :  { %5610 = vst.msk [vmem:[#allocation3 + $0x40] sm:$0xff] %vm5567_vm13, %v5605_v3 }
 0x684   :  { %6168 = vperm.xlu0 %9951, %v6077_v37   ;;  %5787 = vrot.lane.b32.xlu1 %v5556_v13, %s10031_s28  ;;  %v5615_v58 = vpop.permute.xlu0 %5614 }
 0x685   :  { %v5623_v44 = vsel %vm5622_vm0, %v5615_v58, %v5617_v62 }
 0x686   :  { %5627 = vst.msk [vmem:[#allocation3 + $0x50] sm:$0xff] %vm5567_vm13, %v5623_v44 }
 0x688   :  { %6154 = vperm.xlu0 %9951, %v6075_v33   ;;  %5819 = vrot.lane.b32.xlu1 %v5558_v49, %s10049_s20 }
 0x68c   :  { %5791 = vrot.lane.b32.xlu1 %v5562_v40, %s10031_s28 }
 0x690   :  { %5801 = vrot.lane.b32.xlu1 %v5562_v40, %s10048_s4 }
 0x694   :  { %5809 = vrot.lane.b32.xlu1 %v5562_v40, %s15026_s26 }
 0x696   :  { %v5587_v61 = vpop.permute.xlu0 %5586  ;;  %v5575_v26 = vpop.permute.xlu1 %5574 }
 0x697   :  { %5579 = vst.msk [vmem:[#allocation3 + $0x18] sm:$0xff] %vm5567_vm13, %v5575_v26 }
 0x698   :  { %5823 = vrot.lane.b32.xlu1 %v5564_v55, %s10049_s20 }
 0x69a   :  { %v14042_v17 = vpop.permute.xlu0 %5675  ;;  %v5621_v60 = vpop.permute.xlu1 %5620 }
 0x69c   :  { %5645 = vrot.lane.b32.xlu1 %v13963_v46, %s10039_s6 }
 0x69e   :  { %v5619_v43 = vpop.permute.xlu0 %5618  ;;  %v5632_v1 = vpop.permute.xlu1 %5631  ;;  %v5843_v2 = vld [vmem:[#allocation3 + $0x18] sm:$0xff] }
 0x69f   :  { %v5624_v28 = vsel %vm5622_vm0, %v5619_v43, %v5621_v60  ;;  %5636 = vst.msk [vmem:[#allocation3 + $0x68] sm:$0xff] %vm5567_vm13, %v5632_v1  ;;  %v9716_v13 = vpack.c.bf16 %v5843_v2, %v5842_v4  ;;  %v5846_v2 = vld [vmem:[#allocation3 + $0x30] sm:$0xff] }
 0x6a0   :  { %5628 = vst.msk [vmem:[#allocation3 + $0x58] sm:$0xff] %vm5567_vm13, %v5624_v28  ;;  %5834 = vrot.lane.b32.xlu1 %v5564_v55, %s15027_s7  ;;  %s15107_s7 = smov 126  }
 0x6a2   :  { %v5686_v18 = vpop.permute.xlu0 %5685  ;;  %v5656_v27 = vpop.permute.xlu1 %5655 }
 0x6a3   :  { %5691 = vst.msk [vmem:[#allocation3 + $0xb0] sm:$0xff] %vm5567_vm13, %v5686_v18  ;;  %5660 = vst.msk [vmem:[#allocation3 + $0x88] sm:$0xff] %vm5567_vm13, %v5656_v27 }
 0x6a4   :  { %6144 = vperm.xlu1 %9950, %v6073_v59  }
 0x6a6   :  { %v5696_v6 = vpop.permute.xlu0 %5695  ;;  %v5664_v50 = vpop.permute.xlu1 %5663 }
 0x6a7   :  { %5668 = vst.msk [vmem:[#allocation3 + $0x98] sm:$0xff] %vm5567_vm13, %v5664_v50 }
 0x6a8   :  { %6149 = vperm.xlu1 %9950, %v6074_v20  }
 0x6aa   :  { %v5768_v46 = vpop.permute.xlu0 %5767  ;;  %v5589_v56 = vpop.permute.xlu1 %5588  ;;  %v5857_v14 = vld [vmem:[#allocation3 + $0x88] sm:$0xff] }
 0x6ab   :  { %5773 = vst.msk [vmem:[#allocation3 + $0x120] sm:$0xff] %vm5567_vm13, %v5768_v46  ;;  %v5591_v22 = vsel %vm15028_vm1, %v5587_v61, %v5589_v56  ;;  %v9710_v51 = vpack.c.bf16 %v5857_v14, %v5856_v42  ;;  %v5844_v46 = vld [vmem:[#allocation3 + $0x20] sm:$0xff] }
 0x6ac   :  { %5595 = vst.msk [vmem:[#allocation3 + $0x28] sm:$0xff] %vm5567_vm13, %v5591_v22  ;;  %6173 = vperm.xlu1 %9950, %v6078_v52   ;;  %v5862_v22 = vld [vmem:[#allocation3 + $0xb0] sm:$0xff] }
 0x6ad   :  { %9711 = vmatprep.subr.bf16.mxu0 %v9710_v51 }
 0x6ae   :  { %v5776_v47 = vpop.permute.xlu0 %5775  ;;  %9713 = vmatpush3.bf16.msra.mxu0 %v9712_v10  ;;  %v5599_v62 = vpop.permute.xlu1 %5598  ;;  %v5859_v5 = vld [vmem:[#allocation3 + $0x98] sm:$0xff] }
 0x6af   :  { %5781 = vst.msk [vmem:[#allocation3 + $0x130] sm:$0xff] %vm5567_vm13, %v5776_v47  ;;  %5603 = vst.msk [vmem:[#allocation3 + $0x38] sm:$0xff] %vm5567_vm13, %v5599_v62  ;;  %v9714_v12 = vpack.c.bf16 %v5859_v5, %v5858_v29 }
 0x6b0   :  { %6178 = vperm.xlu1 %9950, %v6079_v57  }
 0x6b1   :  { %9715 = vmatprep.subr.bf16.mxu0 %v9714_v12 }
 0x6b2   :  { %v14077_v49 = vpop.permute.xlu0 %5785  ;;  %9717 = vmatpush3.bf16.msra.mxu0 %v9716_v13  ;;  %v5607_v7 = vpop.permute.xlu1 %5606 }
 0x6b3   :  { %5611 = vst.msk [vmem:[#allocation3 + $0x48] sm:$0xff] %vm5567_vm13, %v5607_v7 }
 0x6b6   :  { %v5710_v9 = vpop.permute.xlu0 %5709  ;;  %v5743_v34 = vpop.permute.xlu1 %5742  ;;  %v5847_v39 = vld [vmem:[#allocation3 + $0x38] sm:$0xff] }
 0x6b7   :  { %5715 = vst.msk [vmem:[#allocation3 + $0xd0] sm:$0xff] %vm5567_vm13, %v5710_v9  ;;  %5748 = vst.msk [vmem:[#allocation3 + $0x100] sm:$0xff] %vm5567_vm13, %v5743_v34  ;;  %v9724_v62 = vpack.c.bf16 %v5847_v39, %v5846_v2 }
 0x6ba   :  { %v5718_v40 = vpop.permute.xlu0 %5717  ;;  %v5753_v55 = vpop.permute.xlu1 %5752 }
 0x6bb   :  { %5723 = vst.msk [vmem:[#allocation3 + $0xe0] sm:$0xff] %vm5567_vm13, %v5718_v40  ;;  %v5876_v40 = vld [vmem:[#allocation3 + $0x120] sm:$0xff] }
 0x6be   :  { %v5674_v63 = vpop.permute.xlu1 %5673  ;;  %v5728_v11 = vpop.permute.xlu0 %5727  ;;  %v5872_v28 = vld [vmem:[#allocation3 + $0x100] sm:$0xff] }
 0x6bf   :  { %v5679_v21 = vsel %vm15029_vm2, %v14016_v8, %v5674_v63 }
 0x6c0   :  { %5683 = vst.msk [vmem:[#allocation3 + $0xa0] sm:$0xff] %vm5567_vm13, %v5679_v21 }
 0x6c2   :  { %v5730_v3 = vpop.permute.xlu1 %5729  ;;  %v5757_v33 = vpop.permute.xlu0 %5756 }
 0x6c3   :  { %v5736_v37 = vsel %vm14890_vm8, %v5728_v11, %v5730_v3 }
 0x6c4   :  { %5740 = vst.msk [vmem:[#allocation3 + $0xf0] sm:$0xff] %vm5567_vm13, %v5736_v37  ;;  %v5878_v37 = vld [vmem:[#allocation3 + $0x130] sm:$0xff] }
 0x6c6   :  { %v5755_v58 = vpop.permute.xlu1 %5754  ;;  %v5700_v8 = vpop.permute.xlu0 %5699 }
 0x6c7   :  { %v5761_v44 = vsel %vm5760_vm4, %v5753_v55, %v5755_v58  ;;  %v5860_v52 = vld [vmem:[#allocation3 + $0xa0] sm:$0xff] }
 0x6c8   :  { %5765 = vst.msk [vmem:[#allocation3 + $0x110] sm:$0xff] %vm5567_vm13, %v5761_v44 }
 0x6ca   :  { %v5698_v61 = vpop.permute.xlu1 %5697  ;;  %v14093_v45 = vpop.permute.xlu0 %5789 }
 0x6cb   :  { %v5703_v26 = vsel %vm15030_vm5, %v5696_v6, %v5698_v61  ;;  %v5845_v6 = vld [vmem:[#allocation3 + $0x28] sm:$0xff]  ;;  %v5870_v39 = vld [vmem:[#allocation3 + $0xf0] sm:$0xff] }
 0x6cc   :  { %5707 = vst.msk [vmem:[#allocation3 + $0xc0] sm:$0xff] %vm5567_vm13, %v5703_v26  ;;  %v9720_v42 = vpack.c.bf16 %v5845_v6, %v5844_v46  ;;  %v5849_v26 = vld [vmem:[#allocation3 + $0x48] sm:$0xff] }
 0x6ce   :  { %v5745_v60 = vpop.permute.xlu1 %5744  ;;  %v5732_v27 = vpop.permute.xlu0 %5731 }
 0x6cf   :  { %5749 = vst.msk [vmem:[#allocation3 + $0x108] sm:$0xff] %vm5567_vm13, %v5745_v60  ;;  %v5874_v4 = vld [vmem:[#allocation3 + $0x110] sm:$0xff] }
 0x6d2   :  { %v5678_v53 = vpop.permute.xlu1 %5677 }
 0x6d3   :  { %v5680_v43 = vsel %vm15031_vm10, %v14042_v17, %v5678_v53 }
 0x6d4   :  { %5684 = vst.msk [vmem:[#allocation3 + $0xa8] sm:$0xff] %vm5567_vm13, %v5680_v43  ;;  %v5848_v43 = vld [vmem:[#allocation3 + $0x40] sm:$0xff] }
 0x6d6   :  { %v5688_v1 = vpop.permute.xlu1 %5687  ;;  %v5873_v59 = vld [vmem:[#allocation3 + $0x108] sm:$0xff] }
 0x6d7   :  { %5692 = vst.msk [vmem:[#allocation3 + $0xb8] sm:$0xff] %vm5567_vm13, %v5688_v1  ;;  %v9743_v18 = vpack.c.bf16 %v5873_v59, %v5872_v28  ;;  %v9728_v1 = vpack.c.bf16 %v5849_v26, %v5848_v43  ;;  %v5866_v59 = vld [vmem:[#allocation3 + $0xd0] sm:$0xff]  ;;  %v4130_v43 = vld [vmem:[%s14835_s10 + $0x28] sm:$0xff] }
 0x6d8   :  { %v4125_v26 = vld [vmem:[%s14835_s10] sm:$0xff] }
 0x6d9   :  { %9744 = vmatpush1.bf16.msra.mxu1 %v9743_v18 }
 0x6da   :  { %v5734_v20 = vpop.permute.xlu1 %5733  ;;  %9745 = vmatprep.subr.bf16.mxu1 %v10047_v32 }
 0x6db   :  { %v5737_v50 = vsel %vm14890_vm8, %v5732_v27, %v5734_v20  ;;  %v5861_v31 = vld [vmem:[#allocation3 + $0xa8] sm:$0xff]  ;;  %v5851_v27 = vld [vmem:[#allocation3 + $0x58] sm:$0xff] }
 0x6dc   :  { %5741 = vst.msk [vmem:[#allocation3 + $0xf8] sm:$0xff] %vm5567_vm13, %v5737_v50  ;;  %v9718_v17 = vpack.c.bf16 %v5861_v31, %v5860_v52  ;;  %v5850_v50 = vld [vmem:[#allocation3 + $0x50] sm:$0xff] }
 0x6dd   :  { %v9732_v52 = vpack.c.bf16 %v5851_v27, %v5850_v50  ;;  %v4131_v27 = vld [vmem:[%s14835_s10 + $0x30] sm:$0xff]  ;;  %v4138_v50 = vld [vmem:[%s14835_s10 + $0x68] sm:$0xff] }
 0x6de   :  { %v5800_v56 = vpop.permute.xlu0 %5799  ;;  %9719 = vmatprep.subr.bf16.mxu0 %v9718_v17  ;;  %v5759_v14 = vpop.permute.xlu1 %5758  ;;  %v5863_v51 = vld [vmem:[#allocation3 + $0xb8] sm:$0xff]  ;;  %v5868_v17 = vld [vmem:[#allocation3 + $0xe0] sm:$0xff] }
 0x6df   :  { %5805 = vst.msk [vmem:[#allocation3 + $0x150] sm:$0xff] %vm5567_vm13, %v5800_v56  ;;  %v5762_v10 = vsel %vm5760_vm4, %v5757_v33, %v5759_v14  ;;  %9721 = vmatpush3.bf16.msra.mxu0 %v9720_v42  ;;  %v9722_v57 = vpack.c.bf16 %v5863_v51, %v5862_v22  ;;  %v5853_v56 = vld [vmem:[#allocation3 + $0x68] sm:$0xff] }
 0x6e0   :  { %5766 = vst.msk [vmem:[#allocation3 + $0x118] sm:$0xff] %vm5567_vm13, %v5762_v10 }
 0x6e1   :  { %9723 = vmatprep.subr.bf16.mxu0 %v9722_v57 }
 0x6e2   :  { %v5808_v47 = vpop.permute.xlu0 %5807  ;;  %v5770_v29 = vpop.permute.xlu1 %5769 }
 0x6e3   :  { %5813 = vst.msk [vmem:[#allocation3 + $0x160] sm:$0xff] %vm5567_vm13, %v5808_v47  ;;  %5774 = vst.msk [vmem:[#allocation3 + $0x128] sm:$0xff] %vm5567_vm13, %v5770_v29  ;;  %9725 = vmatpush3.bf16.msra.mxu0 %v9724_v62  ;;  %v5871_v22 = vld [vmem:[#allocation3 + $0xf8] sm:$0xff] }
 0x6e4   :  { %v9738_v57 = vpack.c.bf16 %v5871_v22, %v5870_v39 }
 0x6e6   :  { %v5818_v5 = vpop.permute.xlu0 %5817  ;;  %v5778_v12 = vpop.permute.xlu1 %5777 }
 0x6e7   :  { %5782 = vst.msk [vmem:[#allocation3 + $0x138] sm:$0xff] %vm5567_vm13, %v5778_v12  ;;  %v5875_v13 = vld [vmem:[#allocation3 + $0x118] sm:$0xff] }
 0x6e8   :  { %v9746_v7 = vpack.c.bf16 %v5875_v13, %v5874_v4  ;;  %v5882_v13 = vld [vmem:[#allocation3 + $0x150] sm:$0xff] }
 0x6ea   :  { %v14108_v9 = vpop.permute.xlu0 %5821  ;;  %9747 = vmatpush1.bf16.msra.mxu1 %v9746_v7  ;;  %v5702_v34 = vpop.permute.xlu1 %5701  ;;  %v5877_v55 = vld [vmem:[#allocation3 + $0x128] sm:$0xff] }
 0x6eb   :  { %v5704_v63 = vsel %vm15032_vm9, %v5700_v8, %v5702_v34  ;;  %9748 = vmatprep.subr.bf16.mxu1 %v10047_v32  ;;  %v9749_v21 = vpack.c.bf16 %v5877_v55, %v5876_v40  ;;  %v5864_v8 = vld [vmem:[#allocation3 + $0xc0] sm:$0xff] }
 0x6ec   :  { %5708 = vst.msk [vmem:[#allocation3 + $0xc8] sm:$0xff] %vm5567_vm13, %v5704_v63  ;;  %v5884_v55 = vld [vmem:[#allocation3 + $0x160] sm:$0xff] }
 0x6ee   :  { %v14113_v11 = vpop.permute.xlu0 %5643  ;;  %9750 = vmatpush1.bf16.msra.mxu1 %v9749_v21  ;;  %v5712_v3 = vpop.permute.xlu1 %5711  ;;  %v5879_v58 = vld [vmem:[#allocation3 + $0x138] sm:$0xff] }
 0x6ef   :  { %5716 = vst.msk [vmem:[#allocation3 + $0xd8] sm:$0xff] %vm5567_vm13, %v5712_v3  ;;  %9751 = vmatprep.subr.bf16.mxu1 %v10047_v32  ;;  %v9752_v33 = vpack.c.bf16 %v5879_v58, %v5878_v37 }
 0x6f2   :  { %v5833_v44 = vpop.permute.xlu0 %5832  ;;  %9753 = vmatpush1.bf16.msra.mxu1 %v9752_v33  ;;  %v5720_v61 = vpop.permute.xlu1 %5719 }
 0x6f3   :  { %5838 = vst.msk [vmem:[#allocation3 + $0x180] sm:$0xff] %vm5567_vm13, %v5833_v44  ;;  %5724 = vst.msk [vmem:[#allocation3 + $0xe8] sm:$0xff] %vm5567_vm13, %v5720_v61  ;;  %v5865_v60 = vld [vmem:[#allocation3 + $0xc8] sm:$0xff]  ;;  %9754 = vmatprep.subr.bf16.mxu1 %v10047_v32  ;;  %v5854_v44 = vld [vmem:[#allocation3 + $0x70] sm:$0xff] }
 0x6f4   :  { %v9726_v53 = vpack.c.bf16 %v5865_v60, %v5864_v8 }
 0x6f6   :  { %9727 = vmatprep.subr.bf16.mxu0 %v9726_v53  ;;  %v5788_v28 = vpop.permute.xlu1 %5787  ;;  %v5867_v18 = vld [vmem:[#allocation3 + $0xd8] sm:$0xff] }
 0x6f7   :  { %v5793_v20 = vsel %vm15033_vm6, %v14077_v49, %v5788_v28  ;;  %9729 = vmatpush3.bf16.msra.mxu0 %v9728_v1  ;;  %v9730_v6 = vpack.c.bf16 %v5867_v18, %v5866_v59  ;;  %v5852_v49 = vld [vmem:[#allocation3 + $0x60] sm:$0xff]  ;;  %v4129_v28 = vld [vmem:[%s14835_s10 + $0x20] sm:$0xff]  ;;  %v4132_v59 = vld [vmem:[%s14835_s10 + $0x38] sm:$0xff] }
 0x6f8   :  { %5797 = vst.msk [vmem:[#allocation3 + $0x140] sm:$0xff] %vm5567_vm13, %v5793_v20  ;;  %v9736_v51 = vpack.c.bf16 %v5853_v56, %v5852_v49  ;;  %v4127_v1 = vld [vmem:[%s14835_s10 + $0x10] sm:$0xff]  ;;  %v4134_v18 = vld [vmem:[%s14835_s10 + $0x48] sm:$0xff]  ;;  %v4133_v20 = vld [vmem:[%s14835_s10 + $0x40] sm:$0xff] }
 0x6f9   :  { %9731 = vmatprep.subr.bf16.mxu0 %v9730_v6  ;;  %v4136_v6 = vld [vmem:[%s14835_s10 + $0x58] sm:$0xff] }
 0x6fa   :  { %v5820_v31 = vpop.permute.xlu1 %5819  ;;  %v5869_v46 = vld [vmem:[#allocation3 + $0xe8] sm:$0xff]  ;;  %v5888_v8 = vld [vmem:[#allocation3 + $0x180] sm:$0xff] }
 0x6fb   :  { %v5826_v42 = vsel %vm14889_vm11, %v5818_v5, %v5820_v31  ;;  %9733 = vmatpush3.bf16.msra.mxu0 %v9732_v52  ;;  %v9734_v14 = vpack.c.bf16 %v5869_v46, %v5868_v17  ;;  %v4135_v52 = vld [vmem:[%s14835_s10 + $0x50] sm:$0xff]  ;;  %v4137_v31 = vld [vmem:[%s14835_s10 + $0x60] sm:$0xff]  ;;  %v4140_v17 = vld [vmem:[%s14835_s10 + $0x78] sm:$0xff] }
 0x6fc   :  { %5830 = vst.msk [vmem:[#allocation3 + $0x170] sm:$0xff] %vm5567_vm13, %v5826_v42  ;;  %v4139_v46 = vld [vmem:[%s14835_s10 + $0x70] sm:$0xff]  ;;  %s10054_s10 = smov 122  }
 0x6fd   :  { %9735 = vmatprep.subr.bf16.mxu0 %v9734_v14 }
 0x6fe   :  { %v5792_v10 = vpop.permute.xlu1 %5791 }
 0x6ff   :  { %v5794_v2 = vsel %vm15034_vm12, %v14093_v45, %v5792_v10  ;;  %9737 = vmatpush3.bf16.msra.mxu0 %v9736_v51  ;;  %v5880_v29 = vld [vmem:[#allocation3 + $0x140] sm:$0xff] }
 0x700   :  { %5798 = vst.msk [vmem:[#allocation3 + $0x148] sm:$0xff] %vm5567_vm13, %v5794_v2  ;;  %9739 = vmatprep.subr.bf16.mxu0 %v9738_v57 }
 0x702   :  { %v5802_v47 = vpop.permute.xlu1 %5801 }
 0x703   :  { %5806 = vst.msk [vmem:[#allocation3 + $0x158] sm:$0xff] %vm5567_vm13, %v5802_v47 }
 0x706   :  { %v5810_v62 = vpop.permute.xlu1 %5809 }
 0x707   :  { %5814 = vst.msk [vmem:[#allocation3 + $0x168] sm:$0xff] %vm5567_vm13, %v5810_v62  ;;  %v5881_v5 = vld [vmem:[#allocation3 + $0x148] sm:$0xff] }
 0x708   :  { %v9755_v12 = vpack.c.bf16 %v5881_v5, %v5880_v29 }
 0x70a   :  { %9756 = vmatpush1.bf16.msra.mxu1 %v9755_v12  ;;  %v5824_v4 = vpop.permute.xlu1 %5823  ;;  %v5883_v7 = vld [vmem:[#allocation3 + $0x158] sm:$0xff] }
 0x70b   :  { %v5827_v45 = vsel %vm14889_vm11, %v14108_v9, %v5824_v4  ;;  %9757 = vmatprep.subr.bf16.mxu1 %v10047_v32  ;;  %v9758_v34 = vpack.c.bf16 %v5883_v7, %v5882_v13  ;;  %v5886_v9 = vld [vmem:[#allocation3 + $0x170] sm:$0xff] }
 0x70c   :  { %5831 = vst.msk [vmem:[#allocation3 + $0x178] sm:$0xff] %vm5567_vm13, %v5827_v45 }
 0x70e   :  { %9759 = vmatpush1.bf16.msra.mxu1 %v9758_v34  ;;  %v5646_v40 = vpop.permute.xlu1 %5645  ;;  %v5885_v63 = vld [vmem:[#allocation3 + $0x168] sm:$0xff] }
 0x70f   :  { %v5648_v21 = vsel %vm15035_vm14, %v14113_v11, %v5646_v40  ;;  %9760 = vmatprep.subr.bf16.mxu1 %v10047_v32  ;;  %v9761_v3 = vpack.c.bf16 %v5885_v63, %v5884_v55 }
 0x710   :  { %5652 = vst.msk [vmem:[#allocation3 + $0x78] sm:$0xff] %vm5567_vm13, %v5648_v21 }
 0x712   :  { %9762 = vmatpush1.bf16.msra.mxu1 %v9761_v3  ;;  %v5835_v37 = vpop.permute.xlu1 %5834 }
 0x713   :  { %5839 = vst.msk [vmem:[#allocation3 + $0x188] sm:$0xff] %vm5567_vm13, %v5835_v37  ;;  %9763 = vmatprep.subr.bf16.mxu1 %v10047_v32  ;;  %v5887_v58 = vld [vmem:[#allocation3 + $0x178] sm:$0xff] }
 0x714   :  { %v9764_v33 = vpack.c.bf16 %v5887_v58, %v5886_v9 }
 0x716   :  { %9765 = vmatpush1.bf16.msra.mxu1 %v9764_v33 }
 0x717   :  { %v5855_v61 = vld [vmem:[#allocation3 + $0x78] sm:$0xff]  ;;  %9766 = vmatprep.subr.bf16.mxu1 %v10047_v32 }
 0x718   :  { %v9740_v11 = vpack.c.bf16 %v5855_v61, %v5854_v44 }
 0x71a   :  { %9741 = vmatpush3.bf16.msra.mxu0 %v9740_v11  ;;  %v5889_v60 = vld [vmem:[#allocation3 + $0x188] sm:$0xff] }
 0x71b   :  { %v9767_v53 = vpack.c.bf16 %v5889_v60, %v5888_v8 }
 0x71d   :  { %5968 = vmatmul.mubr.f32.vlgmr.msra.gmra.mrb[36].mxu0 %v4125_v26  ;;  %9768 = vmatpush1.bf16.msra.mxu1 %v9767_v53 }
 0x71e   :  { %5972 = vmatprep.mubr.f32.mxu0 %v4130_v43  ;;  %v6080_v43 = vld [vmem:[%s14837_s12 + $0x18] sm:$0xff]  ;;  %s15041_s12 = smov 110  }
 0x720   :  { %6053 = vmatmul.mubr.f32.vlgmr.msra.gmra.mrb[36].mxu1 %v4127_v1  ;;  %v6226_v1 = vld [vmem:[%s14838_s13] sm:$0x3]  ;;  %s10050_s13 = smov 20  }
 0x721   :  { %5973 = vmatmul.mubr.f32.gmra.mrb[38].mxu0 %v4129_v28  ;;  %8516 = vmatprep.mubr.msk.f32.mxu1 %vm5890_vm3, %v4132_v59  ;;  %v6230_v28 = vrot.slane %v6226_v1, %v11723_v25  ;;  %v6234_v59 = vrot.slane %v6226_v1, %v11737_v30 }
 0x722   :  { %5977 = vmatprep.mubr.f32.mxu0 %v4134_v18  ;;  %v6076_v18 = vld [vmem:[%s14836_s11 + $0x18] sm:$0xff]  ;;  %s15039_s11 = smov 38  }
 0x723   :  { %vm6236_vm7 = vcmp.eq.s32.totalorder %v14936_v41, %v6234_v59  ;;  %vm6238_vm15 = vcmp.eq.s32.totalorder %v12692_v0, %v6234_v59  ;;  %vm6235_vm0 = vcmp.eq.s32.totalorder %v14936_v41, %v6230_v28  ;;  %vm6240_vm2 = vcmp.eq.s32.totalorder %v12699_v19, %v6234_v59 }
 0x724   :  { %6058 = vmatmul.mubr.f32.gmra.mrb[38].mxu1 %v4131_v27  ;;  %vm9769_vm1 = vmpackc.low %vm6238_vm15, %vm6236_vm7  ;;  %vm6242_vm4 = vcmp.eq.s32.totalorder %v12702_v48, %v6234_v59  ;;  %vm6239_vm5 = vcmp.eq.s32.totalorder %v12699_v19, %v6230_v28  ;;  %vm6241_vm10 = vcmp.eq.s32.totalorder %v12702_v48, %v6230_v28  ;;  %vm6244_vm6 = vcmp.eq.s32.totalorder %v12727_v35, %v6234_v59 }
 0x725   :  { %5978 = vmatmul.mubr.f32.gmra.mrb[40].mxu0 %v4133_v20  ;;  %8517 = vmatprep.mubr.msk.f32.mxu1 %vm5890_vm3, %v4136_v6  ;;  %vm6246_vm12 = vcmp.eq.s32.totalorder %v12730_v16, %v6234_v59  ;;  %vm9773_vm14 = vmpackc.low %vm6242_vm4, %vm6240_vm2  ;;  %vm6243_vm11 = vcmp.eq.s32.totalorder %v12727_v35, %v6230_v28  ;;  %vm6245_vm8 = vcmp.eq.s32.totalorder %v12730_v16, %v6230_v28  ;;  %vm15036_vm2 = vcmask 1041408   ;;  %v6145_v35 = vpop.permute.xlu1 %6144  ;;  %v6169_v20 = vpop.permute.xlu0 %6168 }
 0x726   :  { %5982 = vmatprep.mubr.f32.mxu0 %v4138_v50  ;;  %9770 = vmatprep.subr.msk.bf16.mxu0 %vm9769_vm1, %v10036_v15  ;;  %vm9775_vm7 = vmpackc.low %vm6241_vm10, %vm6239_vm5  ;;  %vm6247_vm1 = vcmp.eq.s32.totalorder %v12748_v54, %v6230_v28 }
 0x727   :  { %vm9777_vm15 = vmpackc.low %vm6246_vm12, %vm6244_vm6  ;;  %v8531_v27 = vsel %vm6247_vm1, 1.0, %v14937_v24 }
 0x728   :  { %6063 = vmatmul.mubr.f32.gmra.mrb[40].mxu1 %v4135_v52  ;;  %vm15037_vm4 = vmmov %vm15036_vm2 }
 0x729   :  { %5983 = vmatmul.mubr.f32.gmra.mrb[42].mxu0 %v4137_v31  ;;  %8518 = vmatprep.mubr.msk.f32.mxu1 %vm5890_vm3, %v4140_v17  ;;  %vm6237_vm3 = vcmp.eq.s32.totalorder %v12692_v0, %v6230_v28  ;;  %v6150_v16 = vpop.permute.xlu1 %6149  ;;  %v6155_v50 = vpop.permute.xlu0 %6154 }
 0x72a   :  { %6359 = vmatprep.mubr.f32.mxu0 %v14937_v24  ;;  %vm9771_vm9 = vmpackc.low %vm6237_vm3, %vm6235_vm0  ;;  %vm6248_vm3 = vcmp.eq.s32.totalorder %v12748_v54, %v6234_v59 }
 0x72b   :  { %9772 = vmatpush1.bf16.msk.msra.mxu0 %vm9771_vm9, %v10036_v15  ;;  %vm9779_vm0 = vmpackc.low %vm6245_vm8, %vm6243_vm11  ;;  %v8532_v48 = vsel %vm6248_vm3, 1.0, %v14937_v24  ;;  %vm15038_vm9 = vcmask 146432  }
 0x72c   :  { %6068 = vmatmul.mubr.f32.gmra.mrb[42].mxu1 %v4139_v46  ;;  %9774 = vmatprep.subr.msk.bf16.mxu0 %vm9773_vm14, %v10036_v15  ;;  %vm15040_vm6 = vmmov %vm15038_vm9  ;;  %vm6572_vm14 = vcmask 261120  }
 0x72d   :  { %v6174_v6 = vpop.permute.xlu1 %6173  ;;  %vm15043_vm12 = vmmov %vm15040_vm6 }
 0x72f   :  { %9776 = vmatpush1.bf16.msk.msra.mxu0 %vm9775_vm7, %v10036_v15  ;;  %vm15044_vm7 = vmmov %vm15040_vm6 }
 0x730   :  { %9778 = vmatprep.subr.msk.bf16.mxu0 %vm9777_vm15, %v10036_v15  ;;  %vm15045_vm15 = vmmov %vm15040_vm6 }
 0x731   :  { %v6179_v52 = vpop.permute.xlu1 %6178 }
 0x733   :  { %9780 = vmatpush1.bf16.msk.msra.mxu0 %vm9779_vm0, %v10036_v15  ;;  %vm15046_vm0 = vmmov %vm15040_vm6 }
 0x734   :  { %8545 = vmatprep.subr.msk.mxu0 %vm15036_vm2, %v8532_v48  ;;  %vm15047_vm3 = vmmov %vm15046_vm0 }
 0x735   :  { %vm15048_vm1 = vmmov %vm15046_vm0 }
 0x736   :  { %vm15049_vm2 = vmmov %vm15046_vm0 }
 0x737   :  { %8546 = vmatpush1.msk.msra.mxu0 %vm15037_vm4, %v8531_v27  ;;  %vm15050_vm4 = vmmov %vm15046_vm0 }
 0x7f0   :  { %v8607_v56 = vpop.f32.mrb[36].mxu0 }
 0x7f1   :  { %v8608_v42 = vpop.f32.mrb[37].mxu0 }
 0x7f2   :  { %v8609_v14 = vadd.f32 %v8608_v42, %v8607_v56 }
 0x7f3   :  { %v6054_v22 = vpop.f32.mrb[36].mxu1 }
 0x7f4   :  { %v14187_v49 = vadd.f32 %v8609_v14, %v6054_v22  ;;  %v8610_v51 = vpop.f32.mrb[38].mxu0  ;;  %v6056_v39 = vpop.f32.mrb[37].mxu1 }
 0x7f5   :  { %v8611_v10 = vpop.f32.mrb[39].mxu0 }
 0x7f6   :  { %v8612_v57 = vadd.f32 %v8611_v10, %v8610_v51  ;;  %v6081_v2 = vsel %vm5567_vm13, %v14187_v49, 0.0  ;;  %v6098_v47 = vmul.f32 %v14187_v49, %v14187_v49 }
 0x7f7   :  { %v6059_v62 = vpop.f32.mrb[38].mxu1  ;;  %6082 = vadd.xlane.f32.xlu0 %v6081_v2 }
 0x7f8   :  { %v14193_v29 = vadd.f32 %v8612_v57, %v6059_v62  ;;  %v8613_v5 = vpop.f32.mrb[40].mxu0  ;;  %v6061_v12 = vpop.f32.mrb[39].mxu1  ;;  %v6102_v4 = vsel %vm5567_vm13, %v6098_v47, 0.0 }
 0x7f9   :  { %v8614_v13 = vpop.f32.mrb[41].mxu0  ;;  %6103 = vadd.xlane.f32.xlu1 %v6102_v4 }
 0x7fa   :  { %v8615_v7 = vadd.f32 %v8614_v13, %v8613_v5  ;;  %v6084_v45 = vsel %vm5567_vm13, %v14193_v29, 0.0  ;;  %v6099_v34 = vmul.f32 %v14193_v29, %v14193_v29 }
 0x7fb   :  { %v6064_v40 = vpop.f32.mrb[40].mxu1  ;;  %6085 = vadd.xlane.f32.xlu0 %v6084_v45 }
 0x7fc   :  { %v14200_v55 = vadd.f32 %v8615_v7, %v6064_v40  ;;  %v8616_v63 = vpop.f32.mrb[42].mxu0  ;;  %v6066_v21 = vpop.f32.mrb[41].mxu1  ;;  %v6105_v58 = vsel %vm5567_vm13, %v6099_v34, 0.0 }
 0x7fd   :  { %v8617_v3 = vpop.f32.mrb[43].mxu0 }
 0x7fe   :  { %v8618_v37 = vadd.f32 %v8617_v3, %v8616_v63  ;;  %v6087_v9 = vsel %vm5567_vm13, %v14200_v55, 0.0  ;;  %v6100_v33 = vmul.f32 %v14200_v55, %v14200_v55 }
 0x7ff   :  { %v6069_v44 = vpop.f32.mrb[42].mxu1  ;;  %6088 = vadd.xlane.f32.xlu1 %v6087_v9  ;;  %6106 = vadd.xlane.f32.xlu0 %v6105_v58 }
 0x800   :  { %v14207_v61 = vadd.f32 %v8618_v37, %v6069_v44  ;;  %v6108_v11 = vsel %vm5567_vm13, %v6100_v33, 0.0  ;;  %v6071_v26 = vpop.f32.mrb[43].mxu1 }
 0x802   :  { %v6090_v8 = vsel %vm5567_vm13, %v14207_v61, 0.0  ;;  %v6101_v60 = vmul.f32 %v14207_v61, %v14207_v61 }
 0x803   :  { %6091 = vadd.xlane.f32.xlu1 %v6090_v8  ;;  %6109 = vadd.xlane.f32.xlu0 %v6108_v11 }
 0x804   :  { %v6111_v53 = vsel %vm5567_vm13, %v6101_v60, 0.0 }
 0x807   :  { %6112 = vadd.xlane.f32.xlu0 %v6111_v53 }
 0x814   :  { %6183 = vperm.xlu1 %9950, %v6080_v43  }
 0x81d   :  { %6159 = vperm.xlu0 %9951, %v6076_v18  }
 0x884   :  { %v6083_v31 = vpop.xlane.xlu0 %6082 }
 0x885   :  { %v6094_v17 = vmul.f32 0.02, %v6083_v31 }
 0x886   :  { %v6104_v46 = vpop.xlane.xlu1 %6103 }
 0x887   :  { %v6118_v56 = vmul.f32 %v6094_v17, %v6094_v17  ;;  %v6114_v42 = vmul.f32 0.02, %v6104_v46  ;;  %v6126_v37 = vsub.f32 %v14187_v49, %v6094_v17 }
 0x888   :  { %v6086_v54 = vpop.xlane.xlu0 %6085 }
 0x889   :  { %v6122_v14 = vsub.f32 %v6114_v42, %v6118_v56  ;;  %v6095_v22 = vmul.f32 0.02, %v6086_v54 }
 0x88b   :  { %v6130_v51 = vadd.f32 1e-05, %v6122_v14  ;;  %v6119_v57 = vmul.f32 %v6095_v22, %v6095_v22  ;;  %v6127_v26 = vsub.f32 %v14193_v29, %v6095_v22 }
 0x88c   :  { %v6107_v39 = vpop.xlane.xlu0 %6106  ;;  %v6089_v10 = vpop.xlane.xlu1 %6088 }
 0x88d   :  { %9958 = vrsqrt.f32 %v6130_v51  ;;  %v6115_v2 = vmul.f32 0.02, %v6107_v39  ;;  %v6096_v47 = vmul.f32 0.02, %v6089_v10 }
 0x88f   :  { %v6123_v62 = vsub.f32 %v6115_v2, %v6119_v57  ;;  %v6120_v5 = vmul.f32 %v6096_v47, %v6096_v47  ;;  %v6128_v1 = vsub.f32 %v14200_v55, %v6096_v47  ;;  %v6203_v47 = vld [vmem:[%s14839_s14 + $0x8] sm:$0xff] }
 0x890   :  { %v6110_v12 = vpop.xlane.xlu0 %6109  ;;  %v6092_v4 = vpop.xlane.xlu1 %6091 }
 0x891   :  { %v6131_v13 = vadd.f32 1e-05, %v6123_v62  ;;  %v6116_v7 = vmul.f32 0.02, %v6110_v12  ;;  %v6097_v45 = vmul.f32 0.02, %v6092_v4 }
 0x892   :  { %v6204_v62 = vld [vmem:[%s14839_s14 + $0x10] sm:$0xff]  ;;  %v6807_v12 = vld [vmem:[%s14840_s15] sm:$0xff] }
 0x893   :  { %9960 = vrsqrt.f32 %v6131_v13  ;;  %v6124_v34 = vsub.f32 %v6116_v7, %v6120_v5  ;;  %v6121_v40 = vmul.f32 %v6097_v45, %v6097_v45  ;;  %v6129_v27 = vsub.f32 %v14207_v61, %v6097_v45  ;;  %v6808_v5 = vld [vmem:[%s14840_s15 + $0x8] sm:$0xff]  ;;  %8785 = vmatprep.mubr.msk.f32.mxu1 %vm6572_vm14, %v6204_v62  ;;  %v6809_v4 = vld [vmem:[%s14840_s15 + $0x10] sm:$0xff]  ;;  %v6815_v13 = vld [vmem:[%s14841_s16] sm:$0xff] }
 0x894   :  { %v6113_v63 = vpop.xlane.xlu0 %6112  ;;  %v6184_v42 = vpop.permute.xlu1 %6183  ;;  %v6817_v7 = vld [vmem:[%s14841_s16 + $0x10] sm:$0xff]  ;;  %v6816_v45 = vld [vmem:[%s14841_s16 + $0x8] sm:$0xff] }
 0x895   :  { %v6132_v21 = vadd.f32 1e-05, %v6124_v34  ;;  %v6117_v3 = vmul.f32 0.02, %v6113_v63  ;;  %v6811_v34 = vld [vmem:[%s14840_s15 + $0x20] sm:$0xff] }
 0x896   :  { %v6819_v63 = vld [vmem:[%s14841_s16 + $0x20] sm:$0xff] }
 0x897   :  { %v9959_v9 = vpop.eup %9958  ;;  %9962 = vrsqrt.f32 %v6132_v21  ;;  %v6125_v58 = vsub.f32 %v6117_v3, %v6121_v40  ;;  %v6810_v40 = vld [vmem:[%s14840_s15 + $0x18] sm:$0xff]  ;;  %v6813_v3 = vld [vmem:[%s14840_s15 + $0x30] sm:$0xff] }
 0x898   :  { %v6138_v33 = vmul.f32 %v9959_v9, %v6126_v37  ;;  %v6818_v21 = vld [vmem:[%s14841_s16 + $0x18] sm:$0xff]  ;;  %v6812_v37 = vld [vmem:[%s14840_s15 + $0x28] sm:$0xff] }
 0x899   :  { %v6133_v44 = vadd.f32 1e-05, %v6125_v58  ;;  %v6820_v9 = vld [vmem:[%s14841_s16 + $0x28] sm:$0xff]  ;;  %v6814_v58 = vld [vmem:[%s14840_s15 + $0x38] sm:$0xff] }
 0x89a   :  { %v6162_v11 = vmul.f32 %v6145_v35, %v6138_v33 }
 0x89b   :  { %9964 = vrsqrt.f32 %v6133_v44 }
 0x89c   :  { %v6186_v8 = vadd.f32 %v6169_v20, %v6162_v11  ;;  %v6160_v56 = vpop.permute.xlu0 %6159 }
 0x89d   :  { %v9961_v60 = vpop.eup %9960 }
 0x89e   :  { %vm6190_vm8 = vcmp.ge.f32.partialorder %v6186_v8, 0.0  ;;  %v6194_v53 = vmul.f32 0.2, %v6186_v8  ;;  %v6139_v43 = vmul.f32 %v9961_v60, %v6127_v26 }
 0x8a0   :  { %v6198_v28 = vsel %vm6190_vm8, %v6186_v8, %v6194_v53  ;;  %v6163_v59 = vmul.f32 %v6150_v16, %v6139_v43  ;;  %vm15051_vm8 = vmmov %vm15046_vm0 }
 0x8a1   :  { %v9963_v18 = vpop.eup %9962  ;;  %8547 = vmatmul.mubr.msk.f32.vlgmr.msra.gmra.mrb[44].mxu0 %vm5567_vm13, %v6198_v28 }
 0x8a2   :  { %6365 = vmatprep.mubr.f32.mxu0 %v14937_v24  ;;  %v6187_v49 = vadd.f32 %v6174_v6, %v6163_v59  ;;  %v6140_v48 = vmul.f32 %v9963_v18, %v6128_v1 }
 0x8a4   :  { %vm6191_vm11 = vcmp.ge.f32.partialorder %v6187_v49, 0.0  ;;  %v6195_v29 = vmul.f32 0.2, %v6187_v49  ;;  %v6164_v35 = vmul.f32 %v6155_v50, %v6140_v48 }
 0x8a5   :  { %v9965_v20 = vpop.eup %9964 }
 0x8a6   :  { %v6141_v31 = vmul.f32 %v9965_v20, %v6129_v27  ;;  %v6199_v17 = vsel %vm6191_vm11, %v6187_v49, %v6195_v29  ;;  %v6188_v46 = vadd.f32 %v6179_v52, %v6164_v35  ;;  %vm15052_vm11 = vmmov %vm15046_vm0 }
 0x8a7   :  { %8548 = vmatmul.mubr.msk.f32.gmra.mrb[46].mxu0 %vm5567_vm13, %v6199_v17 }
 0x8a8   :  { %v6165_v55 = vmul.f32 %v6160_v56, %v6141_v31  ;;  %6371 = vmatprep.mubr.f32.mxu0 %v14937_v24  ;;  %vm6192_vm5 = vcmp.ge.f32.partialorder %v6188_v46, 0.0  ;;  %v6196_v16 = vmul.f32 0.2, %v6188_v46 }
 0x8aa   :  { %v6189_v6 = vadd.f32 %v6184_v42, %v6165_v55  ;;  %v6200_v54 = vsel %vm6192_vm5, %v6188_v46, %v6196_v16  ;;  %vm15053_vm5 = vcmask 15360  }
 0x8ab   :  { %8549 = vmatmul.mubr.msk.f32.gmra.mrb[48].mxu0 %vm5567_vm13, %v6200_v54 }
 0x8ac   :  { %6377 = vmatprep.mubr.f32.mxu0 %v14937_v24  ;;  %vm6193_vm10 = vcmp.ge.f32.partialorder %v6189_v6, 0.0  ;;  %v6197_v61 = vmul.f32 0.2, %v6189_v6 }
 0x8ae   :  { %v6201_v50 = vsel %vm6193_vm10, %v6189_v6, %v6197_v61  ;;  %vm15054_vm10 = vmmov %vm15046_vm0 }
 0x8af   :  { %8550 = vmatmul.mubr.msk.f32.gmra.mrb[50].mxu0 %vm5567_vm13, %v6201_v50  ;;  %vm15042_vm13 = vmmov %vm15040_vm6 }
 0x8b0   :  { %6661 = vmatprep.mubr.f32.mxu0 %v6203_v47 }
 0x974   :  { %v6361_v52 = vpop.f32.mrb[44].mxu0 }
 0x975   :  { %6384 = vst.msk [vmem:[#allocation4] sm:$0xff] %vm15038_vm9, %v6361_v52  ;;  %6440 = vrot.lane.b32.xlu0 %v6361_v52, %s10014_s21  ;;  %v6363_v14 = vpop.f32.mrb[45].mxu0  ;;  %vm15055_vm9 = vmmov %vm15046_vm0 }
 0x976   :  { %6494 = vrot.lane.b32.xlu1 %v6363_v14, %s10049_s20 }
 0x979   :  { %6456 = vrot.lane.b32.xlu0 %v6361_v52, %s15039_s11 }
 0x97a   :  { %v6367_v22 = vpop.f32.mrb[46].mxu0 }
 0x97b   :  { %6385 = vst.msk [vmem:[#allocation4 + $0x8] sm:$0xff] %vm15040_vm6, %v6367_v22  ;;  %6442 = vrot.lane.b32.xlu1 %v6367_v22, %s10014_s21  ;;  %v6369_v51 = vpop.f32.mrb[47].mxu0  ;;  %vm15056_vm6 = vmmov %vm15046_vm0 }
 0x97c   :  { %v6536_v49 = vld [vmem:[#allocation4] sm:$0xff] }
 0x97d   :  { %6392 = vrot.lane.b32.xlu0 %v6361_v52, %s15041_s12 }
 0x97e   :  { %v6373_v39 = vpop.f32.mrb[48].mxu0 }
 0x97f   :  { %6386 = vst.msk [vmem:[#allocation4 + $0x10] sm:$0xff] %vm15042_vm13, %v6373_v39  ;;  %6458 = vrot.lane.b32.xlu1 %v6367_v22, %s15039_s11  ;;  %v6375_v10 = vpop.f32.mrb[49].mxu0  ;;  %vm15057_vm13 = vmmov %vm15046_vm0 }
 0x981   :  { %6472 = vrot.lane.b32.xlu0 %v6361_v52, %s10050_s13 }
 0x982   :  { %v6379_v57 = vpop.f32.mrb[50].mxu0  ;;  %v6537_v43 = vld [vmem:[#allocation4 + $0x8] sm:$0xff] }
 0x983   :  { %6387 = vst.msk [vmem:[#allocation4 + $0x18] sm:$0xff] %vm15043_vm12, %v6379_v57  ;;  %6394 = vrot.lane.b32.xlu1 %v6367_v22, %s15041_s12  ;;  %v6381_v2 = vpop.f32.mrb[51].mxu0  ;;  %v9783_v27 = vpack.c.bf16 %v6537_v43, %v6536_v49  ;;  %vm15058_vm12 = vmmov %vm15053_vm5 }
 0x985   :  { %6408 = vrot.lane.b32.xlu0 %v6361_v52, %s10051_s1 }
 0x987   :  { %6474 = vrot.lane.b32.xlu1 %v6367_v22, %s10050_s13 }
 0x989   :  { %6492 = vrot.lane.b32.xlu0 %v6361_v52, %s10049_s20 }
 0x98b   :  { %6410 = vrot.lane.b32.xlu1 %v6367_v22, %s10051_s1 }
 0x98d   :  { %6424 = vrot.lane.b32.xlu0 %v6361_v52, %s10043_s23  ;;  %v6539_v52 = vld [vmem:[#allocation4 + $0x18] sm:$0xff] }
 0x98f   :  { %6426 = vrot.lane.b32.xlu1 %v6367_v22, %s10043_s23 }
 0x991   :  { %6496 = vrot.lane.b32.xlu0 %v6367_v22, %s10049_s20 }
 0x993   :  { %6498 = vrot.lane.b32.xlu1 %v6369_v51, %s10049_s20 }
 0x995   :  { %6444 = vrot.lane.b32.xlu0 %v6373_v39, %s10014_s21 }
 0x997   :  { %6446 = vrot.lane.b32.xlu1 %v6379_v57, %s10014_s21 }
 0x999   :  { %6460 = vrot.lane.b32.xlu0 %v6373_v39, %s15039_s11 }
 0x99b   :  { %6502 = vrot.lane.b32.xlu1 %v6375_v10, %s10049_s20 }
 0x99d   :  { %6396 = vrot.lane.b32.xlu0 %v6373_v39, %s15041_s12 }
 0x99f   :  { %6462 = vrot.lane.b32.xlu1 %v6379_v57, %s15039_s11 }
 0x9a1   :  { %6476 = vrot.lane.b32.xlu0 %v6373_v39, %s10050_s13 }
 0x9a3   :  { %6398 = vrot.lane.b32.xlu1 %v6379_v57, %s15041_s12 }
 0x9a5   :  { %6412 = vrot.lane.b32.xlu0 %v6373_v39, %s10051_s1 }
 0x9a7   :  { %6478 = vrot.lane.b32.xlu1 %v6379_v57, %s10050_s13 }
 0x9a9   :  { %6500 = vrot.lane.b32.xlu0 %v6373_v39, %s10049_s20 }
 0x9ab   :  { %6414 = vrot.lane.b32.xlu1 %v6379_v57, %s10051_s1 }
 0x9ad   :  { %6504 = vrot.lane.b32.xlu0 %v6379_v57, %s10049_s20 }
 0x9af   :  { %6506 = vrot.lane.b32.xlu1 %v6381_v2, %s10049_s20 }
 0x9b1   :  { %6428 = vrot.lane.b32.xlu0 %v6373_v39, %s10043_s23 }
 0x9b3   :  { %6430 = vrot.lane.b32.xlu1 %v6379_v57, %s10043_s23  ;;  %v6538_v57 = vld [vmem:[#allocation4 + $0x10] sm:$0xff] }
 0x9b4   :  { %v9787_v47 = vpack.c.bf16 %v6539_v52, %v6538_v57  ;;  %v6202_v57 = vld [vmem:[%s14839_s14] sm:$0xff] }
 0x9b5   :  { %6520 = vrot.lane.b32.xlu0 %v6363_v14, %s10019_s5 }
 0x9b7   :  { %6522 = vrot.lane.b32.xlu1 %v6369_v51, %s10019_s5 }
 0x9b9   :  { %6524 = vrot.lane.b32.xlu0 %v6375_v10, %s10019_s5 }
 0x9bb   :  { %6526 = vrot.lane.b32.xlu1 %v6381_v2, %s10019_s5 }
 0x9bd   :  { %6951 = vperm.xlu0 %9951, %v6808_v5  }
 0x9bf   :  { %6946 = vperm.xlu1 %9950, %v6807_v12  }
 0x9c1   :  { %6956 = vperm.xlu0 %9951, %v6809_v4  }
 0x9c3   :  { %6994 = vperm.xlu1 %9950, %v6815_v13  }
 0x9c5   :  { %7004 = vperm.xlu0 %9951, %v6817_v7  }
 0x9c7   :  { %6999 = vperm.xlu1 %9950, %v6816_v45  }
 0x9c9   :  { %6966 = vperm.xlu0 %9951, %v6811_v34  }
 0x9cb   :  { %6961 = vperm.xlu1 %9950, %v6810_v40  }
 0x9cd   :  { %7014 = vperm.xlu0 %9951, %v6819_v63  }
 0x9cf   :  { %7009 = vperm.xlu1 %9950, %v6818_v21  }
 0x9d1   :  { %6976 = vperm.xlu0 %9951, %v6813_v3  }
 0x9d3   :  { %6971 = vperm.xlu1 %9950, %v6812_v37  }
 0x9d7   :  { %7019 = vperm.xlu1 %9950, %v6820_v9  }
 0x9db   :  { %6981 = vperm.xlu1 %9950, %v6814_v58  }
 0x9e7   :  { %v6441_v33 = vpop.permute.xlu0 %6440 }
 0x9e8   :  { %6452 = vst.msk [vmem:[#allocation4 + $0x80] sm:$0xff] %vm15044_vm7, %v6441_v33  ;;  %v6495_v44 = vpop.permute.xlu1 %6494  ;;  %vm15059_vm7 = vmmov %vm15046_vm0 }
 0x9eb   :  { %v6457_v11 = vpop.permute.xlu0 %6456 }
 0x9ec   :  { %6468 = vst.msk [vmem:[#allocation4 + $0xa0] sm:$0xff] %vm15045_vm15, %v6457_v11  ;;  %vm15060_vm15 = vmmov %vm15046_vm0 }
 0x9ed   :  { %v6443_v26 = vpop.permute.xlu1 %6442 }
 0x9ee   :  { %6453 = vst.msk [vmem:[#allocation4 + $0x88] sm:$0xff] %vm15046_vm0, %v6443_v26 }
 0x9ef   :  { %v6393_v8 = vpop.permute.xlu0 %6392  ;;  %v6552_v28 = vld [vmem:[#allocation4 + $0x80] sm:$0xff] }
 0x9f0   :  { %6404 = vst.msk [vmem:[#allocation4 + $0x20] sm:$0xff] %vm15047_vm3, %v6393_v8  ;;  %vm15061_vm3 = vmmov %vm15046_vm0 }
 0x9f1   :  { %v6459_v60 = vpop.permute.xlu1 %6458 }
 0x9f2   :  { %6469 = vst.msk [vmem:[#allocation4 + $0xa8] sm:$0xff] %vm15048_vm1, %v6459_v60  ;;  %vm15062_vm1 = vmmov %vm15046_vm0 }
 0x9f3   :  { %v6473_v53 = vpop.permute.xlu0 %6472  ;;  %v6556_v62 = vld [vmem:[#allocation4 + $0xa0] sm:$0xff] }
 0x9f4   :  { %6484 = vst.msk [vmem:[#allocation4 + $0xc0] sm:$0xff] %vm15049_vm2, %v6473_v53  ;;  %vm15063_vm2 = vmmov %vm15046_vm0 }
 0x9f5   :  { %v6395_v1 = vpop.permute.xlu1 %6394  ;;  %v6553_v59 = vld [vmem:[#allocation4 + $0x88] sm:$0xff] }
 0x9f6   :  { %6405 = vst.msk [vmem:[#allocation4 + $0x28] sm:$0xff] %vm15050_vm4, %v6395_v1  ;;  %v9781_v18 = vpack.c.bf16 %v6553_v59, %v6552_v28  ;;  %vm15064_vm4 = vmmov %vm15046_vm0 }
 0x9f7   :  { %v6409_v48 = vpop.permute.xlu0 %6408  ;;  %v6540_v13 = vld [vmem:[#allocation4 + $0x20] sm:$0xff] }
 0x9f8   :  { %6420 = vst.msk [vmem:[#allocation4 + $0x40] sm:$0xff] %vm15051_vm8, %v6409_v48  ;;  %9782 = vmatprep.subr.bf16.mxu0 %v9781_v18  ;;  %vm15065_vm8 = vmmov %vm15046_vm0 }
 0x9f9   :  { %9784 = vmatpush3.bf16.msra.mxu0 %v9783_v27  ;;  %v6475_v29 = vpop.permute.xlu1 %6474  ;;  %v6557_v39 = vld [vmem:[#allocation4 + $0xa8] sm:$0xff] }
 0x9fa   :  { %6485 = vst.msk [vmem:[#allocation4 + $0xc8] sm:$0xff] %vm15052_vm11, %v6475_v29  ;;  %v9789_v5 = vpack.c.bf16 %v6557_v39, %v6556_v62  ;;  %vm15066_vm11 = vmmov %vm15046_vm0  ;;  %v6206_v62 = vld [vmem:[%s14839_s14 + $0x20] sm:$0xff] }
 0x9fb   :  { %v6493_v35 = vpop.permute.xlu0 %6492  ;;  %v6560_v26 = vld [vmem:[#allocation4 + $0xc0] sm:$0xff] }
 0x9fc   :  { %v6508_v20 = vsel %vm15053_vm5, %v6493_v35, %v6495_v44  ;;  %vm15067_vm5 = vmmov %vm15046_vm0 }
 0x9fd   :  { %6516 = vst.msk [vmem:[#allocation4 + $0xe0] sm:$0xff] %vm15054_vm10, %v6508_v20  ;;  %v6411_v31 = vpop.permute.xlu1 %6410  ;;  %v6541_v12 = vld [vmem:[#allocation4 + $0x28] sm:$0xff]  ;;  %vm15068_vm10 = vmmov %vm15058_vm12 }
 0x9fe   :  { %6421 = vst.msk [vmem:[#allocation4 + $0x48] sm:$0xff] %vm15055_vm9, %v6411_v31  ;;  %v9791_v45 = vpack.c.bf16 %v6541_v12, %v6540_v13  ;;  %vm15069_vm9 = vmmov %vm15046_vm0  ;;  %v6205_v12 = vld [vmem:[%s14839_s14 + $0x18] sm:$0xff] }
 0x9ff   :  { %v6425_v17 = vpop.permute.xlu0 %6424  ;;  %v6544_v1 = vld [vmem:[#allocation4 + $0x40] sm:$0xff] }
 0xa00   :  { %6436 = vst.msk [vmem:[#allocation4 + $0x60] sm:$0xff] %vm15056_vm6, %v6425_v17  ;;  %vm15070_vm6 = vmmov %vm15046_vm0 }
 0xa01   :  { %v6427_v46 = vpop.permute.xlu1 %6426  ;;  %v6561_v9 = vld [vmem:[#allocation4 + $0xc8] sm:$0xff] }
 0xa02   :  { %6437 = vst.msk [vmem:[#allocation4 + $0x68] sm:$0xff] %vm15057_vm13, %v6427_v46  ;;  %v9797_v60 = vpack.c.bf16 %v6561_v9, %v6560_v26  ;;  %vm15071_vm13 = vmmov %vm15068_vm10  ;;  %v6215_v9 = vld [vmem:[%s14839_s14 + $0x68] sm:$0xff]  ;;  %v6222_v26 = vld [vmem:[%s14839_s14 + $0xa0] sm:$0xff] }
 0xa03   :  { %v6497_v56 = vpop.permute.xlu0 %6496 }
 0xa04   :  { %v6564_v46 = vld [vmem:[#allocation4 + $0xe0] sm:$0xff] }
 0xa05   :  { %v6499_v55 = vpop.permute.xlu1 %6498  ;;  %v6545_v53 = vld [vmem:[#allocation4 + $0x48] sm:$0xff] }
 0xa06   :  { %v6509_v16 = vsel %vm15058_vm12, %v6497_v56, %v6499_v55  ;;  %v9799_v49 = vpack.c.bf16 %v6545_v53, %v6544_v1  ;;  %vm15072_vm12 = vmmov %vm15046_vm0  ;;  %v6225_v53 = vld [vmem:[%s14839_s14 + $0xb8] sm:$0xff]  ;;  %v6224_v1 = vld [vmem:[%s14839_s14 + $0xb0] sm:$0xff] }
 0xa07   :  { %6517 = vst.msk [vmem:[#allocation4 + $0xe8] sm:$0xff] %vm15059_vm7, %v6509_v16  ;;  %v6445_v42 = vpop.permute.xlu0 %6444  ;;  %vm15073_vm7 = vmmov %vm15046_vm0 }
 0xa08   :  { %6454 = vst.msk [vmem:[#allocation4 + $0x90] sm:$0xff] %vm15060_vm15, %v6445_v42  ;;  %vm15074_vm15 = vmmov %vm15046_vm0 }
 0xa09   :  { %v6447_v6 = vpop.permute.xlu1 %6446  ;;  %v6549_v16 = vld [vmem:[#allocation4 + $0x68] sm:$0xff] }
 0xa0a   :  { %6455 = vst.msk [vmem:[#allocation4 + $0x98] sm:$0xff] %vm15046_vm0, %v6447_v6  ;;  %v6548_v6 = vld [vmem:[#allocation4 + $0x60] sm:$0xff] }
 0xa0b   :  { %v6461_v54 = vpop.permute.xlu0 %6460 }
 0xa0c   :  { %6470 = vst.msk [vmem:[#allocation4 + $0xb0] sm:$0xff] %vm15061_vm3, %v6461_v54  ;;  %vm15075_vm3 = vmmov %vm15046_vm0  ;;  %v9807_v54 = vpack.c.bf16 %v6549_v16, %v6548_v6 }
 0xa0d   :  { %v6503_v61 = vpop.permute.xlu1 %6502 }
 0xa0e   :  { %v6565_v29 = vld [vmem:[#allocation4 + $0xe8] sm:$0xff] }
 0xa0f   :  { %v6397_v50 = vpop.permute.xlu0 %6396  ;;  %v6554_v22 = vld [vmem:[#allocation4 + $0x90] sm:$0xff]  ;;  %v9805_v55 = vpack.c.bf16 %v6565_v29, %v6564_v46 }
 0xa10   :  { %6406 = vst.msk [vmem:[#allocation4 + $0x30] sm:$0xff] %vm15062_vm1, %v6397_v50  ;;  %vm15076_vm1 = vmmov %vm15046_vm0 }
 0xa11   :  { %v6463_v14 = vpop.permute.xlu1 %6462  ;;  %v6555_v51 = vld [vmem:[#allocation4 + $0x98] sm:$0xff] }
 0xa12   :  { %6471 = vst.msk [vmem:[#allocation4 + $0xb8] sm:$0xff] %vm15063_vm2, %v6463_v14  ;;  %v9785_v10 = vpack.c.bf16 %v6555_v51, %v6554_v22  ;;  %vm15077_vm2 = vmmov %vm15046_vm0 }
 0xa13   :  { %v6477_v2 = vpop.permute.xlu0 %6476  ;;  %v6558_v40 = vld [vmem:[#allocation4 + $0xb0] sm:$0xff] }
 0xa14   :  { %6486 = vst.msk [vmem:[#allocation4 + $0xd0] sm:$0xff] %vm15064_vm4, %v6477_v2  ;;  %9786 = vmatprep.subr.bf16.mxu0 %v9785_v10  ;;  %vm15079_vm4 = vmmov %vm15046_vm0 }
 0xa15   :  { %9788 = vmatpush3.bf16.msra.mxu0 %v9787_v47  ;;  %v6399_v4 = vpop.permute.xlu1 %6398 }
 0xa16   :  { %6407 = vst.msk [vmem:[#allocation4 + $0x38] sm:$0xff] %vm15065_vm8, %v6399_v4  ;;  %9790 = vmatprep.subr.bf16.mxu0 %v9789_v5  ;;  %vm15080_vm8 = vmmov %vm15046_vm0 }
 0xa17   :  { %v6413_v7 = vpop.permute.xlu0 %6412  ;;  %v6542_v33 = vld [vmem:[#allocation4 + $0x30] sm:$0xff] }
 0xa18   :  { %6422 = vst.msk [vmem:[#allocation4 + $0x50] sm:$0xff] %vm15066_vm11, %v6413_v7  ;;  %v6209_v7 = vld [vmem:[%s14839_s14 + $0x38] sm:$0xff]  ;;  %vm15081_vm11 = vmmov %vm15046_vm0 }
 0xa19   :  { %9792 = vmatpush3.bf16.msra.mxu0 %v9791_v45  ;;  %v6479_v34 = vpop.permute.xlu1 %6478  ;;  %v6559_v63 = vld [vmem:[#allocation4 + $0xb8] sm:$0xff] }
 0xa1a   :  { %6487 = vst.msk [vmem:[#allocation4 + $0xd8] sm:$0xff] %vm15067_vm5, %v6479_v34  ;;  %v9793_v21 = vpack.c.bf16 %v6559_v63, %v6558_v40  ;;  %v6208_v34 = vld [vmem:[%s14839_s14 + $0x30] sm:$0xff]  ;;  %v6207_v40 = vld [vmem:[%s14839_s14 + $0x28] sm:$0xff]  ;;  %vm15082_vm5 = vmmov %vm15046_vm0 }
 0xa1b   :  { %v6501_v3 = vpop.permute.xlu0 %6500  ;;  %v6562_v28 = vld [vmem:[#allocation4 + $0xd0] sm:$0xff] }
 0xa1c   :  { %v6510_v37 = vsel %vm15068_vm10, %v6501_v3, %v6503_v61  ;;  %9794 = vmatprep.subr.bf16.mxu0 %v9793_v21  ;;  %v6212_v63 = vld [vmem:[%s14839_s14 + $0x50] sm:$0xff]  ;;  %v6210_v21 = vld [vmem:[%s14839_s14 + $0x40] sm:$0xff]  ;;  %v6211_v3 = vld [vmem:[%s14839_s14 + $0x48] sm:$0xff] }
 0xa1d   :  { %6518 = vst.msk [vmem:[#allocation4 + $0xf0] sm:$0xff] %vm15069_vm9, %v6510_v37  ;;  %v6415_v58 = vpop.permute.xlu1 %6414  ;;  %v6543_v44 = vld [vmem:[#allocation4 + $0x38] sm:$0xff]  ;;  %vm15083_vm10 = vmmov %vm15046_vm0 }
 0xa1e   :  { %6423 = vst.msk [vmem:[#allocation4 + $0x58] sm:$0xff] %vm15070_vm6, %v6415_v58  ;;  %v9795_v11 = vpack.c.bf16 %v6543_v44, %v6542_v33  ;;  %v6213_v37 = vld [vmem:[%s14839_s14 + $0x58] sm:$0xff]  ;;  %v6216_v58 = vld [vmem:[%s14839_s14 + $0x70] sm:$0xff]  ;;  %v6214_v33 = vld [vmem:[%s14839_s14 + $0x60] sm:$0xff] }
 0xa1f   :  { %v6505_v8 = vpop.permute.xlu0 %6504  ;;  %v6546_v20 = vld [vmem:[#allocation4 + $0x50] sm:$0xff]  ;;  %v6219_v44 = vld [vmem:[%s14839_s14 + $0x88] sm:$0xff]  ;;  %vm15084_vm9 = vmmov %vm15046_vm0 }
 0xa20   :  { %9796 = vmatpush3.bf16.msra.mxu0 %v9795_v11  ;;  %v6218_v11 = vld [vmem:[%s14839_s14 + $0x80] sm:$0xff]  ;;  %vm15085_vm6 = vmmov %vm15046_vm0 }
 0xa21   :  { %9798 = vmatprep.subr.bf16.mxu0 %v9797_v60  ;;  %v6507_v43 = vpop.permute.xlu1 %6506  ;;  %v6563_v59 = vld [vmem:[#allocation4 + $0xd8] sm:$0xff] }
 0xa22   :  { %v6511_v18 = vsel %vm15071_vm13, %v6505_v8, %v6507_v43  ;;  %v9801_v48 = vpack.c.bf16 %v6563_v59, %v6562_v28  ;;  %v6217_v8 = vld [vmem:[%s14839_s14 + $0x78] sm:$0xff]  ;;  %v6220_v43 = vld [vmem:[%s14839_s14 + $0x90] sm:$0xff]  ;;  %v6223_v28 = vld [vmem:[%s14839_s14 + $0xa8] sm:$0xff] }
 0xa23   :  { %6519 = vst.msk [vmem:[#allocation4 + $0xf8] sm:$0xff] %vm15072_vm12, %v6511_v18  ;;  %v6429_v27 = vpop.permute.xlu0 %6428  ;;  %v6221_v60 = vld [vmem:[%s14839_s14 + $0x98] sm:$0xff]  ;;  %vm15086_vm13 = vmmov %vm15046_vm0 }
 0xa24   :  { %6438 = vst.msk [vmem:[#allocation4 + $0x70] sm:$0xff] %vm15073_vm7, %v6429_v27  ;;  %9800 = vmatpush3.bf16.msra.mxu0 %v9799_v49  ;;  %v6566_v61 = vld [vmem:[#allocation4 + $0xf0] sm:$0xff]  ;;  %vm15087_vm12 = vmmov %vm15046_vm0 }
 0xa25   :  { %9802 = vmatprep.subr.bf16.mxu0 %v9801_v48  ;;  %v6431_v35 = vpop.permute.xlu1 %6430  ;;  %v6547_v31 = vld [vmem:[#allocation4 + $0x58] sm:$0xff]  ;;  %vm15088_vm7 = vmmov %vm15046_vm0 }
 0xa26   :  { %6439 = vst.msk [vmem:[#allocation4 + $0x78] sm:$0xff] %vm15074_vm15, %v6431_v35  ;;  %v9803_v17 = vpack.c.bf16 %v6547_v31, %v6546_v20  ;;  %vm15089_vm15 = vmmov %vm15046_vm0 }
 0xa27   :  { %v6521_v56 = vpop.permute.xlu0 %6520 }
 0xa28   :  { %6532 = vst.msk [vmem:[#allocation4 + $0x100] sm:$0xff] %vm15046_vm0, %v6521_v56  ;;  %9804 = vmatpush3.bf16.msra.mxu0 %v9803_v17 }
 0xa29   :  { %9806 = vmatprep.subr.bf16.mxu0 %v9805_v55  ;;  %v6523_v42 = vpop.permute.xlu1 %6522 }
 0xa2a   :  { %6533 = vst.msk [vmem:[#allocation4 + $0x108] sm:$0xff] %vm15075_vm3, %v6523_v42  ;;  %v6567_v50 = vld [vmem:[#allocation4 + $0xf8] sm:$0xff]  ;;  %vm15090_vm3 = vmmov %vm15046_vm0 }
 0xa2b   :  { %v6525_v52 = vpop.permute.xlu0 %6524  ;;  %v9809_v14 = vpack.c.bf16 %v6567_v50, %v6566_v61  ;;  %v6550_v51 = vld [vmem:[#allocation4 + $0x70] sm:$0xff] }
 0xa2c   :  { %6534 = vst.msk [vmem:[#allocation4 + $0x110] sm:$0xff] %vm15076_vm1, %v6525_v52  ;;  %9808 = vmatpush3.bf16.msra.mxu0 %v9807_v54  ;;  %vm15091_vm1 = vmmov %vm15046_vm0 }
 0xa2d   :  { %9810 = vmatprep.subr.bf16.mxu0 %v9809_v14  ;;  %v6527_v22 = vpop.permute.xlu1 %6526  ;;  %v6551_v39 = vld [vmem:[#allocation4 + $0x78] sm:$0xff] }
 0xa2e   :  { %6535 = vst.msk [vmem:[#allocation4 + $0x118] sm:$0xff] %vm15077_vm2, %v6527_v22  ;;  %v9811_v10 = vpack.c.bf16 %v6551_v39, %v6550_v51  ;;  %vm15092_vm2 = vmmov %vm15046_vm0 }
 0xa2f   :  { %v6568_v2 = vld [vmem:[#allocation4 + $0x100] sm:$0xff] }
 0xa30   :  { %9812 = vmatpush3.bf16.msra.mxu0 %v9811_v10 }
 0xa31   :  { %v6569_v47 = vld [vmem:[#allocation4 + $0x108] sm:$0xff] }
 0xa32   :  { %v9813_v5 = vpack.c.bf16 %v6569_v47, %v6568_v2 }
 0xa33   :  { %6662 = vmatmul.mubr.f32.vlgmr.msra.gmra.mrb[52].mxu0 %v6202_v57  ;;  %v6570_v4 = vld [vmem:[#allocation4 + $0x110] sm:$0xff] }
 0xa34   :  { %9814 = vmatprep.subr.bf16.mxu1 %v9813_v5  ;;  %6666 = vmatprep.mubr.f32.mxu0 %v6206_v62 }
 0xa35   :  { %9816 = vmatpush3.bf16.msra.mxu1 %v9813_v5  ;;  %v6571_v13 = vld [vmem:[#allocation4 + $0x118] sm:$0xff] }
 0xa36   :  { %v9817_v45 = vpack.c.bf16 %v6571_v13, %v6570_v4 }
 0xa37   :  { %6667 = vmatmul.mubr.f32.gmra.mrb[54].mxu0 %v6205_v12 }
 0xa38   :  { %9818 = vmatprep.subr.bf16.mxu1 %v9817_v45  ;;  %6671 = vmatprep.mubr.f32.mxu0 %v6209_v7 }
 0xa39   :  { %9820 = vmatpush3.bf16.msra.mxu1 %v9817_v45 }
 0xa3b   :  { %6672 = vmatmul.mubr.f32.gmra.mrb[56].mxu0 %v6208_v34 }
 0xa3c   :  { %8786 = vmatmul.mubr.msk.f32.vlgmr.msra.gmra.mrb[44].mxu1 %vm6572_vm14, %v6207_v40  ;;  %6676 = vmatprep.mubr.f32.mxu0 %v6212_v63 }
 0xa3d   :  { %8788 = vmatprep.mubr.msk.f32.mxu1 %vm6572_vm14, %v6210_v21 }
 0xa3f   :  { %6677 = vmatmul.mubr.f32.gmra.mrb[58].mxu0 %v6211_v3 }
 0xa40   :  { %8789 = vmatmul.mubr.msk.f32.gmra.mrb[46].mxu1 %vm6572_vm14, %v6213_v37  ;;  %6681 = vmatprep.mubr.f32.mxu0 %v6215_v9 }
 0xa41   :  { %8791 = vmatprep.mubr.msk.f32.mxu1 %vm6572_vm14, %v6216_v58 }
 0xa43   :  { %6682 = vmatmul.mubr.f32.gmra.mrb[60].mxu0 %v6214_v33 }
 0xa44   :  { %8792 = vmatmul.mubr.msk.f32.gmra.mrb[48].mxu1 %vm6572_vm14, %v6219_v44  ;;  %6686 = vmatprep.mubr.f32.mxu0 %v6218_v11 }
 0xa45   :  { %8794 = vmatprep.mubr.msk.f32.mxu1 %vm6572_vm14, %v6222_v26 }
 0xa47   :  { %6687 = vmatmul.mubr.f32.gmra.mrb[62].mxu0 %v6217_v8 }
 0xa48   :  { %6691 = vmatprep.mubr.f32.mxu0 %v6221_v60  ;;  %8795 = vmatmul.mubr.msk.f32.gmra.mrb[50].mxu1 %vm6572_vm14, %v6225_v53  ;;  %vm15078_vm14 = vmmov %vm15046_vm0 }
 0xa4b   :  { %6692 = vmatmul.mubr.f32.gmra.mrb[64].mxu0 %v6220_v43 }
 0xa4c   :  { %6696 = vmatprep.mubr.f32.mxu0 %v6224_v1 }
 0xa4f   :  { %6697 = vmatmul.mubr.f32.gmra.mrb[66].mxu0 %v6223_v28 }
 0xb06   :  { %v8651_v59 = vpop.f32.mrb[52].mxu0 }
 0xb07   :  { %v8652_v18 = vpop.f32.mrb[53].mxu0 }
 0xb08   :  { %v8653_v49 = vadd.f32 %v8652_v18, %v8651_v59 }
 0xb0a   :  { %v8654_v48 = vpop.f32.mrb[54].mxu0 }
 0xb0b   :  { %v8655_v27 = vpop.f32.mrb[55].mxu0 }
 0xb0c   :  { %v8656_v29 = vadd.f32 %v8655_v27, %v8654_v48 }
 0xb0e   :  { %v8657_v35 = vpop.f32.mrb[56].mxu0 }
 0xb0f   :  { %v8787_v20 = vpop.f32.mrb[44].mxu1  ;;  %v8658_v31 = vpop.f32.mrb[57].mxu0 }
 0xb10   :  { %v14451_v17 = vadd.f32 %v8787_v20, %v8656_v29  ;;  %v6768_v46 = vpop.f32.mrb[45].mxu1  ;;  %v8659_v56 = vadd.f32 %v8658_v31, %v8657_v35 }
 0xb11   :  { %v14453_v55 = vadd.f32 %v8653_v49, %v6768_v46 }
 0xb12   :  { %v6826_v16 = vsel %vm15078_vm14, %v14451_v17, 0.0  ;;  %v8660_v42 = vpop.f32.mrb[58].mxu0  ;;  %v6857_v5 = vmul.f32 %v14451_v17, %v14451_v17 }
 0xb13   :  { %6827 = vadd.xlane.f32.xlu1 %v6826_v16  ;;  %v8790_v6 = vpop.f32.mrb[46].mxu1  ;;  %v6823_v54 = vsel %vm15079_vm4, %v14453_v55, 0.0  ;;  %v8661_v61 = vpop.f32.mrb[59].mxu0  ;;  %v6856_v50 = vmul.f32 %v14453_v55, %v14453_v55  ;;  %v6822_v16 = vld [vmem:[%s14841_s16 + $0x38] sm:$0xff] }
 0xb14   :  { %v6778_v52 = vpop.f32.mrb[47].mxu1  ;;  %6824 = vadd.xlane.f32.xlu0 %v6823_v54  ;;  %v8662_v14 = vadd.f32 %v8661_v61, %v8660_v42  ;;  %v6867_v34 = vsel %vm15083_vm10, %v6857_v5, 0.0  ;;  %v8559_v42 = vld [vmem:[%s14842_s17] ss:$0 sm:$0xff]  ;;  %s10053_s17 = smov 120  }
 0xb15   :  { %v14461_v22 = vadd.f32 %v8659_v56, %v6778_v52  ;;  %v6864_v57 = vsel %vm15081_vm11, %v6856_v50, 0.0  ;;  %vm7070_vm14 = vcmp.eq.s32.totalorder %v14936_v41, %v8559_v42  ;;  %vm7071_vm4 = vcmp.eq.s32.totalorder %v12692_v0, %v8559_v42  ;;  %v14524_v41 = vpop.permute.xlu1 %6946 }
 0xb16   :  { %v14463_v51 = vadd.f32 %v8790_v6, %v8662_v14  ;;  %v8663_v39 = vpop.f32.mrb[60].mxu0  ;;  %v6821_v6 = vld [vmem:[%s14841_s16 + $0x30] sm:$0xff]  ;;  %vm7072_vm11 = vcmp.eq.s32.totalorder %v12699_v19, %v8559_v42  ;;  %s10052_s16 = smov 116  }
 0xb17   :  { %v6829_v10 = vsel %vm15080_vm8, %v14461_v22, 0.0  ;;  %v8664_v2 = vpop.f32.mrb[61].mxu0  ;;  %v8793_v47 = vpop.f32.mrb[48].mxu1  ;;  %v6858_v62 = vmul.f32 %v14461_v22, %v14461_v22  ;;  %vm9821_vm8 = vmpackc.low %vm7071_vm4, %vm7070_vm14  ;;  %v8562_v54 = vsel %vm7072_vm11, 1.0, %v14937_v24 }
 0xb18   :  { %6830 = vadd.xlane.f32.xlu1 %v6829_v10  ;;  %6865 = vadd.xlane.f32.xlu0 %v6864_v57  ;;  %v8665_v12 = vadd.f32 %v8664_v2, %v8663_v39  ;;  %v6788_v4 = vpop.f32.mrb[49].mxu1  ;;  %v6832_v9 = vsel %vm15085_vm6, %v14463_v51, 0.0  ;;  %v6859_v33 = vmul.f32 %v14463_v51, %v14463_v51  ;;  %vm15095_vm6 = vmmov %vm15046_vm0 }
 0xb19   :  { %v6870_v13 = vsel %vm15082_vm5, %v6858_v62, 0.0  ;;  %9822 = vmatprep.subr.msk.bf16.mxu1 %vm9821_vm8, %v10036_v15  ;;  %vm15093_vm5 = vcmask 1041408   ;;  %v14526_v0 = vpop.permute.xlu1 %6994  ;;  %vm15100_vm11 = vmmov %vm15091_vm1 }
 0xb1a   :  { %v14473_v7 = vadd.f32 %v8665_v12, %v6788_v4  ;;  %v8666_v45 = vpop.f32.mrb[62].mxu0  ;;  %v6873_v53 = vsel %vm15087_vm12, %v6859_v33, 0.0  ;;  %9824 = vmatpush3.bf16.msk.msra.mxu1 %vm9821_vm8, %v10036_v15  ;;  %vm15094_vm10 = vmmov %vm15093_vm5  ;;  %v14530_v15 = vpop.permute.xlu0 %6951 }
 0xb1b   :  { %v8667_v40 = vpop.f32.mrb[63].mxu0  ;;  %v8796_v63 = vpop.f32.mrb[50].mxu1  ;;  %8801 = vmatprep.subr.msk.mxu1 %vm15093_vm5, %v8562_v54  ;;  %vm15099_vm8 = vmmov %vm15091_vm1 }
 0xb1c   :  { %6871 = vadd.xlane.f32.xlu1 %v6870_v13  ;;  %6868 = vadd.xlane.f32.xlu0 %v6867_v34  ;;  %v8668_v21 = vadd.f32 %v8667_v40, %v8666_v45  ;;  %v6798_v3 = vpop.f32.mrb[51].mxu1  ;;  %v6835_v37 = vsel %vm15084_vm9, %v14473_v7, 0.0  ;;  %v6860_v58 = vmul.f32 %v14473_v7, %v14473_v7 }
 0xb1d   :  { %v14528_v61 = vpop.permute.xlu1 %6999 }
 0xb1e   :  { %v14484_v44 = vadd.f32 %v8793_v47, %v8668_v21  ;;  %v8669_v11 = vpop.f32.mrb[64].mxu0  ;;  %v6876_v60 = vsel %vm15086_vm13, %v6860_v58, 0.0  ;;  %8802 = vmatpush3.msk.msra.mxu1 %vm15094_vm10, %v8562_v54  ;;  %v14534_v52 = vpop.permute.xlu0 %6956  ;;  %vm15101_vm10 = vmmov %vm15091_vm1 }
 0xb1f   :  { %v8670_v26 = vpop.f32.mrb[65].mxu0 }
 0xb20   :  { %6836 = vadd.xlane.f32.xlu1 %v6835_v37  ;;  %6833 = vadd.xlane.f32.xlu0 %v6832_v9  ;;  %v8671_v8 = vadd.f32 %v8670_v26, %v8669_v11  ;;  %v6838_v49 = vsel %vm15089_vm15, %v14484_v44, 0.0  ;;  %v6861_v27 = vmul.f32 %v14484_v44, %v14484_v44  ;;  %vm15097_vm15 = vmmov %vm15046_vm0 }
 0xb21   :  { %v14532_v50 = vpop.permute.xlu1 %6961 }
 0xb22   :  { %v14488_v43 = vadd.f32 %v8671_v8, %v6798_v3  ;;  %v8672_v1 = vpop.f32.mrb[66].mxu0  ;;  %v6879_v20 = vsel %vm15090_vm3, %v6861_v27, 0.0  ;;  %v14538_v14 = vpop.permute.xlu0 %7004 }
 0xb23   :  { %v8673_v28 = vpop.f32.mrb[67].mxu0 }
 0xb24   :  { %6877 = vadd.xlane.f32.xlu1 %v6876_v60  ;;  %6874 = vadd.xlane.f32.xlu0 %v6873_v53  ;;  %v8674_v59 = vadd.f32 %v8673_v28, %v8672_v1  ;;  %v6841_v18 = vsel %vm15088_vm7, %v14488_v43, 0.0  ;;  %v6862_v48 = vmul.f32 %v14488_v43, %v14488_v43  ;;  %vm15096_vm7 = vmmov %vm15046_vm0 }
 0xb25   :  { %v14536_v19 = vpop.permute.xlu1 %7009 }
 0xb26   :  { %v14498_v29 = vadd.f32 %v8796_v63, %v8674_v59  ;;  %v6882_v35 = vsel %vm15046_vm0, %v6862_v48, 0.0  ;;  %v14542_v10 = vpop.permute.xlu0 %6966 }
 0xb28   :  { %6842 = vadd.xlane.f32.xlu1 %v6841_v18  ;;  %6839 = vadd.xlane.f32.xlu0 %v6838_v49  ;;  %v6844_v31 = vsel %vm15091_vm1, %v14498_v29, 0.0  ;;  %v6863_v46 = vmul.f32 %v14498_v29, %v14498_v29 }
 0xb29   :  { %v14540_v39 = vpop.permute.xlu1 %6971 }
 0xb2a   :  { %v6885_v56 = vsel %vm15092_vm2, %v6863_v46, 0.0  ;;  %v14546_v2 = vpop.permute.xlu0 %7014  ;;  %vm15098_vm2 = vmmov %vm15091_vm1 }
 0xb2c   :  { %6883 = vadd.xlane.f32.xlu1 %v6882_v35  ;;  %6880 = vadd.xlane.f32.xlu0 %v6879_v20 }
 0xb2d   :  { %v14544_v57 = vpop.permute.xlu1 %7019 }
 0xb2e   :  { %v14550_v62 = vpop.permute.xlu0 %6976 }
 0xb30   :  { %6845 = vadd.xlane.f32.xlu0 %v6844_v31 }
 0xb31   :  { %v14548_v47 = vpop.permute.xlu1 %6981 }
 0xb34   :  { %6886 = vadd.xlane.f32.xlu0 %v6885_v56 }
 0xb3d   :  { %7029 = vperm.xlu1 %9950, %v6822_v16  }
 0xb4a   :  { %7024 = vperm.xlu0 %9951, %v6821_v6  }
 0xba0   :  { %v6828_v5 = vpop.xlane.xlu1 %6827 }
 0xba1   :  { %v6825_v12 = vpop.xlane.xlu0 %6824  ;;  %v6849_v34 = vmul.f32 0.055555556, %v6828_v5 }
 0xba2   :  { %v6848_v4 = vmul.f32 0.055555556, %v6825_v12 }
 0xba3   :  { %v6897_v33 = vmul.f32 %v6849_v34, %v6849_v34 }
 0xba4   :  { %v6896_v40 = vmul.f32 %v6848_v4, %v6848_v4  ;;  %v6912_v6 = vsub.f32 %v14453_v55, %v6848_v4 }
 0xba5   :  { %v6866_v13 = vpop.xlane.xlu0 %6865  ;;  %v6831_v45 = vpop.xlane.xlu1 %6830 }
 0xba6   :  { %v6888_v63 = vmul.f32 0.055555556, %v6866_v13  ;;  %v6850_v21 = vmul.f32 0.055555556, %v6831_v45 }
 0xba8   :  { %v6904_v3 = vsub.f32 %v6888_v63, %v6896_v40  ;;  %v6898_v37 = vmul.f32 %v6850_v21, %v6850_v21 }
 0xba9   :  { %v6869_v9 = vpop.xlane.xlu0 %6868  ;;  %v6872_v58 = vpop.xlane.xlu1 %6871 }
 0xbaa   :  { %v6920_v11 = vadd.f32 1e-05, %v6904_v3  ;;  %v6889_v26 = vmul.f32 0.055555556, %v6869_v9  ;;  %v6890_v8 = vmul.f32 0.055555556, %v6872_v58  ;;  %v6913_v9 = vsub.f32 %v14451_v17, %v6849_v34 }
 0xbac   :  { %9966 = vrsqrt.f32 %v6920_v11  ;;  %v6905_v60 = vsub.f32 %v6889_v26, %v6897_v33  ;;  %v6906_v53 = vsub.f32 %v6890_v8, %v6898_v37  ;;  %v6914_v26 = vsub.f32 %v14461_v22, %v6850_v21 }
 0xbad   :  { %v6834_v1 = vpop.xlane.xlu0 %6833  ;;  %v6837_v28 = vpop.xlane.xlu1 %6836 }
 0xbae   :  { %v6921_v59 = vadd.f32 1e-05, %v6905_v60  ;;  %v6922_v18 = vadd.f32 1e-05, %v6906_v53  ;;  %v14552_v49 = vmul.f32 0.055555556, %v6834_v1 }
 0xbaf   :  { %v14554_v48 = vmul.f32 0.055555556, %v6837_v28 }
 0xbb0   :  { %9968 = vrsqrt.f32 %v6921_v59  ;;  %v6899_v27 = vmul.f32 %v14552_v49, %v14552_v49 }
 0xbb1   :  { %9970 = vrsqrt.f32 %v6922_v18  ;;  %v6900_v35 = vmul.f32 %v14554_v48, %v14554_v48  ;;  %v6875_v20 = vpop.xlane.xlu0 %6874  ;;  %v6878_v31 = vpop.xlane.xlu1 %6877 }
 0xbb2   :  { %v6891_v46 = vmul.f32 0.055555556, %v6875_v20  ;;  %v6892_v56 = vmul.f32 0.055555556, %v6878_v31 }
 0xbb4   :  { %v6907_v16 = vsub.f32 %v6891_v46, %v6899_v27  ;;  %v6908_v42 = vsub.f32 %v6892_v56, %v6900_v35 }
 0xbb5   :  { %v6840_v54 = vpop.xlane.xlu0 %6839  ;;  %v6843_v5 = vpop.xlane.xlu1 %6842 }
 0xbb6   :  { %v9967_v12 = vpop.eup %9966  ;;  %v6923_v13 = vadd.f32 1e-05, %v6907_v16  ;;  %v6924_v45 = vadd.f32 1e-05, %v6908_v42  ;;  %v14561_v40 = vmul.f32 0.055555556, %v6840_v54  ;;  %v6915_v16 = vsub.f32 %v14463_v51, %v14552_v49 }
 0xbb7   :  { %v14563_v63 = vmul.f32 0.055555556, %v6843_v5  ;;  %v6936_v3 = vmul.f32 %v9967_v12, %v6912_v6 }
 0xbb8   :  { %9972 = vrsqrt.f32 %v6923_v13  ;;  %v6901_v37 = vmul.f32 %v14561_v40, %v14561_v40 }
 0xbb9   :  { %9974 = vrsqrt.f32 %v6924_v45  ;;  %v6902_v55 = vmul.f32 %v14563_v63, %v14563_v63  ;;  %v6881_v4 = vpop.xlane.xlu0 %6880  ;;  %v6884_v58 = vpop.xlane.xlu1 %6883  ;;  %v6984_v33 = vmul.f32 %v14524_v41, %v6936_v3 }
 0xbba   :  { %v9969_v11 = vpop.eup %9968  ;;  %v6893_v8 = vmul.f32 0.055555556, %v6881_v4  ;;  %v6894_v60 = vmul.f32 0.055555556, %v6884_v58  ;;  %v6918_v58 = vsub.f32 %v14488_v43, %v14563_v63 }
 0xbbb   :  { %v9971_v53 = vpop.eup %9970  ;;  %v6937_v1 = vmul.f32 %v9969_v11, %v6913_v9  ;;  %v7032_v28 = vadd.f32 %v14526_v0, %v6984_v33  ;;  %v6917_v9 = vsub.f32 %v14484_v44, %v14561_v40 }
 0xbbc   :  { %v6909_v59 = vsub.f32 %v6893_v8, %v6901_v37  ;;  %v6910_v18 = vsub.f32 %v6894_v60, %v6902_v55  ;;  %v6938_v17 = vmul.f32 %v9971_v53, %v6914_v26 }
 0xbbd   :  { %v6846_v34 = vpop.xlane.xlu0 %6845  ;;  %vm7040_vm9 = vcmp.ge.f32.partialorder %v7032_v28, 0.0  ;;  %v7048_v27 = vmul.f32 0.2, %v7032_v28  ;;  %v6985_v35 = vmul.f32 %v14530_v15, %v6937_v1 }
 0xbbe   :  { %v6925_v20 = vadd.f32 1e-05, %v6909_v59  ;;  %v6926_v31 = vadd.f32 1e-05, %v6910_v18  ;;  %v6855_v41 = vmul.f32 0.055555556, %v6846_v34  ;;  %v6986_v46 = vmul.f32 %v14534_v52, %v6938_v17 }
 0xbbf   :  { %v7056_v22 = vsel %vm7040_vm9, %v7032_v28, %v7048_v27  ;;  %v7033_v21 = vadd.f32 %v14528_v61, %v6985_v35  ;;  %v6916_v52 = vsub.f32 %v14473_v7, %v14554_v48  ;;  %vm15102_vm9 = vcmask 15360  }
 0xbc0   :  { %9976 = vrsqrt.f32 %v6925_v20  ;;  %v6903_v56 = vmul.f32 %v6855_v41, %v6855_v41  ;;  %8803 = vmatprep.mubr.msk.f32.mxu1 %vm15095_vm6, %v7056_v22  ;;  %v7034_v0 = vadd.f32 %v14538_v14, %v6986_v46  ;;  %v6919_v43 = vsub.f32 %v14498_v29, %v6855_v41  ;;  %vm15103_vm6 = vmmov %vm15102_vm9  ;;  %v14714_v22 = vld [vmem:[%s14843_s18] sm:$0x1f]  ;;  %s10057_s18 = smov [#allocation6]  }
 0xbc1   :  { %9978 = vrsqrt.f32 %v6926_v31  ;;  %v6887_v42 = vpop.xlane.xlu0 %6886  ;;  %vm7041_vm13 = vcmp.ge.f32.partialorder %v7033_v21, 0.0  ;;  %v7049_v15 = vmul.f32 0.2, %v7033_v21 }
 0xbc2   :  { %v9973_v6 = vpop.eup %9972  ;;  %v6895_v54 = vmul.f32 0.055555556, %v6887_v42  ;;  %vm7042_vm12 = vcmp.ge.f32.partialorder %v7034_v0, 0.0  ;;  %v7050_v61 = vmul.f32 0.2, %v7034_v0 }
 0xbc3   :  { %v9975_v5 = vpop.eup %9974  ;;  %v7057_v12 = vsel %vm7041_vm13, %v7033_v21, %v7049_v15  ;;  %v6939_v13 = vmul.f32 %v9973_v6, %v6915_v16  ;;  %vm15104_vm13 = vmmov %vm15103_vm6  ;;  %v7563_v21 = vrot.slane %v14714_v22, %v11737_v30 }
 0xbc4   :  { %v6911_v45 = vsub.f32 %v6895_v54, %v6903_v56  ;;  %8804 = vmatmul.mubr.msk.f32.vlgmr.msra.gmra.mrb[52].mxu1 %vm15096_vm7, %v7057_v12  ;;  %v7058_v14 = vsel %vm7042_vm12, %v7034_v0, %v7050_v61  ;;  %v6940_v3 = vmul.f32 %v9975_v5, %v6916_v52  ;;  %vm15105_vm12 = vmmov %vm15103_vm6  ;;  %v7571_v0 = vrot.slane %v14714_v22, %v11755_v38 }
 0xbc5   :  { %8806 = vmatprep.mubr.msk.f32.mxu1 %vm15097_vm15, %v7058_v14  ;;  %v6987_v51 = vmul.f32 %v14532_v50, %v6939_v13  ;;  %vm15106_vm7 = vmmov %vm15103_vm6  ;;  %7647 = vmatprep.mubr.f32.mxu0 %v7563_v21 }
 0xbc6   :  { %v6927_v49 = vadd.f32 1e-05, %v6911_v45  ;;  %v6988_v37 = vmul.f32 %v14542_v10, %v6940_v3  ;;  %vm15108_vm15 = vmmov %vm15103_vm6 }
 0xbc7   :  { %v7035_v7 = vadd.f32 %v14536_v19, %v6987_v51 }
 0xbc8   :  { %9980 = vrsqrt.f32 %v6927_v49  ;;  %v7036_v48 = vadd.f32 %v14546_v2, %v6988_v37 }
 0xbc9   :  { %vm7043_vm0 = vcmp.ge.f32.partialorder %v7035_v7, 0.0  ;;  %v7051_v55 = vmul.f32 0.2, %v7035_v7  ;;  %v7025_v40 = vpop.permute.xlu0 %7024 }
 0xbca   :  { %v9977_v4 = vpop.eup %9976  ;;  %vm7044_vm3 = vcmp.ge.f32.partialorder %v7036_v48, 0.0  ;;  %v7052_v33 = vmul.f32 0.2, %v7036_v48 }
 0xbcb   :  { %v9979_v50 = vpop.eup %9978  ;;  %v7059_v11 = vsel %vm7043_vm0, %v7035_v7, %v7051_v55  ;;  %v6941_v26 = vmul.f32 %v9977_v4, %v6917_v9  ;;  %vm15109_vm0 = vmmov %vm15103_vm6 }
 0xbcc   :  { %v6942_v10 = vmul.f32 %v9979_v50, %v6918_v58  ;;  %8807 = vmatmul.mubr.msk.f32.gmra.mrb[54].mxu1 %vm15091_vm1, %v7059_v11  ;;  %v7060_v19 = vsel %vm7044_vm3, %v7036_v48, %v7052_v33  ;;  %vm15110_vm3 = vmmov %vm15109_vm0 }
 0xbcd   :  { %8809 = vmatprep.mubr.msk.f32.mxu1 %vm15098_vm2, %v7060_v19  ;;  %v6989_v2 = vmul.f32 %v14540_v39, %v6941_v26  ;;  %vm15111_vm1 = vmmov %vm15109_vm0 }
 0xbce   :  { %v6990_v44 = vmul.f32 %v14550_v62, %v6942_v10  ;;  %v7030_v62 = vpop.permute.xlu1 %7029  ;;  %vm15112_vm2 = vmmov %vm15109_vm0 }
 0xbcf   :  { %v7037_v8 = vadd.f32 %v14544_v57, %v6989_v2 }
 0xbd0   :  { %v7038_v60 = vadd.f32 %v7025_v40, %v6990_v44 }
 0xbd1   :  { %vm7045_vm14 = vcmp.ge.f32.partialorder %v7037_v8, 0.0  ;;  %v7053_v63 = vmul.f32 0.2, %v7037_v8 }
 0xbd2   :  { %v9981_v53 = vpop.eup %9980  ;;  %vm7046_vm4 = vcmp.ge.f32.partialorder %v7038_v60, 0.0  ;;  %v7054_v1 = vmul.f32 0.2, %v7038_v60 }
 0xbd3   :  { %v7061_v28 = vsel %vm7045_vm14, %v7037_v8, %v7053_v63  ;;  %v6943_v59 = vmul.f32 %v9981_v53, %v6919_v43  ;;  %vm15113_vm14 = vmmov %vm15109_vm0 }
 0xbd4   :  { %8810 = vmatmul.mubr.msk.f32.gmra.mrb[56].mxu1 %vm15099_vm8, %v7061_v28  ;;  %v7062_v18 = vsel %vm7046_vm4, %v7038_v60, %v7054_v1  ;;  %vm15114_vm4 = vmmov %vm15109_vm0 }
 0xbd5   :  { %8812 = vmatprep.mubr.msk.f32.mxu1 %vm15100_vm11, %v7062_v18  ;;  %v6991_v39 = vmul.f32 %v14548_v47, %v6943_v59  ;;  %vm15115_vm8 = vmmov %vm15109_vm0 }
 0xbd6   :  { %vm15116_vm11 = vmmov %vm15109_vm0 }
 0xbd7   :  { %v7039_v17 = vadd.f32 %v7030_v62, %v6991_v39 }
 0xbd9   :  { %vm7047_vm5 = vcmp.ge.f32.partialorder %v7039_v17, 0.0  ;;  %v7055_v57 = vmul.f32 0.2, %v7039_v17 }
 0xbdb   :  { %v7063_v34 = vsel %vm7047_vm5, %v7039_v17, %v7055_v57  ;;  %vm15117_vm5 = vmmov %vm15109_vm0 }
 0xbdc   :  { %8813 = vmatmul.mubr.msk.f32.gmra.mrb[58].mxu1 %vm15101_vm10, %v7063_v34  ;;  %vm15118_vm10 = vmmov %vm15109_vm0 }
 0xbdd   :  { %7717 = vmatprep.mubr.f32.mxu1 %v7571_v0 }
 0xc97   :  { %v8805_v29 = vpop.f32.mrb[52].mxu1 }
 0xc98   :  { %7212 = vst.msk [vmem:[#allocation5 + $0x8] sm:$0xff] %vm15102_vm9, %v8805_v29  ;;  %7261 = vrot.lane.b32.xlu1 %v8805_v29, %s10030_s2  ;;  %v7172_v27 = vpop.f32.mrb[53].mxu1  ;;  %vm15119_vm9 = vmmov %vm15109_vm0 }
 0xc99   :  { %7211 = vst.msk [vmem:[#allocation5] sm:$0xff] %vm15103_vm6, %v7172_v27  ;;  %7259 = vrot.lane.b32.xlu0 %v7172_v27, %s10030_s2  ;;  %vm15120_vm6 = vmmov %vm15109_vm0 }
 0xc9c   :  { %7389 = vrot.lane.b32.xlu1 %v8805_v29, %s10052_s16 }
 0xc9d   :  { %7387 = vrot.lane.b32.xlu0 %v7172_v27, %s10052_s16 }
 0xc9f   :  { %v14608_v47 = vpop.f32.mrb[54].mxu1  ;;  %v7484_v52 = vld [vmem:[#allocation5 + $0x8] sm:$0xff] }
 0xca0   :  { %7214 = vst.msk [vmem:[#allocation5 + $0x18] sm:$0xff] %vm15104_vm13, %v14608_v47  ;;  %7325 = vrot.lane.b32.xlu1 %v8805_v29, %s10053_s17  ;;  %v7182_v35 = vpop.f32.mrb[55].mxu1  ;;  %v7483_v6 = vld [vmem:[#allocation5] sm:$0xff]  ;;  %vm15121_vm13 = vmmov %vm15109_vm0 }
 0xca1   :  { %7213 = vst.msk [vmem:[#allocation5 + $0x10] sm:$0xff] %vm15105_vm12, %v7182_v35  ;;  %7323 = vrot.lane.b32.xlu0 %v7172_v27, %s10053_s17  ;;  %v9827_v12 = vpack.c.bf16 %v7484_v52, %v7483_v6  ;;  %vm15122_vm12 = vmmov %vm15109_vm0 }
 0xca4   :  { %7293 = vrot.lane.b32.xlu1 %v8805_v29, %s10054_s10 }
 0xca5   :  { %7291 = vrot.lane.b32.xlu0 %v7172_v27, %s10054_s10 }
 0xca7   :  { %v14617_v20 = vpop.f32.mrb[56].mxu1  ;;  %v7486_v60 = vld [vmem:[#allocation5 + $0x18] sm:$0xff] }
 0xca8   :  { %7216 = vst.msk [vmem:[#allocation5 + $0x28] sm:$0xff] %vm15106_vm7, %v14617_v20  ;;  %7229 = vrot.lane.b32.xlu1 %v8805_v29, %s15107_s7  ;;  %v14622_v31 = vpop.f32.mrb[57].mxu1  ;;  %vm15123_vm7 = vmmov %vm15109_vm0  ;;  %v7485_v8 = vld [vmem:[#allocation5 + $0x10] sm:$0xff] }
 0xca9   :  { %7215 = vst.msk [vmem:[#allocation5 + $0x20] sm:$0xff] %vm15108_vm15, %v14622_v31  ;;  %7227 = vrot.lane.b32.xlu0 %v7172_v27, %s15107_s7  ;;  %vm15124_vm15 = vmmov %vm15109_vm0  ;;  %v9831_v1 = vpack.c.bf16 %v7486_v60, %v7485_v8 }
 0xcac   :  { %7421 = vrot.lane.b32.xlu1 %v8805_v29, %s10055_s8 }
 0xcad   :  { %7419 = vrot.lane.b32.xlu0 %v7172_v27, %s10055_s8 }
 0xcaf   :  { %v14629_v41 = vpop.f32.mrb[58].mxu1 }
 0xcb0   :  { %7218 = vst.msk [vmem:[#allocation5 + $0x38] sm:$0xff] %vm15109_vm0, %v14629_v41  ;;  %7357 = vrot.lane.b32.xlu1 %v8805_v29, %s10044_s25  ;;  %v14634_v46 = vpop.f32.mrb[59].mxu1 }
 0xcb1   :  { %7217 = vst.msk [vmem:[#allocation5 + $0x30] sm:$0xff] %vm15110_vm3, %v14634_v46  ;;  %7355 = vrot.lane.b32.xlu0 %v7172_v27, %s10044_s25  ;;  %vm15125_vm3 = vmmov %vm15109_vm0 }
 0xcb4   :  { %7453 = vrot.lane.b32.xlu1 %v8805_v29, %s10019_s5 }
 0xcb5   :  { %7451 = vrot.lane.b32.xlu0 %v7172_v27, %s10019_s5 }
 0xcb8   :  { %7265 = vrot.lane.b32.xlu1 %v14608_v47, %s10030_s2 }
 0xcb9   :  { %7263 = vrot.lane.b32.xlu0 %v7182_v35, %s10030_s2 }
 0xcbc   :  { %7393 = vrot.lane.b32.xlu1 %v14608_v47, %s10052_s16 }
 0xcbd   :  { %7391 = vrot.lane.b32.xlu0 %v7182_v35, %s10052_s16 }
 0xcc0   :  { %7329 = vrot.lane.b32.xlu1 %v14608_v47, %s10053_s17 }
 0xcc1   :  { %7327 = vrot.lane.b32.xlu0 %v7182_v35, %s10053_s17 }
 0xcc4   :  { %7297 = vrot.lane.b32.xlu1 %v14608_v47, %s10054_s10 }
 0xcc5   :  { %7295 = vrot.lane.b32.xlu0 %v7182_v35, %s10054_s10 }
 0xcc8   :  { %7233 = vrot.lane.b32.xlu1 %v14608_v47, %s15107_s7 }
 0xcc9   :  { %7231 = vrot.lane.b32.xlu0 %v7182_v35, %s15107_s7 }
 0xccc   :  { %7425 = vrot.lane.b32.xlu1 %v14608_v47, %s10055_s8 }
 0xccd   :  { %7423 = vrot.lane.b32.xlu0 %v7182_v35, %s10055_s8 }
 0xcd0   :  { %7361 = vrot.lane.b32.xlu1 %v14608_v47, %s10044_s25 }
 0xcd1   :  { %7359 = vrot.lane.b32.xlu0 %v7182_v35, %s10044_s25 }
 0xcd4   :  { %7269 = vrot.lane.b32.xlu1 %v14617_v20, %s10030_s2 }
 0xcd5   :  { %7267 = vrot.lane.b32.xlu0 %v14622_v31, %s10030_s2 }
 0xcd8   :  { %7397 = vrot.lane.b32.xlu1 %v14617_v20, %s10052_s16 }
 0xcd9   :  { %7395 = vrot.lane.b32.xlu0 %v14622_v31, %s10052_s16 }
 0xcdc   :  { %7333 = vrot.lane.b32.xlu1 %v14617_v20, %s10053_s17 }
 0xcdd   :  { %7331 = vrot.lane.b32.xlu0 %v14622_v31, %s10053_s17 }
 0xce0   :  { %7301 = vrot.lane.b32.xlu1 %v14617_v20, %s10054_s10 }
 0xce1   :  { %7299 = vrot.lane.b32.xlu0 %v14622_v31, %s10054_s10 }
 0xce4   :  { %7237 = vrot.lane.b32.xlu1 %v14617_v20, %s15107_s7 }
 0xce5   :  { %7235 = vrot.lane.b32.xlu0 %v14622_v31, %s15107_s7 }
 0xce8   :  { %7429 = vrot.lane.b32.xlu1 %v14617_v20, %s10055_s8 }
 0xce9   :  { %7427 = vrot.lane.b32.xlu0 %v14622_v31, %s10055_s8 }
 0xcec   :  { %7365 = vrot.lane.b32.xlu1 %v14617_v20, %s10044_s25 }
 0xced   :  { %7363 = vrot.lane.b32.xlu0 %v14622_v31, %s10044_s25 }
 0xcf0   :  { %7273 = vrot.lane.b32.xlu1 %v14629_v41, %s10030_s2 }
 0xcf1   :  { %7271 = vrot.lane.b32.xlu0 %v14634_v46, %s10030_s2 }
 0xcf4   :  { %7401 = vrot.lane.b32.xlu1 %v14629_v41, %s10052_s16 }
 0xcf5   :  { %7455 = vrot.lane.b32.xlu0 %v7182_v35, %s10019_s5 }
 0xcf8   :  { %7337 = vrot.lane.b32.xlu1 %v14629_v41, %s10053_s17 }
 0xcf9   :  { %7399 = vrot.lane.b32.xlu0 %v14634_v46, %s10052_s16 }
 0xcfc   :  { %7305 = vrot.lane.b32.xlu1 %v14629_v41, %s10054_s10 }
 0xcfd   :  { %7335 = vrot.lane.b32.xlu0 %v14634_v46, %s10053_s17 }
 0xd00   :  { %7241 = vrot.lane.b32.xlu1 %v14629_v41, %s15107_s7 }
 0xd01   :  { %7303 = vrot.lane.b32.xlu0 %v14634_v46, %s10054_s10 }
 0xd04   :  { %7457 = vrot.lane.b32.xlu1 %v14608_v47, %s10019_s5 }
 0xd05   :  { %7239 = vrot.lane.b32.xlu0 %v14634_v46, %s15107_s7 }
 0xd08   :  { %7433 = vrot.lane.b32.xlu1 %v14629_v41, %s10055_s8 }
 0xd09   :  { %7431 = vrot.lane.b32.xlu0 %v14634_v46, %s10055_s8 }
 0xd0a   :  { %v7262_v56 = vpop.permute.xlu1 %7261 }
 0xd0b   :  { %7284 = vst.msk [vmem:[#allocation5 + $0x88] sm:$0xff] %vm15111_vm1, %v7262_v56  ;;  %v7260_v16 = vpop.permute.xlu0 %7259  ;;  %vm15126_vm1 = vmmov %vm15109_vm0 }
 0xd0c   :  { %7283 = vst.msk [vmem:[#allocation5 + $0x80] sm:$0xff] %vm15112_vm2, %v7260_v16  ;;  %7369 = vrot.lane.b32.xlu1 %v14629_v41, %s10044_s25  ;;  %vm15127_vm2 = vmmov %vm15109_vm0 }
 0xd0d   :  { %7367 = vrot.lane.b32.xlu0 %v14634_v46, %s10044_s25 }
 0xd0e   :  { %v7390_v30 = vpop.permute.xlu1 %7389 }
 0xd0f   :  { %7412 = vst.msk [vmem:[#allocation5 + $0x188] sm:$0xff] %vm15113_vm14, %v7390_v30  ;;  %v7388_v42 = vpop.permute.xlu0 %7387  ;;  %vm15128_vm14 = vmmov %vm15109_vm0  ;;  %v7487_v30 = vld [vmem:[#allocation5 + $0x20] sm:$0xff] }
 0xd10   :  { %7411 = vst.msk [vmem:[#allocation5 + $0x180] sm:$0xff] %vm15114_vm4, %v7388_v42  ;;  %7461 = vrot.lane.b32.xlu1 %v14617_v20, %s10019_s5  ;;  %vm15129_vm4 = vmmov %vm15109_vm0  ;;  %v7488_v42 = vld [vmem:[#allocation5 + $0x28] sm:$0xff] }
 0xd11   :  { %7459 = vrot.lane.b32.xlu0 %v14622_v31, %s10019_s5  ;;  %v9835_v52 = vpack.c.bf16 %v7488_v42, %v7487_v30 }
 0xd12   :  { %v7326_v38 = vpop.permute.xlu1 %7325  ;;  %v7500_v15 = vld [vmem:[#allocation5 + $0x88] sm:$0xff] }
 0xd13   :  { %7348 = vst.msk [vmem:[#allocation5 + $0x108] sm:$0xff] %vm15115_vm8, %v7326_v38  ;;  %v7324_v54 = vpop.permute.xlu0 %7323  ;;  %v7499_v61 = vld [vmem:[#allocation5 + $0x80] sm:$0xff]  ;;  %vm15130_vm8 = vmmov %vm15109_vm0 }
 0xd14   :  { %7347 = vst.msk [vmem:[#allocation5 + $0x100] sm:$0xff] %vm15116_vm11, %v7324_v54  ;;  %7465 = vrot.lane.b32.xlu1 %v14629_v41, %s10019_s5  ;;  %v9825_v5 = vpack.c.bf16 %v7500_v15, %v7499_v61  ;;  %vm15131_vm11 = vmmov %vm15109_vm0 }
 0xd15   :  { %7463 = vrot.lane.b32.xlu0 %v14634_v46, %s10019_s5  ;;  %s7803_s5 = sshll.u32 %s10057_s18, 4  ;;  %s7804_s5 = int_to_ptr.vmem [resolvable:$true] %s7803_s5 }
 0xd16   :  { %9826 = vmatprep.subr.bf16.mxu0 %v9825_v5  ;;  %v7294_v13 = vpop.permute.xlu1 %7293  ;;  %v7532_v45 = vld [vmem:[#allocation5 + $0x188] sm:$0xff]  ;;  %s9985_s25 = scalar_lea.vmem %s7804_s5, 16  ;;  %s9989_s29 = scalar_lea.vmem %s7804_s5, 32 }
 0xd17   :  { %7316 = vst.msk [vmem:[#allocation5 + $0xc8] sm:$0xff] %vm15117_vm5, %v7294_v13  ;;  %v7292_v14 = vpop.permute.xlu0 %7291  ;;  %9828 = vmatpush3.bf16.msra.mxu0 %v9827_v12  ;;  %v7531_v3 = vld [vmem:[#allocation5 + $0x180] sm:$0xff]  ;;  %vm15132_vm5 = vmmov %vm15109_vm0  ;;  %p9986_p0 = scmp.ne.s32.totalorder %s7804_s5, %s9985_s25  ;;  %p9990_p1 = scmp.lt.s32.totalorder %s7804_s5, %s7804_s5 }
 0xd18   :  { %7315 = vst.msk [vmem:[#allocation5 + $0xc0] sm:$0xff] %vm15118_vm10, %v7292_v14  ;;  %v9857_v51 = vpack.c.bf16 %v7532_v45, %v7531_v3  ;;  %vm15133_vm10 = vmmov %vm15109_vm0  ;;  %p9991_p2 = scmp.lt.s32.totalorder %s9989_s29, %s9985_s25 }
 0xd1a   :  { %9858 = vmatprep.subr.bf16.mxu1 %v9857_v51  ;;  %v7230_v49 = vpop.permute.xlu1 %7229  ;;  %v7516_v37 = vld [vmem:[#allocation5 + $0x108] sm:$0xff]  ;;  %p9992_p3 = por %p9991_p2, %p9990_p1 }
 0xd1b   :  { %7252 = vst.msk [vmem:[#allocation5 + $0x48] sm:$0xff] %vm15119_vm9, %v7230_v49  ;;  %v7228_v7 = vpop.permute.xlu0 %7227  ;;  %v7515_v48 = vld [vmem:[#allocation5 + $0x100] sm:$0xff]  ;;  %vm15134_vm9 = vmmov %vm15109_vm0 }
 0xd1c   :  { %7251 = vst.msk [vmem:[#allocation5 + $0x40] sm:$0xff] %vm15120_vm6, %v7228_v7  ;;  %v9859_v9 = vpack.c.bf16 %v7516_v37, %v7515_v48  ;;  %vm15135_vm6 = vmmov %vm15109_vm0  ;;  %p9993_p4 = pnand %p9992_p3, %p9986_p0 }
 0xd1e   :  { %9860 = vmatpush3.bf16.msra.mxu1 %v9859_v9  ;;  %v7422_v55 = vpop.permute.xlu1 %7421 }
 0xd1f   :  { %7444 = vst.msk [vmem:[#allocation5 + $0x1c8] sm:$0xff] %vm15121_vm13, %v7422_v55  ;;  %v7420_v4 = vpop.permute.xlu0 %7419  ;;  %vm15136_vm13 = vmmov %vm15109_vm0 }
 0xd20   :  { %7443 = vst.msk [vmem:[#allocation5 + $0x1c0] sm:$0xff] %vm15122_vm12, %v7420_v4  ;;  %vm15137_vm12 = vmmov %vm15109_vm0 }
 0xd22   :  { %v7358_v58 = vpop.permute.xlu1 %7357 }
 0xd23   :  { %7380 = vst.msk [vmem:[#allocation5 + $0x148] sm:$0xff] %vm15123_vm7, %v7358_v58  ;;  %v7356_v33 = vpop.permute.xlu0 %7355  ;;  %vm15138_vm7 = vmmov %vm15109_vm0 }
 0xd24   :  { %7379 = vst.msk [vmem:[#allocation5 + $0x140] sm:$0xff] %vm15124_vm15, %v7356_v33  ;;  %vm15139_vm15 = vmmov %vm15109_vm0 }
 0xd26   :  { %v7454_v50 = vpop.permute.xlu1 %7453 }
 0xd27   :  { %7476 = vst.msk [vmem:[#allocation5 + $0x208] sm:$0xff] %vm15109_vm0, %v7454_v50  ;;  %v7452_v11 = vpop.permute.xlu0 %7451  ;;  %v7539_v30 = vld [vmem:[#allocation5 + $0x1c0] sm:$0xff] }
 0xd28   :  { %7475 = vst.msk [vmem:[#allocation5 + $0x200] sm:$0xff] %vm15125_vm3, %v7452_v11  ;;  %vm15140_vm3 = vmmov %vm15109_vm0 }
 0xd2a   :  { %v7266_v26 = vpop.permute.xlu1 %7265 }
 0xd2b   :  { %7286 = vst.msk [vmem:[#allocation5 + $0x98] sm:$0xff] %vm15126_vm1, %v7266_v26  ;;  %v7264_v10 = vpop.permute.xlu0 %7263  ;;  %vm15141_vm1 = vmmov %vm15109_vm0  ;;  %v7489_v26 = vld [vmem:[#allocation5 + $0x30] sm:$0xff] }
 0xd2c   :  { %7285 = vst.msk [vmem:[#allocation5 + $0x90] sm:$0xff] %vm15127_vm2, %v7264_v10  ;;  %vm15142_vm2 = vmmov %vm15109_vm0  ;;  %v7490_v10 = vld [vmem:[#allocation5 + $0x38] sm:$0xff] }
 0xd2d   :  { %v9839_v60 = vpack.c.bf16 %v7490_v10, %v7489_v26 }
 0xd2e   :  { %v7394_v19 = vpop.permute.xlu1 %7393 }
 0xd2f   :  { %7414 = vst.msk [vmem:[#allocation5 + $0x198] sm:$0xff] %vm15128_vm14, %v7394_v19  ;;  %v7392_v2 = vpop.permute.xlu0 %7391  ;;  %vm15143_vm14 = vmmov %vm15109_vm0 }
 0xd30   :  { %7413 = vst.msk [vmem:[#allocation5 + $0x190] sm:$0xff] %vm15129_vm4, %v7392_v2  ;;  %vm15144_vm4 = vmmov %vm15109_vm0 }
 0xd32   :  { %v7330_v44 = vpop.permute.xlu1 %7329  ;;  %v7502_v40 = vld [vmem:[#allocation5 + $0x98] sm:$0xff] }
 0xd33   :  { %7350 = vst.msk [vmem:[#allocation5 + $0x118] sm:$0xff] %vm15130_vm8, %v7330_v44  ;;  %v7328_v43 = vpop.permute.xlu0 %7327  ;;  %v7501_v63 = vld [vmem:[#allocation5 + $0x90] sm:$0xff]  ;;  %vm15145_vm8 = vmmov %vm15109_vm0  ;;  %v7507_v44 = vld [vmem:[#allocation5 + $0xc0] sm:$0xff] }
 0xd34   :  { %7349 = vst.msk [vmem:[#allocation5 + $0x110] sm:$0xff] %vm15131_vm11, %v7328_v43  ;;  %v9829_v53 = vpack.c.bf16 %v7502_v40, %v7501_v63  ;;  %vm15146_vm11 = vmmov %vm15109_vm0  ;;  %v7508_v40 = vld [vmem:[#allocation5 + $0xc8] sm:$0xff] }
 0xd35   :  { %v9841_v63 = vpack.c.bf16 %v7508_v40, %v7507_v44  ;;  %v7559_v44 = vrot.slane %v14714_v22, %v11723_v25 }
 0xd36   :  { %9830 = vmatprep.subr.bf16.mxu0 %v9829_v53  ;;  %v7298_v28 = vpop.permute.xlu1 %7297  ;;  %v7534_v59 = vld [vmem:[#allocation5 + $0x198] sm:$0xff]  ;;  %v7491_v53 = vld [vmem:[#allocation5 + $0x40] sm:$0xff] }
 0xd37   :  { %7318 = vst.msk [vmem:[#allocation5 + $0xd8] sm:$0xff] %vm15132_vm5, %v7298_v28  ;;  %v7296_v18 = vpop.permute.xlu0 %7295  ;;  %9832 = vmatpush3.bf16.msra.mxu0 %v9831_v1  ;;  %v7533_v39 = vld [vmem:[#allocation5 + $0x190] sm:$0xff]  ;;  %vm15147_vm5 = vmmov %vm15109_vm0  ;;  %v7492_v1 = vld [vmem:[#allocation5 + $0x48] sm:$0xff] }
 0xd38   :  { %7317 = vst.msk [vmem:[#allocation5 + $0xd0] sm:$0xff] %vm15133_vm10, %v7296_v18  ;;  %v9861_v62 = vpack.c.bf16 %v7534_v59, %v7533_v39  ;;  %vm15148_vm10 = vmmov %vm15109_vm0  ;;  %v9843_v39 = vpack.c.bf16 %v7492_v1, %v7491_v53 }
 0xd3a   :  { %9862 = vmatprep.subr.bf16.mxu1 %v9861_v62  ;;  %v7234_v17 = vpop.permute.xlu1 %7233  ;;  %v7518_v57 = vld [vmem:[#allocation5 + $0x118] sm:$0xff] }
 0xd3b   :  { %7254 = vst.msk [vmem:[#allocation5 + $0x58] sm:$0xff] %vm15134_vm9, %v7234_v17  ;;  %v7232_v34 = vpop.permute.xlu0 %7231  ;;  %v7517_v29 = vld [vmem:[#allocation5 + $0x110] sm:$0xff]  ;;  %vm15149_vm9 = vmmov %vm15109_vm0 }
 0xd3c   :  { %7253 = vst.msk [vmem:[#allocation5 + $0x50] sm:$0xff] %vm15135_vm6, %v7232_v34  ;;  %v9863_v27 = vpack.c.bf16 %v7518_v57, %v7517_v29  ;;  %vm15150_vm6 = vmmov %vm15109_vm0 }
 0xd3e   :  { %9864 = vmatpush3.bf16.msra.mxu1 %v9863_v27  ;;  %v7426_v47 = vpop.permute.xlu1 %7425  ;;  %v7510_v18 = vld [vmem:[#allocation5 + $0xd8] sm:$0xff] }
 0xd3f   :  { %7446 = vst.msk [vmem:[#allocation5 + $0x1d8] sm:$0xff] %vm15136_vm13, %v7426_v47  ;;  %v7424_v35 = vpop.permute.xlu0 %7423  ;;  %vm15151_vm13 = vmmov %vm15109_vm0  ;;  %v7509_v59 = vld [vmem:[#allocation5 + $0xd0] sm:$0xff] }
 0xd40   :  { %7445 = vst.msk [vmem:[#allocation5 + $0x1d0] sm:$0xff] %vm15137_vm12, %v7424_v35  ;;  %vm15152_vm12 = vmmov %vm15109_vm0  ;;  %v9845_v17 = vpack.c.bf16 %v7510_v18, %v7509_v59 }
 0xd42   :  { %v7362_v20 = vpop.permute.xlu1 %7361  ;;  %v7494_v34 = vld [vmem:[#allocation5 + $0x58] sm:$0xff] }
 0xd43   :  { %7382 = vst.msk [vmem:[#allocation5 + $0x158] sm:$0xff] %vm15138_vm7, %v7362_v20  ;;  %v7360_v31 = vpop.permute.xlu0 %7359  ;;  %vm15153_vm7 = vmmov %vm15109_vm0  ;;  %v7493_v57 = vld [vmem:[#allocation5 + $0x50] sm:$0xff] }
 0xd44   :  { %7381 = vst.msk [vmem:[#allocation5 + $0x150] sm:$0xff] %vm15139_vm15, %v7360_v31  ;;  %vm15154_vm15 = vmmov %vm15109_vm0 }
 0xd46   :  { %v7270_v41 = vpop.permute.xlu1 %7269 }
 0xd47   :  { %7288 = vst.msk [vmem:[#allocation5 + $0xa8] sm:$0xff] %vm15109_vm0, %v7270_v41  ;;  %v7268_v46 = vpop.permute.xlu0 %7267  ;;  %v9847_v41 = vpack.c.bf16 %v7494_v34, %v7493_v57 }
 0xd48   :  { %7287 = vst.msk [vmem:[#allocation5 + $0xa0] sm:$0xff] %vm15140_vm3, %v7268_v46  ;;  %vm15155_vm3 = vmmov %vm15109_vm0  ;;  %v7540_v46 = vld [vmem:[#allocation5 + $0x1c8] sm:$0xff] }
 0xd4a   :  { %v7398_v21 = vpop.permute.xlu1 %7397 }
 0xd4b   :  { %7416 = vst.msk [vmem:[#allocation5 + $0x1a8] sm:$0xff] %vm15141_vm1, %v7398_v21  ;;  %v7396_v56 = vpop.permute.xlu0 %7395  ;;  %vm15156_vm1 = vmmov %vm15109_vm0 }
 0xd4c   :  { %7415 = vst.msk [vmem:[#allocation5 + $0x1a0] sm:$0xff] %vm15142_vm2, %v7396_v56  ;;  %vm15157_vm2 = vmmov %vm15109_vm0 }
 0xd4e   :  { %v7334_v0 = vpop.permute.xlu1 %7333  ;;  %v7504_v16 = vld [vmem:[#allocation5 + $0xa8] sm:$0xff] }
 0xd4f   :  { %7352 = vst.msk [vmem:[#allocation5 + $0x128] sm:$0xff] %vm15143_vm14, %v7334_v0  ;;  %v7332_v38 = vpop.permute.xlu0 %7331  ;;  %v7503_v15 = vld [vmem:[#allocation5 + $0xa0] sm:$0xff]  ;;  %vm15158_vm14 = vmmov %vm15109_vm0 }
 0xd50   :  { %7351 = vst.msk [vmem:[#allocation5 + $0x120] sm:$0xff] %vm15144_vm4, %v7332_v38  ;;  %v9833_v6 = vpack.c.bf16 %v7504_v16, %v7503_v15  ;;  %vm15159_vm4 = vmmov %vm15109_vm0 }
 0xd52   :  { %9834 = vmatprep.subr.bf16.mxu0 %v9833_v6  ;;  %v7302_v54 = vpop.permute.xlu1 %7301  ;;  %v7536_v61 = vld [vmem:[#allocation5 + $0x1a8] sm:$0xff] }
 0xd53   :  { %7320 = vst.msk [vmem:[#allocation5 + $0xe8] sm:$0xff] %vm15145_vm8, %v7302_v54  ;;  %v7300_v5 = vpop.permute.xlu0 %7299  ;;  %9836 = vmatpush3.bf16.msra.mxu0 %v9835_v52  ;;  %v7535_v12 = vld [vmem:[#allocation5 + $0x1a0] sm:$0xff]  ;;  %vm15160_vm8 = vmmov %vm15109_vm0  ;;  %v9873_v54 = vpack.c.bf16 %v7540_v46, %v7539_v30 }
 0xd54   :  { %7319 = vst.msk [vmem:[#allocation5 + $0xe0] sm:$0xff] %vm15146_vm11, %v7300_v5  ;;  %v9865_v13 = vpack.c.bf16 %v7536_v61, %v7535_v12  ;;  %vm15161_vm11 = vmmov %vm15109_vm0  ;;  %v7523_v61 = vld [vmem:[#allocation5 + $0x140] sm:$0xff]  ;;  %v7524_v5 = vld [vmem:[#allocation5 + $0x148] sm:$0xff] }
 0xd56   :  { %9866 = vmatprep.subr.bf16.mxu1 %v9865_v13  ;;  %v7238_v45 = vpop.permute.xlu1 %7237  ;;  %v7520_v14 = vld [vmem:[#allocation5 + $0x128] sm:$0xff]  ;;  %v7541_v13 = vld [vmem:[#allocation5 + $0x1d0] sm:$0xff] }
 0xd57   :  { %7256 = vst.msk [vmem:[#allocation5 + $0x68] sm:$0xff] %vm15147_vm5, %v7238_v45  ;;  %v7236_v3 = vpop.permute.xlu0 %7235  ;;  %v7519_v51 = vld [vmem:[#allocation5 + $0x120] sm:$0xff]  ;;  %vm15162_vm5 = vmmov %vm15109_vm0  ;;  %v7542_v45 = vld [vmem:[#allocation5 + $0x1d8] sm:$0xff] }
 0xd58   :  { %7255 = vst.msk [vmem:[#allocation5 + $0x60] sm:$0xff] %vm15148_vm10, %v7236_v3  ;;  %v9867_v49 = vpack.c.bf16 %v7520_v14, %v7519_v51  ;;  %vm15163_vm10 = vmmov %vm15109_vm0 }
 0xd5a   :  { %9868 = vmatpush3.bf16.msra.mxu1 %v9867_v49  ;;  %v7430_v37 = vpop.permute.xlu1 %7429  ;;  %v7512_v29 = vld [vmem:[#allocation5 + $0xe8] sm:$0xff] }
 0xd5b   :  { %7448 = vst.msk [vmem:[#allocation5 + $0x1e8] sm:$0xff] %vm15149_vm9, %v7430_v37  ;;  %v7428_v7 = vpop.permute.xlu0 %7427  ;;  %v7511_v20 = vld [vmem:[#allocation5 + $0xe0] sm:$0xff]  ;;  %vm15164_vm9 = vmmov %vm15109_vm0  ;;  %v9875_v37 = vpack.c.bf16 %v7524_v5, %v7523_v61 }
 0xd5c   :  { %7447 = vst.msk [vmem:[#allocation5 + $0x1e0] sm:$0xff] %vm15150_vm6, %v7428_v7  ;;  %v9849_v56 = vpack.c.bf16 %v7512_v29, %v7511_v20  ;;  %vm15165_vm6 = vmmov %vm15109_vm0  ;;  %v9877_v7 = vpack.c.bf16 %v7542_v45, %v7541_v13 }
 0xd5e   :  { %v7366_v48 = vpop.permute.xlu1 %7365  ;;  %v7496_v16 = vld [vmem:[#allocation5 + $0x68] sm:$0xff] }
 0xd5f   :  { %7384 = vst.msk [vmem:[#allocation5 + $0x168] sm:$0xff] %vm15151_vm13, %v7366_v48  ;;  %v7364_v9 = vpop.permute.xlu0 %7363  ;;  %v7495_v0 = vld [vmem:[#allocation5 + $0x60] sm:$0xff]  ;;  %v7525_v48 = vld [vmem:[#allocation5 + $0x150] sm:$0xff]  ;;  %vm15166_vm13 = vmmov %vm15109_vm0 }
 0xd60   :  { %7383 = vst.msk [vmem:[#allocation5 + $0x160] sm:$0xff] %vm15152_vm12, %v7364_v9  ;;  %v9851_v52 = vpack.c.bf16 %v7496_v16, %v7495_v0  ;;  %v7526_v9 = vld [vmem:[#allocation5 + $0x158] sm:$0xff]  ;;  %vm15167_vm12 = vmmov %vm15109_vm0 }
 0xd61   :  { %v9879_v10 = vpack.c.bf16 %v7526_v9, %v7525_v48 }
 0xd62   :  { %v7274_v55 = vpop.permute.xlu1 %7273 }
 0xd63   :  { %7290 = vst.msk [vmem:[#allocation5 + $0xb8] sm:$0xff] %vm15153_vm7, %v7274_v55  ;;  %v7272_v4 = vpop.permute.xlu0 %7271  ;;  %vm15168_vm7 = vmmov %vm15109_vm0 }
 0xd64   :  { %7289 = vst.msk [vmem:[#allocation5 + $0xb0] sm:$0xff] %vm15154_vm15, %v7272_v4  ;;  %v7543_v4 = vld [vmem:[#allocation5 + $0x1e0] sm:$0xff]  ;;  %vm15169_vm15 = vmmov %vm15109_vm0 }
 0xd66   :  { %v7402_v58 = vpop.permute.xlu1 %7401 }
 0xd67   :  { %7418 = vst.msk [vmem:[#allocation5 + $0x1b8] sm:$0xff] %vm15109_vm0, %v7402_v58  ;;  %v7456_v33 = vpop.permute.xlu0 %7455  ;;  %v7544_v58 = vld [vmem:[#allocation5 + $0x1e8] sm:$0xff]  ;;  %v7527_v40 = vld [vmem:[#allocation5 + $0x160] sm:$0xff] }
 0xd68   :  { %7477 = vst.msk [vmem:[#allocation5 + $0x210] sm:$0xff] %vm15155_vm3, %v7456_v33  ;;  %vm15170_vm3 = vmmov %vm15109_vm0 }
 0xd6a   :  { %v7338_v50 = vpop.permute.xlu1 %7337  ;;  %v7506_v11 = vld [vmem:[#allocation5 + $0xb8] sm:$0xff] }
 0xd6b   :  { %7354 = vst.msk [vmem:[#allocation5 + $0x138] sm:$0xff] %vm15156_vm1, %v7338_v50  ;;  %v7400_v19 = vpop.permute.xlu0 %7399  ;;  %v7505_v2 = vld [vmem:[#allocation5 + $0xb0] sm:$0xff]  ;;  %vm10056_vm1 = vmmov 0  }
 0xd6c   :  { %7417 = vst.msk [vmem:[#allocation5 + $0x1b0] sm:$0xff] %vm15157_vm2, %v7400_v19  ;;  %v9837_v8 = vpack.c.bf16 %v7506_v11, %v7505_v2  ;;  %v7548_v19 = vld [vmem:[#allocation5 + $0x208] sm:$0xff]  ;;  %v9881_v2 = vpack.c.bf16 %v7544_v58, %v7543_v4  ;;  %vm7580_vm2 = vcmask 523264  }
 0xd6e   :  { %9838 = vmatprep.subr.bf16.mxu0 %v9837_v8  ;;  %v7306_v43 = vpop.permute.xlu1 %7305  ;;  %v7538_v35 = vld [vmem:[#allocation5 + $0x1b8] sm:$0xff]  ;;  %v7528_v8 = vld [vmem:[#allocation5 + $0x168] sm:$0xff] }
 0xd6f   :  { %7322 = vst.msk [vmem:[#allocation5 + $0xf8] sm:$0xff] %vm15158_vm14, %v7306_v43  ;;  %v7336_v28 = vpop.permute.xlu0 %7335  ;;  %9840 = vmatpush3.bf16.msra.mxu0 %v9839_v60  ;;  %v7547_v60 = vld [vmem:[#allocation5 + $0x200] sm:$0xff]  ;;  %v7549_v34 = vld [vmem:[#allocation5 + $0x210] sm:$0xff]  ;;  %vm7795_vm14 = vcmask 8192  }
 0xd70   :  { %7353 = vst.msk [vmem:[#allocation5 + $0x130] sm:$0xff] %vm15159_vm4, %v7336_v28  ;;  %9842 = vmatprep.subr.bf16.mxu0 %v9841_v63  ;;  %v9883_v28 = vpack.c.bf16 %v7528_v8, %v7527_v40  ;;  %v9890_v59 = vpack.c.bf16 %v7548_v19, %v7547_v60 }
 0xd72   :  { %v7242_v62 = vpop.permute.xlu1 %7241  ;;  %v7522_v15 = vld [vmem:[#allocation5 + $0x138] sm:$0xff] }
 0xd73   :  { %7258 = vst.msk [vmem:[#allocation5 + $0x78] sm:$0xff] %vm15160_vm8, %v7242_v62  ;;  %v7304_v27 = vpop.permute.xlu0 %7303  ;;  %9844 = vmatpush3.bf16.msra.mxu0 %v9843_v39  ;;  %v7537_v47 = vld [vmem:[#allocation5 + $0x1b0] sm:$0xff] }
 0xd74   :  { %7321 = vst.msk [vmem:[#allocation5 + $0xf0] sm:$0xff] %vm15161_vm11, %v7304_v27  ;;  %9846 = vmatprep.subr.bf16.mxu0 %v9845_v17  ;;  %v9869_v31 = vpack.c.bf16 %v7538_v35, %v7537_v47  ;;  %v7567_v47 = vrot.slane %v14714_v22, %v11752_v36 }
 0xd76   :  { %9870 = vmatprep.subr.bf16.mxu1 %v9869_v31  ;;  %v7458_v21 = vpop.permute.xlu1 %7457  ;;  %v7514_v51 = vld [vmem:[#allocation5 + $0xf8] sm:$0xff] }
 0xd77   :  { %7478 = vst.msk [vmem:[#allocation5 + $0x218] sm:$0xff] %vm15162_vm5, %v7458_v21  ;;  %v7240_v42 = vpop.permute.xlu0 %7239  ;;  %9848 = vmatpush3.bf16.msra.mxu0 %v9847_v41  ;;  %v7521_v38 = vld [vmem:[#allocation5 + $0x130] sm:$0xff] }
 0xd78   :  { %7257 = vst.msk [vmem:[#allocation5 + $0x70] sm:$0xff] %vm15163_vm10, %v7240_v42  ;;  %9850 = vmatprep.subr.bf16.mxu0 %v9849_v56  ;;  %v9871_v6 = vpack.c.bf16 %v7522_v15, %v7521_v38 }
 0xd7a   :  { %9872 = vmatpush3.bf16.msra.mxu1 %v9871_v6  ;;  %v7434_v12 = vpop.permute.xlu1 %7433  ;;  %v7498_v11 = vld [vmem:[#allocation5 + $0x78] sm:$0xff] }
 0xd7b   :  { %7450 = vst.msk [vmem:[#allocation5 + $0x1f8] sm:$0xff] %vm15164_vm9, %v7434_v12  ;;  %v7432_v14 = vpop.permute.xlu0 %7431  ;;  %9852 = vmatpush3.bf16.msra.mxu0 %v9851_v52  ;;  %9874 = vmatprep.subr.bf16.mxu1 %v9873_v54  ;;  %v7513_v3 = vld [vmem:[#allocation5 + $0xf0] sm:$0xff] }
 0xd7c   :  { %7449 = vst.msk [vmem:[#allocation5 + $0x1f0] sm:$0xff] %vm15165_vm6, %v7432_v14  ;;  %v9853_v49 = vpack.c.bf16 %v7514_v51, %v7513_v3 }
 0xd7e   :  { %9854 = vmatprep.subr.bf16.mxu0 %v9853_v49  ;;  %9876 = vmatpush3.bf16.msra.mxu1 %v9875_v37  ;;  %v7370_v55 = vpop.permute.xlu1 %7369  ;;  %v7550_v25 = vld [vmem:[#allocation5 + $0x218] sm:$0xff] }
 0xd7f   :  { %7386 = vst.msk [vmem:[#allocation5 + $0x178] sm:$0xff] %vm15166_vm13, %v7370_v55  ;;  %v7368_v33 = vpop.permute.xlu0 %7367  ;;  %9878 = vmatprep.subr.bf16.mxu1 %v9877_v7  ;;  %v7497_v50 = vld [vmem:[#allocation5 + $0x70] sm:$0xff]  ;;  %v9893_v27 = vpack.c.bf16 %v7550_v25, %v7549_v34 }
 0xd80   :  { %7385 = vst.msk [vmem:[#allocation5 + $0x170] sm:$0xff] %vm15167_vm12, %v7368_v33  ;;  %v9855_v26 = vpack.c.bf16 %v7498_v11, %v7497_v50 }
 0xd82   :  { %9856 = vmatpush3.bf16.msra.mxu0 %v9855_v26  ;;  %9880 = vmatpush3.bf16.msra.mxu1 %v9879_v10  ;;  %v7462_v43 = vpop.permute.xlu1 %7461  ;;  %v7546_v63 = vld [vmem:[#allocation5 + $0x1f8] sm:$0xff] }
 0xd83   :  { %7480 = vst.msk [vmem:[#allocation5 + $0x228] sm:$0xff] %vm15168_vm7, %v7462_v43  ;;  %v7460_v53 = vpop.permute.xlu0 %7459  ;;  %9882 = vmatprep.subr.bf16.mxu1 %v9881_v2  ;;  %9889 = vmatprep.subr.bf16.mxu0 %v10047_v32  ;;  %v7545_v1 = vld [vmem:[#allocation5 + $0x1f0] sm:$0xff] }
 0xd84   :  { %7479 = vst.msk [vmem:[#allocation5 + $0x220] sm:$0xff] %vm15169_vm15, %v7460_v53  ;;  %v9885_v18 = vpack.c.bf16 %v7546_v63, %v7545_v1 }
 0xd85   :  { %7648 = vmatmul.mubr.f32.vlgmr.msra.gmra.mrb[68].mxu0 %v7559_v44 }
 0xd86   :  { %9884 = vmatpush3.bf16.msra.mxu1 %v9883_v28  ;;  %9891 = vmatpush3.bf16.msra.mxu0 %v9890_v59  ;;  %v7466_v39 = vpop.permute.xlu1 %7465  ;;  %v7530_v62 = vld [vmem:[#allocation5 + $0x178] sm:$0xff] }
 0xd87   :  { %7482 = vst.msk [vmem:[#allocation5 + $0x238] sm:$0xff] %vm15109_vm0, %v7466_v39  ;;  %v7464_v17 = vpop.permute.xlu0 %7463  ;;  %9886 = vmatprep.subr.bf16.mxu1 %v9885_v18  ;;  %9892 = vmatprep.subr.bf16.mxu0 %v10047_v32  ;;  %v7529_v57 = vld [vmem:[#allocation5 + $0x170] sm:$0xff] }
 0xd88   :  { %7481 = vst.msk [vmem:[#allocation5 + $0x230] sm:$0xff] %vm15170_vm3, %v7464_v17  ;;  %v9887_v29 = vpack.c.bf16 %v7530_v62, %v7529_v57  ;;  %8831 = vmatprep.mubr.msk.f32.mxu0 %vm10056_vm1, %v14937_v24  ;;  %v7575_v24 = vrot.slane %v14714_v22, %v11828_v23 }
 0xd8a   :  { %9888 = vmatpush3.bf16.msra.mxu1 %v9887_v29  ;;  %9894 = vmatpush3.bf16.msra.mxu0 %v9893_v27  ;;  %v7552_v35 = vld [vmem:[#allocation5 + $0x228] sm:$0xff] }
 0xd8b   :  { %9895 = vmatprep.subr.bf16.mxu0 %v10047_v32  ;;  %v7551_v20 = vld [vmem:[#allocation5 + $0x220] sm:$0xff] }
 0xd8c   :  { %v9896_v31 = vpack.c.bf16 %v7552_v35, %v7551_v20 }
 0xd8d   :  { %7718 = vmatmul.mubr.f32.vlgmr.msra.gmra.mrb[60].mxu1 %v7567_v47 }
 0xd8e   :  { %9897 = vmatpush3.bf16.msra.mxu0 %v9896_v31  ;;  %v7554_v41 = vld [vmem:[#allocation5 + $0x238] sm:$0xff] }
 0xd8f   :  { %9898 = vmatprep.subr.bf16.mxu0 %v10047_v32  ;;  %v7553_v46 = vld [vmem:[#allocation5 + $0x230] sm:$0xff] }
 0xd90   :  { %v9899_v21 = vpack.c.bf16 %v7554_v41, %v7553_v46 }
 0xd92   :  { %9900 = vmatpush3.bf16.msra.mxu0 %v9899_v21 }
 0xd95   :  { %8832 = vmatmul.mubr.msk.f32.vlgmr.msra.gmra.mrb[70].mxu0 %vm7580_vm2, %v7575_v24 }
 0xe58   :  { %v8730_v36 = vpop.f32.mrb[68].mxu0 }
 0xe59   :  { %v8731_v56 = vpop.f32.mrb[69].mxu0 }
 0xe5a   :  { %v8732_v0 = vadd.f32 %v8731_v56, %v8730_v36 }
 0xe60   :  { %v8765_v16 = vpop.f32.mrb[60].mxu1 }
 0xe61   :  { %v8766_v30 = vpop.f32.mrb[61].mxu1 }
 0xe62   :  { %v8767_v42 = vadd.f32 %v8766_v30, %v8765_v16 }
 0xe64   :  { %v7720_v38 = vadd.f32 %v8767_v42, %v8732_v0 }
 0xe68   :  { %v7789_v15 = vpop.f32.mrb[70].mxu0 }
 0xe69   :  { %v7790_v6 = vadd.f32 %v7789_v15, %v7720_v38  ;;  %v8833_v52 = vpop.f32.mrb[71].mxu0 }
 0xe6b   :  { %9982 = vtanh.f32 %v7790_v6 }
 0xe75   :  { %v9983_v32 = vpop.eup %9982 }
 0xe76   :  { %v7794_v54 = vsub.f32 %v7790_v6, %v9983_v32 }
 0xe78   :  { %7796 = vst.msk [vmem:[#allocation6] sm:$0x1] %vm7795_vm14, %v7794_v54 }
 0xe79   :  { %9996 = shalt.err (!%p9993_p4)
}
 0xe7a   :  { %s9997_s12 = scalar_lea.hbm %s14844_s19, 16 }
 0xe7b   :  { %p9998_p5 = scmp.ne.s32.totalorder %s14844_s19, %s9997_s12  ;;  %p10001_p6 = scmp.lt.u32.totalorder %s9997_s12, %s14844_s19 }
 0xe7d   :  { %p10003_p7 = pnand %p10001_p6, %p9998_p5 }
 0xe7f   :  { %10006 = shalt.err (!%p10003_p7)
}
 0xe80   :  { %7806 = dma.vmem_to_hbm [thread:$0]  %s7804_s5, 16, %s14844_s19, [#allocation7]  }
 0xe81   :  { %10007 = dma.done.wait [#allocation7], 16  }
 0xe82   :  { %10008 = vsyncadd [#allocation7], 4294967280 }
 0xe83   :  { %7810 = vsyncpa [#allocation7], 1 }

</bundles_post_ra>
